<compile_context>
chip_gen: v7x
topology: tpu7x:2x2x1
jax: 0.10.0
libtpu: 0.0.40
codegen_flags: <defaults>
</compile_context>

<pallas_src>
import functools

import jax
import jax.numpy as jnp
from jax import lax
from jax.experimental import pallas as pl
from jax.experimental.pallas import tpu as pltpu


def _bottleneck_kernel(x_ref,
                       s1_ref, t1_ref, w1_ref, b1_ref,
                       s2_ref, t2_ref, w2_ref, b2_ref,
                       s3_ref, t3_ref, w3_ref, b3_ref,
                       o_ref, hpad_ref, *, H, W, Hp, Wp):
    B = x_ref.shape[0]
    Cin = x_ref.shape[3]
    P = w1_ref.shape[1]
    Cout = w3_ref.shape[1]

    # Single load of the input tile; reused for stage 1 and the residual add.
    x = x_ref[...]                                    # (B, H, W, Cin)
    xflat = x.reshape(B * H * W, Cin)                 # free: W % 8 == 0

    # ---- Stage 1: BN1 + ReLU + conv1 (1x1) + BN2 + ReLU, valid rows only. ----
    h = jnp.maximum(xflat * s1_ref[...] + t1_ref[...], 0.0)
    h = jnp.dot(h, w1_ref[...], preferred_element_type=jnp.float32) + b1_ref[...]
    h = jnp.maximum(h * s2_ref[...] + t2_ref[...], 0.0)          # (B*H*W, P)

    # Place into the zero-padded scratch: rows 1..H hold data, row 0 and row
    # H+1 are the vertical zero pad, columns W..Wp-1 are the horizontal zero
    # pad (they also absorb the circular wrap of the sublane rolls below).
    # The write is fully aligned (leading-dim row offset, column offset 0).
    hpad_ref[...] = jnp.zeros_like(hpad_ref)
    hpad_ref[:, 1:1 + H, 0:W, :] = h.reshape(B, H, W, P)
    hp = hpad_ref[...]                                # (B, Hp, Wp, P)

    # ---- conv2: 3x3, stride 1, padding 1. -----------------------------------
    # Column (dx) shifts: two sublane rolls on the XLU (np.roll semantics:
    # result[x] = src[x - shift]).  Row (dy) shifts: free leading-dim slices.
    w2 = w2_ref[...]                                  # (3, 3, P, P) HWIO
    shifted = {
        -1: pltpu.roll(hp, 1, axis=2),                # [..., x, :] = hp[..., x-1, :]
         0: hp,
         1: pltpu.roll(hp, Wp - 1, axis=2),           # [..., x, :] = hp[..., x+1, :]
    }
    acc = jnp.zeros((B * H * Wp, P), jnp.float32)
    for dy in (-1, 0, 1):
        for dx in (-1, 0, 1):
            slab = shifted[dx][:, 1 + dy:1 + dy + H, :, :].reshape(B * H * Wp, P)
            acc = acc + jnp.dot(slab, w2[dy + 1, dx + 1],
                                preferred_element_type=jnp.float32)

    # Drop the padding columns (aligned slice: W % 8 == 0, offset 0), add bias.
    acc = acc.reshape(B, H, Wp, P)[:, :, 0:W, :].reshape(B * H * W, P)
    acc = acc + b2_ref[...]

    # ---- Stage 3: BN3 + ReLU + conv3 (1x1) + residual add. -------------------
    g = jnp.maximum(acc * s3_ref[...] + t3_ref[...], 0.0)
    out = jnp.dot(g, w3_ref[...], preferred_element_type=jnp.float32) + b3_ref[...]
    out = out + xflat                                 # Cin == Cout (no downsample)
    o_ref[...] = out.reshape(B, H, W, Cout)


def bottleneck_pallas(x, params, *, batch_tile=None):
    N, H, W, Cin = x.shape
    (s1, t1, w1, b1, s2, t2, w2, b2, s3, t3, w3, b3) = params
    P = w1.shape[1]
    Cout = w3.shape[1]

    assert Cout == Cin, "no-downsample residual path requires Cin == planes*expansion"
    assert W % 8 == 0, "W must be a multiple of 8 for free in-kernel reshapes"

    bt = batch_tile if batch_tile is not None else N   # fold whole batch per step
    assert N % bt == 0

    Hp = H + 2                            # exactly 1 row of zero pad top/bottom
    Wp = ((W + 1 + 7) // 8) * 8           # >= W+1 and sublane-aligned

    kernel = functools.partial(_bottleneck_kernel, H=H, W=W, Hp=Hp, Wp=Wp)

    def const_spec(arr):
        n = arr.ndim
        return pl.BlockSpec(arr.shape, lambda b, _n=n: (0,) * _n)

    return pl.pallas_call(
        kernel,
        out_shape=jax.ShapeDtypeStruct((N, H, W, Cout), jnp.float32),
        grid_spec=pltpu.PrefetchScalarGridSpec(
            num_scalar_prefetch=0,
            grid=(N // bt,),
            in_specs=[pl.BlockSpec((bt, H, W, Cin), lambda b: (b, 0, 0, 0))]
                     + [const_spec(a) for a in
                        (s1, t1, w1, b1, s2, t2, w2, b2, s3, t3, w3, b3)],
            out_specs=pl.BlockSpec((bt, H, W, Cout), lambda b: (b, 0, 0, 0)),
            scratch_shapes=[pltpu.VMEM((bt, Hp, Wp, P), jnp.float32)],
        ),
        compiler_params=pltpu.CompilerParams(
            dimension_semantics=("parallel",),
            # Raise above the v5e 16 MiB default; safe on all generations.
            # For large feature maps raise further / add spatial tiling.
            vmem_limit_bytes=32 * 1024 * 1024,
        ),
    )(x, s1, t1, w1, b1, s2, t2, w2, b2, s3, t3, w3, b3)


def bottleneck_ref(x, params):
    """Pure-JAX reference (lax.conv) for correctness checking."""
    s1, t1, w1, b1, s2, t2, w2, b2, s3, t3, w3, b3 = params
    Cin = x.shape[-1]
    P = w1.shape[1]
    Cout = w3.shape[1]
    dn = lax.conv_dimension_numbers(x.shape, (1, 1, 1, 1), ('NHWC', 'HWIO', 'NHWC'))
    o = jnp.maximum(x * s1 + t1, 0.0)
    o = lax.conv_general_dilated(o, w1.reshape(1, 1, Cin, P), (1, 1), 'VALID',
                                 dimension_numbers=dn) + b1
    o = jnp.maximum(o * s2 + t2, 0.0)
    o = lax.conv_general_dilated(o, w2, (1, 1), 'SAME',
                                 dimension_numbers=dn) + b2
    o = jnp.maximum(o * s3 + t3, 0.0)
    o = lax.conv_general_dilated(o, w3.reshape(1, 1, P, Cout), (1, 1), 'VALID',
                                 dimension_numbers=dn) + b3
    return o + x


if __name__ == "__main__":
    N, H, W = 2, 16, 16
    inplanes, planes = 8, 4          # expansion = 2 -> out channels = 8 = inplanes
    Cout = planes * 2

    key = jax.random.PRNGKey(0)
    ks = jax.random.split(key, 20)
    x = jax.random.normal(ks[0], (N, H, W, inplanes), jnp.float32)

    def bn_params(kg, kb, km, kv, c):
        gamma = jax.random.uniform(kg, (c,), jnp.float32, 0.5, 1.5)
        beta = 0.1 * jax.random.normal(kb, (c,), jnp.float32)
        mean = 0.1 * jax.random.normal(km, (c,), jnp.float32)
        var = jax.random.uniform(kv, (c,), jnp.float32, 0.5, 1.5)
        s = gamma / jnp.sqrt(var + 1e-5)
        t = beta - mean * s
        return s.reshape(1, c), t.reshape(1, c)

    s1, t1 = bn_params(ks[1], ks[2], ks[3], ks[4], inplanes)
    s2, t2 = bn_params(ks[5], ks[6], ks[7], ks[8], planes)
    s3, t3 = bn_params(ks[9], ks[10], ks[11], ks[12], planes)

    w1 = 0.2 * jax.random.normal(ks[13], (inplanes, planes), jnp.float32)      # conv1 1x1
    b1 = 0.1 * jax.random.normal(ks[14], (1, planes), jnp.float32)
    w2 = 0.2 * jax.random.normal(ks[15], (3, 3, planes, planes), jnp.float32)  # conv2 3x3 HWIO
    b2 = 0.1 * jax.random.normal(ks[16], (1, planes), jnp.float32)
    w3 = 0.2 * jax.random.normal(ks[17], (planes, Cout), jnp.float32)          # conv3 1x1
    b3 = 0.1 * jax.random.normal(ks[18], (1, Cout), jnp.float32)

    params = (s1, t1, w1, b1, s2, t2, w2, b2, s3, t3, w3, b3)

    out = jax.block_until_ready(bottleneck_pallas(x, params))
    ref = jax.block_until_ready(bottleneck_ref(x, params))

    assert out.shape == (N, H, W, Cout), out.shape
    max_err = float(jnp.max(jnp.abs(out - ref)))
    assert max_err < 1e-3, f"max abs error vs reference: {max_err}"
    print("KERNEL_OK")
</pallas_src>

<mosaic_0001>
module attributes {stable_mosaic.version = 11 : i64} {
  func.func @_bottleneck_kernel(%arg0: i32, %arg1: memref<2x16x16x8xf32, #tpu.memory_space<vmem>>, %arg2: memref<1x8xf32, #tpu.memory_space<vmem>>, %arg3: memref<1x8xf32, #tpu.memory_space<vmem>>, %arg4: memref<8x4xf32, #tpu.memory_space<vmem>>, %arg5: memref<1x4xf32, #tpu.memory_space<vmem>>, %arg6: memref<1x4xf32, #tpu.memory_space<vmem>>, %arg7: memref<1x4xf32, #tpu.memory_space<vmem>>, %arg8: memref<3x3x4x4xf32, #tpu.memory_space<vmem>>, %arg9: memref<1x4xf32, #tpu.memory_space<vmem>>, %arg10: memref<1x4xf32, #tpu.memory_space<vmem>>, %arg11: memref<1x4xf32, #tpu.memory_space<vmem>>, %arg12: memref<4x8xf32, #tpu.memory_space<vmem>>, %arg13: memref<1x8xf32, #tpu.memory_space<vmem>>, %arg14: memref<2x16x16x8xf32, #tpu.memory_space<vmem>>, %arg15: memref<2x18x24x4xf32, #tpu.memory_space<vmem>>) attributes {dimension_semantics = [#tpu.dimension_semantics<parallel>], iteration_bounds = array<i64: 1>, scalar_prefetch = 0 : i64, scratch_operands = 1 : i64, tpu.core_type = #tpu.core_type<tc>, window_params = [{transform_indices = @transform_0, window_bounds = array<i64: 2, 16, 16, 8>}, {pipeline_mode = #tpu.pipeline_mode<synchronous>, transform_indices = @transform_1, window_bounds = array<i64: 1, 8>}, {pipeline_mode = #tpu.pipeline_mode<synchronous>, transform_indices = @transform_2, window_bounds = array<i64: 1, 8>}, {pipeline_mode = #tpu.pipeline_mode<synchronous>, transform_indices = @transform_3, window_bounds = array<i64: 8, 4>}, {pipeline_mode = #tpu.pipeline_mode<synchronous>, transform_indices = @transform_4, window_bounds = array<i64: 1, 4>}, {pipeline_mode = #tpu.pipeline_mode<synchronous>, transform_indices = @transform_5, window_bounds = array<i64: 1, 4>}, {pipeline_mode = #tpu.pipeline_mode<synchronous>, transform_indices = @transform_6, window_bounds = array<i64: 1, 4>}, {pipeline_mode = #tpu.pipeline_mode<synchronous>, transform_indices = @transform_7, window_bounds = array<i64: 3, 3, 4, 4>}, {pipeline_mode = #tpu.pipeline_mode<synchronous>, transform_indices = @transform_8, window_bounds = array<i64: 1, 4>}, {pipeline_mode = #tpu.pipeline_mode<synchronous>, transform_indices = @transform_9, window_bounds = array<i64: 1, 4>}, {pipeline_mode = #tpu.pipeline_mode<synchronous>, transform_indices = @transform_10, window_bounds = array<i64: 1, 4>}, {pipeline_mode = #tpu.pipeline_mode<synchronous>, transform_indices = @transform_11, window_bounds = array<i64: 4, 8>}, {pipeline_mode = #tpu.pipeline_mode<synchronous>, transform_indices = @transform_12, window_bounds = array<i64: 1, 8>}, {transform_indices = @transform_13, window_bounds = array<i64: 2, 16, 16, 8>}]} {
    %c0 = arith.constant 0 : index
    %c0_0 = arith.constant 0 : index
    %c0_1 = arith.constant 0 : index
    %c0_2 = arith.constant 0 : index
    %0 = vector.load %arg1[%c0, %c0_0, %c0_1, %c0_2] : memref<2x16x16x8xf32, #tpu.memory_space<vmem>>, vector<2x16x16x8xf32>
    %1 = vector.shape_cast %0 : vector<2x16x16x8xf32> to vector<512x8xf32>
    %c0_3 = arith.constant 0 : index
    %c0_4 = arith.constant 0 : index
    %2 = vector.load %arg2[%c0_3, %c0_4] : memref<1x8xf32, #tpu.memory_space<vmem>>, vector<1x8xf32>
    %3 = vector.broadcast %2 : vector<1x8xf32> to vector<512x8xf32>
    %4 = arith.mulf %1, %3 : vector<512x8xf32>
    %c0_5 = arith.constant 0 : index
    %c0_6 = arith.constant 0 : index
    %5 = vector.load %arg3[%c0_5, %c0_6] : memref<1x8xf32, #tpu.memory_space<vmem>>, vector<1x8xf32>
    %6 = vector.broadcast %5 : vector<1x8xf32> to vector<512x8xf32>
    %7 = arith.addf %4, %6 : vector<512x8xf32>
    %cst = arith.constant 0.000000e+00 : f32
    %8 = vector.broadcast %cst : f32 to vector<512x8xf32>
    %9 = arith.maximumf %7, %8 : vector<512x8xf32>
    %c0_7 = arith.constant 0 : index
    %c0_8 = arith.constant 0 : index
    %10 = vector.load %arg4[%c0_7, %c0_8] : memref<8x4xf32, #tpu.memory_space<vmem>>, vector<8x4xf32>
    %cst_9 = arith.constant dense<0.000000e+00> : vector<512x4xf32>
    %11 = tpu.matmul %9, %10, %cst_9 {dimension_numbers = #tpu.dot_dimension_numbers<[1], [0], [0], [1], [0, 0, 1, 1], [], []>} : vector<512x8xf32>, vector<8x4xf32>, vector<512x4xf32> -> vector<512x4xf32>
    %c0_10 = arith.constant 0 : index
    %c0_11 = arith.constant 0 : index
    %12 = vector.load %arg5[%c0_10, %c0_11] : memref<1x4xf32, #tpu.memory_space<vmem>>, vector<1x4xf32>
    %13 = vector.broadcast %12 : vector<1x4xf32> to vector<512x4xf32>
    %14 = arith.addf %11, %13 : vector<512x4xf32>
    %c0_12 = arith.constant 0 : index
    %c0_13 = arith.constant 0 : index
    %15 = vector.load %arg6[%c0_12, %c0_13] : memref<1x4xf32, #tpu.memory_space<vmem>>, vector<1x4xf32>
    %16 = vector.broadcast %15 : vector<1x4xf32> to vector<512x4xf32>
    %17 = arith.mulf %14, %16 : vector<512x4xf32>
    %c0_14 = arith.constant 0 : index
    %c0_15 = arith.constant 0 : index
    %18 = vector.load %arg7[%c0_14, %c0_15] : memref<1x4xf32, #tpu.memory_space<vmem>>, vector<1x4xf32>
    %19 = vector.broadcast %18 : vector<1x4xf32> to vector<512x4xf32>
    %20 = arith.addf %17, %19 : vector<512x4xf32>
    %cst_16 = arith.constant 0.000000e+00 : f32
    %21 = vector.broadcast %cst_16 : f32 to vector<512x4xf32>
    %22 = arith.maximumf %20, %21 : vector<512x4xf32>
    %cst_17 = arith.constant 0.000000e+00 : f32
    %23 = vector.broadcast %cst_17 : f32 to vector<2x18x24x4xf32>
    %c0_18 = arith.constant 0 : index
    %c0_19 = arith.constant 0 : index
    %c0_20 = arith.constant 0 : index
    %c0_21 = arith.constant 0 : index
    %24 = vector.load %arg15[%c0_18, %c0_19, %c0_20, %c0_21] : memref<2x18x24x4xf32, #tpu.memory_space<vmem>>, vector<2x18x24x4xf32>
    tpu.vector_store %arg15[%c0_18, %c0_19, %c0_20, %c0_21], %23 {strides = array<i32>} : memref<2x18x24x4xf32, #tpu.memory_space<vmem>>, vector<2x18x24x4xf32>,
    %25 = vector.shape_cast %22 : vector<512x4xf32> to vector<2x16x16x4xf32>
    %c0_22 = arith.constant 0 : index
    %c1 = arith.constant 1 : index
    %c0_23 = arith.constant 0 : index
    %c0_24 = arith.constant 0 : index
    %26 = vector.load %arg15[%c0_22, %c1, %c0_23, %c0_24] : memref<2x18x24x4xf32, #tpu.memory_space<vmem>>, vector<2x16x16x4xf32>
    tpu.vector_store %arg15[%c0_22, %c1, %c0_23, %c0_24], %25 {strides = array<i32>} : memref<2x18x24x4xf32, #tpu.memory_space<vmem>>, vector<2x16x16x4xf32>,
    %c0_25 = arith.constant 0 : index
    %c0_26 = arith.constant 0 : index
    %c0_27 = arith.constant 0 : index
    %c0_28 = arith.constant 0 : index
    %27 = vector.load %arg15[%c0_25, %c0_26, %c0_27, %c0_28] : memref<2x18x24x4xf32, #tpu.memory_space<vmem>>, vector<2x18x24x4xf32>
    %c0_29 = arith.constant 0 : index
    %c0_30 = arith.constant 0 : index
    %c0_31 = arith.constant 0 : index
    %c0_32 = arith.constant 0 : index
    %28 = vector.load %arg8[%c0_29, %c0_30, %c0_31, %c0_32] : memref<3x3x4x4xf32, #tpu.memory_space<vmem>>, vector<3x3x4x4xf32>
    %c1_i32 = arith.constant 1 : i32
    %29 = tpu.dynamic_rotate %27 by %c1_i32 dim 2 : vector<2x18x24x4xf32>, i32 -> vector<2x18x24x4xf32>
    %c23_i32 = arith.constant 23 : i32
    %30 = tpu.dynamic_rotate %27 by %c23_i32 dim 2 : vector<2x18x24x4xf32>, i32 -> vector<2x18x24x4xf32>
    %cst_33 = arith.constant 0.000000e+00 : f32
    %31 = vector.broadcast %cst_33 : f32 to vector<768x4xf32>
    %32 = vector.extract_strided_slice %29 {offsets = [0, 0, 0, 0], sizes = [2, 16, 24, 4], strides = [1, 1, 1, 1]} : vector<2x18x24x4xf32> to vector<2x16x24x4xf32>
    %33 = vector.shape_cast %32 : vector<2x16x24x4xf32> to vector<768x4xf32>
    %34 = vector.extract_strided_slice %28 {offsets = [0, 0, 0, 0], sizes = [1, 1, 4, 4], strides = [1, 1, 1, 1]} : vector<3x3x4x4xf32> to vector<1x1x4x4xf32>
    %35 = vector.shape_cast %34 : vector<1x1x4x4xf32> to vector<4x4xf32>
    %cst_34 = arith.constant dense<0.000000e+00> : vector<768x4xf32>
    %36 = tpu.matmul %33, %35, %cst_34 {dimension_numbers = #tpu.dot_dimension_numbers<[1], [0], [0], [1], [0, 0, 1, 1], [], []>} : vector<768x4xf32>, vector<4x4xf32>, vector<768x4xf32> -> vector<768x4xf32>
    %37 = arith.addf %31, %36 : vector<768x4xf32>
    %38 = vector.extract_strided_slice %27 {offsets = [0, 0, 0, 0], sizes = [2, 16, 24, 4], strides = [1, 1, 1, 1]} : vector<2x18x24x4xf32> to vector<2x16x24x4xf32>
    %39 = vector.shape_cast %38 : vector<2x16x24x4xf32> to vector<768x4xf32>
    %40 = vector.extract_strided_slice %28 {offsets = [0, 1, 0, 0], sizes = [1, 1, 4, 4], strides = [1, 1, 1, 1]} : vector<3x3x4x4xf32> to vector<1x1x4x4xf32>
    %41 = vector.shape_cast %40 : vector<1x1x4x4xf32> to vector<4x4xf32>
    %cst_35 = arith.constant dense<0.000000e+00> : vector<768x4xf32>
    %42 = tpu.matmul %39, %41, %cst_35 {dimension_numbers = #tpu.dot_dimension_numbers<[1], [0], [0], [1], [0, 0, 1, 1], [], []>} : vector<768x4xf32>, vector<4x4xf32>, vector<768x4xf32> -> vector<768x4xf32>
    %43 = arith.addf %37, %42 : vector<768x4xf32>
    %44 = vector.extract_strided_slice %30 {offsets = [0, 0, 0, 0], sizes = [2, 16, 24, 4], strides = [1, 1, 1, 1]} : vector<2x18x24x4xf32> to vector<2x16x24x4xf32>
    %45 = vector.shape_cast %44 : vector<2x16x24x4xf32> to vector<768x4xf32>
    %46 = vector.extract_strided_slice %28 {offsets = [0, 2, 0, 0], sizes = [1, 1, 4, 4], strides = [1, 1, 1, 1]} : vector<3x3x4x4xf32> to vector<1x1x4x4xf32>
    %47 = vector.shape_cast %46 : vector<1x1x4x4xf32> to vector<4x4xf32>
    %cst_36 = arith.constant dense<0.000000e+00> : vector<768x4xf32>
    %48 = tpu.matmul %45, %47, %cst_36 {dimension_numbers = #tpu.dot_dimension_numbers<[1], [0], [0], [1], [0, 0, 1, 1], [], []>} : vector<768x4xf32>, vector<4x4xf32>, vector<768x4xf32> -> vector<768x4xf32>
    %49 = arith.addf %43, %48 : vector<768x4xf32>
    %50 = vector.extract_strided_slice %29 {offsets = [0, 1, 0, 0], sizes = [2, 16, 24, 4], strides = [1, 1, 1, 1]} : vector<2x18x24x4xf32> to vector<2x16x24x4xf32>
    %51 = vector.shape_cast %50 : vector<2x16x24x4xf32> to vector<768x4xf32>
    %52 = vector.extract_strided_slice %28 {offsets = [1, 0, 0, 0], sizes = [1, 1, 4, 4], strides = [1, 1, 1, 1]} : vector<3x3x4x4xf32> to vector<1x1x4x4xf32>
    %53 = vector.shape_cast %52 : vector<1x1x4x4xf32> to vector<4x4xf32>
    %cst_37 = arith.constant dense<0.000000e+00> : vector<768x4xf32>
    %54 = tpu.matmul %51, %53, %cst_37 {dimension_numbers = #tpu.dot_dimension_numbers<[1], [0], [0], [1], [0, 0, 1, 1], [], []>} : vector<768x4xf32>, vector<4x4xf32>, vector<768x4xf32> -> vector<768x4xf32>
    %55 = arith.addf %49, %54 : vector<768x4xf32>
    %56 = vector.extract_strided_slice %27 {offsets = [0, 1, 0, 0], sizes = [2, 16, 24, 4], strides = [1, 1, 1, 1]} : vector<2x18x24x4xf32> to vector<2x16x24x4xf32>
    %57 = vector.shape_cast %56 : vector<2x16x24x4xf32> to vector<768x4xf32>
    %58 = vector.extract_strided_slice %28 {offsets = [1, 1, 0, 0], sizes = [1, 1, 4, 4], strides = [1, 1, 1, 1]} : vector<3x3x4x4xf32> to vector<1x1x4x4xf32>
    %59 = vector.shape_cast %58 : vector<1x1x4x4xf32> to vector<4x4xf32>
    %cst_38 = arith.constant dense<0.000000e+00> : vector<768x4xf32>
    %60 = tpu.matmul %57, %59, %cst_38 {dimension_numbers = #tpu.dot_dimension_numbers<[1], [0], [0], [1], [0, 0, 1, 1], [], []>} : vector<768x4xf32>, vector<4x4xf32>, vector<768x4xf32> -> vector<768x4xf32>
    %61 = arith.addf %55, %60 : vector<768x4xf32>
    %62 = vector.extract_strided_slice %30 {offsets = [0, 1, 0, 0], sizes = [2, 16, 24, 4], strides = [1, 1, 1, 1]} : vector<2x18x24x4xf32> to vector<2x16x24x4xf32>
    %63 = vector.shape_cast %62 : vector<2x16x24x4xf32> to vector<768x4xf32>
    %64 = vector.extract_strided_slice %28 {offsets = [1, 2, 0, 0], sizes = [1, 1, 4, 4], strides = [1, 1, 1, 1]} : vector<3x3x4x4xf32> to vector<1x1x4x4xf32>
    %65 = vector.shape_cast %64 : vector<1x1x4x4xf32> to vector<4x4xf32>
    %cst_39 = arith.constant dense<0.000000e+00> : vector<768x4xf32>
    %66 = tpu.matmul %63, %65, %cst_39 {dimension_numbers = #tpu.dot_dimension_numbers<[1], [0], [0], [1], [0, 0, 1, 1], [], []>} : vector<768x4xf32>, vector<4x4xf32>, vector<768x4xf32> -> vector<768x4xf32>
    %67 = arith.addf %61, %66 : vector<768x4xf32>
    %68 = vector.extract_strided_slice %29 {offsets = [0, 2, 0, 0], sizes = [2, 16, 24, 4], strides = [1, 1, 1, 1]} : vector<2x18x24x4xf32> to vector<2x16x24x4xf32>
    %69 = vector.shape_cast %68 : vector<2x16x24x4xf32> to vector<768x4xf32>
    %70 = vector.extract_strided_slice %28 {offsets = [2, 0, 0, 0], sizes = [1, 1, 4, 4], strides = [1, 1, 1, 1]} : vector<3x3x4x4xf32> to vector<1x1x4x4xf32>
    %71 = vector.shape_cast %70 : vector<1x1x4x4xf32> to vector<4x4xf32>
    %cst_40 = arith.constant dense<0.000000e+00> : vector<768x4xf32>
    %72 = tpu.matmul %69, %71, %cst_40 {dimension_numbers = #tpu.dot_dimension_numbers<[1], [0], [0], [1], [0, 0, 1, 1], [], []>} : vector<768x4xf32>, vector<4x4xf32>, vector<768x4xf32> -> vector<768x4xf32>
    %73 = arith.addf %67, %72 : vector<768x4xf32>
    %74 = vector.extract_strided_slice %27 {offsets = [0, 2, 0, 0], sizes = [2, 16, 24, 4], strides = [1, 1, 1, 1]} : vector<2x18x24x4xf32> to vector<2x16x24x4xf32>
    %75 = vector.shape_cast %74 : vector<2x16x24x4xf32> to vector<768x4xf32>
    %76 = vector.extract_strided_slice %28 {offsets = [2, 1, 0, 0], sizes = [1, 1, 4, 4], strides = [1, 1, 1, 1]} : vector<3x3x4x4xf32> to vector<1x1x4x4xf32>
    %77 = vector.shape_cast %76 : vector<1x1x4x4xf32> to vector<4x4xf32>
    %cst_41 = arith.constant dense<0.000000e+00> : vector<768x4xf32>
    %78 = tpu.matmul %75, %77, %cst_41 {dimension_numbers = #tpu.dot_dimension_numbers<[1], [0], [0], [1], [0, 0, 1, 1], [], []>} : vector<768x4xf32>, vector<4x4xf32>, vector<768x4xf32> -> vector<768x4xf32>
    %79 = arith.addf %73, %78 : vector<768x4xf32>
    %80 = vector.extract_strided_slice %30 {offsets = [0, 2, 0, 0], sizes = [2, 16, 24, 4], strides = [1, 1, 1, 1]} : vector<2x18x24x4xf32> to vector<2x16x24x4xf32>
    %81 = vector.shape_cast %80 : vector<2x16x24x4xf32> to vector<768x4xf32>
    %82 = vector.extract_strided_slice %28 {offsets = [2, 2, 0, 0], sizes = [1, 1, 4, 4], strides = [1, 1, 1, 1]} : vector<3x3x4x4xf32> to vector<1x1x4x4xf32>
    %83 = vector.shape_cast %82 : vector<1x1x4x4xf32> to vector<4x4xf32>
    %cst_42 = arith.constant dense<0.000000e+00> : vector<768x4xf32>
    %84 = tpu.matmul %81, %83, %cst_42 {dimension_numbers = #tpu.dot_dimension_numbers<[1], [0], [0], [1], [0, 0, 1, 1], [], []>} : vector<768x4xf32>, vector<4x4xf32>, vector<768x4xf32> -> vector<768x4xf32>
    %85 = arith.addf %79, %84 : vector<768x4xf32>
    %86 = vector.shape_cast %85 : vector<768x4xf32> to vector<2x16x24x4xf32>
    %87 = vector.extract_strided_slice %86 {offsets = [0, 0, 0, 0], sizes = [2, 16, 16, 4], strides = [1, 1, 1, 1]} : vector<2x16x24x4xf32> to vector<2x16x16x4xf32>
    %88 = vector.shape_cast %87 : vector<2x16x16x4xf32> to vector<512x4xf32>
    %c0_43 = arith.constant 0 : index
    %c0_44 = arith.constant 0 : index
    %89 = vector.load %arg9[%c0_43, %c0_44] : memref<1x4xf32, #tpu.memory_space<vmem>>, vector<1x4xf32>
    %90 = vector.broadcast %89 : vector<1x4xf32> to vector<512x4xf32>
    %91 = arith.addf %88, %90 : vector<512x4xf32>
    %c0_45 = arith.constant 0 : index
    %c0_46 = arith.constant 0 : index
    %92 = vector.load %arg10[%c0_45, %c0_46] : memref<1x4xf32, #tpu.memory_space<vmem>>, vector<1x4xf32>
    %93 = vector.broadcast %92 : vector<1x4xf32> to vector<512x4xf32>
    %94 = arith.mulf %91, %93 : vector<512x4xf32>
    %c0_47 = arith.constant 0 : index
    %c0_48 = arith.constant 0 : index
    %95 = vector.load %arg11[%c0_47, %c0_48] : memref<1x4xf32, #tpu.memory_space<vmem>>, vector<1x4xf32>
    %96 = vector.broadcast %95 : vector<1x4xf32> to vector<512x4xf32>
    %97 = arith.addf %94, %96 : vector<512x4xf32>
    %cst_49 = arith.constant 0.000000e+00 : f32
    %98 = vector.broadcast %cst_49 : f32 to vector<512x4xf32>
    %99 = arith.maximumf %97, %98 : vector<512x4xf32>
    %c0_50 = arith.constant 0 : index
    %c0_51 = arith.constant 0 : index
    %100 = vector.load %arg12[%c0_50, %c0_51] : memref<4x8xf32, #tpu.memory_space<vmem>>, vector<4x8xf32>
    %cst_52 = arith.constant dense<0.000000e+00> : vector<512x8xf32>
    %101 = tpu.matmul %99, %100, %cst_52 {dimension_numbers = #tpu.dot_dimension_numbers<[1], [0], [0], [1], [0, 0, 1, 1], [], []>} : vector<512x4xf32>, vector<4x8xf32>, vector<512x8xf32> -> vector<512x8xf32>
    %c0_53 = arith.constant 0 : index
    %c0_54 = arith.constant 0 : index
    %102 = vector.load %arg13[%c0_53, %c0_54] : memref<1x8xf32, #tpu.memory_space<vmem>>, vector<1x8xf32>
    %103 = vector.broadcast %102 : vector<1x8xf32> to vector<512x8xf32>
    %104 = arith.addf %101, %103 : vector<512x8xf32>
    %105 = arith.addf %104, %1 : vector<512x8xf32>
    %106 = vector.shape_cast %105 : vector<512x8xf32> to vector<2x16x16x8xf32>
    %c0_55 = arith.constant 0 : index
    %c0_56 = arith.constant 0 : index
    %c0_57 = arith.constant 0 : index
    %c0_58 = arith.constant 0 : index
    %107 = vector.load %arg14[%c0_55, %c0_56, %c0_57, %c0_58] : memref<2x16x16x8xf32, #tpu.memory_space<vmem>>, vector<2x16x16x8xf32>
    tpu.vector_store %arg14[%c0_55, %c0_56, %c0_57, %c0_58], %106 {strides = array<i32>} : memref<2x16x16x8xf32, #tpu.memory_space<vmem>>, vector<2x16x16x8xf32>,
    return
  }
  func.func @transform_0(%arg0: i32) -> (i32, i32, i32, i32) {
    %c0_i32 = arith.constant 0 : i32
    %c0_i32_0 = arith.constant 0 : i32
    %c0_i32_1 = arith.constant 0 : i32
    %c0_i32_2 = arith.constant 0 : i32
    return %arg0, %c0_i32, %c0_i32_0, %c0_i32_1 : i32, i32, i32, i32
  }
  func.func @transform_1(%arg0: i32) -> (i32, i32) {
    %c0_i32 = arith.constant 0 : i32
    %c0_i32_0 = arith.constant 0 : i32
    %c0_i32_1 = arith.constant 0 : i32
    return %c0_i32, %c0_i32_0 : i32, i32
  }
  func.func @transform_2(%arg0: i32) -> (i32, i32) {
    %c0_i32 = arith.constant 0 : i32
    %c0_i32_0 = arith.constant 0 : i32
    %c0_i32_1 = arith.constant 0 : i32
    return %c0_i32, %c0_i32_0 : i32, i32
  }
  func.func @transform_3(%arg0: i32) -> (i32, i32) {
    %c0_i32 = arith.constant 0 : i32
    %c0_i32_0 = arith.constant 0 : i32
    %c0_i32_1 = arith.constant 0 : i32
    return %c0_i32, %c0_i32_0 : i32, i32
  }
  func.func @transform_4(%arg0: i32) -> (i32, i32) {
    %c0_i32 = arith.constant 0 : i32
    %c0_i32_0 = arith.constant 0 : i32
    %c0_i32_1 = arith.constant 0 : i32
    return %c0_i32, %c0_i32_0 : i32, i32
  }
  func.func @transform_5(%arg0: i32) -> (i32, i32) {
    %c0_i32 = arith.constant 0 : i32
    %c0_i32_0 = arith.constant 0 : i32
    %c0_i32_1 = arith.constant 0 : i32
    return %c0_i32, %c0_i32_0 : i32, i32
  }
  func.func @transform_6(%arg0: i32) -> (i32, i32) {
    %c0_i32 = arith.constant 0 : i32
    %c0_i32_0 = arith.constant 0 : i32
    %c0_i32_1 = arith.constant 0 : i32
    return %c0_i32, %c0_i32_0 : i32, i32
  }
  func.func @transform_7(%arg0: i32) -> (i32, i32, i32, i32) {
    %c0_i32 = arith.constant 0 : i32
    %c0_i32_0 = arith.constant 0 : i32
    %c0_i32_1 = arith.constant 0 : i32
    %c0_i32_2 = arith.constant 0 : i32
    %c0_i32_3 = arith.constant 0 : i32
    return %c0_i32, %c0_i32_0, %c0_i32_1, %c0_i32_2 : i32, i32, i32, i32
  }
  func.func @transform_8(%arg0: i32) -> (i32, i32) {
    %c0_i32 = arith.constant 0 : i32
    %c0_i32_0 = arith.constant 0 : i32
    %c0_i32_1 = arith.constant 0 : i32
    return %c0_i32, %c0_i32_0 : i32, i32
  }
  func.func @transform_9(%arg0: i32) -> (i32, i32) {
    %c0_i32 = arith.constant 0 : i32
    %c0_i32_0 = arith.constant 0 : i32
    %c0_i32_1 = arith.constant 0 : i32
    return %c0_i32, %c0_i32_0 : i32, i32
  }
  func.func @transform_10(%arg0: i32) -> (i32, i32) {
    %c0_i32 = arith.constant 0 : i32
    %c0_i32_0 = arith.constant 0 : i32
    %c0_i32_1 = arith.constant 0 : i32
    return %c0_i32, %c0_i32_0 : i32, i32
  }
  func.func @transform_11(%arg0: i32) -> (i32, i32) {
    %c0_i32 = arith.constant 0 : i32
    %c0_i32_0 = arith.constant 0 : i32
    %c0_i32_1 = arith.constant 0 : i32
    return %c0_i32, %c0_i32_0 : i32, i32
  }
  func.func @transform_12(%arg0: i32) -> (i32, i32) {
    %c0_i32 = arith.constant 0 : i32
    %c0_i32_0 = arith.constant 0 : i32
    %c0_i32_1 = arith.constant 0 : i32
    return %c0_i32, %c0_i32_0 : i32, i32
  }
  func.func @transform_13(%arg0: i32) -> (i32, i32, i32, i32) {
    %c0_i32 = arith.constant 0 : i32
    %c0_i32_0 = arith.constant 0 : i32
    %c0_i32_1 = arith.constant 0 : i32
    %c0_i32_2 = arith.constant 0 : i32
    return %arg0, %c0_i32, %c0_i32_0, %c0_i32_1 : i32, i32, i32, i32
  }
}

</mosaic_0001>

<bundles_post_ra>
// kernel: tpu_custom_call.1
= control target key start
LH: loop header
LB: loop body
LE: loop exit
PB: predicated region body
PF: predicated region fallthrough
CT: control target
= control target key end

     0   :  { %vm322_vm0 = vcmask 64512   ;;  %vm1106_vm1 = vcmask 31744   ;;  %vm2121_vm2 = vcmask 1043456   ;;  %s18607_s3 = inlined_call_operand.vmem [shape: f32[8,4], index: 3, kind: input, shape index: {}]   ;;  %s18608_s0 = inlined_call_operand.vmem [shape: f32[2,16,16,8], index: 0, kind: input, shape index: {}]   ;;  %s18609_s1 = inlined_call_operand.vmem [shape: f32[1,8], index: 1, kind: input, shape index: {}]   ;;  %s18610_s2 = inlined_call_operand.vmem [shape: f32[1,8], index: 2, kind: input, shape index: {}]   ;;  %s18611_s7 = inlined_call_operand.vmem [shape: f32[3,3,4,4], index: 7, kind: input, shape index: {}]   ;;  %s18612_s4 = inlined_call_operand.vmem [shape: f32[1,4], index: 4, kind: input, shape index: {}]   ;;  %s18613_s5 = inlined_call_operand.vmem [shape: f32[1,4], index: 5, kind: input, shape index: {}]   ;;  %s18614_s6 = inlined_call_operand.vmem [shape: f32[1,4], index: 6, kind: input, shape index: {}]   ;;  %s18615_s11 = inlined_call_operand.vmem [shape: f32[4,8], index: 11, kind: input, shape index: {}]   ;;  %s18616_s8 = inlined_call_operand.vmem [shape: f32[1,4], index: 8, kind: input, shape index: {}]   ;;  %s18617_s9 = inlined_call_operand.vmem [shape: f32[1,4], index: 9, kind: input, shape index: {}]   ;;  %s18618_s10 = inlined_call_operand.vmem [shape: f32[1,4], index: 10, kind: input, shape index: {}]   ;;  %s18619_s12 = inlined_call_operand.vmem [shape: f32[1,8], index: 12, kind: input, shape index: {}]   ;;  %s18620_s13 = inlined_call_operand.vmem [shape: f32[2,16,16,8], index: 13, kind: output, shape index: {}]  }
   0x1   :  { %v314_v0 = vld [vmem:[%s18607_s3] sm:$0xff]  ;;  %v45_v5 = vld [vmem:[%s18608_s0 + $0x8] sm:$0xff]  ;;  %v46_v6 = vld [vmem:[%s18608_s0 + $0x10] sm:$0xff] }
   0x2   :  { %v44_v1 = vld [vmem:[%s18608_s0] sm:$0xff]  ;;  %10909 = vmatprep.subr.mxu0 %v314_v0  ;;  %v47_v9 = vld [vmem:[%s18608_s0 + $0x18] sm:$0xff]  ;;  %v49_v11 = vld [vmem:[%s18608_s0 + $0x28] sm:$0xff] }
   0x3   :  { %v13022_v2 = vld [vmem:[%s18609_s1] ss:$0 sm:$0xff]  ;;  %10910 = vmatpush3.msra.mxu0 %v314_v0  ;;  %v50_v15 = vld [vmem:[%s18608_s0 + $0x30] sm:$0xff]  ;;  %v51_v23 = vld [vmem:[%s18608_s0 + $0x38] sm:$0xff] }
   0x4   :  { %v115_v3 = vmul.f32 %v13022_v2, %v44_v1  ;;  %v13028_v4 = vld [vmem:[%s18610_s2] ss:$0 sm:$0xff]  ;;  %v116_v7 = vmul.f32 %v13022_v2, %v45_v5  ;;  %v117_v8 = vmul.f32 %v13022_v2, %v46_v6  ;;  %v118_v13 = vmul.f32 %v13022_v2, %v47_v9  ;;  %v53_v33 = vld [vmem:[%s18608_s0 + $0x48] sm:$0xff]  ;;  %v54_v34 = vld [vmem:[%s18608_s0 + $0x50] sm:$0xff] }
   0x5   :  { %v48_v10 = vld [vmem:[%s18608_s0 + $0x20] sm:$0xff]  ;;  %v120_v18 = vmul.f32 %v13022_v2, %v49_v11  ;;  %v121_v22 = vmul.f32 %v13022_v2, %v50_v15  ;;  %v122_v29 = vmul.f32 %v13022_v2, %v51_v23  ;;  %v124_v37 = vmul.f32 %v13022_v2, %v53_v33  ;;  %v55_v41 = vld [vmem:[%s18608_s0 + $0x58] sm:$0xff]  ;;  %v57_v43 = vld [vmem:[%s18608_s0 + $0x68] sm:$0xff] }
   0x6   :  { %v186_v12 = vadd.f32 %v13028_v4, %v115_v3  ;;  %v119_v14 = vmul.f32 %v13022_v2, %v48_v10  ;;  %v187_v16 = vadd.f32 %v13028_v4, %v116_v7  ;;  %v188_v17 = vadd.f32 %v13028_v4, %v117_v8  ;;  %v52_v26 = vld [vmem:[%s18608_s0 + $0x40] sm:$0xff]  ;;  %v58_v44 = vld [vmem:[%s18608_s0 + $0x70] sm:$0xff]  ;;  %v59_v53 = vld [vmem:[%s18608_s0 + $0x78] sm:$0xff] }
   0x7   :  { %v189_v20 = vadd.f32 %v13028_v4, %v118_v13  ;;  %v191_v28 = vadd.f32 %v13028_v4, %v120_v18  ;;  %v192_v31 = vadd.f32 %v13028_v4, %v121_v22  ;;  %v123_v32 = vmul.f32 %v13022_v2, %v52_v26  ;;  %v56_v42 = vld [vmem:[%s18608_s0 + $0x60] sm:$0xff]  ;;  %v61_v63 = vld [vmem:[%s18608_s0 + $0x88] sm:$0xff]  ;;  %v62_v0 = vld [vmem:[%s18608_s0 + $0x90] sm:$0xff] }
   0x8   :  { %v250_v19 = vmax.f32 %v186_v12, 0.0  ;;  %v190_v21 = vadd.f32 %v13028_v4, %v119_v14  ;;  %v251_v24 = vmax.f32 %v187_v16, 0.0  ;;  %v252_v25 = vmax.f32 %v188_v17, 0.0  ;;  %v60_v54 = vld [vmem:[%s18608_s0 + $0x80] sm:$0xff]  ;;  %v63_v1 = vld [vmem:[%s18608_s0 + $0x98] sm:$0xff]  ;;  %v77_v3 = vld [vmem:[%s18608_s0 + $0x108] sm:$0xff] }
   0x9   :  { %v253_v27 = vmax.f32 %v189_v20, 0.0  ;;  %v255_v35 = vmax.f32 %v191_v28, 0.0  ;;  %v193_v36 = vadd.f32 %v13028_v4, %v122_v29  ;;  %v256_v38 = vmax.f32 %v192_v31, 0.0  ;;  %v78_v5 = vld [vmem:[%s18608_s0 + $0x110] sm:$0xff]  ;;  %v79_v8 = vld [vmem:[%s18608_s0 + $0x118] sm:$0xff]  ;;  %v80_v9 = vld [vmem:[%s18608_s0 + $0x120] sm:$0xff] }
   0xa   :  { %10911 = vmatprep.mubr.msk.f32.mxu0 %vm322_vm0, %v250_v19  ;;  %v254_v30 = vmax.f32 %v190_v21, 0.0  ;;  %v194_v39 = vadd.f32 %v13028_v4, %v123_v32  ;;  %v125_v40 = vmul.f32 %v13022_v2, %v54_v34  ;;  %v195_v46 = vadd.f32 %v13028_v4, %v124_v37  ;;  %v81_v10 = vld [vmem:[%s18608_s0 + $0x128] sm:$0xff]  ;;  %v82_v15 = vld [vmem:[%s18608_s0 + $0x130] sm:$0xff]  ;;  %v83_v16 = vld [vmem:[%s18608_s0 + $0x138] sm:$0xff] }
   0xb   :  { %10912 = vmatmul.mubr.msk.f32.vlgmr.msra.gmra.mrb[0].mxu0 %vm322_vm0, %v251_v24  ;;  %v257_v45 = vmax.f32 %v193_v36, 0.0  ;;  %v126_v47 = vmul.f32 %v13022_v2, %v55_v41  ;;  %v127_v48 = vmul.f32 %v13022_v2, %v56_v42  ;;  %v128_v51 = vmul.f32 %v13022_v2, %v57_v43  ;;  %v64_v22 = vld [vmem:[%s18608_s0 + $0xa0] sm:$0xff]  ;;  %v65_v23 = vld [vmem:[%s18608_s0 + $0xa8] sm:$0xff]  ;;  %v87_v43 = vld [vmem:[%s18608_s0 + $0x158] sm:$0xff] }
   0xc   :  { %10914 = vmatprep.mubr.msk.f32.mxu0 %vm322_vm0, %v252_v25  ;;  %v258_v49 = vmax.f32 %v194_v39, 0.0  ;;  %v196_v50 = vadd.f32 %v13028_v4, %v125_v40  ;;  %v129_v52 = vmul.f32 %v13022_v2, %v58_v44  ;;  %v259_v55 = vmax.f32 %v195_v46, 0.0  ;;  %v84_v32 = vld [vmem:[%s18608_s0 + $0x140] sm:$0xff]  ;;  %v85_v37 = vld [vmem:[%s18608_s0 + $0x148] sm:$0xff] }
   0xd   :  { %v197_v56 = vadd.f32 %v13028_v4, %v126_v47  ;;  %v130_v57 = vmul.f32 %v13022_v2, %v59_v53  ;;  %v198_v59 = vadd.f32 %v13028_v4, %v127_v48  ;;  %v199_v60 = vadd.f32 %v13028_v4, %v128_v51  ;;  %v88_v44 = vld [vmem:[%s18608_s0 + $0x160] sm:$0xff]  ;;  %v91_v51 = vld [vmem:[%s18608_s0 + $0x178] sm:$0xff] }
   0xe   :  { %v260_v58 = vmax.f32 %v196_v50, 0.0  ;;  %v13117_v61 = vadd.f32 %v13028_v4, %v129_v52  ;;  %v131_v62 = vmul.f32 %v13022_v2, %v60_v54  ;;  %v132_v14 = vmul.f32 %v13022_v2, %v61_v63  ;;  %v90_v50 = vld [vmem:[%s18608_s0 + $0x170] sm:$0xff]  ;;  %v67_v54 = vld [vmem:[%s18608_s0 + $0xb8] sm:$0xff] }
   0xf   :  { %10915 = vmatmul.mubr.msk.f32.gmra.mrb[2].mxu0 %vm322_vm0, %v253_v27  ;;  %v261_v6 = vmax.f32 %v197_v56, 0.0  ;;  %v13137_v7 = vadd.f32 %v13028_v4, %v130_v57  ;;  %v262_v11 = vmax.f32 %v198_v59, 0.0  ;;  %v263_v12 = vmax.f32 %v199_v60, 0.0  ;;  %v66_v27 = vld [vmem:[%s18608_s0 + $0xb0] sm:$0xff] }
  0x10   :  { %10917 = vmatprep.mubr.msk.f32.mxu0 %vm322_vm0, %v254_v30  ;;  %v264_v13 = vmax.f32 %v13117_v61, 0.0  ;;  %v13158_v17 = vadd.f32 %v13028_v4, %v131_v62  ;;  %v133_v18 = vmul.f32 %v13022_v2, %v62_v0  ;;  %v148_v19 = vmul.f32 %v13022_v2, %v77_v3 }
  0x11   :  { %v149_v20 = vmul.f32 %v13022_v2, %v78_v5  ;;  %v134_v21 = vmul.f32 %v13022_v2, %v63_v1  ;;  %v150_v24 = vmul.f32 %v13022_v2, %v79_v8  ;;  %v151_v25 = vmul.f32 %v13022_v2, %v80_v9  ;;  %v92_v1 = vld [vmem:[%s18608_s0 + $0x180] sm:$0xff]  ;;  %v93_v9 = vld [vmem:[%s18608_s0 + $0x188] sm:$0xff] }
  0x12   :  { %v152_v26 = vmul.f32 %v13022_v2, %v81_v10  ;;  %v13178_v28 = vadd.f32 %v13028_v4, %v148_v19  ;;  %v153_v30 = vmul.f32 %v13022_v2, %v82_v15  ;;  %v154_v31 = vmul.f32 %v13022_v2, %v83_v16  ;;  %v68_v5 = vld [vmem:[%s18608_s0 + $0xc0] sm:$0xff]  ;;  %v94_v10 = vld [vmem:[%s18608_s0 + $0x190] sm:$0xff]  ;;  %v95_v15 = vld [vmem:[%s18608_s0 + $0x198] sm:$0xff] }
  0x13   :  { %10918 = vmatmul.mubr.msk.f32.gmra.mrb[4].mxu0 %vm322_vm0, %v255_v35  ;;  %v13181_v29 = vadd.f32 %v13028_v4, %v149_v20  ;;  %v265_v33 = vmax.f32 %v13137_v7, 0.0  ;;  %v13191_v34 = vadd.f32 %v13028_v4, %v150_v24  ;;  %v13194_v35 = vadd.f32 %v13028_v4, %v151_v25  ;;  %v96_v16 = vld [vmem:[%s18608_s0 + $0x1a0] sm:$0xff] }
  0x14   :  { %10920 = vmatprep.mubr.msk.f32.mxu0 %vm322_vm0, %v256_v38  ;;  %v13197_v36 = vadd.f32 %v13028_v4, %v152_v26  ;;  %v86_v38 = vld [vmem:[%s18608_s0 + $0x150] sm:$0xff]  ;;  %v135_v39 = vmul.f32 %v13022_v2, %v64_v22  ;;  %v136_v40 = vmul.f32 %v13022_v2, %v65_v23  ;;  %v13208_v41 = vadd.f32 %v13028_v4, %v153_v30  ;;  %v99_v23 = vld [vmem:[%s18608_s0 + $0x1b8] sm:$0xff] }
  0x15   :  { %v13211_v42 = vadd.f32 %v13028_v4, %v154_v31  ;;  %v203_v46 = vadd.f32 %v13028_v4, %v132_v14  ;;  %v204_v47 = vadd.f32 %v13028_v4, %v133_v18  ;;  %v137_v48 = vmul.f32 %v13022_v2, %v66_v27  ;;  %v98_v22 = vld [vmem:[%s18608_s0 + $0x1b0] sm:$0xff] }
  0x16   :  { %v266_v52 = vmax.f32 %v13158_v17, 0.0  ;;  %v13235_v53 = vadd.f32 %v13028_v4, %v134_v21  ;;  %v157_v56 = vmul.f32 %v13022_v2, %v86_v38  ;;  %v159_v59 = vmul.f32 %v13022_v2, %v88_v44  ;;  %v97_v17 = vld [vmem:[%s18608_s0 + $0x1a8] sm:$0xff]  ;;  %v100_v44 = vld [vmem:[%s18608_s0 + $0x1c0] sm:$0xff] }
  0x17   :  { %10921 = vmatmul.mubr.msk.f32.gmra.mrb[6].mxu0 %vm322_vm0, %v257_v45  ;;  %v89_v45 = vld [vmem:[%s18608_s0 + $0x168] sm:$0xff]  ;;  %v161_v63 = vmul.f32 %v13022_v2, %v90_v50  ;;  %v162_v0 = vmul.f32 %v13022_v2, %v91_v51  ;;  %v138_v3 = vmul.f32 %v13022_v2, %v67_v54  ;;  %v268_v18 = vmax.f32 %v204_v47, 0.0  ;;  %v102_v51 = vld [vmem:[%s18608_s0 + $0x1d0] sm:$0xff] }
  0x18   :  { %10923 = vmatprep.mubr.msk.f32.mxu0 %vm322_vm0, %v258_v49  ;;  %v155_v49 = vmul.f32 %v13022_v2, %v84_v32  ;;  %v160_v60 = vmul.f32 %v13022_v2, %v89_v45  ;;  %v13253_v62 = vadd.f32 %v13028_v4, %v157_v56  ;;  %v13268_v7 = vadd.f32 %v13028_v4, %v159_v59  ;;  %v101_v50 = vld [vmem:[%s18608_s0 + $0x1c8] sm:$0xff]  ;;  %v104_v56 = vld [vmem:[%s18608_s0 + $0x1e0] sm:$0xff] }
  0x19   :  { %v13285_v14 = vadd.f32 %v13028_v4, %v162_v0  ;;  %v207_v19 = vadd.f32 %v13028_v4, %v136_v40  ;;  %v13299_v20 = vadd.f32 %v13028_v4, %v137_v48  ;;  %v163_v21 = vmul.f32 %v13022_v2, %v92_v1  ;;  %v106_v1 = vld [vmem:[%s18608_s0 + $0x1f0] sm:$0xff] }
  0x1a   :  { %v13244_v57 = vadd.f32 %v13028_v4, %v155_v49  ;;  %v13271_v8 = vadd.f32 %v13028_v4, %v160_v60  ;;  %v269_v24 = vmax.f32 %v13235_v53, 0.0  ;;  %v139_v25 = vmul.f32 %v13022_v2, %v68_v5 }
  0x1b   :  { %10924 = vmatmul.mubr.msk.f32.gmra.mrb[8].mxu0 %vm322_vm0, %v259_v55  ;;  %v156_v55 = vmul.f32 %v13022_v2, %v85_v37  ;;  %v164_v26 = vmul.f32 %v13022_v2, %v93_v9  ;;  %v165_v27 = vmul.f32 %v13022_v2, %v94_v10  ;;  %v13313_v30 = vadd.f32 %v13028_v4, %v163_v21  ;;  %v69_v37 = vld [vmem:[%s18608_s0 + $0xc8] sm:$0xff] }
  0x1c   :  { %10926 = vmatprep.mubr.msk.f32.mxu0 %vm322_vm0, %v260_v58  ;;  %v158_v58 = vmul.f32 %v13022_v2, %v87_v43  ;;  %v166_v31 = vmul.f32 %v13022_v2, %v95_v15  ;;  %v167_v32 = vmul.f32 %v13022_v2, %v96_v16  ;;  %v169_v40 = vmul.f32 %v13022_v2, %v98_v22 }
  0x1d   :  { %v13250_v61 = vadd.f32 %v13028_v4, %v156_v55  ;;  %v13323_v38 = vadd.f32 %v13028_v4, %v164_v26  ;;  %v170_v43 = vmul.f32 %v13022_v2, %v99_v23  ;;  %v103_v55 = vld [vmem:[%s18608_s0 + $0x1d8] sm:$0xff]  ;;  %v271_v59 = vmax.f32 %v207_v19, 0.0  ;;  %v72_v19 = vld [vmem:[%s18608_s0 + $0xe0] sm:$0xff] }
  0x1e   :  { %v13338_v47 = vadd.f32 %v13028_v4, %v166_v31  ;;  %v13341_v48 = vadd.f32 %v13028_v4, %v167_v32  ;;  %v13354_v53 = vadd.f32 %v13028_v4, %v169_v40  ;;  %v272_v60 = vmax.f32 %v13299_v20, 0.0 }
  0x1f   :  { %10927 = vmatmul.mubr.msk.f32.gmra.mrb[10].mxu0 %vm322_vm0, %v261_v6  ;;  %v13265_v6 = vadd.f32 %v13028_v4, %v158_v58  ;;  %v13357_v54 = vadd.f32 %v13028_v4, %v170_v43  ;;  %v105_v58 = vld [vmem:[%s18608_s0 + $0x1e8] sm:$0xff]  ;;  %v171_v0 = vmul.f32 %v13022_v2, %v100_v44  ;;  %v210_v5 = vadd.f32 %v13028_v4, %v139_v25 }
  0x20   :  { %10929 = vmatprep.mubr.msk.f32.mxu0 %vm322_vm0, %v262_v11  ;;  %v267_v11 = vmax.f32 %v203_v46, 0.0  ;;  %v70_v46 = vld [vmem:[%s18608_s0 + $0xd0] sm:$0xff]  ;;  %v172_v10 = vmul.f32 %v13022_v2, %v101_v50  ;;  %v174_v16 = vmul.f32 %v13022_v2, %v103_v55  ;;  %v177_v22 = vmul.f32 %v13022_v2, %v106_v1 }
  0x21   :  { %v141_v9 = vmul.f32 %v13022_v2, %v70_v46  ;;  %v13387_v15 = vadd.f32 %v13028_v4, %v171_v0  ;;  %v274_v40 = vmax.f32 %v210_v5, 0.0  ;;  %v143_v44 = vmul.f32 %v13022_v2, %v72_v19  ;;  %v74_v46 = vld [vmem:[%s18608_s0 + $0xf0] sm:$0xff] }
  0x22   :  { %v13396_v20 = vadd.f32 %v13028_v4, %v172_v10  ;;  %v13404_v25 = vadd.f32 %v13028_v4, %v174_v16  ;;  %v284_v19 = vmax.f32 %v13181_v29, 0.0  ;;  %v289_v29 = vmax.f32 %v13211_v42, 0.0 }
  0x23   :  { %10930 = vmatmul.mubr.msk.f32.gmra.mrb[12].mxu0 %vm322_vm0, %v263_v12  ;;  %v206_v12 = vadd.f32 %v13028_v4, %v135_v39  ;;  %v13326_v39 = vadd.f32 %v13028_v4, %v165_v27  ;;  %v212_v43 = vadd.f32 %v13028_v4, %v141_v9  ;;  %v294_v42 = vmax.f32 %v13268_v7, 0.0 }
  0x24   :  { %10932 = vmatprep.mubr.msk.f32.mxu0 %vm322_vm0, %v264_v13  ;;  %v13282_v13 = vadd.f32 %v13028_v4, %v161_v63  ;;  %v140_v63 = vmul.f32 %v13022_v2, %v69_v37  ;;  %v299_v7 = vmax.f32 %v13323_v38, 0.0  ;;  %v304_v38 = vmax.f32 %v13354_v53, 0.0 }
  0x25   :  { %v270_v45 = vmax.f32 %v206_v12, 0.0  ;;  %v71_v12 = vld [vmem:[%s18608_s0 + $0xd8] sm:$0xff]  ;;  %v276_v55 = vmax.f32 %v212_v43, 0.0  ;;  %v309_v53 = vmax.f32 %v13404_v25, 0.0 }
  0x26   :  { %v211_v31 = vadd.f32 %v13028_v4, %v140_v63  ;;  %v142_v32 = vmul.f32 %v13022_v2, %v71_v12 }
  0x27   :  { %10933 = vmatmul.mubr.msk.f32.gmra.mrb[14].mxu0 %vm322_vm0, %v265_v33  ;;  %v168_v33 = vmul.f32 %v13022_v2, %v97_v17  ;;  %v175_v17 = vmul.f32 %v13022_v2, %v104_v56  ;;  %v214_v56 = vadd.f32 %v13028_v4, %v143_v44 }
  0x28   :  { %10935 = vmatprep.mubr.msk.f32.mxu0 %vm322_vm0, %v266_v52  ;;  %v209_v52 = vadd.f32 %v13028_v4, %v138_v3  ;;  %v107_v3 = vld [vmem:[%s18608_s0 + $0x1f8] sm:$0xff]  ;;  %v275_v50 = vmax.f32 %v211_v31, 0.0  ;;  %v1389_v31 = vld [vmem:[%s18611_s7 + $0x4] sm:$0xf] }
  0x29   :  { %v13344_v49 = vadd.f32 %v13028_v4, %v168_v33  ;;  %v178_v23 = vmul.f32 %v13022_v2, %v107_v3  ;;  %v13407_v26 = vadd.f32 %v13028_v4, %v175_v17  ;;  %v13416_v33 = vadd.f32 %v13028_v4, %v177_v22  ;;  %11007 = vmatprep.subr.msk.mxu0 %vm2121_vm2, %v1389_v31 }
  0x2a   :  { %v278_v3 = vmax.f32 %v214_v56, 0.0  ;;  %v285_v22 = vmax.f32 %v13191_v34, 0.0  ;;  %v290_v34 = vmax.f32 %v13244_v57, 0.0  ;;  %v295_v57 = vmax.f32 %v13271_v8, 0.0  ;;  %11008 = vmatpush3.msk.msra.mxu0 %vm2121_vm2, %v1389_v31 }
  0x2b   :  { %10936 = vmatmul.mubr.msk.f32.gmra.mrb[16].mxu0 %vm322_vm0, %v267_v11  ;;  %v173_v11 = vmul.f32 %v13022_v2, %v102_v51  ;;  %v13419_v37 = vadd.f32 %v13028_v4, %v178_v23  ;;  %v213_v51 = vadd.f32 %v13028_v4, %v142_v32  ;;  %v287_v23 = vmax.f32 %v13197_v36, 0.0 }
  0x2c   :  { %10938 = vmatprep.mubr.msk.f32.mxu0 %vm322_vm0, %v268_v18  ;;  %v176_v18 = vmul.f32 %v13022_v2, %v105_v58  ;;  %v145_v58 = vmul.f32 %v13022_v2, %v74_v46  ;;  %v292_v36 = vmax.f32 %v13253_v62, 0.0  ;;  %v297_v62 = vmax.f32 %v13285_v14, 0.0 }
  0x2d   :  { %v13399_v21 = vadd.f32 %v13028_v4, %v173_v11  ;;  %v277_v63 = vmax.f32 %v213_v51, 0.0  ;;  %v300_v8 = vmax.f32 %v13326_v39, 0.0  ;;  %v302_v14 = vmax.f32 %v13341_v48, 0.0 }
  0x2e   :  { %v13410_v27 = vadd.f32 %v13028_v4, %v176_v18  ;;  %v216_v5 = vadd.f32 %v13028_v4, %v145_v58  ;;  %v305_v39 = vmax.f32 %v13357_v54, 0.0  ;;  %v307_v48 = vmax.f32 %v13396_v20, 0.0 }
  0x2f   :  { %10939 = vmatmul.mubr.msk.f32.gmra.mrb[18].mxu0 %vm322_vm0, %v269_v24  ;;  %v273_v24 = vmax.f32 %v209_v52, 0.0  ;;  %v310_v54 = vmax.f32 %v13407_v26, 0.0  ;;  %v312_v20 = vmax.f32 %v13416_v33, 0.0  ;;  %v1391_v33 = vld [vmem:[%s18611_s7 + $0xc] sm:$0xf] }
  0x30   :  { %10941 = vmatprep.mubr.msk.f32.mxu0 %vm322_vm0, %v270_v45  ;;  %v73_v45 = vld [vmem:[%s18608_s0 + $0xe8] sm:$0xff]  ;;  %v280_v12 = vmax.f32 %v216_v5, 0.0  ;;  %12419 = vmatprep.subr.msk.mxu1 %vm2121_vm2, %v1391_v33 }
  0x31   :  { %v144_v52 = vmul.f32 %v13022_v2, %v73_v45  ;;  %12420 = vmatpush3.msk.msra.mxu1 %vm2121_vm2, %v1391_v33  ;;  %v13771_v45 = vld [vmem:[%s18614_s6] ss:$0 sm:$0xff] }
  0x33   :  { %10942 = vmatmul.mubr.msk.f32.gmra.mrb[20].mxu0 %vm322_vm0, %v271_v59  ;;  %v75_v59 = vld [vmem:[%s18608_s0 + $0xf8] sm:$0xff]  ;;  %v215_v0 = vadd.f32 %v13028_v4, %v144_v52 }
  0x34   :  { %10944 = vmatprep.mubr.msk.f32.mxu0 %vm322_vm0, %v272_v60  ;;  %v76_v60 = vld [vmem:[%s18608_s0 + $0x100] sm:$0xff]  ;;  %v146_v1 = vmul.f32 %v13022_v2, %v75_v59 }
  0x35   :  { %v147_v9 = vmul.f32 %v13022_v2, %v76_v60  ;;  %v279_v10 = vmax.f32 %v215_v0, 0.0  ;;  %v283_v2 = vmax.f32 %v13178_v28, 0.0  ;;  %v288_v28 = vmax.f32 %v13208_v41, 0.0 }
  0x36   :  { %v217_v11 = vadd.f32 %v13028_v4, %v146_v1  ;;  %v293_v41 = vmax.f32 %v13265_v6, 0.0  ;;  %v298_v6 = vmax.f32 %v13313_v30, 0.0  ;;  %v303_v30 = vmax.f32 %v13344_v49, 0.0 }
  0x37   :  { %10945 = vmatmul.mubr.msk.f32.gmra.mrb[22].mxu0 %vm322_vm0, %v273_v24  ;;  %v218_v16 = vadd.f32 %v13028_v4, %v147_v9  ;;  %v286_v4 = vmax.f32 %v13194_v35, 0.0  ;;  %v291_v35 = vmax.f32 %v13250_v61, 0.0  ;;  %v296_v61 = vmax.f32 %v13282_v13, 0.0 }
  0x38   :  { %10947 = vmatprep.mubr.msk.f32.mxu0 %vm322_vm0, %v274_v40  ;;  %v281_v17 = vmax.f32 %v217_v11, 0.0  ;;  %v12942_v24 = vmov 0.0   ;;  %v301_v13 = vmax.f32 %v13338_v47, 0.0  ;;  %v306_v47 = vmax.f32 %v13387_v15, 0.0  ;;  %v13764_v40 = vld [vmem:[%s18613_s5] ss:$0 sm:$0xff] }
  0x39   :  { %v282_v18 = vmax.f32 %v218_v16, 0.0  ;;  %1111 = vst.msk [vmem:[#allocation2 + $0x20] sm:$0xff] %vm1106_vm1, %v12942_v24  ;;  %1107 = vst.msk [vmem:[#allocation2] sm:$0xff] %vm1106_vm1, %v12942_v24  ;;  %v308_v49 = vmax.f32 %v13399_v21, 0.0  ;;  %v311_v15 = vmax.f32 %v13410_v27, 0.0  ;;  %v313_v21 = vmax.f32 %v13419_v37, 0.0 }
  0x3a   :  { %1108 = vst.msk [vmem:[#allocation2 + $0x8] sm:$0xff] %vm1106_vm1, %v12942_v24  ;;  %1109 = vst.msk [vmem:[#allocation2 + $0x10] sm:$0xff] %vm1106_vm1, %v12942_v24  ;;  %v13755_v27 = vld [vmem:[%s18612_s4] ss:$0 sm:$0xff] }
  0x3b   :  { %10948 = vmatmul.mubr.msk.f32.gmra.mrb[24].mxu0 %vm322_vm0, %v275_v50  ;;  %1110 = vst.msk [vmem:[#allocation2 + $0x18] sm:$0xff] %vm1106_vm1, %v12942_v24  ;;  %1112 = vst.msk [vmem:[#allocation2 + $0x28] sm:$0xff] %vm1106_vm1, %v12942_v24  ;;  %v1392_v50 = vld [vmem:[%s18611_s7 + $0x10] sm:$0xf] }
  0x3c   :  { %10950 = vmatprep.mubr.msk.f32.mxu0 %vm322_vm0, %v276_v55  ;;  %1113 = vst.msk [vmem:[#allocation2 + $0x30] sm:$0xff] %vm1106_vm1, %v12942_v24  ;;  %1114 = vst.msk [vmem:[#allocation2 + $0x38] sm:$0xff] %vm1106_vm1, %v12942_v24  ;;  %11591 = vmatprep.subr.msk.mxu1 %vm2121_vm2, %v1392_v50 }
  0x3d   :  { %1115 = vst.msk [vmem:[#allocation2 + $0x40] sm:$0xff] %vm1106_vm1, %v12942_v24  ;;  %1116 = vst.msk [vmem:[#allocation2 + $0x48] sm:$0xff] %vm1106_vm1, %v12942_v24 }
  0x3e   :  { %1117 = vst.msk [vmem:[#allocation2 + $0x50] sm:$0xff] %vm1106_vm1, %v12942_v24  ;;  %1118 = vst.msk [vmem:[#allocation2 + $0x58] sm:$0xff] %vm1106_vm1, %v12942_v24 }
  0x3f   :  { %10951 = vmatmul.mubr.msk.f32.gmra.mrb[26].mxu0 %vm322_vm0, %v277_v63  ;;  %1119 = vst.msk [vmem:[#allocation2 + $0x60] sm:$0xff] %vm1106_vm1, %v12942_v24  ;;  %1120 = vst.msk [vmem:[#allocation2 + $0x68] sm:$0xff] %vm1106_vm1, %v12942_v24 }
  0x40   :  { %10953 = vmatprep.mubr.msk.f32.mxu0 %vm322_vm0, %v278_v3  ;;  %1121 = vst.msk [vmem:[#allocation2 + $0x70] sm:$0xff] %vm1106_vm1, %v12942_v24  ;;  %1122 = vst.msk [vmem:[#allocation2 + $0x78] sm:$0xff] %vm1106_vm1, %v12942_v24  ;;  %v13742_v32 = vld [vmem:[#allocation2] sm:$0xff] }
  0x41   :  { %1123 = vst.msk [vmem:[#allocation2 + $0x80] sm:$0xff] %vm1106_vm1, %v12942_v24  ;;  %1124 = vst.msk [vmem:[#allocation2 + $0x88] sm:$0xff] %vm1106_vm1, %v12942_v24  ;;  %v1281_v25 = vld [vmem:[#allocation2 + $0x8] sm:$0xff]  ;;  %v13747_v26 = vld [vmem:[#allocation2 + $0x10] sm:$0xff] }
  0x42   :  { %1125 = vst.msk [vmem:[#allocation2 + $0x90] sm:$0xff] %vm1106_vm1, %v12942_v24  ;;  %1126 = vst.msk [vmem:[#allocation2 + $0x98] sm:$0xff] %vm1106_vm1, %v12942_v24 }
  0x43   :  { %10954 = vmatmul.mubr.msk.f32.gmra.mrb[28].mxu0 %vm322_vm0, %v279_v10  ;;  %1127 = vst.msk [vmem:[#allocation2 + $0xa0] sm:$0xff] %vm1106_vm1, %v12942_v24  ;;  %1128 = vst.msk [vmem:[#allocation2 + $0xa8] sm:$0xff] %vm1106_vm1, %v12942_v24 }
  0x44   :  { %10956 = vmatprep.mubr.msk.f32.mxu0 %vm322_vm0, %v280_v12  ;;  %1129 = vst.msk [vmem:[#allocation2 + $0xb0] sm:$0xff] %vm1106_vm1, %v12942_v24  ;;  %1130 = vst.msk [vmem:[#allocation2 + $0xb8] sm:$0xff] %vm1106_vm1, %v12942_v24 }
  0x45   :  { %1131 = vst.msk [vmem:[#allocation2 + $0xc0] sm:$0xff] %vm1106_vm1, %v12942_v24  ;;  %1132 = vst.msk [vmem:[#allocation2 + $0xc8] sm:$0xff] %vm1106_vm1, %v12942_v24 }
  0x46   :  { %1133 = vst.msk [vmem:[#allocation2 + $0xd0] sm:$0xff] %vm1106_vm1, %v12942_v24  ;;  %1134 = vst.msk [vmem:[#allocation2 + $0xd8] sm:$0xff] %vm1106_vm1, %v12942_v24 }
  0x47   :  { %10957 = vmatmul.mubr.msk.f32.gmra.mrb[30].mxu0 %vm322_vm0, %v281_v17  ;;  %1135 = vst.msk [vmem:[#allocation2 + $0xe0] sm:$0xff] %vm1106_vm1, %v12942_v24  ;;  %1136 = vst.msk [vmem:[#allocation2 + $0xe8] sm:$0xff] %vm1106_vm1, %v12942_v24 }
  0x48   :  { %10959 = vmatprep.mubr.msk.f32.mxu0 %vm322_vm0, %v282_v18  ;;  %1137 = vst.msk [vmem:[#allocation2 + $0xf0] sm:$0xff] %vm1106_vm1, %v12942_v24  ;;  %1138 = vst.msk [vmem:[#allocation2 + $0xf8] sm:$0xff] %vm1106_vm1, %v12942_v24 }
  0x49   :  { %1139 = vst.msk [vmem:[#allocation2 + $0x100] sm:$0xff] %vm1106_vm1, %v12942_v24  ;;  %1140 = vst.msk [vmem:[#allocation2 + $0x108] sm:$0xff] %vm1106_vm1, %v12942_v24 }
  0x4a   :  { %1141 = vst.msk [vmem:[#allocation2 + $0x110] sm:$0xff] %vm1106_vm1, %v12942_v24  ;;  %1142 = vst.msk [vmem:[#allocation2 + $0x118] sm:$0xff] %vm1106_vm1, %v12942_v24 }
  0x4b   :  { %10960 = vmatmul.mubr.msk.f32.gmra.mrb[32].mxu0 %vm322_vm0, %v283_v2  ;;  %1143 = vst.msk [vmem:[#allocation2 + $0x120] sm:$0xff] %vm1106_vm1, %v12942_v24  ;;  %1144 = vst.msk [vmem:[#allocation2 + $0x128] sm:$0xff] %vm1106_vm1, %v12942_v24 }
  0x4c   :  { %10962 = vmatprep.mubr.msk.f32.mxu0 %vm322_vm0, %v284_v19  ;;  %1145 = vst.msk [vmem:[#allocation2 + $0x130] sm:$0xff] %vm1106_vm1, %v12942_v24  ;;  %1146 = vst.msk [vmem:[#allocation2 + $0x138] sm:$0xff] %vm1106_vm1, %v12942_v24 }
  0x4d   :  { %1147 = vst.msk [vmem:[#allocation2 + $0x140] sm:$0xff] %vm1106_vm1, %v12942_v24  ;;  %1148 = vst.msk [vmem:[#allocation2 + $0x148] sm:$0xff] %vm1106_vm1, %v12942_v24 }
  0x4e   :  { %1149 = vst.msk [vmem:[#allocation2 + $0x150] sm:$0xff] %vm1106_vm1, %v12942_v24  ;;  %1150 = vst.msk [vmem:[#allocation2 + $0x158] sm:$0xff] %vm1106_vm1, %v12942_v24 }
  0x4f   :  { %10963 = vmatmul.mubr.msk.f32.gmra.mrb[34].mxu0 %vm322_vm0, %v285_v22  ;;  %1151 = vst.msk [vmem:[#allocation2 + $0x160] sm:$0xff] %vm1106_vm1, %v12942_v24  ;;  %1152 = vst.msk [vmem:[#allocation2 + $0x168] sm:$0xff] %vm1106_vm1, %v12942_v24 }
  0x50   :  { %10965 = vmatprep.mubr.msk.f32.mxu0 %vm322_vm0, %v286_v4  ;;  %1153 = vst.msk [vmem:[#allocation2 + $0x170] sm:$0xff] %vm1106_vm1, %v12942_v24  ;;  %1154 = vst.msk [vmem:[#allocation2 + $0x178] sm:$0xff] %vm1106_vm1, %v12942_v24 }
  0x51   :  { %1155 = vst.msk [vmem:[#allocation2 + $0x180] sm:$0xff] %vm1106_vm1, %v12942_v24  ;;  %1156 = vst.msk [vmem:[#allocation2 + $0x188] sm:$0xff] %vm1106_vm1, %v12942_v24 }
  0x52   :  { %1157 = vst.msk [vmem:[#allocation2 + $0x190] sm:$0xff] %vm1106_vm1, %v12942_v24  ;;  %1158 = vst.msk [vmem:[#allocation2 + $0x198] sm:$0xff] %vm1106_vm1, %v12942_v24 }
  0x53   :  { %10966 = vmatmul.mubr.msk.f32.gmra.mrb[36].mxu0 %vm322_vm0, %v287_v23  ;;  %1159 = vst.msk [vmem:[#allocation2 + $0x1a0] sm:$0xff] %vm1106_vm1, %v12942_v24  ;;  %1160 = vst.msk [vmem:[#allocation2 + $0x1a8] sm:$0xff] %vm1106_vm1, %v12942_v24 }
  0x54   :  { %10968 = vmatprep.mubr.msk.f32.mxu0 %vm322_vm0, %v288_v28  ;;  %1161 = vst.msk [vmem:[#allocation2 + $0x1b0] sm:$0xff] %vm1106_vm1, %v12942_v24  ;;  %1162 = vst.msk [vmem:[#allocation2 + $0x1b8] sm:$0xff] %vm1106_vm1, %v12942_v24 }
  0x55   :  { %1163 = vst.msk [vmem:[#allocation2 + $0x1c0] sm:$0xff] %vm1106_vm1, %v12942_v24  ;;  %1164 = vst.msk [vmem:[#allocation2 + $0x1c8] sm:$0xff] %vm1106_vm1, %v12942_v24 }
  0x56   :  { %1165 = vst.msk [vmem:[#allocation2 + $0x1d0] sm:$0xff] %vm1106_vm1, %v12942_v24  ;;  %1166 = vst.msk [vmem:[#allocation2 + $0x1d8] sm:$0xff] %vm1106_vm1, %v12942_v24 }
  0x57   :  { %10969 = vmatmul.mubr.msk.f32.gmra.mrb[38].mxu0 %vm322_vm0, %v289_v29  ;;  %1167 = vst.msk [vmem:[#allocation2 + $0x1e0] sm:$0xff] %vm1106_vm1, %v12942_v24  ;;  %1168 = vst.msk [vmem:[#allocation2 + $0x1e8] sm:$0xff] %vm1106_vm1, %v12942_v24 }
  0x58   :  { %10971 = vmatprep.mubr.msk.f32.mxu0 %vm322_vm0, %v290_v34  ;;  %1169 = vst.msk [vmem:[#allocation2 + $0x1f0] sm:$0xff] %vm1106_vm1, %v12942_v24  ;;  %1170 = vst.msk [vmem:[#allocation2 + $0x1f8] sm:$0xff] %vm1106_vm1, %v12942_v24 }
  0x59   :  { %1171 = vst.msk [vmem:[#allocation2 + $0x200] sm:$0xff] %vm1106_vm1, %v12942_v24  ;;  %1172 = vst.msk [vmem:[#allocation2 + $0x208] sm:$0xff] %vm1106_vm1, %v12942_v24 }
  0x5a   :  { %1173 = vst.msk [vmem:[#allocation2 + $0x210] sm:$0xff] %vm1106_vm1, %v12942_v24  ;;  %1174 = vst.msk [vmem:[#allocation2 + $0x218] sm:$0xff] %vm1106_vm1, %v12942_v24 }
  0x5b   :  { %10972 = vmatmul.mubr.msk.f32.gmra.mrb[40].mxu0 %vm322_vm0, %v291_v35  ;;  %1175 = vst.msk [vmem:[#allocation2 + $0x220] sm:$0xff] %vm1106_vm1, %v12942_v24  ;;  %1176 = vst.msk [vmem:[#allocation2 + $0x228] sm:$0xff] %vm1106_vm1, %v12942_v24 }
  0x5c   :  { %10974 = vmatprep.mubr.msk.f32.mxu0 %vm322_vm0, %v292_v36  ;;  %1177 = vst.msk [vmem:[#allocation2 + $0x230] sm:$0xff] %vm1106_vm1, %v12942_v24  ;;  %1178 = vst.msk [vmem:[#allocation2 + $0x238] sm:$0xff] %vm1106_vm1, %v12942_v24 }
  0x5d   :  { %1179 = vst.msk [vmem:[#allocation2 + $0x240] sm:$0xff] %vm1106_vm1, %v12942_v24  ;;  %1180 = vst.msk [vmem:[#allocation2 + $0x248] sm:$0xff] %vm1106_vm1, %v12942_v24 }
  0x5e   :  { %1181 = vst.msk [vmem:[#allocation2 + $0x250] sm:$0xff] %vm1106_vm1, %v12942_v24  ;;  %1182 = vst.msk [vmem:[#allocation2 + $0x258] sm:$0xff] %vm1106_vm1, %v12942_v24 }
  0x5f   :  { %10975 = vmatmul.mubr.msk.f32.gmra.mrb[42].mxu0 %vm322_vm0, %v293_v41  ;;  %1183 = vst.msk [vmem:[#allocation2 + $0x260] sm:$0xff] %vm1106_vm1, %v12942_v24  ;;  %1184 = vst.msk [vmem:[#allocation2 + $0x268] sm:$0xff] %vm1106_vm1, %v12942_v24 }
  0x60   :  { %10977 = vmatprep.mubr.msk.f32.mxu0 %vm322_vm0, %v294_v42  ;;  %1185 = vst.msk [vmem:[#allocation2 + $0x270] sm:$0xff] %vm1106_vm1, %v12942_v24  ;;  %1186 = vst.msk [vmem:[#allocation2 + $0x278] sm:$0xff] %vm1106_vm1, %v12942_v24 }
  0x61   :  { %1187 = vst.msk [vmem:[#allocation2 + $0x280] sm:$0xff] %vm1106_vm1, %v12942_v24  ;;  %1188 = vst.msk [vmem:[#allocation2 + $0x288] sm:$0xff] %vm1106_vm1, %v12942_v24 }
  0x62   :  { %1189 = vst.msk [vmem:[#allocation2 + $0x290] sm:$0xff] %vm1106_vm1, %v12942_v24  ;;  %1190 = vst.msk [vmem:[#allocation2 + $0x298] sm:$0xff] %vm1106_vm1, %v12942_v24 }
  0x63   :  { %10978 = vmatmul.mubr.msk.f32.gmra.mrb[44].mxu0 %vm322_vm0, %v295_v57  ;;  %1191 = vst.msk [vmem:[#allocation2 + $0x2a0] sm:$0xff] %vm1106_vm1, %v12942_v24  ;;  %1192 = vst.msk [vmem:[#allocation2 + $0x2a8] sm:$0xff] %vm1106_vm1, %v12942_v24 }
  0x64   :  { %1193 = vst.msk [vmem:[#allocation2 + $0x2b0] sm:$0xff] %vm1106_vm1, %v12942_v24  ;;  %1194 = vst.msk [vmem:[#allocation2 + $0x2b8] sm:$0xff] %vm1106_vm1, %v12942_v24  ;;  %10980 = vmatprep.mubr.msk.f32.mxu0 %vm322_vm0, %v296_v61 }
  0x65   :  { %1195 = vst.msk [vmem:[#allocation2 + $0x2c0] sm:$0xff] %vm1106_vm1, %v12942_v24  ;;  %1196 = vst.msk [vmem:[#allocation2 + $0x2c8] sm:$0xff] %vm1106_vm1, %v12942_v24 }
  0x66   :  { %1197 = vst.msk [vmem:[#allocation2 + $0x2d0] sm:$0xff] %vm1106_vm1, %v12942_v24  ;;  %1198 = vst.msk [vmem:[#allocation2 + $0x2d8] sm:$0xff] %vm1106_vm1, %v12942_v24 }
  0x67   :  { %1199 = vst.msk [vmem:[#allocation2 + $0x2e0] sm:$0xff] %vm1106_vm1, %v12942_v24  ;;  %1200 = vst.msk [vmem:[#allocation2 + $0x2e8] sm:$0xff] %vm1106_vm1, %v12942_v24  ;;  %10981 = vmatmul.mubr.msk.f32.gmra.mrb[46].mxu0 %vm322_vm0, %v297_v62 }
  0x68   :  { %1201 = vst.msk [vmem:[#allocation2 + $0x2f0] sm:$0xff] %vm1106_vm1, %v12942_v24  ;;  %1202 = vst.msk [vmem:[#allocation2 + $0x2f8] sm:$0xff] %vm1106_vm1, %v12942_v24  ;;  %10983 = vmatprep.mubr.msk.f32.mxu0 %vm322_vm0, %v298_v6 }
  0x69   :  { %1203 = vst.msk [vmem:[#allocation2 + $0x300] sm:$0xff] %vm1106_vm1, %v12942_v24  ;;  %1204 = vst.msk [vmem:[#allocation2 + $0x308] sm:$0xff] %vm1106_vm1, %v12942_v24 }
  0x6a   :  { %1205 = vst.msk [vmem:[#allocation2 + $0x310] sm:$0xff] %vm1106_vm1, %v12942_v24  ;;  %1206 = vst.msk [vmem:[#allocation2 + $0x318] sm:$0xff] %vm1106_vm1, %v12942_v24 }
  0x6b   :  { %1207 = vst.msk [vmem:[#allocation2 + $0x320] sm:$0xff] %vm1106_vm1, %v12942_v24  ;;  %1208 = vst.msk [vmem:[#allocation2 + $0x328] sm:$0xff] %vm1106_vm1, %v12942_v24  ;;  %10984 = vmatmul.mubr.msk.f32.gmra.mrb[48].mxu0 %vm322_vm0, %v299_v7 }
  0x6c   :  { %1209 = vst.msk [vmem:[#allocation2 + $0x330] sm:$0xff] %vm1106_vm1, %v12942_v24  ;;  %1210 = vst.msk [vmem:[#allocation2 + $0x338] sm:$0xff] %vm1106_vm1, %v12942_v24  ;;  %10986 = vmatprep.mubr.msk.f32.mxu0 %vm322_vm0, %v300_v8 }
  0x6d   :  { %1211 = vst.msk [vmem:[#allocation2 + $0x340] sm:$0xff] %vm1106_vm1, %v12942_v24  ;;  %1212 = vst.msk [vmem:[#allocation2 + $0x348] sm:$0xff] %vm1106_vm1, %v12942_v24 }
  0x6e   :  { %1213 = vst.msk [vmem:[#allocation2 + $0x350] sm:$0xff] %vm1106_vm1, %v12942_v24  ;;  %1214 = vst.msk [vmem:[#allocation2 + $0x358] sm:$0xff] %vm1106_vm1, %v12942_v24 }
  0x6f   :  { %10987 = vmatmul.mubr.msk.f32.gmra.mrb[50].mxu0 %vm322_vm0, %v301_v13 }
  0x70   :  { %10989 = vmatprep.mubr.msk.f32.mxu0 %vm322_vm0, %v302_v14 }
  0x73   :  { %10990 = vmatmul.mubr.msk.f32.gmra.mrb[52].mxu0 %vm322_vm0, %v303_v30 }
  0x74   :  { %10992 = vmatprep.mubr.msk.f32.mxu0 %vm322_vm0, %v304_v38 }
  0x77   :  { %10993 = vmatmul.mubr.msk.f32.gmra.mrb[54].mxu0 %vm322_vm0, %v305_v39 }
  0x78   :  { %10995 = vmatprep.mubr.msk.f32.mxu0 %vm322_vm0, %v306_v47 }
  0x7b   :  { %10996 = vmatmul.mubr.msk.f32.gmra.mrb[56].mxu0 %vm322_vm0, %v307_v48 }
  0x7c   :  { %10998 = vmatprep.mubr.msk.f32.mxu0 %vm322_vm0, %v308_v49 }
  0x7f   :  { %10999 = vmatmul.mubr.msk.f32.gmra.mrb[58].mxu0 %vm322_vm0, %v309_v53 }
  0x80   :  { %11001 = vmatprep.mubr.msk.f32.mxu0 %vm322_vm0, %v310_v54  ;;  %v1285_v54 = vld [vmem:[#allocation2 + $0x28] sm:$0xff] }
  0x83   :  { %11002 = vmatmul.mubr.msk.f32.gmra.mrb[60].mxu0 %vm322_vm0, %v311_v15 }
  0x84   :  { %11004 = vmatprep.mubr.msk.f32.mxu0 %vm322_vm0, %v312_v20 }
  0x87   :  { %11005 = vmatmul.mubr.msk.f32.gmra.mrb[62].mxu0 %vm322_vm0, %v313_v21 }
  0x88   :  { %11009 = vmatprep.mubr.msk.f32.mxu0 %vm1106_vm1, %v13742_v32 }
  0x8b   :  { %11010 = vmatmul.mubr.msk.f32.vlgmr.msra.gmra.mrb[64].mxu0 %vm1106_vm1, %v1281_v25 }
  0x8c   :  { %11012 = vmatprep.mubr.msk.f32.mxu0 %vm1106_vm1, %v13747_v26 }
  0xde   :  { %v10913_v37 = vpop.f32.mrb[0].mxu0 }
  0xdf   :  { %v587_v43 = vadd.f32 %v10913_v37, %v13755_v27  ;;  %v581_v44 = vpop.f32.mrb[1].mxu0 }
  0xe0   :  { %v582_v46 = vadd.f32 %v13755_v27, %v581_v44 }
  0xe1   :  { %v908_v51 = vmul.f32 %v13764_v40, %v587_v43 }
  0xe2   :  { %v907_v52 = vmul.f32 %v13764_v40, %v582_v46  ;;  %v10916_v55 = vpop.f32.mrb[2].mxu0 }
  0xe3   :  { %v979_v56 = vadd.f32 %v13771_v45, %v908_v51  ;;  %v597_v58 = vadd.f32 %v10916_v55, %v13755_v27  ;;  %v591_v59 = vpop.f32.mrb[3].mxu0 }
  0xe4   :  { %v978_v60 = vadd.f32 %v13771_v45, %v907_v52  ;;  %v592_v63 = vadd.f32 %v13755_v27, %v591_v59 }
  0xe5   :  { %v1043_v0 = vmax.f32 %v979_v56, 0.0  ;;  %v910_v1 = vmul.f32 %v13764_v40, %v597_v58  ;;  %v1288_v58 = vld [vmem:[#allocation2 + $0x40] sm:$0xff] }
  0xe6   :  { %v1042_v3 = vmax.f32 %v978_v60, 0.0  ;;  %v909_v5 = vmul.f32 %v13764_v40, %v592_v63  ;;  %v10919_v9 = vpop.f32.mrb[4].mxu0 }
  0xe7   :  { %1217 = vst.msk [vmem:[#allocation2 + $0x20] sm:$0xff] %vm1106_vm1, %v1043_v0  ;;  %v981_v10 = vadd.f32 %v13771_v45, %v910_v1  ;;  %v607_v11 = vadd.f32 %v10919_v9, %v13755_v27  ;;  %v601_v12 = vpop.f32.mrb[5].mxu0 }
  0xe8   :  { %1216 = vst.msk [vmem:[#allocation2 + $0x18] sm:$0xff] %vm1106_vm1, %v1042_v3  ;;  %v980_v16 = vadd.f32 %v13771_v45, %v909_v5  ;;  %v602_v17 = vadd.f32 %v13755_v27, %v601_v12 }
  0xe9   :  { %v1045_v18 = vmax.f32 %v981_v10, 0.0  ;;  %v912_v2 = vmul.f32 %v13764_v40, %v607_v11 }
  0xea   :  { %v1044_v19 = vmax.f32 %v980_v16, 0.0  ;;  %v911_v22 = vmul.f32 %v13764_v40, %v602_v17  ;;  %v10922_v4 = vpop.f32.mrb[6].mxu0 }
  0xeb   :  { %1219 = vst.msk [vmem:[#allocation2 + $0x38] sm:$0xff] %vm1106_vm1, %v1045_v18  ;;  %v983_v23 = vadd.f32 %v13771_v45, %v912_v2  ;;  %v617_v28 = vadd.f32 %v10922_v4, %v13755_v27  ;;  %v611_v29 = vpop.f32.mrb[7].mxu0 }
  0xec   :  { %1218 = vst.msk [vmem:[#allocation2 + $0x30] sm:$0xff] %vm1106_vm1, %v1044_v19  ;;  %v982_v34 = vadd.f32 %v13771_v45, %v911_v22  ;;  %v612_v35 = vadd.f32 %v13755_v27, %v611_v29  ;;  %v1291_v29 = vld [vmem:[#allocation2 + $0x58] sm:$0xff] }
  0xed   :  { %v1047_v36 = vmax.f32 %v983_v23, 0.0  ;;  %v914_v41 = vmul.f32 %v13764_v40, %v617_v28 }
  0xee   :  { %v1046_v42 = vmax.f32 %v982_v34, 0.0  ;;  %v913_v57 = vmul.f32 %v13764_v40, %v612_v35  ;;  %v10925_v61 = vpop.f32.mrb[8].mxu0  ;;  %v1284_v13 = vld [vmem:[#allocation2 + $0x20] sm:$0xff] }
  0xef   :  { %1221 = vst.msk [vmem:[#allocation2 + $0x50] sm:$0xff] %vm1106_vm1, %v1047_v36  ;;  %v985_v62 = vadd.f32 %v13771_v45, %v914_v41  ;;  %v627_v24 = vadd.f32 %v10925_v61, %v13755_v27  ;;  %v621_v6 = vpop.f32.mrb[9].mxu0  ;;  %v1283_v7 = vld [vmem:[#allocation2 + $0x18] sm:$0xff] }
  0xf0   :  { %1220 = vst.msk [vmem:[#allocation2 + $0x48] sm:$0xff] %vm1106_vm1, %v1046_v42  ;;  %v984_v8 = vadd.f32 %v13771_v45, %v913_v57  ;;  %v622_v31 = vadd.f32 %v13755_v27, %v621_v6  ;;  %11013 = vmatmul.mubr.msk.f32.gmra.mrb[66].mxu0 %vm1106_vm1, %v1283_v7 }
  0xf1   :  { %v1049_v14 = vmax.f32 %v985_v62, 0.0  ;;  %v916_v30 = vmul.f32 %v13764_v40, %v627_v24  ;;  %11015 = vmatprep.mubr.msk.f32.mxu0 %vm1106_vm1, %v1284_v13 }
  0xf2   :  { %v1048_v38 = vmax.f32 %v984_v8, 0.0  ;;  %v915_v39 = vmul.f32 %v13764_v40, %v622_v31  ;;  %v10928_v47 = vpop.f32.mrb[10].mxu0  ;;  %v1287_v52 = vld [vmem:[#allocation2 + $0x38] sm:$0xff] }
  0xf3   :  { %1223 = vst.msk [vmem:[#allocation2 + $0x68] sm:$0xff] %vm1106_vm1, %v1049_v14  ;;  %v987_v48 = vadd.f32 %v13771_v45, %v916_v30  ;;  %v637_v49 = vadd.f32 %v10928_v47, %v13755_v27  ;;  %v631_v53 = vpop.f32.mrb[11].mxu0  ;;  %v1286_v15 = vld [vmem:[#allocation2 + $0x30] sm:$0xff] }
  0xf4   :  { %1222 = vst.msk [vmem:[#allocation2 + $0x60] sm:$0xff] %vm1106_vm1, %v1048_v38  ;;  %v986_v20 = vadd.f32 %v13771_v45, %v915_v39  ;;  %v632_v21 = vadd.f32 %v13755_v27, %v631_v53  ;;  %11016 = vmatmul.mubr.msk.f32.gmra.mrb[68].mxu0 %vm1106_vm1, %v1285_v54  ;;  %v13862_v14 = vld [vmem:[#allocation2 + $0x70] sm:$0xff] }
  0xf5   :  { %v1051_v25 = vmax.f32 %v987_v48, 0.0  ;;  %v918_v33 = vmul.f32 %v13764_v40, %v637_v49  ;;  %11018 = vmatprep.mubr.msk.f32.mxu0 %vm1106_vm1, %v1286_v15 }
  0xf6   :  { %v1050_v37 = vmax.f32 %v986_v20, 0.0  ;;  %v917_v43 = vmul.f32 %v13764_v40, %v632_v21  ;;  %v10931_v44 = vpop.f32.mrb[12].mxu0  ;;  %v1290_v16 = vld [vmem:[#allocation2 + $0x50] sm:$0xff] }
  0xf7   :  { %1225 = vst.msk [vmem:[#allocation2 + $0x80] sm:$0xff] %vm1106_vm1, %v1051_v25  ;;  %v989_v46 = vadd.f32 %v13771_v45, %v918_v33  ;;  %v647_v50 = vadd.f32 %v10931_v44, %v13755_v27  ;;  %v641_v51 = vpop.f32.mrb[13].mxu0  ;;  %v1289_v10 = vld [vmem:[#allocation2 + $0x48] sm:$0xff] }
  0xf8   :  { %1224 = vst.msk [vmem:[#allocation2 + $0x78] sm:$0xff] %vm1106_vm1, %v1050_v37  ;;  %v988_v55 = vadd.f32 %v13771_v45, %v917_v43  ;;  %v642_v56 = vadd.f32 %v13755_v27, %v641_v51  ;;  %11019 = vmatmul.mubr.msk.f32.gmra.mrb[70].mxu0 %vm1106_vm1, %v1287_v52 }
  0xf9   :  { %v1053_v59 = vmax.f32 %v989_v46, 0.0  ;;  %v920_v60 = vmul.f32 %v13764_v40, %v647_v50  ;;  %11021 = vmatprep.mubr.msk.f32.mxu0 %vm1106_vm1, %v1288_v58 }
  0xfa   :  { %v1052_v63 = vmax.f32 %v988_v55, 0.0  ;;  %v919_v0 = vmul.f32 %v13764_v40, %v642_v56  ;;  %v10934_v1 = vpop.f32.mrb[14].mxu0  ;;  %v13855_v8 = vld [vmem:[#allocation2 + $0x68] sm:$0xff] }
  0xfb   :  { %1227 = vst.msk [vmem:[#allocation2 + $0x98] sm:$0xff] %vm1106_vm1, %v1053_v59  ;;  %v991_v3 = vadd.f32 %v13771_v45, %v920_v60  ;;  %v657_v5 = vadd.f32 %v10934_v1, %v13755_v27  ;;  %v651_v9 = vpop.f32.mrb[15].mxu0  ;;  %v1292_v36 = vld [vmem:[#allocation2 + $0x60] sm:$0xff]  ;;  %v13887_v55 = vld [vmem:[#allocation2 + $0x88] sm:$0xff] }
  0xfc   :  { %1226 = vst.msk [vmem:[#allocation2 + $0x90] sm:$0xff] %vm1106_vm1, %v1052_v63  ;;  %v990_v11 = vadd.f32 %v13771_v45, %v919_v0  ;;  %v652_v12 = vadd.f32 %v13755_v27, %v651_v9  ;;  %11022 = vmatmul.mubr.msk.f32.gmra.mrb[72].mxu0 %vm1106_vm1, %v1289_v10 }
  0xfd   :  { %v1055_v17 = vmax.f32 %v991_v3, 0.0  ;;  %v922_v18 = vmul.f32 %v13764_v40, %v657_v5  ;;  %11024 = vmatprep.mubr.msk.f32.mxu0 %vm1106_vm1, %v1290_v16 }
  0xfe   :  { %v1054_v2 = vmax.f32 %v990_v11, 0.0  ;;  %v921_v19 = vmul.f32 %v13764_v40, %v652_v12  ;;  %v10937_v22 = vpop.f32.mrb[16].mxu0  ;;  %v13878_v25 = vld [vmem:[#allocation2 + $0x80] sm:$0xff] }
  0xff   :  { %1229 = vst.msk [vmem:[#allocation2 + $0xb0] sm:$0xff] %vm1106_vm1, %v1055_v17  ;;  %v993_v4 = vadd.f32 %v13771_v45, %v922_v18  ;;  %v667_v23 = vadd.f32 %v10937_v22, %v13755_v27  ;;  %v661_v28 = vpop.f32.mrb[17].mxu0  ;;  %v13871_v15 = vld [vmem:[#allocation2 + $0x78] sm:$0xff]  ;;  %v13910_v17 = vld [vmem:[#allocation2 + $0xa0] sm:$0xff] }
 0x100   :  { %1228 = vst.msk [vmem:[#allocation2 + $0xa8] sm:$0xff] %vm1106_vm1, %v1054_v2  ;;  %v992_v34 = vadd.f32 %v13771_v45, %v921_v19  ;;  %v662_v35 = vadd.f32 %v13755_v27, %v661_v28  ;;  %11025 = vmatmul.mubr.msk.f32.gmra.mrb[74].mxu0 %vm1106_vm1, %v1291_v29 }
 0x101   :  { %v1057_v41 = vmax.f32 %v993_v4, 0.0  ;;  %v924_v42 = vmul.f32 %v13764_v40, %v667_v23  ;;  %11027 = vmatprep.mubr.msk.f32.mxu0 %vm1106_vm1, %v1292_v36 }
 0x102   :  { %v1056_v57 = vmax.f32 %v992_v34, 0.0  ;;  %v923_v61 = vmul.f32 %v13764_v40, %v662_v35  ;;  %v10940_v62 = vpop.f32.mrb[18].mxu0  ;;  %v13903_v11 = vld [vmem:[#allocation2 + $0x98] sm:$0xff] }
 0x103   :  { %1231 = vst.msk [vmem:[#allocation2 + $0xc8] sm:$0xff] %vm1106_vm1, %v1057_v41  ;;  %v995_v24 = vadd.f32 %v13771_v45, %v924_v42  ;;  %v677_v6 = vadd.f32 %v10940_v62, %v13755_v27  ;;  %v671_v7 = vpop.f32.mrb[19].mxu0  ;;  %v13894_v59 = vld [vmem:[#allocation2 + $0x90] sm:$0xff] }
 0x104   :  { %1230 = vst.msk [vmem:[#allocation2 + $0xc0] sm:$0xff] %vm1106_vm1, %v1056_v57  ;;  %v994_v31 = vadd.f32 %v13771_v45, %v923_v61  ;;  %v672_v13 = vadd.f32 %v13755_v27, %v671_v7  ;;  %11028 = vmatmul.mubr.msk.f32.gmra.mrb[76].mxu0 %vm1106_vm1, %v13855_v8 }
 0x105   :  { %v1059_v30 = vmax.f32 %v995_v24, 0.0  ;;  %v926_v38 = vmul.f32 %v13764_v40, %v677_v6  ;;  %11030 = vmatprep.mubr.msk.f32.mxu0 %vm1106_vm1, %v13862_v14 }
 0x106   :  { %v1058_v39 = vmax.f32 %v994_v31, 0.0  ;;  %v925_v47 = vmul.f32 %v13764_v40, %v672_v13  ;;  %v10943_v48 = vpop.f32.mrb[20].mxu0  ;;  %v13926_v41 = vld [vmem:[#allocation2 + $0xb0] sm:$0xff]  ;;  %v13935_v13 = vld [vmem:[#allocation2 + $0xb8] sm:$0xff] }
 0x107   :  { %1233 = vst.msk [vmem:[#allocation2 + $0xe0] sm:$0xff] %vm1106_vm1, %v1059_v30  ;;  %v997_v49 = vadd.f32 %v13771_v45, %v926_v38  ;;  %v687_v53 = vadd.f32 %v10943_v48, %v13755_v27  ;;  %v681_v54 = vpop.f32.mrb[21].mxu0  ;;  %v13919_v34 = vld [vmem:[#allocation2 + $0xa8] sm:$0xff] }
 0x108   :  { %1232 = vst.msk [vmem:[#allocation2 + $0xd8] sm:$0xff] %vm1106_vm1, %v1058_v39  ;;  %v996_v20 = vadd.f32 %v13771_v45, %v925_v47  ;;  %v682_v21 = vadd.f32 %v13755_v27, %v681_v54  ;;  %11031 = vmatmul.mubr.msk.f32.gmra.mrb[78].mxu0 %vm1106_vm1, %v13871_v15 }
 0x109   :  { %v1061_v33 = vmax.f32 %v997_v49, 0.0  ;;  %v928_v37 = vmul.f32 %v13764_v40, %v687_v53  ;;  %11033 = vmatprep.mubr.msk.f32.mxu0 %vm1106_vm1, %v13878_v25 }
 0x10a   :  { %v1060_v43 = vmax.f32 %v996_v20, 0.0  ;;  %v927_v44 = vmul.f32 %v13764_v40, %v682_v21  ;;  %v10946_v46 = vpop.f32.mrb[22].mxu0 }
 0x10b   :  { %1235 = vst.msk [vmem:[#allocation2 + $0xf8] sm:$0xff] %vm1106_vm1, %v1061_v33  ;;  %v999_v50 = vadd.f32 %v13771_v45, %v928_v37  ;;  %v697_v51 = vadd.f32 %v10946_v46, %v13755_v27  ;;  %v691_v52 = vpop.f32.mrb[23].mxu0  ;;  %v13942_v39 = vld [vmem:[#allocation2 + $0xc0] sm:$0xff]  ;;  %v13951_v37 = vld [vmem:[#allocation2 + $0xc8] sm:$0xff]  ;;  %v13958_v46 = vld [vmem:[#allocation2 + $0xd0] sm:$0xff] }
 0x10c   :  { %1234 = vst.msk [vmem:[#allocation2 + $0xf0] sm:$0xff] %vm1106_vm1, %v1060_v43  ;;  %v998_v56 = vadd.f32 %v13771_v45, %v927_v44  ;;  %v692_v58 = vadd.f32 %v13755_v27, %v691_v52  ;;  %11034 = vmatmul.mubr.msk.f32.gmra.mrb[80].mxu0 %vm1106_vm1, %v13887_v55 }
 0x10d   :  { %v1063_v60 = vmax.f32 %v999_v50, 0.0  ;;  %v930_v63 = vmul.f32 %v13764_v40, %v697_v51  ;;  %11036 = vmatprep.mubr.msk.f32.mxu0 %vm1106_vm1, %v13894_v59 }
 0x10e   :  { %v1062_v0 = vmax.f32 %v998_v56, 0.0  ;;  %v929_v1 = vmul.f32 %v13764_v40, %v692_v58  ;;  %v10949_v3 = vpop.f32.mrb[24].mxu0 }
 0x10f   :  { %1237 = vst.msk [vmem:[#allocation2 + $0x110] sm:$0xff] %vm1106_vm1, %v1063_v60  ;;  %v1001_v5 = vadd.f32 %v13771_v45, %v930_v63  ;;  %v707_v9 = vadd.f32 %v10949_v3, %v13755_v27  ;;  %v701_v10 = vpop.f32.mrb[25].mxu0  ;;  %v1505_v3 = vlaneseq }
 0x110   :  { %1236 = vst.msk [vmem:[#allocation2 + $0x108] sm:$0xff] %vm1106_vm1, %v1062_v0  ;;  %v1000_v12 = vadd.f32 %v13771_v45, %v929_v1  ;;  %v702_v16 = vadd.f32 %v13755_v27, %v701_v10  ;;  %11037 = vmatmul.mubr.msk.f32.gmra.mrb[82].mxu0 %vm1106_vm1, %v13903_v11  ;;  %v13967_v1 = vld [vmem:[#allocation2 + $0xd8] sm:$0xff]  ;;  %v13974_v10 = vld [vmem:[#allocation2 + $0xe0] sm:$0xff] }
 0x111   :  { %v1065_v18 = vmax.f32 %v1001_v5, 0.0  ;;  %v932_v2 = vmul.f32 %v13764_v40, %v707_v9  ;;  %11039 = vmatprep.mubr.msk.f32.mxu0 %vm1106_vm1, %v13910_v17 }
 0x112   :  { %v1064_v19 = vmax.f32 %v1000_v12, 0.0  ;;  %v931_v22 = vmul.f32 %v13764_v40, %v702_v16  ;;  %v10952_v4 = vpop.f32.mrb[26].mxu0 }
 0x113   :  { %1239 = vst.msk [vmem:[#allocation2 + $0x128] sm:$0xff] %vm1106_vm1, %v1065_v18  ;;  %v1003_v23 = vadd.f32 %v13771_v45, %v932_v2  ;;  %v717_v28 = vadd.f32 %v10952_v4, %v13755_v27  ;;  %v711_v29 = vpop.f32.mrb[27].mxu0 }
 0x114   :  { %1238 = vst.msk [vmem:[#allocation2 + $0x120] sm:$0xff] %vm1106_vm1, %v1064_v19  ;;  %v1002_v35 = vadd.f32 %v13771_v45, %v931_v22  ;;  %v712_v36 = vadd.f32 %v13755_v27, %v711_v29  ;;  %11040 = vmatmul.mubr.msk.f32.gmra.mrb[84].mxu0 %vm1106_vm1, %v13919_v34  ;;  %v13985_v29 = vshrl.u32 %v1505_v3, 7 }
 0x115   :  { %v1067_v42 = vmax.f32 %v1003_v23, 0.0  ;;  %v934_v57 = vmul.f32 %v13764_v40, %v717_v28  ;;  %11042 = vmatprep.mubr.msk.f32.mxu0 %vm1106_vm1, %v13926_v41  ;;  %v13983_v28 = vld [vmem:[#allocation2 + $0xe8] sm:$0xff] }
 0x116   :  { %v1066_v61 = vmax.f32 %v1002_v35, 0.0  ;;  %v933_v62 = vmul.f32 %v13764_v40, %v712_v36  ;;  %v10955_v24 = vpop.f32.mrb[28].mxu0  ;;  %v18622_v35 = vrot.slane %v13742_v32, 7  ;;  %v18621_v36 = vrot.slane %v13747_v26, 7  ;;  %v14040_v3 = vld [vmem:[#allocation2 + $0x110] sm:$0xff] }
 0x117   :  { %1241 = vst.msk [vmem:[#allocation2 + $0x140] sm:$0xff] %vm1106_vm1, %v1067_v42  ;;  %v1005_v6 = vadd.f32 %v13771_v45, %v934_v57  ;;  %v727_v7 = vadd.f32 %v10955_v24, %v13755_v27  ;;  %v721_v31 = vpop.f32.mrb[29].mxu0  ;;  %vm1507_vm3 = vcmp.lt.s32.totalorder %v13985_v29, 1  ;;  %vm1724_vm4 = vcmp.lt.s32.totalorder %v13985_v29, 7 }
 0x118   :  { %1240 = vst.msk [vmem:[#allocation2 + $0x138] sm:$0xff] %vm1106_vm1, %v1066_v61  ;;  %v1004_v30 = vadd.f32 %v13771_v45, %v933_v62  ;;  %v722_v38 = vadd.f32 %v13755_v27, %v721_v31  ;;  %11043 = vmatmul.mubr.msk.f32.gmra.mrb[86].mxu0 %vm1106_vm1, %v13935_v13  ;;  %v13994_v61 = vld [vmem:[#allocation2 + $0xf0] sm:$0xff] }
 0x119   :  { %v1069_v47 = vmax.f32 %v1005_v6, 0.0  ;;  %v936_v48 = vmul.f32 %v13764_v40, %v727_v7  ;;  %11045 = vmatprep.mubr.msk.f32.mxu0 %vm1106_vm1, %v13942_v39 }
 0x11a   :  { %v1068_v49 = vmax.f32 %v1004_v30, 0.0  ;;  %v935_v53 = vmul.f32 %v13764_v40, %v722_v38  ;;  %v10958_v54 = vpop.f32.mrb[30].mxu0 }
 0x11b   :  { %1243 = vst.msk [vmem:[#allocation2 + $0x158] sm:$0xff] %vm1106_vm1, %v1069_v47  ;;  %v1007_v20 = vadd.f32 %v13771_v45, %v936_v48  ;;  %v737_v21 = vadd.f32 %v10958_v54, %v13755_v27  ;;  %v731_v33 = vpop.f32.mrb[31].mxu0  ;;  %v14003_v48 = vld [vmem:[#allocation2 + $0xf8] sm:$0xff]  ;;  %v14011_v54 = vld [vmem:[#allocation2 + $0x100] sm:$0xff] }
 0x11c   :  { %1242 = vst.msk [vmem:[#allocation2 + $0x150] sm:$0xff] %vm1106_vm1, %v1068_v49  ;;  %v1006_v43 = vadd.f32 %v13771_v45, %v935_v53  ;;  %v732_v44 = vadd.f32 %v13755_v27, %v731_v33  ;;  %11046 = vmatmul.mubr.msk.f32.gmra.mrb[88].mxu0 %vm1106_vm1, %v13951_v37 }
 0x11d   :  { %v1071_v50 = vmax.f32 %v1007_v20, 0.0  ;;  %v938_v51 = vmul.f32 %v13764_v40, %v737_v21  ;;  %11048 = vmatprep.mubr.msk.f32.mxu0 %vm1106_vm1, %v13958_v46  ;;  %v1388_v20 = vld [vmem:[%s18611_s7] sm:$0xf]  ;;  %v14022_v21 = vsel %vm1507_vm3, %v18621_v36, %v18622_v35 }
 0x11e   :  { %v1070_v52 = vmax.f32 %v1006_v43, 0.0  ;;  %v937_v56 = vmul.f32 %v13764_v40, %v732_v44  ;;  %v10961_v58 = vpop.f32.mrb[32].mxu0  ;;  %11153 = vmatprep.subr.msk.mxu0 %vm2121_vm2, %v1388_v20 }
 0x11f   :  { %1245 = vst.msk [vmem:[#allocation2 + $0x170] sm:$0xff] %vm1106_vm1, %v1071_v50  ;;  %v1009_v60 = vadd.f32 %v13771_v45, %v938_v51  ;;  %v747_v63 = vadd.f32 %v10961_v58, %v13755_v27  ;;  %v741_v0 = vpop.f32.mrb[33].mxu0  ;;  %11154 = vmatpush3.msk.msra.mxu0 %vm2121_vm2, %v1388_v20 }
 0x120   :  { %1244 = vst.msk [vmem:[#allocation2 + $0x168] sm:$0xff] %vm1106_vm1, %v1070_v52  ;;  %v1008_v5 = vadd.f32 %v13771_v45, %v937_v56  ;;  %v742_v9 = vadd.f32 %v13755_v27, %v741_v0  ;;  %11049 = vmatmul.mubr.msk.f32.gmra.mrb[90].mxu0 %vm1106_vm1, %v13967_v1 }
 0x121   :  { %v1073_v12 = vmax.f32 %v1009_v60, 0.0  ;;  %v940_v16 = vmul.f32 %v13764_v40, %v747_v63  ;;  %11051 = vmatprep.mubr.msk.f32.mxu0 %vm1106_vm1, %v13974_v10  ;;  %v14033_v60 = vld [vmem:[#allocation2 + $0x108] sm:$0xff] }
 0x122   :  { %v1072_v18 = vmax.f32 %v1008_v5, 0.0  ;;  %v939_v2 = vmul.f32 %v13764_v40, %v742_v9  ;;  %v10964_v19 = vpop.f32.mrb[34].mxu0 }
 0x123   :  { %1247 = vst.msk [vmem:[#allocation2 + $0x188] sm:$0xff] %vm1106_vm1, %v1073_v12  ;;  %v1011_v22 = vadd.f32 %v13771_v45, %v940_v16  ;;  %v757_v4 = vadd.f32 %v10964_v19, %v13755_v27  ;;  %v751_v23 = vpop.f32.mrb[35].mxu0 }
 0x124   :  { %1246 = vst.msk [vmem:[#allocation2 + $0x180] sm:$0xff] %vm1106_vm1, %v1072_v18  ;;  %v1010_v42 = vadd.f32 %v13771_v45, %v939_v2  ;;  %v752_v57 = vadd.f32 %v13755_v27, %v751_v23  ;;  %11052 = vmatmul.mubr.msk.f32.gmra.mrb[92].mxu0 %vm1106_vm1, %v13983_v28 }
 0x125   :  { %v1075_v62 = vmax.f32 %v1011_v22, 0.0  ;;  %v942_v24 = vmul.f32 %v13764_v40, %v757_v4  ;;  %11054 = vmatprep.mubr.msk.f32.mxu0 %vm1106_vm1, %v13994_v61  ;;  %v14049_v4 = vld [vmem:[#allocation2 + $0x118] sm:$0xff] }
 0x126   :  { %v1074_v6 = vmax.f32 %v1010_v42, 0.0  ;;  %v941_v7 = vmul.f32 %v13764_v40, %v752_v57  ;;  %v10967_v31 = vpop.f32.mrb[36].mxu0  ;;  %v14056_v57 = vld [vmem:[#allocation2 + $0x120] sm:$0xff] }
 0x127   :  { %1249 = vst.msk [vmem:[#allocation2 + $0x1d0] sm:$0xff] %vm1106_vm1, %v1075_v62  ;;  %v1013_v30 = vadd.f32 %v13771_v45, %v942_v24  ;;  %v767_v38 = vadd.f32 %v10967_v31, %v13755_v27  ;;  %v761_v47 = vpop.f32.mrb[37].mxu0 }
 0x128   :  { %1248 = vst.msk [vmem:[#allocation2 + $0x1c8] sm:$0xff] %vm1106_vm1, %v1074_v6  ;;  %v1012_v49 = vadd.f32 %v13771_v45, %v941_v7  ;;  %v762_v53 = vadd.f32 %v13755_v27, %v761_v47  ;;  %11055 = vmatmul.mubr.msk.f32.gmra.mrb[94].mxu0 %vm1106_vm1, %v14003_v48 }
 0x129   :  { %v1077_v33 = vmax.f32 %v1013_v30, 0.0  ;;  %v944_v43 = vmul.f32 %v13764_v40, %v767_v38  ;;  %11057 = vmatprep.mubr.msk.f32.mxu0 %vm1106_vm1, %v14011_v54 }
 0x12a   :  { %v1076_v44 = vmax.f32 %v1012_v49, 0.0  ;;  %v943_v50 = vmul.f32 %v13764_v40, %v762_v53  ;;  %v10970_v51 = vpop.f32.mrb[38].mxu0  ;;  %v14065_v49 = vld [vmem:[#allocation2 + $0x128] sm:$0xff] }
 0x12b   :  { %1251 = vst.msk [vmem:[#allocation2 + $0x1e8] sm:$0xff] %vm1106_vm1, %v1077_v33  ;;  %v1015_v52 = vadd.f32 %v13771_v45, %v944_v43  ;;  %v777_v56 = vadd.f32 %v10970_v51, %v13755_v27  ;;  %v771_v58 = vpop.f32.mrb[39].mxu0  ;;  %v14072_v33 = vld [vmem:[#allocation2 + $0x130] sm:$0xff] }
 0x12c   :  { %1250 = vst.msk [vmem:[#allocation2 + $0x1e0] sm:$0xff] %vm1106_vm1, %v1076_v44  ;;  %v1014_v63 = vadd.f32 %v13771_v45, %v943_v50  ;;  %v772_v0 = vadd.f32 %v13755_v27, %v771_v58  ;;  %11058 = vmatmul.mubr.msk.f32.gmra.mrb[96].mxu0 %vm1106_vm1, %v14033_v60 }
 0x12d   :  { %v1079_v5 = vmax.f32 %v1015_v52, 0.0  ;;  %v946_v9 = vmul.f32 %v13764_v40, %v777_v56  ;;  %11060 = vmatprep.mubr.msk.f32.mxu0 %vm1106_vm1, %v14040_v3 }
 0x12e   :  { %v1078_v12 = vmax.f32 %v1014_v63, 0.0  ;;  %v945_v16 = vmul.f32 %v13764_v40, %v772_v0  ;;  %v10973_v18 = vpop.f32.mrb[40].mxu0  ;;  %v14081_v0 = vld [vmem:[#allocation2 + $0x138] sm:$0xff] }
 0x12f   :  { %1253 = vst.msk [vmem:[#allocation2 + $0x200] sm:$0xff] %vm1106_vm1, %v1079_v5  ;;  %v1017_v2 = vadd.f32 %v13771_v45, %v946_v9  ;;  %v787_v19 = vadd.f32 %v10973_v18, %v13755_v27  ;;  %v781_v22 = vpop.f32.mrb[41].mxu0 }
 0x130   :  { %1252 = vst.msk [vmem:[#allocation2 + $0x1f8] sm:$0xff] %vm1106_vm1, %v1078_v12  ;;  %v1016_v23 = vadd.f32 %v13771_v45, %v945_v16  ;;  %v782_v42 = vadd.f32 %v13755_v27, %v781_v22  ;;  %11061 = vmatmul.mubr.msk.f32.gmra.mrb[98].mxu0 %vm1106_vm1, %v14049_v4  ;;  %v14088_v12 = vld [vmem:[#allocation2 + $0x140] sm:$0xff] }
 0x131   :  { %v1081_v62 = vmax.f32 %v1017_v2, 0.0  ;;  %v948_v24 = vmul.f32 %v13764_v40, %v787_v19  ;;  %11063 = vmatprep.mubr.msk.f32.mxu0 %vm1106_vm1, %v14056_v57 }
 0x132   :  { %v1080_v6 = vmax.f32 %v1016_v23, 0.0  ;;  %v947_v7 = vmul.f32 %v13764_v40, %v782_v42  ;;  %v10976_v31 = vpop.f32.mrb[42].mxu0  ;;  %v14213_v35 = vld [vmem:[#allocation2 + $0x1e8] sm:$0xff] }
 0x133   :  { %1255 = vst.msk [vmem:[#allocation2 + $0x218] sm:$0xff] %vm1106_vm1, %v1081_v62  ;;  %v1019_v30 = vadd.f32 %v13771_v45, %v948_v24  ;;  %v797_v38 = vadd.f32 %v10976_v31, %v13755_v27  ;;  %v791_v47 = vpop.f32.mrb[43].mxu0  ;;  %v14097_v24 = vld [vmem:[#allocation2 + $0x148] sm:$0xff]  ;;  %v14104_v31 = vld [vmem:[#allocation2 + $0x150] sm:$0xff]  ;;  %18996 = vst [vmem:[#allocation12_spill] sm:$0xff] %v14213_v35 }
 0x134   :  { %1254 = vst.msk [vmem:[#allocation2 + $0x210] sm:$0xff] %vm1106_vm1, %v1080_v6  ;;  %v1018_v53 = vadd.f32 %v13771_v45, %v947_v7  ;;  %v792_v20 = vadd.f32 %v13755_v27, %v791_v47  ;;  %11064 = vmatmul.mubr.msk.f32.gmra.mrb[100].mxu0 %vm1106_vm1, %v14065_v49 }
 0x135   :  { %v1083_v43 = vmax.f32 %v1019_v30, 0.0  ;;  %v950_v44 = vmul.f32 %v13764_v40, %v797_v38  ;;  %11066 = vmatprep.mubr.msk.f32.mxu0 %vm1106_vm1, %v14072_v33 }
 0x136   :  { %v1082_v50 = vmax.f32 %v1018_v53, 0.0  ;;  %v949_v51 = vmul.f32 %v13764_v40, %v792_v20  ;;  %v10979_v52 = vpop.f32.mrb[44].mxu0 }
 0x137   :  { %1257 = vst.msk [vmem:[#allocation2 + $0x230] sm:$0xff] %vm1106_vm1, %v1083_v43  ;;  %v1021_v56 = vadd.f32 %v13771_v45, %v950_v44  ;;  %v807_v58 = vadd.f32 %v10979_v52, %v13755_v27  ;;  %v801_v63 = vpop.f32.mrb[45].mxu0 }
 0x138   :  { %1256 = vst.msk [vmem:[#allocation2 + $0x228] sm:$0xff] %vm1106_vm1, %v1082_v50  ;;  %v1020_v5 = vadd.f32 %v13771_v45, %v949_v51  ;;  %v802_v9 = vadd.f32 %v13755_v27, %v801_v63  ;;  %11067 = vmatmul.mubr.msk.f32.gmra.mrb[102].mxu0 %vm1106_vm1, %v14081_v0  ;;  %v14113_v51 = vld [vmem:[#allocation2 + $0x158] sm:$0xff] }
 0x139   :  { %v1085_v16 = vmax.f32 %v1021_v56, 0.0  ;;  %v952_v18 = vmul.f32 %v13764_v40, %v807_v58  ;;  %11069 = vmatprep.mubr.msk.f32.mxu0 %vm1106_vm1, %v14088_v12  ;;  %v14120_v58 = vld [vmem:[#allocation2 + $0x160] sm:$0xff] }
 0x13a   :  { %v1084_v2 = vmax.f32 %v1020_v5, 0.0  ;;  %v951_v19 = vmul.f32 %v13764_v40, %v802_v9  ;;  %v10982_v22 = vpop.f32.mrb[46].mxu0 }
 0x13b   :  { %1259 = vst.msk [vmem:[#allocation2 + $0x248] sm:$0xff] %vm1106_vm1, %v1085_v16  ;;  %v1023_v23 = vadd.f32 %v13771_v45, %v952_v18  ;;  %v817_v42 = vadd.f32 %v10982_v22, %v13755_v27  ;;  %v811_v62 = vpop.f32.mrb[47].mxu0 }
 0x13c   :  { %1258 = vst.msk [vmem:[#allocation2 + $0x240] sm:$0xff] %vm1106_vm1, %v1084_v2  ;;  %v1022_v6 = vadd.f32 %v13771_v45, %v951_v19  ;;  %v812_v7 = vadd.f32 %v13755_v27, %v811_v62  ;;  %11070 = vmatmul.mubr.msk.f32.gmra.mrb[104].mxu0 %vm1106_vm1, %v14097_v24 }
 0x13d   :  { %v1087_v30 = vmax.f32 %v1023_v23, 0.0  ;;  %v954_v38 = vmul.f32 %v13764_v40, %v817_v42  ;;  %11072 = vmatprep.mubr.msk.f32.mxu0 %vm1106_vm1, %v14104_v31  ;;  %v14129_v23 = vld [vmem:[#allocation2 + $0x168] sm:$0xff] }
 0x13e   :  { %v1086_v47 = vmax.f32 %v1022_v6, 0.0  ;;  %v953_v53 = vmul.f32 %v13764_v40, %v812_v7  ;;  %v10985_v20 = vpop.f32.mrb[48].mxu0  ;;  %v14136_v6 = vld [vmem:[#allocation2 + $0x170] sm:$0xff] }
 0x13f   :  { %1261 = vst.msk [vmem:[#allocation2 + $0x260] sm:$0xff] %vm1106_vm1, %v1087_v30  ;;  %v1025_v43 = vadd.f32 %v13771_v45, %v954_v38  ;;  %v827_v44 = vadd.f32 %v10985_v20, %v13755_v27  ;;  %v821_v50 = vpop.f32.mrb[49].mxu0  ;;  %18987 = vst [vmem:[#allocation3_spill] sm:$0xff] %v14136_v6  ;;  %v14142_v20 = vld [vmem:[#allocation2 + $0x1b0] sm:$0xff] }
 0x140   :  { %1260 = vst.msk [vmem:[#allocation2 + $0x258] sm:$0xff] %vm1106_vm1, %v1086_v47  ;;  %v1024_v52 = vadd.f32 %v13771_v45, %v953_v53  ;;  %v822_v56 = vadd.f32 %v13755_v27, %v821_v50  ;;  %11073 = vmatmul.mubr.msk.f32.gmra.mrb[106].mxu0 %vm1106_vm1, %v14113_v51  ;;  %18988 = vst [vmem:[#allocation4_spill] sm:$0xff] %v14142_v20 }
 0x141   :  { %v1089_v63 = vmax.f32 %v1025_v43, 0.0  ;;  %v956_v5 = vmul.f32 %v13764_v40, %v827_v44  ;;  %11075 = vmatprep.mubr.msk.f32.mxu0 %vm1106_vm1, %v14120_v58 }
 0x142   :  { %v1088_v9 = vmax.f32 %v1024_v52, 0.0  ;;  %v955_v16 = vmul.f32 %v13764_v40, %v822_v56  ;;  %v10988_v18 = vpop.f32.mrb[50].mxu0  ;;  %v14147_v52 = vld [vmem:[#allocation2 + $0x178] sm:$0xff] }
 0x143   :  { %1263 = vst.msk [vmem:[#allocation2 + $0x278] sm:$0xff] %vm1106_vm1, %v1089_v63  ;;  %v1027_v2 = vadd.f32 %v13771_v45, %v956_v5  ;;  %v837_v19 = vadd.f32 %v10988_v18, %v13755_v27  ;;  %v831_v22 = vpop.f32.mrb[51].mxu0  ;;  %18989 = vst [vmem:[#allocation5_spill] sm:$0xff] %v14147_v52 }
 0x144   :  { %1262 = vst.msk [vmem:[#allocation2 + $0x270] sm:$0xff] %vm1106_vm1, %v1088_v9  ;;  %v1026_v42 = vadd.f32 %v13771_v45, %v955_v16  ;;  %v832_v62 = vadd.f32 %v13755_v27, %v831_v22  ;;  %11076 = vmatmul.mubr.msk.f32.gmra.mrb[108].mxu0 %vm1106_vm1, %v14129_v23  ;;  %v14157_v16 = vld [vmem:[#allocation2 + $0x1b8] sm:$0xff]  ;;  %v14160_v22 = vld [vmem:[#allocation2 + $0x1c0] sm:$0xff] }
 0x145   :  { %v1091_v7 = vmax.f32 %v1027_v2, 0.0  ;;  %v958_v30 = vmul.f32 %v13764_v40, %v837_v19  ;;  %11078 = vmatprep.mubr.msk.f32.mxu0 %vm1106_vm1, %v14136_v6  ;;  %18990 = vst [vmem:[#allocation6_spill] sm:$0xff] %v14157_v16  ;;  %18991 = vst [vmem:[#allocation7_spill] sm:$0xff] %v14160_v22 }
 0x146   :  { %v1090_v38 = vmax.f32 %v1026_v42, 0.0  ;;  %v957_v47 = vmul.f32 %v13764_v40, %v832_v62  ;;  %v10991_v53 = vpop.f32.mrb[52].mxu0 }
 0x147   :  { %1265 = vst.msk [vmem:[#allocation2 + $0x290] sm:$0xff] %vm1106_vm1, %v1091_v7  ;;  %v1029_v43 = vadd.f32 %v13771_v45, %v958_v30  ;;  %v847_v44 = vadd.f32 %v10991_v53, %v13755_v27  ;;  %v841_v50 = vpop.f32.mrb[53].mxu0 }
 0x148   :  { %1264 = vst.msk [vmem:[#allocation2 + $0x288] sm:$0xff] %vm1106_vm1, %v1090_v38  ;;  %v1028_v56 = vadd.f32 %v13771_v45, %v957_v47  ;;  %v842_v63 = vadd.f32 %v13755_v27, %v841_v50  ;;  %11079 = vmatmul.mubr.msk.f32.gmra.mrb[110].mxu0 %vm1106_vm1, %v14147_v52 }
 0x149   :  { %v1093_v5 = vmax.f32 %v1029_v43, 0.0  ;;  %v960_v9 = vmul.f32 %v13764_v40, %v847_v44  ;;  %11081 = vmatprep.mubr.msk.f32.mxu0 %vm1106_vm1, %v14142_v20 }
 0x14a   :  { %v1092_v18 = vmax.f32 %v1028_v56, 0.0  ;;  %v959_v2 = vmul.f32 %v13764_v40, %v842_v63  ;;  %v10994_v19 = vpop.f32.mrb[54].mxu0 }
 0x14b   :  { %1267 = vst.msk [vmem:[#allocation2 + $0x2a8] sm:$0xff] %vm1106_vm1, %v1093_v5  ;;  %v1031_v42 = vadd.f32 %v13771_v45, %v960_v9  ;;  %v857_v62 = vadd.f32 %v10994_v19, %v13755_v27  ;;  %v851_v7 = vpop.f32.mrb[55].mxu0  ;;  %v14177_v5 = vld [vmem:[#allocation2 + $0x1c8] sm:$0xff]  ;;  %v14184_v19 = vld [vmem:[#allocation2 + $0x1d0] sm:$0xff] }
 0x14c   :  { %1266 = vst.msk [vmem:[#allocation2 + $0x2a0] sm:$0xff] %vm1106_vm1, %v1092_v18  ;;  %v1030_v30 = vadd.f32 %v13771_v45, %v959_v2  ;;  %v852_v38 = vadd.f32 %v13755_v27, %v851_v7  ;;  %11082 = vmatmul.mubr.msk.f32.gmra.mrb[112].mxu0 %vm1106_vm1, %v14157_v16  ;;  %18992 = vst [vmem:[#allocation8_spill] sm:$0xff] %v14177_v5  ;;  %v14217_v16 = vld [vmem:[#allocation2 + $0x2e0] sm:$0xff] }
 0x14d   :  { %v1095_v47 = vmax.f32 %v1031_v42, 0.0  ;;  %v962_v53 = vmul.f32 %v13764_v40, %v857_v62  ;;  %11084 = vmatprep.mubr.msk.f32.mxu0 %vm1106_vm1, %v14160_v22  ;;  %18993 = vst [vmem:[#allocation9_spill] sm:$0xff] %v14184_v19 }
 0x14e   :  { %v1094_v43 = vmax.f32 %v1030_v30, 0.0  ;;  %v961_v44 = vmul.f32 %v13764_v40, %v852_v38  ;;  %v10997_v50 = vpop.f32.mrb[56].mxu0 }
 0x14f   :  { %1269 = vst.msk [vmem:[#allocation2 + $0x2c0] sm:$0xff] %vm1106_vm1, %v1095_v47  ;;  %v1033_v56 = vadd.f32 %v13771_v45, %v962_v53  ;;  %v867_v63 = vadd.f32 %v10997_v50, %v13755_v27  ;;  %v861_v9 = vpop.f32.mrb[57].mxu0  ;;  %v14190_v47 = vld [vmem:[#allocation2 + $0x2c8] sm:$0xff] }
 0x150   :  { %1268 = vst.msk [vmem:[#allocation2 + $0x2b8] sm:$0xff] %vm1106_vm1, %v1094_v43  ;;  %v1032_v18 = vadd.f32 %v13771_v45, %v961_v44  ;;  %11085 = vmatmul.mubr.msk.f32.gmra.mrb[114].mxu0 %vm1106_vm1, %v14177_v5  ;;  %v862_v2 = vadd.f32 %v13755_v27, %v861_v9  ;;  %v14194_v43 = vld [vmem:[#allocation2 + $0x1d8] sm:$0xff] }
 0x151   :  { %v1097_v42 = vmax.f32 %v1033_v56, 0.0  ;;  %v964_v62 = vmul.f32 %v13764_v40, %v867_v63  ;;  %11087 = vmatprep.mubr.msk.f32.mxu0 %vm1106_vm1, %v14184_v19  ;;  %18994 = vst [vmem:[#allocation10_spill] sm:$0xff] %v14194_v43  ;;  %v14201_v63 = vld [vmem:[#allocation2 + $0x1e0] sm:$0xff] }
 0x152   :  { %v1096_v7 = vmax.f32 %v1032_v18, 0.0  ;;  %v963_v30 = vmul.f32 %v13764_v40, %v862_v2  ;;  %v11000_v38 = vpop.f32.mrb[58].mxu0  ;;  %18995 = vst [vmem:[#allocation11_spill] sm:$0xff] %v14201_v63 }
 0x153   :  { %1271 = vst.msk [vmem:[#allocation2 + $0x2d8] sm:$0xff] %vm1106_vm1, %v1097_v42  ;;  %v1035_v53 = vadd.f32 %v13771_v45, %v964_v62  ;;  %v877_v44 = vadd.f32 %v11000_v38, %v13755_v27  ;;  %v871_v50 = vpop.f32.mrb[59].mxu0  ;;  %v18629_v42 = vrot.slane %v14190_v47, 7 }
 0x154   :  { %1270 = vst.msk [vmem:[#allocation2 + $0x2d0] sm:$0xff] %vm1106_vm1, %v1096_v7  ;;  %v1034_v56 = vadd.f32 %v13771_v45, %v963_v30  ;;  %11088 = vmatmul.mubr.msk.f32.gmra.mrb[116].mxu0 %vm1106_vm1, %v14194_v43  ;;  %v872_v9 = vadd.f32 %v13755_v27, %v871_v50 }
 0x155   :  { %v1099_v18 = vmax.f32 %v1035_v53, 0.0  ;;  %v966_v2 = vmul.f32 %v13764_v40, %v877_v44  ;;  %11090 = vmatprep.mubr.msk.f32.mxu0 %vm1106_vm1, %v14201_v63  ;;  %v14257_v63 = vld [vmem:[#allocation2 + $0x200] sm:$0xff] }
 0x156   :  { %v1098_v62 = vmax.f32 %v1034_v56, 0.0  ;;  %v965_v7 = vmul.f32 %v13764_v40, %v872_v9  ;;  %v14209_v38 = vld [vmem:[#allocation2 + $0x2c0] sm:$0xff]  ;;  %v11003_v30 = vpop.f32.mrb[60].mxu0  ;;  %v14223_v9 = vld [vmem:[#allocation2 + $0x1f0] sm:$0xff]  ;;  %19000 = vst [vmem:[#allocation16_spill] sm:$0xff] %v14257_v63 }
 0x157   :  { %1273 = vst.msk [vmem:[#allocation2 + $0x2f0] sm:$0xff] %vm1106_vm1, %v1099_v18  ;;  %v1037_v36 = vadd.f32 %v13771_v45, %v966_v2  ;;  %v18628_v53 = vrot.slane %v14209_v38, 7  ;;  %v887_v44 = vadd.f32 %v11003_v30, %v13755_v27  ;;  %v881_v50 = vpop.f32.mrb[61].mxu0  ;;  %18997 = vst [vmem:[#allocation13_spill] sm:$0xff] %v14223_v9 }
 0x158   :  { %1272 = vst.msk [vmem:[#allocation2 + $0x2e8] sm:$0xff] %vm1106_vm1, %v1098_v62  ;;  %v1036_v56 = vadd.f32 %v13771_v45, %v965_v7  ;;  %11091 = vmatmul.mubr.msk.f32.gmra.mrb[118].mxu0 %vm1106_vm1, %v14213_v35  ;;  %v882_v18 = vadd.f32 %v13755_v27, %v881_v50  ;;  %v14243_v35 = vld [vmem:[#allocation2 + $0x2f8] sm:$0xff] }
 0x159   :  { %v1101_v2 = vmax.f32 %v1037_v36, 0.0  ;;  %v14232_v30 = vsel %vm1507_vm3, %v18628_v53, %v18629_v42  ;;  %11093 = vmatprep.mubr.msk.f32.mxu0 %vm1106_vm1, %v14223_v9  ;;  %v968_v62 = vmul.f32 %v13764_v40, %v887_v44  ;;  %v1499_v36 = vrot.slane %v14217_v16, 7  ;;  %v14247_v42 = vld [vmem:[#allocation2 + $0x1f8] sm:$0xff] }
 0x15a   :  { %18998 = vst [vmem:[#allocation14_spill] sm:$0xff] %v14232_v30  ;;  %v1100_v7 = vmax.f32 %v1036_v56, 0.0  ;;  %11567 = vmatprep.mubr.msk.f32.mxu1 %vm1106_vm1, %v14232_v30  ;;  %v967_v50 = vmul.f32 %v13764_v40, %v882_v18  ;;  %v14241_v22 = vld [vmem:[#allocation2 + $0x2d8] sm:$0xff]  ;;  %v11006_v20 = vpop.f32.mrb[62].mxu0  ;;  %18999 = vst [vmem:[#allocation15_spill] sm:$0xff] %v14247_v42 }
 0x15b   :  { %1275 = vst.msk [vmem:[#allocation2 + $0x308] sm:$0xff] %vm1106_vm1, %v1101_v2  ;;  %v1039_v53 = vadd.f32 %v13771_v45, %v968_v62  ;;  %v14249_v44 = vld [vmem:[#allocation2 + $0x2d0] sm:$0xff]  ;;  %v1463_v56 = vrot.slane %v14241_v22, 7  ;;  %v897_v30 = vadd.f32 %v11006_v20, %v13755_v27  ;;  %v891_v18 = vpop.f32.mrb[63].mxu0  ;;  %v12678_v62 = vld [vmem:[%s18612_s4] ss:$0 sm:$0xff] }
 0x15c   :  { %1274 = vst.msk [vmem:[#allocation2 + $0x300] sm:$0xff] %vm1106_vm1, %v1100_v7  ;;  %11094 = vmatmul.mubr.msk.f32.gmra.mrb[120].mxu0 %vm1106_vm1, %v14247_v42  ;;  %v1038_v9 = vadd.f32 %v13771_v45, %v967_v50  ;;  %v1427_v2 = vrot.slane %v14249_v44, 7  ;;  %v892_v43 = vadd.f32 %v12678_v62, %v891_v18  ;;  %v1500_v20 = vrot.slane %v14243_v35, 7  ;;  %v14271_v50 = vld [vmem:[#allocation2 + $0x208] sm:$0xff] }
 0x15d   :  { %v1103_v19 = vmax.f32 %v1039_v53, 0.0  ;;  %11096 = vmatprep.mubr.msk.f32.mxu0 %vm1106_vm1, %v14257_v63  ;;  %v970_v27 = vmul.f32 %v13764_v40, %v897_v30  ;;  %19002 = vst [vmem:[#allocation18_spill] sm:$0xff] %v14271_v50  ;;  %v12679_v53 = vld [vmem:[%s18613_s5] ss:$0 sm:$0xff] }
 0x15e   :  { %v1102_v7 = vmax.f32 %v1038_v9, 0.0  ;;  %v14269_v45 = vsel %vm1507_vm3, %v1499_v36, %v1427_v2  ;;  %v14275_v42 = vsel %vm1507_vm3, %v1427_v2, %v1463_v56  ;;  %v969_v18 = vmul.f32 %v12679_v53, %v892_v43  ;;  %v12680_v40 = vld [vmem:[%s18614_s6] ss:$0 sm:$0xff]  ;;  %v14288_v62 = vld [vmem:[#allocation2 + $0x2f0] sm:$0xff] }
 0x15f   :  { %19001 = vst [vmem:[#allocation17_spill] sm:$0xff] %v14269_v45  ;;  %19003 = vst [vmem:[#allocation19_spill] sm:$0xff] %v14275_v42  ;;  %11568 = vmatmul.mubr.msk.f32.vlgmr.msra.gmra.mrb[0].mxu1 %vm1106_vm1, %v14269_v45  ;;  %v1041_v9 = vadd.f32 %v12680_v40, %v970_v27  ;;  %v14286_v30 = vld [vmem:[#allocation2 + $0x2e8] sm:$0xff]  ;;  %v14293_v2 = vld [vmem:[%s18611_s7 + $0x14] sm:$0xf] }
 0x160   :  { %1277 = vst.msk [vmem:[#allocation2 + $0x320] sm:$0xff] %vm1106_vm1, %v1103_v19  ;;  %1276 = vst.msk [vmem:[#allocation2 + $0x318] sm:$0xff] %vm1106_vm1, %v1102_v7  ;;  %v12681_v19 = vld [vmem:[%s18611_s7 + $0x10] sm:$0xf]  ;;  %11097 = vmatmul.mubr.msk.f32.gmra.mrb[122].mxu0 %vm1106_vm1, %v14271_v50  ;;  %v1040_v27 = vadd.f32 %v12680_v40, %v969_v18  ;;  %v1428_v53 = vrot.slane %v14286_v30, 7  ;;  %11570 = vmatprep.mubr.msk.f32.mxu1 %vm1106_vm1, %v14275_v42  ;;  %v1464_v18 = vrot.slane %v14288_v62, 7 }
 0x161   :  { %11592 = vmatpush3.msk.msra.mxu1 %vm2121_vm2, %v12681_v19  ;;  %v14302_v43 = vld [vmem:[#allocation2 + $0x210] sm:$0xff]  ;;  %v1105_v45 = vmax.f32 %v1041_v9, 0.0  ;;  %v14313_v19 = vsel %vm1507_vm3, %v1463_v56, %v1499_v36  ;;  %v14325_v40 = vld [vmem:[#allocation2 + $0x218] sm:$0xff]  ;;  %v14334_v36 = vld [vmem:[#allocation2 + $0x220] sm:$0xff] }
 0x162   :  { %19004 = vst [vmem:[#allocation20_spill] sm:$0xff] %v14302_v43  ;;  %11099 = vmatprep.mubr.msk.f32.mxu0 %vm1106_vm1, %v14302_v43  ;;  %v14309_v7 = vld [vmem:[#allocation2 + $0x310] sm:$0xff]  ;;  %v1104_v63 = vmax.f32 %v1040_v27, 0.0  ;;  %19005 = vst [vmem:[#allocation21_spill] sm:$0xff] %v14313_v19  ;;  %v14317_v50 = vsel %vm1507_vm3, %v1500_v20, %v1428_v53  ;;  %11737 = vmatprep.subr.msk.mxu1 %vm2121_vm2, %v14293_v2  ;;  %v14338_v27 = vld [vmem:[#allocation2 + $0x308] sm:$0xff]  ;;  %v14354_v42 = vsel %vm1507_vm3, %v1464_v18, %v1500_v20 }
 0x163   :  { %19006 = vst [vmem:[#allocation22_spill] sm:$0xff] %v14317_v50  ;;  %1279 = vst.msk [vmem:[#allocation2 + $0x338] sm:$0xff] %vm1106_vm1, %v1105_v45  ;;  %11571 = vmatmul.mubr.msk.f32.gmra.mrb[2].mxu1 %vm1106_vm1, %v14313_v19  ;;  %v14327_v9 = vld [vmem:[#allocation2 + $0x300] sm:$0xff]  ;;  %v1501_v45 = vrot.slane %v14309_v7, 7  ;;  %v14346_v19 = vld [vmem:[#allocation2 + $0x328] sm:$0xff] }
 0x164   :  { %19007 = vst [vmem:[#allocation23_spill] sm:$0xff] %v14325_v40  ;;  %1278 = vst.msk [vmem:[#allocation2 + $0x330] sm:$0xff] %vm1106_vm1, %v1104_v63  ;;  %11100 = vmatmul.mubr.msk.f32.gmra.mrb[124].mxu0 %vm1106_vm1, %v14325_v40  ;;  %11573 = vmatprep.mubr.msk.f32.mxu1 %vm1106_vm1, %v14317_v50  ;;  %v1429_v56 = vrot.slane %v14327_v9, 7  ;;  %v14344_v63 = vsel %vm1507_vm3, %v1428_v53, %v1464_v18  ;;  %v14350_v50 = vld [vmem:[#allocation2 + $0x228] sm:$0xff]  ;;  %v1465_v40 = vrot.slane %v14338_v27, 7  ;;  %v14363_v53 = vld [vmem:[#allocation2 + $0x230] sm:$0xff] }
 0x165   :  { %19008 = vst [vmem:[#allocation24_spill] sm:$0xff] %v14334_v36  ;;  %11102 = vmatprep.mubr.msk.f32.mxu0 %vm1106_vm1, %v14334_v36  ;;  %19009 = vst [vmem:[#allocation25_spill] sm:$0xff] %v14344_v63  ;;  %v1502_v18 = vrot.slane %v14346_v19, 7 }
 0x166   :  { %19010 = vst [vmem:[#allocation26_spill] sm:$0xff] %v14350_v50  ;;  %19011 = vst [vmem:[#allocation27_spill] sm:$0xff] %v14354_v42  ;;  %v14401_v52 = vsel %vm1507_vm3, %v1465_v40, %v1501_v45 }
 0x167   :  { %11574 = vmatmul.mubr.msk.f32.gmra.mrb[4].mxu1 %vm1106_vm1, %v14344_v63  ;;  %v14357_v43 = vld [vmem:[#allocation2 + $0x318] sm:$0xff]  ;;  %19012 = vst [vmem:[#allocation28_spill] sm:$0xff] %v14363_v53  ;;  %v14367_v63 = vsel %vm1507_vm3, %v1501_v45, %v1429_v56  ;;  %v14381_v36 = vld [vmem:[#allocation2 + $0x320] sm:$0xff]  ;;  %19020 = vst [vmem:[#allocation36_spill] sm:$0xff] %v14401_v52 }
 0x168   :  { %11103 = vmatmul.mubr.msk.f32.gmra.mrb[126].mxu0 %vm1106_vm1, %v14350_v50  ;;  %11576 = vmatprep.mubr.msk.f32.mxu1 %vm1106_vm1, %v14354_v42  ;;  %19013 = vst [vmem:[#allocation29_spill] sm:$0xff] %v14367_v63  ;;  %v1430_v20 = vrot.slane %v14357_v43, 7  ;;  %v14375_v50 = vld [vmem:[#allocation2 + $0x238] sm:$0xff]  ;;  %v14379_v42 = vsel %vm1507_vm3, %v1429_v56, %v1465_v40  ;;  %v14397_v56 = vld [vmem:[#allocation2 + $0x340] sm:$0xff] }
 0x169   :  { %11105 = vmatprep.mubr.msk.f32.mxu0 %vm1106_vm1, %v14363_v53  ;;  %19014 = vst [vmem:[#allocation30_spill] sm:$0xff] %v14375_v50  ;;  %19015 = vst [vmem:[#allocation31_spill] sm:$0xff] %v14379_v42  ;;  %v14387_v53 = vld [vmem:[#allocation2 + $0x240] sm:$0xff]  ;;  %v1503_v40 = vrot.slane %v14397_v56, 7 }
 0x16a   :  { %19016 = vst [vmem:[#allocation32_spill] sm:$0xff] %v14387_v53  ;;  %19019 = vst [vmem:[#allocation35_spill] sm:$0xff] %v14397_v56  ;;  %v14416_v45 = vld [vmem:[#allocation2 + $0x338] sm:$0xff] }
 0x16b   :  { %11577 = vmatmul.mubr.msk.f32.gmra.mrb[6].mxu1 %vm1106_vm1, %v14367_v63  ;;  %v14393_v63 = vsel %vm1507_vm3, %v1502_v18, %v1430_v20  ;;  %v14395_v5 = vld [vmem:[#allocation2 + $0x330] sm:$0xff]  ;;  %19022 = vst [vmem:[#allocation38_spill] sm:$0xff] %v14416_v45  ;;  %v1467_v56 = vrot.slane %v14416_v45, 7  ;;  %v14493_v45 = vld [vmem:[#allocation2 + $0x28] sm:$0xff] }
 0x16c   :  { %11106 = vmatmul.mubr.msk.f32.gmra.mrb[128].mxu0 %vm1106_vm1, %v14375_v50  ;;  %11579 = vmatprep.mubr.msk.f32.mxu1 %vm1106_vm1, %v14379_v42  ;;  %19017 = vst [vmem:[#allocation33_spill] sm:$0xff] %v14393_v63  ;;  %19018 = vst [vmem:[#allocation34_spill] sm:$0xff] %v14395_v5  ;;  %v1466_v50 = vrot.slane %v14381_v36, 7  ;;  %v14406_v42 = vld [vmem:[#allocation2 + $0x248] sm:$0xff]  ;;  %v1431_v6 = vrot.slane %v14395_v5, 7  ;;  %v14437_v5 = vld [vmem:[#allocation2 + $0x260] sm:$0xff] }
 0x16d   :  { %11108 = vmatprep.mubr.msk.f32.mxu0 %vm1106_vm1, %v14387_v53  ;;  %19021 = vst [vmem:[#allocation37_spill] sm:$0xff] %v14406_v42  ;;  %v14412_v53 = vld [vmem:[#allocation2 + $0x250] sm:$0xff]  ;;  %19026 = vst [vmem:[#allocation42_spill] sm:$0xff] %v14437_v5 }
 0x16f   :  { %11580 = vmatmul.mubr.msk.f32.gmra.mrb[8].mxu1 %vm1106_vm1, %v14401_v52  ;;  %v14422_v52 = vsel %vm1507_vm3, %v1430_v20, %v1466_v50  ;;  %v14441_v20 = vsel %vm1507_vm3, %v1503_v40, %v1431_v6 }
 0x170   :  { %11109 = vmatmul.mubr.msk.f32.gmra.mrb[130].mxu0 %vm1106_vm1, %v14406_v42  ;;  %11582 = vmatprep.mubr.msk.f32.mxu1 %vm1106_vm1, %v14393_v63  ;;  %19023 = vst [vmem:[#allocation39_spill] sm:$0xff] %v14422_v52  ;;  %v14426_v42 = vld [vmem:[#allocation2 + $0x258] sm:$0xff]  ;;  %v14430_v63 = vsel %vm1507_vm3, %v1466_v50, %v1502_v18  ;;  %19027 = vst [vmem:[#allocation43_spill] sm:$0xff] %v14441_v20  ;;  %v14447_v50 = vld [vmem:[#allocation2 + $0x268] sm:$0xff]  ;;  %v14451_v18 = vsel %vm1507_vm3, %v1431_v6, %v1467_v56 }
 0x171   :  { %11111 = vmatprep.mubr.msk.f32.mxu0 %vm1106_vm1, %v14412_v53  ;;  %19024 = vst [vmem:[#allocation40_spill] sm:$0xff] %v14426_v42  ;;  %19025 = vst [vmem:[#allocation41_spill] sm:$0xff] %v14430_v63  ;;  %v14467_v6 = vld [vmem:[#allocation2 + $0x278] sm:$0xff] }
 0x172   :  { %19028 = vst [vmem:[#allocation44_spill] sm:$0xff] %v14447_v50  ;;  %19029 = vst [vmem:[#allocation45_spill] sm:$0xff] %v14451_v18 }
 0x173   :  { %11583 = vmatmul.mubr.msk.f32.gmra.mrb[10].mxu1 %vm1106_vm1, %v14422_v52  ;;  %19032 = vst [vmem:[#allocation48_spill] sm:$0xff] %v14467_v6  ;;  %v14471_v52 = vld [vmem:[#allocation2 + $0x18] sm:$0xff] }
 0x174   :  { %11112 = vmatmul.mubr.msk.f32.gmra.mrb[132].mxu0 %vm1106_vm1, %v14426_v42  ;;  %11585 = vmatprep.mubr.msk.f32.mxu1 %vm1106_vm1, %v14430_v63  ;;  %v14457_v63 = vld [vmem:[#allocation2 + $0x270] sm:$0xff]  ;;  %v14543_v42 = vld [vmem:[#allocation2 + $0x60] sm:$0xff] }
 0x175   :  { %11114 = vmatprep.mubr.msk.f32.mxu0 %vm1106_vm1, %v14437_v5  ;;  %19030 = vst [vmem:[#allocation46_spill] sm:$0xff] %v14457_v63  ;;  %v14533_v5 = vld [vmem:[#allocation2 + $0x2b8] sm:$0xff] }
 0x177   :  { %11586 = vmatmul.mubr.msk.f32.gmra.mrb[12].mxu1 %vm1106_vm1, %v14441_v20  ;;  %v14463_v20 = vsel %vm1507_vm3, %v1467_v56, %v1503_v40  ;;  %v14479_v56 = vld [vmem:[#allocation2 + $0x20] sm:$0xff]  ;;  %v14483_v40 = vld [vmem:[#allocation2 + $0x288] sm:$0xff] }
 0x178   :  { %11115 = vmatmul.mubr.msk.f32.gmra.mrb[134].mxu0 %vm1106_vm1, %v14447_v50  ;;  %11588 = vmatprep.mubr.msk.f32.mxu1 %vm1106_vm1, %v14451_v18  ;;  %19031 = vst [vmem:[#allocation47_spill] sm:$0xff] %v14463_v20  ;;  %v14475_v18 = vld [vmem:[#allocation2 + $0x280] sm:$0xff]  ;;  %19034 = vst [vmem:[#allocation50_spill] sm:$0xff] %v14483_v40  ;;  %v14525_v50 = vld [vmem:[#allocation2 + $0x2b0] sm:$0xff] }
 0x179   :  { %11117 = vmatprep.mubr.msk.f32.mxu0 %vm1106_vm1, %v14457_v63  ;;  %19033 = vst [vmem:[#allocation49_spill] sm:$0xff] %v14475_v18  ;;  %v14517_v63 = vld [vmem:[#allocation2 + $0x2a8] sm:$0xff] }
 0x17a   :  { %19038 = vst [vmem:[#allocation54_spill] sm:$0xff] %v14517_v63 }
 0x17b   :  { %11589 = vmatmul.mubr.msk.f32.gmra.mrb[14].mxu1 %vm1106_vm1, %v14463_v20  ;;  %v14489_v20 = vld [vmem:[#allocation2 + $0x290] sm:$0xff] }
 0x17c   :  { %11118 = vmatmul.mubr.msk.f32.gmra.mrb[136].mxu0 %vm1106_vm1, %v14467_v6  ;;  %11593 = vmatprep.mubr.msk.f32.mxu1 %vm1106_vm1, %v14471_v52  ;;  %19035 = vst [vmem:[#allocation51_spill] sm:$0xff] %v14489_v20  ;;  %v14501_v6 = vld [vmem:[#allocation2 + $0x298] sm:$0xff] }
 0x17d   :  { %11120 = vmatprep.mubr.msk.f32.mxu0 %vm1106_vm1, %v14475_v18  ;;  %v14497_v18 = vld [vmem:[#allocation2 + $0x30] sm:$0xff]  ;;  %19036 = vst [vmem:[#allocation52_spill] sm:$0xff] %v14501_v6 }
 0x17f   :  { %11594 = vmatmul.mubr.msk.f32.vlgmr.msra.gmra.mrb[16].mxu1 %vm1106_vm1, %v14479_v56 }
 0x180   :  { %11738 = vmatpush3.msk.msra.mxu1 %vm2121_vm2, %v14293_v2  ;;  %11121 = vmatmul.mubr.msk.f32.gmra.mrb[138].mxu0 %vm1106_vm1, %v14483_v40  ;;  %v14505_v2 = vld [vmem:[#allocation2 + $0x38] sm:$0xff]  ;;  %v14513_v40 = vld [vmem:[#allocation2 + $0x40] sm:$0xff] }
 0x181   :  { %11123 = vmatprep.mubr.msk.f32.mxu0 %vm1106_vm1, %v14489_v20  ;;  %11596 = vmatprep.mubr.msk.f32.mxu1 %vm1106_vm1, %v14493_v45  ;;  %v14509_v20 = vld [vmem:[#allocation2 + $0x2a0] sm:$0xff] }
 0x182   :  { %19037 = vst [vmem:[#allocation53_spill] sm:$0xff] %v14509_v20 }
 0x183   :  { %11597 = vmatmul.mubr.msk.f32.gmra.mrb[18].mxu1 %vm1106_vm1, %v14497_v18 }
 0x184   :  { %11124 = vmatmul.mubr.msk.f32.gmra.mrb[140].mxu0 %vm1106_vm1, %v14501_v6  ;;  %11599 = vmatprep.mubr.msk.f32.mxu1 %vm1106_vm1, %v14505_v2  ;;  %v14521_v6 = vld [vmem:[#allocation2 + $0x48] sm:$0xff] }
 0x185   :  { %11126 = vmatprep.mubr.msk.f32.mxu0 %vm1106_vm1, %v14509_v20  ;;  %v14529_v20 = vld [vmem:[#allocation2 + $0x50] sm:$0xff] }
 0x187   :  { %11600 = vmatmul.mubr.msk.f32.gmra.mrb[20].mxu1 %vm1106_vm1, %v14513_v40 }
 0x188   :  { %11127 = vmatmul.mubr.msk.f32.gmra.mrb[142].mxu0 %vm1106_vm1, %v14517_v63  ;;  %11602 = vmatprep.mubr.msk.f32.mxu1 %vm1106_vm1, %v14521_v6  ;;  %v14537_v63 = vld [vmem:[#allocation2 + $0x58] sm:$0xff] }
 0x189   :  { %11129 = vmatprep.mubr.msk.f32.mxu0 %vm1106_vm1, %v14525_v50 }
 0x18b   :  { %11603 = vmatmul.mubr.msk.f32.gmra.mrb[22].mxu1 %vm1106_vm1, %v14529_v20 }
 0x18c   :  { %11130 = vmatmul.mubr.msk.f32.gmra.mrb[144].mxu0 %vm1106_vm1, %v14533_v5  ;;  %11605 = vmatprep.mubr.msk.f32.mxu1 %vm1106_vm1, %v14537_v63 }
 0x18d   :  { %11132 = vmatprep.mubr.msk.f32.mxu0 %vm1106_vm1, %v14209_v38 }
 0x18f   :  { %11606 = vmatmul.mubr.msk.f32.gmra.mrb[24].mxu1 %vm1106_vm1, %v14543_v42 }
 0x190   :  { %11133 = vmatmul.mubr.msk.f32.gmra.mrb[146].mxu0 %vm1106_vm1, %v14190_v47  ;;  %11608 = vmatprep.mubr.msk.f32.mxu1 %vm1106_vm1, %v13855_v8  ;;  %v14591_v8 = vld [vmem:[#allocation2 + $0x8] sm:$0xff] }
 0x191   :  { %11135 = vmatprep.mubr.msk.f32.mxu0 %vm1106_vm1, %v14249_v44  ;;  %19039 = vst [vmem:[#allocation55_spill] sm:$0xff] %v14591_v8 }
 0x193   :  { %11609 = vmatmul.mubr.msk.f32.gmra.mrb[26].mxu1 %vm1106_vm1, %v13862_v14  ;;  %v1433_v14 = vrot.slane %v14591_v8, 7  ;;  %v14832_v8 = vld [vmem:[#allocation2 + $0xc0] sm:$0xff] }
 0x194   :  { %11136 = vmatmul.mubr.msk.f32.gmra.mrb[148].mxu0 %vm1106_vm1, %v14241_v22  ;;  %11611 = vmatprep.mubr.msk.f32.mxu1 %vm1106_vm1, %v13871_v15  ;;  %v19040_v15 = vrot.slane %v13742_v32, 7 }
 0x195   :  { %11138 = vmatprep.mubr.msk.f32.mxu0 %vm1106_vm1, %v14217_v16 }
 0x197   :  { %11612 = vmatmul.mubr.msk.f32.gmra.mrb[28].mxu1 %vm1106_vm1, %v13878_v25  ;;  %v1544_v25 = vsel %vm1507_vm3, %v19040_v15, %v1433_v14  ;;  %v1401_v15 = vrot.slane %v14543_v42, 7 }
 0x198   :  { %11139 = vmatmul.mubr.msk.f32.gmra.mrb[150].mxu0 %vm1106_vm1, %v14286_v30  ;;  %11614 = vmatprep.mubr.msk.f32.mxu1 %vm1106_vm1, %v13887_v55  ;;  %v19041_v55 = vrot.slane %v13747_v26, 7 }
 0x199   :  { %11141 = vmatprep.mubr.msk.f32.mxu0 %vm1106_vm1, %v14288_v62 }
 0x19b   :  { %11615 = vmatmul.mubr.msk.f32.gmra.mrb[30].mxu1 %vm1106_vm1, %v13894_v59  ;;  %v1508_v59 = vsel %vm1507_vm3, %v1433_v14, %v19041_v55 }
 0x19c   :  { %11142 = vmatmul.mubr.msk.f32.gmra.mrb[152].mxu0 %vm1106_vm1, %v14243_v35  ;;  %11617 = vmatprep.mubr.msk.f32.mxu1 %vm1106_vm1, %v13903_v11  ;;  %v1398_v11 = vrot.slane %v14471_v52, 7 }
 0x19d   :  { %11144 = vmatprep.mubr.msk.f32.mxu0 %vm1106_vm1, %v14327_v9 }
 0x19f   :  { %11618 = vmatmul.mubr.msk.f32.gmra.mrb[32].mxu1 %vm1106_vm1, %v13910_v17  ;;  %v1470_v17 = vrot.slane %v14493_v45, 7 }
 0x1a0   :  { %11145 = vmatmul.mubr.msk.f32.gmra.mrb[154].mxu0 %vm1106_vm1, %v14338_v27  ;;  %11620 = vmatprep.mubr.msk.f32.mxu1 %vm1106_vm1, %v13919_v34  ;;  %v1434_v34 = vrot.slane %v14479_v56, 7 }
 0x1a1   :  { %11147 = vmatprep.mubr.msk.f32.mxu0 %vm1106_vm1, %v14309_v7  ;;  %v14625_v32 = vsel %vm1507_vm3, %v1470_v17, %v1398_v11 }
 0x1a2   :  { %19042 = vst [vmem:[#allocation56_spill] sm:$0xff] %v14625_v32  ;;  %v14631_v26 = vsel %vm1507_vm3, %v1398_v11, %v1434_v34 }
 0x1a3   :  { %11621 = vmatmul.mubr.msk.f32.gmra.mrb[34].mxu1 %vm1106_vm1, %v13926_v41  ;;  %19043 = vst [vmem:[#allocation57_spill] sm:$0xff] %v14631_v26  ;;  %v1399_v41 = vrot.slane %v14497_v18, 7 }
 0x1a4   :  { %11148 = vmatmul.mubr.msk.f32.gmra.mrb[156].mxu0 %vm1106_vm1, %v14357_v43  ;;  %11623 = vmatprep.mubr.msk.f32.mxu1 %vm1106_vm1, %v13935_v13  ;;  %v1471_v13 = vrot.slane %v14513_v40, 7 }
 0x1a5   :  { %11150 = vmatprep.mubr.msk.f32.mxu0 %vm1106_vm1, %v14381_v36 }
 0x1a7   :  { %11624 = vmatmul.mubr.msk.f32.gmra.mrb[36].mxu1 %vm1106_vm1, %v13942_v39  ;;  %v14643_v39 = vsel %vm1507_vm3, %v1434_v34, %v1470_v17  ;;  %v14706_v17 = vld [vmem:[#allocation2 + $0x68] sm:$0xff] }
 0x1a8   :  { %11151 = vmatmul.mubr.msk.f32.gmra.mrb[158].mxu0 %vm1106_vm1, %v14346_v19  ;;  %11626 = vmatprep.mubr.msk.f32.mxu1 %vm1106_vm1, %v13951_v37  ;;  %19044 = vst [vmem:[#allocation58_spill] sm:$0xff] %v14643_v39  ;;  %v1435_v37 = vrot.slane %v14505_v2, 7  ;;  %v1437_v34 = vrot.slane %v14706_v17, 7 }
 0x1a9   :  { %11155 = vmatprep.mubr.msk.f32.mxu0 %vm1106_vm1, %v14022_v21 }
 0x1ab   :  { %11627 = vmatmul.mubr.msk.f32.gmra.mrb[38].mxu1 %vm1106_vm1, %v13958_v46  ;;  %v14652_v46 = vsel %vm1507_vm3, %v1471_v13, %v1399_v41 }
 0x1ac   :  { %11156 = vmatmul.mubr.msk.f32.vlgmr.msra.gmra.mrb[64].mxu0 %vm1106_vm1, %v1544_v25  ;;  %11629 = vmatprep.mubr.msk.f32.mxu1 %vm1106_vm1, %v13967_v1  ;;  %19045 = vst [vmem:[#allocation59_spill] sm:$0xff] %v14652_v46  ;;  %v14660_v1 = vsel %vm1507_vm3, %v1399_v41, %v1435_v37  ;;  %v14690_v25 = vld [vmem:[#allocation2 + $0x70] sm:$0xff] }
 0x1ad   :  { %11158 = vmatprep.mubr.msk.f32.mxu0 %vm1106_vm1, %v1508_v59  ;;  %19046 = vst [vmem:[#allocation60_spill] sm:$0xff] %v14660_v1  ;;  %19050 = vst [vmem:[#allocation64_spill] sm:$0xff] %v14690_v25  ;;  %v1473_v55 = vrot.slane %v14690_v25, 7  ;;  %v14698_v59 = vld [vmem:[%s18611_s7 + $0x18] sm:$0xf] }
 0x1ae   :  { %11883 = vmatprep.subr.msk.mxu1 %vm2121_vm2, %v14698_v59 }
 0x1af   :  { %11630 = vmatmul.mubr.msk.f32.gmra.mrb[40].mxu1 %vm1106_vm1, %v13974_v10  ;;  %v1400_v10 = vrot.slane %v14521_v6, 7  ;;  %v14717_v41 = vsel %vm1507_vm3, %v1473_v55, %v1401_v15 }
 0x1b0   :  { %11159 = vmatmul.mubr.msk.f32.gmra.mrb[160].mxu0 %vm1106_vm1, %v14625_v32  ;;  %11632 = vmatprep.mubr.msk.f32.mxu1 %vm1106_vm1, %v13983_v28  ;;  %v1472_v28 = vrot.slane %v14537_v63, 7  ;;  %19052 = vst [vmem:[#allocation66_spill] sm:$0xff] %v14717_v41  ;;  %v14741_v32 = vsel %vm1507_vm3, %v1437_v34, %v1473_v55 }
 0x1b1   :  { %11161 = vmatprep.mubr.msk.f32.mxu0 %vm1106_vm1, %v14631_v26  ;;  %19057 = vst [vmem:[#allocation71_spill] sm:$0xff] %v14741_v32 }
 0x1b2   :  { %v14679_v21 = vsel %vm1507_vm3, %v1472_v28, %v1400_v10 }
 0x1b3   :  { %11633 = vmatmul.mubr.msk.f32.gmra.mrb[42].mxu1 %vm1106_vm1, %v13994_v61  ;;  %v14670_v61 = vsel %vm1507_vm3, %v1435_v37, %v1471_v13  ;;  %19048 = vst [vmem:[#allocation62_spill] sm:$0xff] %v14679_v21  ;;  %v14727_v37 = vsel %vm1507_vm3, %v1401_v15, %v1437_v34  ;;  %v14743_v15 = vld [vmem:[#allocation2 + $0x80] sm:$0xff]  ;;  %v14762_v34 = vld [vmem:[#allocation2 + $0x90] sm:$0xff] }
 0x1b4   :  { %11162 = vmatmul.mubr.msk.f32.gmra.mrb[162].mxu0 %vm1106_vm1, %v14643_v39  ;;  %11635 = vmatprep.mubr.msk.f32.mxu1 %vm1106_vm1, %v14003_v48  ;;  %19047 = vst [vmem:[#allocation61_spill] sm:$0xff] %v14670_v61  ;;  %v1436_v48 = vrot.slane %v14529_v20, 7  ;;  %19054 = vst [vmem:[#allocation68_spill] sm:$0xff] %v14727_v37 }
 0x1b5   :  { %11164 = vmatprep.mubr.msk.f32.mxu0 %vm1106_vm1, %v14652_v46  ;;  %19058 = vst [vmem:[#allocation72_spill] sm:$0xff] %v14743_v15  ;;  %19061 = vst [vmem:[#allocation75_spill] sm:$0xff] %v14762_v34 }
 0x1b6   :  { %v14685_v14 = vsel %vm1507_vm3, %v1400_v10, %v1436_v48  ;;  %v14704_v11 = vsel %vm1507_vm3, %v1436_v48, %v1472_v28  ;;  %v14729_v10 = vld [vmem:[#allocation2 + $0x78] sm:$0xff]  ;;  %v14732_v48 = vld [vmem:[#allocation2 + $0x88] sm:$0xff] }
 0x1b7   :  { %11636 = vmatmul.mubr.msk.f32.gmra.mrb[44].mxu1 %vm1106_vm1, %v14011_v54  ;;  %19049 = vst [vmem:[#allocation63_spill] sm:$0xff] %v14685_v14  ;;  %19051 = vst [vmem:[#allocation65_spill] sm:$0xff] %v14704_v11  ;;  %v1402_v28 = vrot.slane %v14729_v10, 7  ;;  %v1474_v39 = vrot.slane %v14732_v48, 7 }
 0x1b8   :  { %11165 = vmatmul.mubr.msk.f32.gmra.mrb[70].mxu0 %vm1106_vm1, %v14660_v1  ;;  %11638 = vmatprep.mubr.msk.f32.mxu1 %vm1106_vm1, %v14033_v60  ;;  %19055 = vst [vmem:[#allocation69_spill] sm:$0xff] %v14729_v10  ;;  %19056 = vst [vmem:[#allocation70_spill] sm:$0xff] %v14732_v48  ;;  %v14802_v1 = vld [vmem:[#allocation2 + $0xb8] sm:$0xff]  ;;  %v19107_v48 = vld [vmem:[#allocation15_spill] sm:$0xff] }
 0x1b9   :  { %11167 = vmatprep.mubr.msk.f32.mxu0 %vm1106_vm1, %v14670_v61  ;;  %19070 = vst [vmem:[#allocation84_spill] sm:$0xff] %v14802_v1  ;;  %v1476_v46 = vrot.slane %v14802_v1, 7  ;;  %v14835_v1 = vld [vmem:[#allocation2 + $0xd0] sm:$0xff] }
 0x1ba   :  { %19078 = vst [vmem:[#allocation88_spill] sm:$0xff] %v14835_v1 }
 0x1bb   :  { %11639 = vmatmul.mubr.msk.f32.gmra.mrb[46].mxu1 %vm1106_vm1, %v14040_v3 }
 0x1bc   :  { %11168 = vmatmul.mubr.msk.f32.gmra.mrb[164].mxu0 %vm1106_vm1, %v14679_v21  ;;  %11641 = vmatprep.mubr.msk.f32.mxu1 %vm1106_vm1, %v14049_v4 }
 0x1bd   :  { %11170 = vmatprep.mubr.msk.f32.mxu0 %vm1106_vm1, %v14685_v14 }
 0x1bf   :  { %11642 = vmatmul.mubr.msk.f32.gmra.mrb[48].mxu1 %vm1106_vm1, %v14056_v57 }
 0x1c0   :  { %11171 = vmatmul.mubr.msk.f32.gmra.mrb[166].mxu0 %vm1106_vm1, %v14704_v11  ;;  %11644 = vmatprep.mubr.msk.f32.mxu1 %vm1106_vm1, %v14065_v49  ;;  %v14765_v11 = vld [vmem:[#allocation2 + $0xa0] sm:$0xff] }
 0x1c1   :  { %11173 = vmatprep.mubr.msk.f32.mxu0 %vm1106_vm1, %v14717_v41  ;;  %v1438_v41 = vrot.slane %v14743_v15, 7  ;;  %19062 = vst [vmem:[#allocation76_spill] sm:$0xff] %v14765_v11  ;;  %v1475_v14 = vrot.slane %v14765_v11, 7  ;;  %v1481_v15 = vrot.slane %v14072_v33, 7 }
 0x1c3   :  { %v14721_v13 = vpop.f32.mrb[66].mxu0  ;;  %11645 = vmatmul.mubr.msk.f32.gmra.mrb[50].mxu1 %vm1106_vm1, %v14072_v33  ;;  %v14758_v55 = vsel %vm1507_vm3, %v1402_v28, %v1438_v41  ;;  %v1445_v33 = vrot.slane %v14065_v49, 7 }
 0x1c4   :  { %19053 = vst [vmem:[#allocation67_spill] sm:$0xff] %v14721_v13  ;;  %v2201_v26 = vpop.f32.mrb[67].mxu0  ;;  %11174 = vmatmul.mubr.msk.f32.gmra.mrb[76].mxu0 %vm1106_vm1, %v14727_v37  ;;  %11647 = vmatprep.mubr.msk.f32.mxu1 %vm1106_vm1, %v14081_v0  ;;  %19060 = vst [vmem:[#allocation74_spill] sm:$0xff] %v14758_v55  ;;  %v19073_v13 = vld [vmem:[#allocation3_spill] sm:$0xff] }
 0x1c5   :  { %11176 = vmatprep.mubr.msk.f32.mxu0 %vm1106_vm1, %v14741_v32  ;;  %v14752_v26 = vsel %vm1507_vm3, %v1474_v39, %v1402_v28  ;;  %v1403_v32 = vrot.slane %v14762_v34, 7  ;;  %v14778_v28 = vld [vmem:[#allocation2 + $0x98] sm:$0xff] }
 0x1c6   :  { %19059 = vst [vmem:[#allocation73_spill] sm:$0xff] %v14752_v26  ;;  %19065 = vst [vmem:[#allocation79_spill] sm:$0xff] %v14778_v28 }
 0x1c7   :  { %11648 = vmatmul.mubr.msk.f32.gmra.mrb[52].mxu1 %vm1106_vm1, %v14088_v12  ;;  %v11017_v37 = vpop.f32.mrb[68].mxu0 }
 0x1c8   :  { %11177 = vmatmul.mubr.msk.f32.gmra.mrb[168].mxu0 %vm1106_vm1, %v14752_v26  ;;  %11650 = vmatprep.mubr.msk.f32.mxu1 %vm1106_vm1, %v14097_v24  ;;  %v14768_v21 = vpop.f32.mrb[69].mxu0  ;;  %v14776_v37 = vsel %vm1507_vm3, %v1438_v41, %v1474_v39  ;;  %v1439_v26 = vrot.slane %v14778_v28, 7  ;;  %v14799_v41 = vld [vmem:[#allocation2 + $0xa8] sm:$0xff] }
 0x1c9   :  { %19063 = vst [vmem:[#allocation77_spill] sm:$0xff] %v14768_v21  ;;  %11179 = vmatprep.mubr.msk.f32.mxu0 %vm1106_vm1, %v14758_v55  ;;  %19064 = vst [vmem:[#allocation78_spill] sm:$0xff] %v14776_v37  ;;  %v14787_v55 = vsel %vm1507_vm3, %v1475_v14, %v1403_v32 }
 0x1ca   :  { %19066 = vst [vmem:[#allocation80_spill] sm:$0xff] %v14787_v55  ;;  %v14797_v39 = vsel %vm1507_vm3, %v1403_v32, %v1439_v26  ;;  %19069 = vst [vmem:[#allocation83_spill] sm:$0xff] %v14799_v41  ;;  %v14813_v32 = vld [vmem:[#allocation2 + $0xb0] sm:$0xff] }
 0x1cb   :  { %11651 = vmatmul.mubr.msk.f32.gmra.mrb[54].mxu1 %vm1106_vm1, %v14104_v31  ;;  %19068 = vst [vmem:[#allocation82_spill] sm:$0xff] %v14797_v39  ;;  %19072 = vst [vmem:[#allocation86_spill] sm:$0xff] %v14813_v32 }
 0x1cc   :  { %11180 = vmatmul.mubr.msk.f32.gmra.mrb[170].mxu0 %vm1106_vm1, %v14776_v37  ;;  %11653 = vmatprep.mubr.msk.f32.mxu1 %vm1106_vm1, %v14113_v51  ;;  %v1404_v37 = vrot.slane %v14799_v41, 7 }
 0x1cd   :  { %11182 = vmatprep.mubr.msk.f32.mxu0 %vm1106_vm1, %v14787_v55  ;;  %v14811_v55 = vsel %vm1507_vm3, %v1439_v26, %v1475_v14  ;;  %v19076_v26 = vld [vmem:[#allocation5_spill] sm:$0xff] }
 0x1ce   :  { %19071 = vst [vmem:[#allocation85_spill] sm:$0xff] %v14811_v55  ;;  %19077 = vst [vmem:[#allocation5_spill] sm:$0xff] %v14832_v8 }
 0x1cf   :  { %v14791_v61 = vpop.f32.mrb[72].mxu0  ;;  %11654 = vmatmul.mubr.msk.f32.gmra.mrb[56].mxu1 %vm1106_vm1, %v14120_v58 }
 0x1d0   :  { %19067 = vst [vmem:[#allocation81_spill] sm:$0xff] %v14791_v61  ;;  %v2229_v21 = vpop.f32.mrb[73].mxu0  ;;  %11183 = vmatmul.mubr.msk.f32.gmra.mrb[82].mxu0 %vm1106_vm1, %v14797_v39  ;;  %11656 = vmatprep.mubr.msk.f32.mxu1 %vm1106_vm1, %v14129_v23  ;;  %v1440_v61 = vrot.slane %v14813_v32, 7  ;;  %v1477_v32 = vrot.slane %v14835_v1, 7 }
 0x1d1   :  { %11185 = vmatprep.mubr.msk.f32.mxu0 %vm1106_vm1, %v14811_v55  ;;  %v14822_v21 = vsel %vm1507_vm3, %v1476_v46, %v1404_v37  ;;  %v1405_v55 = vrot.slane %v14832_v8, 7  ;;  %v14852_v8 = vld [vmem:[#allocation2 + $0xc8] sm:$0xff] }
 0x1d2   :  { %19074 = vst [vmem:[#allocation3_spill] sm:$0xff] %v14822_v21  ;;  %v14828_v14 = vsel %vm1507_vm3, %v1404_v37, %v1440_v61  ;;  %v14848_v37 = vsel %vm1507_vm3, %v1440_v61, %v1476_v46  ;;  %19083 = vst [vmem:[#allocation93_spill] sm:$0xff] %v14852_v8  ;;  %v1441_v1 = vrot.slane %v14852_v8, 7  ;;  %v14865_v46 = vld [vmem:[#allocation2 + $0x190] sm:$0xff] }
 0x1d3   :  { %11657 = vmatmul.mubr.msk.f32.gmra.mrb[58].mxu1 %vm1106_vm1, %v19073_v13  ;;  %v11026_v39 = vpop.f32.mrb[74].mxu0  ;;  %19075 = vst [vmem:[#allocation87_spill] sm:$0xff] %v14828_v14  ;;  %19081 = vst [vmem:[#allocation91_spill] sm:$0xff] %v14848_v37 }
 0x1d4   :  { %11186 = vmatmul.mubr.msk.f32.gmra.mrb[172].mxu0 %vm1106_vm1, %v14822_v21  ;;  %11659 = vmatprep.mubr.msk.f32.mxu1 %vm1106_vm1, %v19076_v26  ;;  %v14838_v41 = vpop.f32.mrb[75].mxu0  ;;  %v14842_v39 = vld [vmem:[#allocation2 + $0x180] sm:$0xff]  ;;  %v14850_v21 = vld [vmem:[#allocation2 + $0x188] sm:$0xff]  ;;  %19085 = vst [vmem:[#allocation95_spill] sm:$0xff] %v14865_v46 }
 0x1d5   :  { %19079 = vst [vmem:[#allocation89_spill] sm:$0xff] %v14838_v41  ;;  %11188 = vmatprep.mubr.msk.f32.mxu0 %vm1106_vm1, %v14828_v14  ;;  %19080 = vst [vmem:[#allocation90_spill] sm:$0xff] %v14842_v39  ;;  %v14861_v14 = vsel %vm1507_vm3, %v1477_v32, %v1405_v55  ;;  %v14875_v41 = vld [vmem:[#allocation2 + $0xd8] sm:$0xff] }
 0x1d6   :  { %19082 = vst [vmem:[#allocation92_spill] sm:$0xff] %v14850_v21  ;;  %19084 = vst [vmem:[#allocation94_spill] sm:$0xff] %v14861_v14 }
 0x1d7   :  { %11660 = vmatmul.mubr.msk.f32.gmra.mrb[60].mxu1 %vm1106_vm1, %v14842_v39  ;;  %19088 = vst [vmem:[#allocation98_spill] sm:$0xff] %v14875_v41  ;;  %v14878_v39 = vld [vmem:[#allocation2 + $0xe8] sm:$0xff] }
 0x1d8   :  { %11189 = vmatmul.mubr.msk.f32.gmra.mrb[174].mxu0 %vm1106_vm1, %v14848_v37  ;;  %11662 = vmatprep.mubr.msk.f32.mxu1 %vm1106_vm1, %v14850_v21  ;;  %v14873_v37 = vsel %vm1507_vm3, %v1405_v55, %v1441_v1  ;;  %v1406_v21 = vrot.slane %v14875_v41, 7  ;;  %19089 = vst [vmem:[#allocation99_spill] sm:$0xff] %v14878_v39  ;;  %v1478_v8 = vrot.slane %v14878_v39, 7  ;;  %v14889_v55 = vld [vmem:[#allocation2 + $0xe0] sm:$0xff]  ;;  %v19093_v41 = vld [vmem:[#allocation9_spill] sm:$0xff] }
 0x1d9   :  { %11191 = vmatprep.mubr.msk.f32.mxu0 %vm1106_vm1, %v14861_v14  ;;  %19087 = vst [vmem:[#allocation97_spill] sm:$0xff] %v14873_v37  ;;  %19092 = vst [vmem:[#allocation100_spill] sm:$0xff] %v14889_v55  ;;  %v1442_v11 = vrot.slane %v14889_v55, 7  ;;  %v14908_v39 = vld [vmem:[#allocation2 + $0xf0] sm:$0xff]  ;;  %v1479_v55 = vrot.slane %v14011_v54, 7  ;;  %v19102_v54 = vld [vmem:[#allocation12_spill] sm:$0xff] }
 0x1db   :  { %v14867_v61 = vpop.f32.mrb[78].mxu0  ;;  %11663 = vmatmul.mubr.msk.f32.gmra.mrb[62].mxu1 %vm1106_vm1, %v14865_v46  ;;  %v14887_v46 = vsel %vm1507_vm3, %v1441_v1, %v1477_v32  ;;  %v14904_v1 = vsel %vm1507_vm3, %v1406_v21, %v1442_v11  ;;  %v19096_v32 = vld [vmem:[#allocation10_spill] sm:$0xff] }
 0x1dc   :  { %19086 = vst [vmem:[#allocation96_spill] sm:$0xff] %v14867_v61  ;;  %v2257_v14 = vpop.f32.mrb[79].mxu0  ;;  %11192 = vmatmul.mubr.msk.f32.gmra.mrb[88].mxu0 %vm1106_vm1, %v14873_v37  ;;  %v19090_v61 = vld [vmem:[#allocation8_spill] sm:$0xff]  ;;  %19095 = vst [vmem:[#allocation101_spill] sm:$0xff] %v14904_v1 }
 0x1dd   :  { %11665 = vmatprep.mubr.msk.f32.mxu1 %vm1106_vm1, %v19090_v61  ;;  %19091 = vst [vmem:[#allocation8_spill] sm:$0xff] %v14887_v46  ;;  %11194 = vmatprep.mubr.msk.f32.mxu0 %vm1106_vm1, %v14887_v46  ;;  %v14898_v14 = vsel %vm1507_vm3, %v1478_v8, %v1406_v21  ;;  %19097 = vst [vmem:[#allocation10_spill] sm:$0xff] %v14908_v39  ;;  %v1407_v46 = vrot.slane %v14908_v39, 7  ;;  %v14920_v21 = vsel %vm1507_vm3, %v1442_v11, %v1478_v8  ;;  %v19105_v8 = vld [vmem:[#allocation13_spill] sm:$0xff] }
 0x1de   :  { %19094 = vst [vmem:[#allocation9_spill] sm:$0xff] %v14898_v14 }
 0x1df   :  { %11666 = vmatmul.mubr.msk.f32.gmra.mrb[64].mxu1 %vm1106_vm1, %v19093_v41  ;;  %v11035_v37 = vpop.f32.mrb[80].mxu0 }
 0x1e0   :  { %11195 = vmatmul.mubr.msk.f32.gmra.mrb[176].mxu0 %vm1106_vm1, %v14898_v14  ;;  %11668 = vmatprep.mubr.msk.f32.mxu1 %vm1106_vm1, %v19096_v32  ;;  %v14912_v28 = vpop.f32.mrb[81].mxu0  ;;  %v19099_v37 = vld [vmem:[#allocation11_spill] sm:$0xff]  ;;  %v14922_v14 = vld [vmem:[#allocation2 + $0xf8] sm:$0xff] }
 0x1e1   :  { %19098 = vst [vmem:[#allocation102_spill] sm:$0xff] %v14912_v28  ;;  %11197 = vmatprep.mubr.msk.f32.mxu0 %vm1106_vm1, %v14904_v1  ;;  %19100 = vst [vmem:[#allocation11_spill] sm:$0xff] %v14920_v21  ;;  %v1443_v34 = vrot.slane %v14922_v14, 7  ;;  %v14931_v1 = vsel %vm1507_vm3, %v1479_v55, %v1407_v46 }
 0x1e2   :  { %19101 = vst [vmem:[#allocation103_spill] sm:$0xff] %v14922_v14  ;;  %19103 = vst [vmem:[#allocation12_spill] sm:$0xff] %v14931_v1  ;;  %v1480_v14 = vrot.slane %v14049_v4, 7 }
 0x1e3   :  { %11669 = vmatmul.mubr.msk.f32.gmra.mrb[66].mxu1 %vm1106_vm1, %v19099_v37  ;;  %v14941_v11 = vsel %vm1507_vm3, %v1407_v46, %v1443_v34  ;;  %v1390_v46 = vld [vmem:[%s18611_s7 + $0x8] sm:$0xf] }
 0x1e4   :  { %11198 = vmatmul.mubr.msk.f32.gmra.mrb[178].mxu0 %vm1106_vm1, %v14920_v21  ;;  %11671 = vmatprep.mubr.msk.f32.mxu1 %vm1106_vm1, %v19102_v54  ;;  %19106 = vst [vmem:[#allocation13_spill] sm:$0xff] %v14941_v11  ;;  %v1408_v21 = vrot.slane %v14033_v60, 7  ;;  %v14961_v60 = vld [vmem:[#allocation2] sm:$0xff] }
 0x1e5   :  { %11200 = vmatprep.mubr.msk.f32.mxu0 %vm1106_vm1, %v14931_v1  ;;  %v14951_v1 = vsel %vm1507_vm3, %v1443_v34, %v1479_v55  ;;  %11299 = vmatprep.subr.msk.mxu0 %vm2121_vm2, %v1390_v46  ;;  %19109 = vst [vmem:[#allocation105_spill] sm:$0xff] %v14961_v60  ;;  %v14973_v55 = vld [vmem:[%s18611_s7 + $0xc] sm:$0xf]  ;;  %v19117_v4 = vrot.slane %v14961_v60, 1  ;;  %v1488_v60 = vrot.slane %v19096_v32, 7 }
 0x1e6   :  { %19108 = vst [vmem:[#allocation15_spill] sm:$0xff] %v14951_v1  ;;  %11300 = vmatpush3.msk.msra.mxu0 %vm2121_vm2, %v1390_v46  ;;  %19112 = vst [vmem:[#allocation106_spill] sm:$0xff] %v14973_v55  ;;  %v14977_v46 = vld [vmem:[#allocation2 + $0x10] sm:$0xff] }
 0x1e7   :  { %v14935_v28 = vpop.f32.mrb[84].mxu0  ;;  %11672 = vmatmul.mubr.msk.f32.gmra.mrb[68].mxu1 %vm1106_vm1, %v19105_v8  ;;  %11445 = vmatprep.subr.msk.mxu0 %vm2121_vm2, %v14973_v55  ;;  %19113 = vst [vmem:[#allocation107_spill] sm:$0xff] %v14977_v46  ;;  %v19120_v55 = vld [vmem:[#allocation20_spill] sm:$0xff] }
 0x1e8   :  { %19104 = vst [vmem:[#allocation104_spill] sm:$0xff] %v14935_v28  ;;  %v2285_v39 = vpop.f32.mrb[85].mxu0  ;;  %11201 = vmatmul.mubr.msk.f32.gmra.mrb[94].mxu0 %vm1106_vm1, %v14941_v11  ;;  %11674 = vmatprep.mubr.msk.f32.mxu1 %vm1106_vm1, %v19107_v48  ;;  %v1444_v28 = vrot.slane %v14040_v3, 7  ;;  %v14968_v3 = vsel %vm1507_vm3, %v1480_v14, %v1408_v21  ;;  %v1409_v11 = vrot.slane %v14056_v57, 7 }
 0x1e9   :  { %11203 = vmatprep.mubr.msk.f32.mxu0 %vm1106_vm1, %v14951_v1  ;;  %v19110_v39 = vld [vmem:[#allocation16_spill] sm:$0xff] }
 0x1ea   :  { %19111 = vst [vmem:[#allocation16_spill] sm:$0xff] %v14968_v3  ;;  %v14984_v1 = vsel %vm1507_vm3, %v1408_v21, %v1444_v28  ;;  %v15007_v57 = vsel %vm1507_vm3, %v1444_v28, %v1480_v14  ;;  %v15026_v49 = vsel %vm1507_vm3, %v1409_v11, %v1445_v33  ;;  %v1410_v28 = vrot.slane %v14081_v0, 7 }
 0x1eb   :  { %11675 = vmatmul.mubr.msk.f32.gmra.mrb[70].mxu1 %vm1106_vm1, %v19110_v39  ;;  %v11044_v34 = vpop.f32.mrb[86].mxu0  ;;  %19114 = vst [vmem:[#allocation108_spill] sm:$0xff] %v14984_v1  ;;  %19121 = vst [vmem:[#allocation20_spill] sm:$0xff] %v15007_v57  ;;  %v1482_v14 = vrot.slane %v14097_v24, 7 }
 0x1ec   :  { %11204 = vmatmul.mubr.msk.f32.gmra.mrb[180].mxu0 %vm1106_vm1, %v14968_v3  ;;  %v19115_v34 = vld [vmem:[#allocation18_spill] sm:$0xff]  ;;  %v14990_v10 = vpop.f32.mrb[87].mxu0  ;;  %v19118_v3 = vrot.slane %v14977_v46, 1 }
 0x1ed   :  { %11677 = vmatprep.mubr.msk.f32.mxu1 %vm1106_vm1, %v19115_v34  ;;  %19116 = vst [vmem:[#allocation18_spill] sm:$0xff] %v14990_v10  ;;  %11206 = vmatprep.mubr.msk.f32.mxu0 %vm1106_vm1, %v14984_v1  ;;  %v19122_v1 = vld [vmem:[#allocation23_spill] sm:$0xff]  ;;  %v15016_v10 = vsel %vm1507_vm3, %v1481_v15, %v1409_v11  ;;  %v19129_v11 = vld [vmem:[#allocation28_spill] sm:$0xff]  ;;  %v15045_v0 = vsel %vm1507_vm3, %v1482_v14, %v1410_v28 }
 0x1ee   :  { %v15001_v21 = vsel %vm1724_vm4, %v19118_v3, %v19117_v4  ;;  %19123 = vst [vmem:[#allocation23_spill] sm:$0xff] %v15016_v10  ;;  %v19125_v3 = vld [vmem:[#allocation24_spill] sm:$0xff]  ;;  %19130 = vst [vmem:[#allocation28_spill] sm:$0xff] %v15045_v0 }
 0x1ef   :  { %19119 = vst [vmem:[#allocation109_spill] sm:$0xff] %v15001_v21  ;;  %11678 = vmatmul.mubr.msk.f32.gmra.mrb[72].mxu1 %vm1106_vm1, %v19120_v55  ;;  %19126 = vst [vmem:[#allocation24_spill] sm:$0xff] %v15026_v49  ;;  %v19127_v21 = vld [vmem:[#allocation26_spill] sm:$0xff] }
 0x1f0   :  { %11207 = vmatmul.mubr.msk.f32.gmra.mrb[182].mxu0 %vm1106_vm1, %v15007_v57  ;;  %11680 = vmatprep.mubr.msk.f32.mxu1 %vm1106_vm1, %v19122_v1 }
 0x1f1   :  { %11209 = vmatprep.mubr.msk.f32.mxu0 %vm1106_vm1, %v15016_v10  ;;  %v15036_v10 = vsel %vm1507_vm3, %v1445_v33, %v1481_v15  ;;  %v1483_v33 = vrot.slane %v14120_v58, 7 }
 0x1f2   :  { %19128 = vst [vmem:[#allocation26_spill] sm:$0xff] %v15036_v10 }
 0x1f3   :  { %v15020_v4 = vpop.f32.mrb[90].mxu0  ;;  %11681 = vmatmul.mubr.msk.f32.gmra.mrb[74].mxu1 %vm1106_vm1, %v19125_v3 }
 0x1f4   :  { %19124 = vst [vmem:[#allocation110_spill] sm:$0xff] %v15020_v4  ;;  %v2313_v57 = vpop.f32.mrb[91].mxu0  ;;  %11210 = vmatmul.mubr.msk.f32.gmra.mrb[100].mxu0 %vm1106_vm1, %v15026_v49  ;;  %11683 = vmatprep.mubr.msk.f32.mxu1 %vm1106_vm1, %v19127_v21  ;;  %v1446_v4 = vrot.slane %v14088_v12, 7  ;;  %v1411_v12 = vrot.slane %v14104_v31, 7  ;;  %v19136_v31 = vld [vmem:[#allocation37_spill] sm:$0xff]  ;;  %v19140_v49 = vld [vmem:[#allocation40_spill] sm:$0xff] }
 0x1f5   :  { %11212 = vmatprep.mubr.msk.f32.mxu0 %vm1106_vm1, %v15036_v10  ;;  %v19132_v57 = vld [vmem:[#allocation30_spill] sm:$0xff] }
 0x1f6   :  { %v15051_v15 = vsel %vm1507_vm3, %v1410_v28, %v1446_v4  ;;  %v1447_v28 = vrot.slane %v14113_v51, 7  ;;  %v15074_v58 = vsel %vm1507_vm3, %v1483_v33, %v1411_v12 }
 0x1f7   :  { %11684 = vmatmul.mubr.msk.f32.gmra.mrb[76].mxu1 %vm1106_vm1, %v19129_v11  ;;  %v11053_v24 = vpop.f32.mrb[92].mxu0  ;;  %19131 = vst [vmem:[#allocation111_spill] sm:$0xff] %v15051_v15  ;;  %19137 = vst [vmem:[#allocation37_spill] sm:$0xff] %v15074_v58 }
 0x1f8   :  { %11213 = vmatmul.mubr.msk.f32.gmra.mrb[184].mxu0 %vm1106_vm1, %v15045_v0  ;;  %11686 = vmatprep.mubr.msk.f32.mxu1 %vm1106_vm1, %v19132_v57  ;;  %v15057_v10 = vpop.f32.mrb[93].mxu0  ;;  %v19134_v24 = vld [vmem:[#allocation32_spill] sm:$0xff]  ;;  %v15065_v0 = vsel %vm1507_vm3, %v1446_v4, %v1482_v14  ;;  %v15084_v51 = vsel %vm1507_vm3, %v1411_v12, %v1447_v28  ;;  %v1412_v4 = vrot.slane %v14129_v23, 7  ;;  %v1484_v14 = vrot.slane %v19076_v26, 7 }
 0x1f9   :  { %19133 = vst [vmem:[#allocation30_spill] sm:$0xff] %v15057_v10  ;;  %11215 = vmatprep.mubr.msk.f32.mxu0 %vm1106_vm1, %v15051_v15  ;;  %19135 = vst [vmem:[#allocation32_spill] sm:$0xff] %v15065_v0  ;;  %v19142_v12 = vld [vmem:[#allocation4_spill] sm:$0xff]  ;;  %v19143_v10 = vld [vmem:[#allocation7_spill] sm:$0xff] }
 0x1fa   :  { %19139 = vst [vmem:[#allocation113_spill] sm:$0xff] %v15084_v51  ;;  %v1415_v23 = vrot.slane %v19142_v12, 7  ;;  %v1487_v26 = vrot.slane %v19143_v10, 7  ;;  %v19149_v10 = vld [vmem:[#allocation6_spill] sm:$0xff] }
 0x1fb   :  { %11687 = vmatmul.mubr.msk.f32.gmra.mrb[78].mxu1 %vm1106_vm1, %v19134_v24  ;;  %v1451_v12 = vrot.slane %v19149_v10, 7 }
 0x1fc   :  { %11216 = vmatmul.mubr.msk.f32.gmra.mrb[186].mxu0 %vm1106_vm1, %v15065_v0  ;;  %11689 = vmatprep.mubr.msk.f32.mxu1 %vm1106_vm1, %v19136_v31 }
 0x1fd   :  { %11218 = vmatprep.mubr.msk.f32.mxu0 %vm1106_vm1, %v15074_v58  ;;  %v15094_v58 = vsel %vm1507_vm3, %v1447_v28, %v1483_v33  ;;  %v19147_v33 = vld [vmem:[#allocation44_spill] sm:$0xff]  ;;  %v1562_v10 = vsel %vm1507_vm3, %v1415_v23, %v1451_v12 }
 0x1fe   :  { %19141 = vst [vmem:[#allocation40_spill] sm:$0xff] %v15094_v58 }
 0x1ff   :  { %v15078_v15 = vpop.f32.mrb[96].mxu0  ;;  %11690 = vmatmul.mubr.msk.f32.gmra.mrb[80].mxu1 %vm1106_vm1, %v14412_v53 }
 0x200   :  { %19138 = vst [vmem:[#allocation112_spill] sm:$0xff] %v15078_v15  ;;  %v2341_v0 = vpop.f32.mrb[97].mxu0  ;;  %11219 = vmatmul.mubr.msk.f32.gmra.mrb[106].mxu0 %vm1106_vm1, %v15084_v51  ;;  %11692 = vmatprep.mubr.msk.f32.mxu1 %vm1106_vm1, %v19140_v49  ;;  %v1448_v15 = vrot.slane %v19073_v13, 7  ;;  %v15105_v51 = vsel %vm1507_vm3, %v1484_v14, %v1412_v4 }
 0x201   :  { %11221 = vmatprep.mubr.msk.f32.mxu0 %vm1106_vm1, %v15094_v58  ;;  %v19144_v0 = vld [vmem:[#allocation42_spill] sm:$0xff]  ;;  %19145 = vst [vmem:[#allocation4_spill] sm:$0xff] %v15105_v51 }
 0x202   :  { %v15111_v13 = vsel %vm1507_vm3, %v1412_v4, %v1448_v15  ;;  %v19150_v58 = vld [vmem:[#allocation46_spill] sm:$0xff]  ;;  %v15126_v4 = vsel %vm1507_vm3, %v1448_v15, %v1484_v14  ;;  %v19153_v14 = vld [vmem:[#allocation49_spill] sm:$0xff] }
 0x203   :  { %11693 = vmatmul.mubr.msk.f32.gmra.mrb[82].mxu1 %vm1106_vm1, %v19144_v0  ;;  %v11062_v46 = vpop.f32.mrb[98].mxu0  ;;  %19146 = vst [vmem:[#allocation7_spill] sm:$0xff] %v15111_v13  ;;  %19151 = vst [vmem:[#allocation44_spill] sm:$0xff] %v15126_v4 }
 0x204   :  { %11222 = vmatmul.mubr.msk.f32.gmra.mrb[188].mxu0 %vm1106_vm1, %v15105_v51  ;;  %11695 = vmatprep.mubr.msk.f32.mxu1 %vm1106_vm1, %v19147_v33  ;;  %v15115_v28 = vpop.f32.mrb[99].mxu0  ;;  %v1598_v46 = vsel %vm1507_vm3, %v1487_v26, %v1415_v23  ;;  %v19152_v51 = vld [vmem:[#allocation48_spill] sm:$0xff]  ;;  %v19155_v23 = vld [vmem:[#allocation51_spill] sm:$0xff] }
 0x205   :  { %19148 = vst [vmem:[#allocation42_spill] sm:$0xff] %v15115_v28  ;;  %11224 = vmatprep.mubr.msk.f32.mxu0 %vm1106_vm1, %v15111_v13  ;;  %v1526_v13 = vsel %vm1507_vm3, %v1451_v12, %v1487_v26  ;;  %v1416_v28 = vrot.slane %v19090_v61, 7  ;;  %v1417_v26 = vrot.slane %v19099_v37, 7  ;;  %v19161_v37 = vld [vmem:[#allocation54_spill] sm:$0xff] }
 0x207   :  { %11696 = vmatmul.mubr.msk.f32.gmra.mrb[84].mxu1 %vm1106_vm1, %v19150_v58  ;;  %v15152_v61 = vsel %vm1507_vm3, %v1488_v60, %v1416_v28 }
 0x208   :  { %11225 = vmatmul.mubr.msk.f32.gmra.mrb[190].mxu0 %vm1106_vm1, %v15126_v4  ;;  %11698 = vmatprep.mubr.msk.f32.mxu1 %vm1106_vm1, %v19152_v51  ;;  %v1452_v4 = vrot.slane %v19093_v41, 7  ;;  %19156 = vst [vmem:[#allocation6_spill] sm:$0xff] %v15152_v61  ;;  %v19158_v41 = vld [vmem:[#allocation52_spill] sm:$0xff] }
 0x209   :  { %11227 = vmatprep.mubr.msk.f32.mxu0 %vm1106_vm1, %v1598_v46  ;;  %v19154_v46 = vld [vmem:[#allocation50_spill] sm:$0xff] }
 0x20b   :  { %v15139_v15 = vpop.f32.mrb[102].mxu0  ;;  %11699 = vmatmul.mubr.msk.f32.gmra.mrb[86].mxu1 %vm1106_vm1, %v19153_v14 }
 0x20c   :  { %v2369_v25 = vpop.f32.mrb[103].mxu0  ;;  %11228 = vmatmul.mubr.msk.f32.gmra.mrb[112].mxu0 %vm1106_vm1, %v1562_v10  ;;  %11701 = vmatprep.mubr.msk.f32.mxu1 %vm1106_vm1, %v19154_v46  ;;  %v19159_v10 = vld [vmem:[#allocation53_spill] sm:$0xff] }
 0x20d   :  { %11230 = vmatprep.mubr.msk.f32.mxu0 %vm1106_vm1, %v1526_v13  ;;  %v15158_v25 = vsel %vm1507_vm3, %v1416_v28, %v1452_v4  ;;  %v1489_v13 = vrot.slane %v19105_v8, 7  ;;  %v1453_v28 = vrot.slane %v19102_v54, 7 }
 0x20e   :  { %19157 = vst [vmem:[#allocation46_spill] sm:$0xff] %v15158_v25 }
 0x20f   :  { %11702 = vmatmul.mubr.msk.f32.gmra.mrb[88].mxu1 %vm1106_vm1, %v19155_v23  ;;  %v11071_v32 = vpop.f32.mrb[104].mxu0  ;;  %v15181_v8 = vsel %vm1507_vm3, %v1489_v13, %v1417_v26  ;;  %v15191_v54 = vsel %vm1507_vm3, %v1417_v26, %v1453_v28 }
 0x210   :  { %11231 = vmatmul.mubr.msk.f32.gmra.mrb[192].mxu0 %vm1106_vm1, %v15152_v61  ;;  %11704 = vmatprep.mubr.msk.f32.mxu1 %vm1106_vm1, %v19158_v41  ;;  %v15164_v12 = vpop.f32.mrb[105].mxu0  ;;  %v15172_v32 = vsel %vm1507_vm3, %v1452_v4, %v1488_v60  ;;  %19162 = vst [vmem:[#allocation49_spill] sm:$0xff] %v15181_v8  ;;  %19163 = vst [vmem:[#allocation50_spill] sm:$0xff] %v15191_v54  ;;  %v1418_v60 = vrot.slane %v19107_v48, 7  ;;  %v1490_v4 = vrot.slane %v19115_v34, 7 }
 0x211   :  { %11233 = vmatprep.mubr.msk.f32.mxu0 %vm1106_vm1, %v15158_v25  ;;  %19160 = vst [vmem:[#allocation48_spill] sm:$0xff] %v15172_v32  ;;  %v15201_v61 = vsel %vm1507_vm3, %v1453_v28, %v1489_v13  ;;  %v1491_v13 = vrot.slane %v19125_v3, 7  ;;  %v1420_v3 = vrot.slane %v19127_v21, 7 }
 0x212   :  { %19164 = vst [vmem:[#allocation51_spill] sm:$0xff] %v15201_v61  ;;  %v15210_v48 = vsel %vm1507_vm3, %v1490_v4, %v1418_v60 }
 0x213   :  { %11705 = vmatmul.mubr.msk.f32.gmra.mrb[90].mxu1 %vm1106_vm1, %v19159_v10  ;;  %19165 = vst [vmem:[#allocation52_spill] sm:$0xff] %v15210_v48 }
 0x214   :  { %11234 = vmatmul.mubr.msk.f32.gmra.mrb[194].mxu0 %vm1106_vm1, %v15172_v32  ;;  %11707 = vmatprep.mubr.msk.f32.mxu1 %vm1106_vm1, %v19161_v37 }
 0x215   :  { %11236 = vmatprep.mubr.msk.f32.mxu0 %vm1106_vm1, %v15181_v8  ;;  %v1454_v8 = vrot.slane %v19110_v39, 7  ;;  %v1419_v39 = vrot.slane %v19120_v55, 7 }
 0x217   :  { %v15185_v25 = vpop.f32.mrb[108].mxu0  ;;  %11708 = vmatmul.mubr.msk.f32.gmra.mrb[92].mxu1 %vm1106_vm1, %v14525_v50  ;;  %v15216_v26 = vsel %vm1507_vm3, %v1418_v60, %v1454_v8  ;;  %v15230_v28 = vsel %vm1507_vm3, %v1454_v8, %v1490_v4  ;;  %v1455_v60 = vrot.slane %v19122_v1, 7  ;;  %v15239_v55 = vsel %vm1507_vm3, %v1491_v13, %v1419_v39 }
 0x218   :  { %v2397_v32 = vpop.f32.mrb[109].mxu0  ;;  %11237 = vmatmul.mubr.msk.f32.gmra.mrb[118].mxu0 %vm1106_vm1, %v15191_v54  ;;  %11710 = vmatprep.mubr.msk.f32.mxu1 %vm1106_vm1, %v14533_v5  ;;  %19166 = vst [vmem:[#allocation53_spill] sm:$0xff] %v15216_v26  ;;  %19167 = vst [vmem:[#allocation54_spill] sm:$0xff] %v15230_v28 }
 0x219   :  { %11239 = vmatprep.mubr.msk.f32.mxu0 %vm1106_vm1, %v15201_v61  ;;  %19168 = vst [vmem:[#allocation114_spill] sm:$0xff] %v15239_v55  ;;  %v15249_v1 = vsel %vm1507_vm3, %v1419_v39, %v1455_v60  ;;  %v15259_v4 = vsel %vm1507_vm3, %v1455_v60, %v1491_v13  ;;  %v1457_v13 = vrot.slane %v19136_v31, 7 }
 0x21a   :  { %19169 = vst [vmem:[#allocation115_spill] sm:$0xff] %v15249_v1  ;;  %19170 = vst [vmem:[#allocation116_spill] sm:$0xff] %v15259_v4 }
 0x21b   :  { %11711 = vmatmul.mubr.msk.f32.gmra.mrb[94].mxu1 %vm1106_vm1, %v14209_v38  ;;  %v11080_v34 = vpop.f32.mrb[110].mxu0 }
 0x21c   :  { %11240 = vmatmul.mubr.msk.f32.gmra.mrb[196].mxu0 %vm1106_vm1, %v15210_v48  ;;  %11713 = vmatprep.mubr.msk.f32.mxu1 %vm1106_vm1, %v14190_v47  ;;  %v15222_v32 = vpop.f32.mrb[111].mxu0  ;;  %v1493_v34 = vrot.slane %v14412_v53, 7 }
 0x21d   :  { %11242 = vmatprep.mubr.msk.f32.mxu0 %vm1106_vm1, %v15216_v26 }
 0x21e   :  { %v15317_v60 = vsel %vm1507_vm3, %v1457_v13, %v1493_v34 }
 0x21f   :  { %11714 = vmatmul.mubr.msk.f32.gmra.mrb[96].mxu1 %vm1106_vm1, %v14249_v44  ;;  %19176 = vst [vmem:[#allocation122_spill] sm:$0xff] %v15317_v60 }
 0x220   :  { %11243 = vmatmul.mubr.msk.f32.gmra.mrb[198].mxu0 %vm1106_vm1, %v15230_v28  ;;  %11716 = vmatprep.mubr.msk.f32.mxu1 %vm1106_vm1, %v14241_v22  ;;  %v1492_v22 = vrot.slane %v19132_v57, 7  ;;  %v12726_v28 = vld [vmem:[#allocation2 + $0x158] sm:$0xff] }
 0x221   :  { %11245 = vmatprep.mubr.msk.f32.mxu0 %vm1106_vm1, %v15239_v55  ;;  %v1666_v26 = vrot.slane %v12726_v28, 1 }
 0x222   :  { %v15268_v21 = vsel %vm1507_vm3, %v1492_v22, %v1420_v3 }
 0x223   :  { %v15243_v44 = vpop.f32.mrb[114].mxu0  ;;  %11717 = vmatmul.mubr.msk.f32.gmra.mrb[98].mxu1 %vm1106_vm1, %v14217_v16  ;;  %v1456_v16 = vrot.slane %v19129_v11, 7  ;;  %19171 = vst [vmem:[#allocation117_spill] sm:$0xff] %v15268_v21  ;;  %v1421_v11 = vrot.slane %v19134_v24, 7  ;;  %v1422_v24 = vrot.slane %v19140_v49, 7 }
 0x224   :  { %v2425_v8 = vpop.f32.mrb[115].mxu0  ;;  %11246 = vmatmul.mubr.msk.f32.gmra.mrb[124].mxu0 %vm1106_vm1, %v15249_v1  ;;  %11719 = vmatprep.mubr.msk.f32.mxu1 %vm1106_vm1, %v14286_v30  ;;  %v12721_v1 = vld [vmem:[#allocation2 + $0x130] sm:$0xff] }
 0x225   :  { %11248 = vmatprep.mubr.msk.f32.mxu0 %vm1106_vm1, %v15259_v4  ;;  %v15274_v30 = vsel %vm1507_vm3, %v1420_v3, %v1456_v16  ;;  %v15288_v39 = vsel %vm1507_vm3, %v1456_v16, %v1492_v22  ;;  %v15307_v53 = vsel %vm1507_vm3, %v1421_v11, %v1457_v13  ;;  %v1423_v22 = vrot.slane %v19150_v58, 7  ;;  %v19181_v13 = vld [vmem:[#allocation34_spill] sm:$0xff] }
 0x226   :  { %19172 = vst [vmem:[#allocation118_spill] sm:$0xff] %v15274_v30  ;;  %19173 = vst [vmem:[#allocation119_spill] sm:$0xff] %v15288_v39  ;;  %v1495_v8 = vrot.slane %v19153_v14, 7  ;;  %v1459_v58 = vrot.slane %v19152_v51, 7  ;;  %v19183_v14 = vld [vmem:[#allocation38_spill] sm:$0xff] }
 0x227   :  { %11720 = vmatmul.mubr.msk.f32.gmra.mrb[4].mxu1 %vm1106_vm1, %v14288_v62  ;;  %v11089_v57 = vpop.f32.mrb[116].mxu0  ;;  %19175 = vst [vmem:[#allocation121_spill] sm:$0xff] %v15307_v53 }
 0x228   :  { %11249 = vmatmul.mubr.msk.f32.gmra.mrb[200].mxu0 %vm1106_vm1, %v15268_v21  ;;  %11722 = vmatprep.mubr.msk.f32.mxu1 %vm1106_vm1, %v14243_v35  ;;  %v15280_v62 = vpop.f32.mrb[117].mxu0  ;;  %v15297_v35 = vsel %vm1507_vm3, %v1493_v34, %v1421_v11  ;;  %v1617_v57 = vrot.slane %v14471_v52, 1  ;;  %v1653_v11 = vrot.slane %v14479_v56, 1  ;;  %v15361_v52 = vsel %vm1507_vm3, %v1495_v8, %v1423_v22  ;;  %v12715_v21 = vld [vmem:[#allocation2 + $0x100] sm:$0xff] }
 0x229   :  { %11251 = vmatprep.mubr.msk.f32.mxu0 %vm1106_vm1, %v15274_v30  ;;  %19174 = vst [vmem:[#allocation120_spill] sm:$0xff] %v15297_v35  ;;  %19184 = vst [vmem:[#allocation38_spill] sm:$0xff] %v15361_v52  ;;  %v1689_v56 = vrot.slane %v14493_v45, 1  ;;  %v15372_v51 = vsel %vm1507_vm3, %v1423_v22, %v1459_v58  ;;  %v15386_v45 = vsel %vm1507_vm3, %v1459_v58, %v1495_v8  ;;  %v1460_v22 = vrot.slane %v19155_v23, 7 }
 0x22a   :  { %19187 = vst [vmem:[#allocation127_spill] sm:$0xff] %v15386_v45 }
 0x22b   :  { %11723 = vmatmul.mubr.msk.f32.gmra.mrb[100].mxu1 %vm1106_vm1, %v14327_v9 }
 0x22c   :  { %11252 = vmatmul.mubr.msk.f32.gmra.mrb[202].mxu0 %vm1106_vm1, %v15288_v39  ;;  %11725 = vmatprep.mubr.msk.f32.mxu1 %vm1106_vm1, %v14338_v27  ;;  %v1494_v27 = vrot.slane %v19147_v33, 7 }
 0x22d   :  { %11254 = vmatprep.mubr.msk.f32.mxu0 %vm1106_vm1, %v15297_v35  ;;  %v19256_v35 = vld [vmem:[#allocation41_spill] sm:$0xff] }
 0x22e   :  { %v15328_v33 = vsel %vm1507_vm3, %v1494_v27, %v1422_v24 }
 0x22f   :  { %v15301_v9 = vpop.f32.mrb[120].mxu0  ;;  %11726 = vmatmul.mubr.msk.f32.gmra.mrb[102].mxu1 %vm1106_vm1, %v14309_v7  ;;  %v1458_v7 = vrot.slane %v19144_v0, 7  ;;  %19178 = vst [vmem:[#allocation124_spill] sm:$0xff] %v15328_v33 }
 0x230   :  { %v2453_v31 = vpop.f32.mrb[121].mxu0  ;;  %11255 = vmatmul.mubr.msk.f32.gmra.mrb[130].mxu0 %vm1106_vm1, %v15307_v53  ;;  %11728 = vmatprep.mubr.msk.f32.mxu1 %vm1106_vm1, %v14357_v43 }
 0x231   :  { %11257 = vmatprep.mubr.msk.f32.mxu0 %vm1106_vm1, %v15317_v60  ;;  %v15334_v0 = vsel %vm1507_vm3, %v1422_v24, %v1458_v7  ;;  %v15376_v31 = vsel %vm1724_vm4, %v1617_v57, %v1653_v11  ;;  %v19247_v60 = vld [vmem:[#allocation33_spill] sm:$0xff] }
 0x232   :  { %v15322_v3 = vpop.f32.mrb[0].mxu1  ;;  %19179 = vst [vmem:[#allocation125_spill] sm:$0xff] %v15334_v0 }
 0x233   :  { %19177 = vst [vmem:[#allocation123_spill] sm:$0xff] %v15322_v3  ;;  %v4771_v49 = vpop.f32.mrb[1].mxu1  ;;  %11729 = vmatmul.mubr.msk.f32.gmra.mrb[10].mxu1 %vm1106_vm1, %v14381_v36  ;;  %v11098_v43 = vpop.f32.mrb[122].mxu0 }
 0x234   :  { %11258 = vmatmul.mubr.msk.f32.gmra.mrb[204].mxu0 %vm1106_vm1, %v15328_v33  ;;  %11731 = vmatprep.mubr.msk.f32.mxu1 %vm1106_vm1, %v14346_v19  ;;  %v15340_v36 = vpop.f32.mrb[123].mxu0  ;;  %v15352_v19 = vsel %vm1507_vm3, %v1458_v7, %v1494_v27  ;;  %v19185_v27 = vld [vmem:[#allocation35_spill] sm:$0xff]  ;;  %v1424_v7 = vrot.slane %v19154_v46, 7  ;;  %v1496_v49 = vrot.slane %v19158_v41, 7  ;;  %v15395_v46 = vsel %vm1724_vm4, %v1653_v11, %v1689_v56 }
 0x235   :  { %11260 = vmatprep.mubr.msk.f32.mxu0 %vm1106_vm1, %v15334_v0  ;;  %19182 = vst [vmem:[#allocation34_spill] sm:$0xff] %v15352_v19  ;;  %19186 = vst [vmem:[#allocation35_spill] sm:$0xff] %v15372_v51  ;;  %v1618_v41 = vrot.slane %v14497_v18, 1  ;;  %v15412_v18 = vsel %vm1724_vm4, %v1689_v56, %v1617_v57  ;;  %v1497_v11 = vrot.slane %v14525_v50, 7 }
 0x236   :  { %v11572_v16 = vpop.f32.mrb[2].mxu1  ;;  %v15404_v23 = vsel %vm1507_vm3, %v1496_v49, %v1424_v7  ;;  %v15440_v50 = vsel %vm1507_vm3, %v1460_v22, %v1496_v49 }
 0x237   :  { %v15346_v34 = vpop.f32.mrb[3].mxu1  ;;  %11732 = vmatmul.mubr.msk.f32.gmra.mrb[104].mxu1 %vm1106_vm1, %v19181_v13  ;;  %v1654_v13 = vrot.slane %v14505_v2, 1  ;;  %19189 = vst [vmem:[#allocation129_spill] sm:$0xff] %v15404_v23  ;;  %v1425_v2 = vrot.slane %v19159_v10, 7  ;;  %19194 = vst [vmem:[#allocation134_spill] sm:$0xff] %v15440_v50 }
 0x238   :  { %19180 = vst [vmem:[#allocation126_spill] sm:$0xff] %v15346_v34  ;;  %11261 = vmatmul.mubr.msk.f32.gmra.mrb[206].mxu0 %vm1106_vm1, %v15352_v19  ;;  %11734 = vmatprep.mubr.msk.f32.mxu1 %vm1106_vm1, %v19183_v14  ;;  %v1690_v14 = vrot.slane %v14513_v40, 1  ;;  %v15416_v40 = vsel %vm1507_vm3, %v1424_v7, %v1460_v22  ;;  %v1461_v7 = vrot.slane %v19161_v37, 7  ;;  %v19216_v34 = vld [vmem:[#allocation70_spill] sm:$0xff] }
 0x239   :  { %11263 = vmatprep.mubr.msk.f32.mxu0 %vm1106_vm1, %v15361_v52  ;;  %19190 = vst [vmem:[#allocation130_spill] sm:$0xff] %v15416_v40  ;;  %v15428_v57 = vsel %vm1724_vm4, %v1618_v41, %v1654_v13 }
 0x23a   :  { %19191 = vst [vmem:[#allocation131_spill] sm:$0xff] %v15428_v57  ;;  %v15432_v56 = vsel %vm1724_vm4, %v1654_v13, %v1690_v14  ;;  %v15451_v13 = vsel %vm1507_vm3, %v1497_v11, %v1425_v2  ;;  %v15457_v37 = vsel %vm1724_vm4, %v1690_v14, %v1618_v41  ;;  %v15466_v49 = vsel %vm1507_vm3, %v1425_v2, %v1461_v7 }
 0x23b   :  { %v15366_v24 = vpop.f32.mrb[126].mxu0  ;;  %11735 = vmatmul.mubr.msk.f32.gmra.mrb[106].mxu1 %vm1106_vm1, %v19185_v27  ;;  %19192 = vst [vmem:[#allocation132_spill] sm:$0xff] %v15432_v56  ;;  %19195 = vst [vmem:[#allocation135_spill] sm:$0xff] %v15451_v13  ;;  %v1656_v2 = vrot.slane %v14706_v17, 1 }
 0x23c   :  { %v2481_v43 = vpop.f32.mrb[127].mxu0  ;;  %11264 = vmatmul.mubr.msk.f32.gmra.mrb[136].mxu0 %vm1106_vm1, %v15372_v51  ;;  %11739 = vmatprep.mubr.msk.f32.mxu1 %vm1106_vm1, %v15376_v31  ;;  %19196 = vst [vmem:[#allocation136_spill] sm:$0xff] %v15457_v37  ;;  %19197 = vst [vmem:[#allocation137_spill] sm:$0xff] %v15466_v49  ;;  %v19243_v51 = vld [vmem:[#allocation93_spill] sm:$0xff] }
 0x23d   :  { %11266 = vmatprep.mubr.msk.f32.mxu0 %vm1106_vm1, %v15386_v45  ;;  %v1619_v43 = vrot.slane %v14521_v6, 1  ;;  %v1691_v6 = vrot.slane %v14537_v63, 1  ;;  %v15479_v63 = vsel %vm1507_vm3, %v1461_v7, %v1497_v11  ;;  %v19202_v11 = vrot.slane %v14190_v47, 7 }
 0x23e   :  { %v15391_v16 = vpop.f32.mrb[6].mxu1  ;;  %19199 = vst [vmem:[#allocation139_spill] sm:$0xff] %v15479_v63  ;;  %v1660_v52 = vrot.slane %v19243_v51, 1 }
 0x23f   :  { %19188 = vst [vmem:[#allocation128_spill] sm:$0xff] %v15391_v16  ;;  %v4799_v27 = vpop.f32.mrb[7].mxu1  ;;  %11740 = vmatmul.mubr.msk.f32.vlgmr.msra.gmra.mrb[16].mxu1 %vm1106_vm1, %v15395_v46  ;;  %v11107_v8 = vpop.f32.mrb[128].mxu0 }
 0x240   :  { %11884 = vmatpush3.msk.msra.mxu1 %vm2121_vm2, %v14698_v59  ;;  %11267 = vmatmul.mubr.msk.f32.gmra.mrb[208].mxu0 %vm1106_vm1, %v15404_v23  ;;  %v15420_v58 = vpop.f32.mrb[129].mxu0  ;;  %v1655_v27 = vrot.slane %v14529_v20, 1  ;;  %v1426_v8 = vrot.slane %v14533_v5, 7  ;;  %v1620_v5 = vrot.slane %v14543_v42, 1  ;;  %v19206_v42 = vrot.slane %v14209_v38, 7 }
 0x241   :  { %11742 = vmatprep.mubr.msk.f32.mxu1 %vm1106_vm1, %v15412_v18  ;;  %11269 = vmatprep.mubr.msk.f32.mxu0 %vm1106_vm1, %v15416_v40  ;;  %v19233_v40 = vld [vmem:[#allocation27_spill] sm:$0xff] }
 0x242   :  { %v11581_v59 = vpop.f32.mrb[8].mxu1  ;;  %v15470_v22 = vsel %vm1724_vm4, %v1619_v43, %v1655_v27  ;;  %v15487_v14 = vsel %vm1724_vm4, %v1655_v27, %v1691_v6  ;;  %v15497_v7 = vsel %vm1507_vm3, %v19202_v11, %v1426_v8  ;;  %v19205_v27 = vld [vmem:[#allocation64_spill] sm:$0xff]  ;;  %v15512_v47 = vsel %vm1507_vm3, %v1426_v8, %v19206_v42  ;;  %v19211_v8 = vld [vmem:[#allocation69_spill] sm:$0xff]  ;;  %v19213_v42 = vld [vmem:[#allocation14_spill] sm:$0xff] }
 0x243   :  { %v15434_v10 = vpop.f32.mrb[9].mxu1  ;;  %11743 = vmatmul.mubr.msk.f32.gmra.mrb[108].mxu1 %vm1106_vm1, %v15428_v57  ;;  %19198 = vst [vmem:[#allocation138_spill] sm:$0xff] %v15470_v22  ;;  %19201 = vst [vmem:[#allocation141_spill] sm:$0xff] %v15487_v14  ;;  %v19212_v11 = vld [vmem:[#allocation72_spill] sm:$0xff] }
 0x244   :  { %19193 = vst [vmem:[#allocation133_spill] sm:$0xff] %v15434_v10  ;;  %11270 = vmatmul.mubr.msk.f32.gmra.mrb[210].mxu0 %vm1106_vm1, %v15440_v50  ;;  %11745 = vmatprep.mubr.msk.f32.mxu1 %vm1106_vm1, %v15432_v56  ;;  %19203 = vst [vmem:[#allocation142_spill] sm:$0xff] %v15497_v7  ;;  %v1692_v10 = vrot.slane %v19205_v27, 1  ;;  %v1657_v27 = vrot.slane %v19212_v11, 1 }
 0x245   :  { %11272 = vmatprep.mubr.msk.f32.mxu0 %vm1106_vm1, %v15451_v13  ;;  %19207 = vst [vmem:[#allocation64_spill] sm:$0xff] %v15512_v47 }
 0x246   :  { %v15528_v38 = vsel %vm1724_vm4, %v1656_v2, %v1692_v10 }
 0x247   :  { %v15460_v20 = vpop.f32.mrb[132].mxu0  ;;  %11746 = vmatmul.mubr.msk.f32.gmra.mrb[110].mxu1 %vm1106_vm1, %v15457_v37  ;;  %19210 = vst [vmem:[#allocation146_spill] sm:$0xff] %v15528_v38 }
 0x248   :  { %v2509_v59 = vpop.f32.mrb[133].mxu0  ;;  %11273 = vmatmul.mubr.msk.f32.gmra.mrb[142].mxu0 %vm1106_vm1, %v15466_v49  ;;  %11748 = vmatprep.mubr.msk.f32.mxu1 %vm1106_vm1, %v15470_v22  ;;  %v19225_v49 = vld [vmem:[#allocation76_spill] sm:$0xff] }
 0x249   :  { %11275 = vmatprep.mubr.msk.f32.mxu0 %vm1106_vm1, %v15479_v63 }
 0x24a   :  { %v15483_v41 = vpop.f32.mrb[12].mxu1 }
 0x24b   :  { %19200 = vst [vmem:[#allocation140_spill] sm:$0xff] %v15483_v41  ;;  %v4827_v59 = vpop.f32.mrb[13].mxu1  ;;  %11749 = vmatmul.mubr.msk.f32.gmra.mrb[22].mxu1 %vm1106_vm1, %v15487_v14  ;;  %v15501_v41 = vsel %vm1724_vm4, %v1691_v6, %v1619_v43  ;;  %v11116_v16 = vpop.f32.mrb[134].mxu0 }
 0x24c   :  { %19204 = vst [vmem:[#allocation143_spill] sm:$0xff] %v15501_v41  ;;  %11276 = vmatmul.mubr.msk.f32.gmra.mrb[212].mxu0 %vm1106_vm1, %v15497_v7  ;;  %11751 = vmatprep.mubr.msk.f32.mxu1 %vm1106_vm1, %v15501_v41  ;;  %v15514_v17 = vpop.f32.mrb[135].mxu0  ;;  %v15520_v16 = vsel %vm1724_vm4, %v1620_v5, %v1656_v2  ;;  %v1621_v59 = vrot.slane %v19211_v8, 1  ;;  %v1693_v2 = vrot.slane %v19216_v34, 1  ;;  %v19223_v7 = vld [vmem:[#allocation79_spill] sm:$0xff] }
 0x24d   :  { %11278 = vmatprep.mubr.msk.f32.mxu0 %vm1106_vm1, %v15512_v47  ;;  %19208 = vst [vmem:[#allocation144_spill] sm:$0xff] %v15520_v16  ;;  %v1658_v63 = vrot.slane %v19223_v7, 1  ;;  %v19227_v7 = vld [vmem:[#allocation25_spill] sm:$0xff] }
 0x24e   :  { %v11590_v43 = vpop.f32.mrb[14].mxu1  ;;  %v15549_v8 = vsel %vm1724_vm4, %v1621_v59, %v1657_v27 }
 0x24f   :  { %v15522_v6 = vpop.f32.mrb[15].mxu1  ;;  %11752 = vmatmul.mubr.msk.f32.gmra.mrb[112].mxu1 %vm1106_vm1, %v15520_v16  ;;  %v19214_v43 = vld [vmem:[#allocation17_spill] sm:$0xff]  ;;  %19217 = vst [vmem:[#allocation72_spill] sm:$0xff] %v15549_v8 }
 0x250   :  { %19209 = vst [vmem:[#allocation145_spill] sm:$0xff] %v15522_v6  ;;  %11279 = vmatmul.mubr.msk.f32.gmra.mrb[214].mxu0 %vm1106_vm1, %v19213_v42  ;;  %11754 = vmatprep.mubr.msk.f32.mxu1 %vm1106_vm1, %v15528_v38  ;;  %v15540_v6 = vsel %vm1724_vm4, %v1692_v10, %v1620_v5  ;;  %v19218_v42 = vld [vmem:[#allocation19_spill] sm:$0xff]  ;;  %v19219_v10 = vld [vmem:[#allocation21_spill] sm:$0xff]  ;;  %v15561_v5 = vsel %vm1724_vm4, %v1657_v27, %v1693_v2 }
 0x251   :  { %11281 = vmatprep.mubr.msk.f32.mxu0 %vm1106_vm1, %v19214_v43  ;;  %19215 = vst [vmem:[#allocation69_spill] sm:$0xff] %v15540_v6  ;;  %19221 = vst [vmem:[#allocation147_spill] sm:$0xff] %v15561_v5  ;;  %v19222_v43 = vld [vmem:[#allocation75_spill] sm:$0xff] }
 0x252   :  { %v1622_v47 = vrot.slane %v19222_v43, 1 }
 0x253   :  { %v15543_v3 = vpop.f32.mrb[138].mxu0  ;;  %11755 = vmatmul.mubr.msk.f32.gmra.mrb[114].mxu1 %vm1106_vm1, %v15540_v6 }
 0x254   :  { %v2537_v11 = vpop.f32.mrb[139].mxu0  ;;  %11282 = vmatmul.mubr.msk.f32.gmra.mrb[148].mxu0 %vm1106_vm1, %v19218_v42  ;;  %11757 = vmatprep.mubr.msk.f32.mxu1 %vm1106_vm1, %v15549_v8  ;;  %v15569_v42 = vsel %vm1724_vm4, %v1693_v2, %v1621_v59 }
 0x255   :  { %11284 = vmatprep.mubr.msk.f32.mxu0 %vm1106_vm1, %v19219_v10  ;;  %19224 = vst [vmem:[#allocation75_spill] sm:$0xff] %v15569_v42  ;;  %v1694_v10 = vrot.slane %v19225_v49, 1  ;;  %v19231_v49 = vld [vmem:[#allocation83_spill] sm:$0xff] }
 0x256   :  { %v15557_v34 = vpop.f32.mrb[18].mxu1  ;;  %v1623_v2 = vrot.slane %v19231_v49, 1 }
 0x257   :  { %19220 = vst [vmem:[#allocation70_spill] sm:$0xff] %v15557_v34  ;;  %v5005_v11 = vpop.f32.mrb[19].mxu1  ;;  %11758 = vmatmul.mubr.msk.f32.gmra.mrb[28].mxu1 %vm1106_vm1, %v15561_v5  ;;  %v11125_v13 = vpop.f32.mrb[140].mxu0  ;;  %v19226_v34 = vld [vmem:[#allocation22_spill] sm:$0xff] }
 0x258   :  { %11285 = vmatmul.mubr.msk.f32.gmra.mrb[216].mxu0 %vm1106_vm1, %v19226_v34  ;;  %11760 = vmatprep.mubr.msk.f32.mxu1 %vm1106_vm1, %v15569_v42  ;;  %v15576_v27 = vpop.f32.mrb[141].mxu0  ;;  %v15582_v11 = vsel %vm1724_vm4, %v1622_v47, %v1658_v63  ;;  %v15590_v13 = vsel %vm1724_vm4, %v1658_v63, %v1694_v10  ;;  %v19232_v34 = vld [vmem:[#allocation86_spill] sm:$0xff] }
 0x259   :  { %11287 = vmatprep.mubr.msk.f32.mxu0 %vm1106_vm1, %v19227_v7  ;;  %19228 = vst [vmem:[#allocation79_spill] sm:$0xff] %v15582_v11  ;;  %19230 = vst [vmem:[#allocation148_spill] sm:$0xff] %v15590_v13  ;;  %v1659_v50 = vrot.slane %v19232_v34, 1  ;;  %v19236_v7 = vld [vmem:[#allocation84_spill] sm:$0xff] }
 0x25a   :  { %v11601_v43 = vpop.f32.mrb[20].mxu1  ;;  %v1695_v63 = vrot.slane %v19236_v7, 1 }
 0x25b   :  { %v15584_v59 = vpop.f32.mrb[21].mxu1  ;;  %11761 = vmatmul.mubr.msk.f32.gmra.mrb[116].mxu1 %vm1106_vm1, %v15582_v11  ;;  %v19234_v43 = vld [vmem:[#allocation29_spill] sm:$0xff]  ;;  %v15611_v34 = vsel %vm1724_vm4, %v1623_v2, %v1659_v50 }
 0x25c   :  { %19229 = vst [vmem:[#allocation76_spill] sm:$0xff] %v15584_v59  ;;  %11288 = vmatmul.mubr.msk.f32.gmra.mrb[218].mxu0 %vm1106_vm1, %v19233_v40  ;;  %11763 = vmatprep.mubr.msk.f32.mxu1 %vm1106_vm1, %v15590_v13  ;;  %v15602_v59 = vsel %vm1724_vm4, %v1694_v10, %v1622_v47  ;;  %19237 = vst [vmem:[#allocation86_spill] sm:$0xff] %v15611_v34  ;;  %v19238_v40 = vld [vmem:[#allocation31_spill] sm:$0xff]  ;;  %v19239_v47 = vld [vmem:[#allocation36_spill] sm:$0xff]  ;;  %v15623_v7 = vsel %vm1724_vm4, %v1659_v50, %v1695_v63 }
 0x25d   :  { %11290 = vmatprep.mubr.msk.f32.mxu0 %vm1106_vm1, %v19234_v43  ;;  %19235 = vst [vmem:[#allocation83_spill] sm:$0xff] %v15602_v59  ;;  %19241 = vst [vmem:[#allocation149_spill] sm:$0xff] %v15623_v7  ;;  %v19242_v43 = vld [vmem:[#allocation5_spill] sm:$0xff]  ;;  %v19248_v50 = vld [vmem:[#allocation39_spill] sm:$0xff] }
 0x25e   :  { %v1624_v45 = vrot.slane %v19242_v43, 1 }
 0x25f   :  { %v15605_v23 = vpop.f32.mrb[144].mxu0  ;;  %11764 = vmatmul.mubr.msk.f32.gmra.mrb[118].mxu1 %vm1106_vm1, %v15602_v59 }
 0x260   :  { %v2565_v49 = vpop.f32.mrb[145].mxu0  ;;  %11291 = vmatmul.mubr.msk.f32.gmra.mrb[154].mxu0 %vm1106_vm1, %v19238_v40  ;;  %11766 = vmatprep.mubr.msk.f32.mxu1 %vm1106_vm1, %v15611_v34  ;;  %v15632_v40 = vsel %vm1724_vm4, %v1695_v63, %v1623_v2  ;;  %v15645_v43 = vsel %vm1724_vm4, %v1624_v45, %v1660_v52  ;;  %v19250_v2 = vld [vmem:[#allocation105_spill] sm:$0xff] }
 0x261   :  { %11293 = vmatprep.mubr.msk.f32.mxu0 %vm1106_vm1, %v19239_v47  ;;  %v19244_v49 = vld [vmem:[#allocation55_spill] sm:$0xff]  ;;  %19245 = vst [vmem:[#allocation5_spill] sm:$0xff] %v15632_v40  ;;  %v19246_v47 = vld [vmem:[#allocation88_spill] sm:$0xff]  ;;  %19249 = vst [vmem:[#allocation93_spill] sm:$0xff] %v15645_v43  ;;  %v19251_v63 = vrot.slane %v19250_v2, 1 }
 0x262   :  { %v15619_v10 = vpop.f32.mrb[24].mxu1  ;;  %v1652_v19 = vrot.slane %v19244_v49, 1  ;;  %v19257_v2 = vld [vmem:[#allocation107_spill] sm:$0xff] }
 0x263   :  { %19240 = vst [vmem:[#allocation84_spill] sm:$0xff] %v15619_v10  ;;  %v5033_v0 = vpop.f32.mrb[25].mxu1  ;;  %11767 = vmatmul.mubr.msk.f32.gmra.mrb[34].mxu1 %vm1106_vm1, %v15623_v7  ;;  %v1696_v10 = vrot.slane %v19246_v47, 1  ;;  %v11134_v33 = vpop.f32.mrb[146].mxu0 }
 0x264   :  { %11294 = vmatmul.mubr.msk.f32.gmra.mrb[220].mxu0 %vm1106_vm1, %v19247_v60  ;;  %11769 = vmatprep.mubr.msk.f32.mxu1 %vm1106_vm1, %v15632_v40  ;;  %v15639_v51 = vpop.f32.mrb[147].mxu0  ;;  %v1761_v33 = vsel %vm1724_vm4, %v19251_v63, %v1652_v19  ;;  %v19255_v60 = vld [vmem:[#allocation100_spill] sm:$0xff]  ;;  %v19258_v63 = vrot.slane %v19257_v2, 1 }
 0x265   :  { %11296 = vmatprep.mubr.msk.f32.mxu0 %vm1106_vm1, %v19248_v50  ;;  %v15657_v49 = vsel %vm1724_vm4, %v1660_v52, %v1696_v10  ;;  %v19254_v50 = vld [vmem:[#allocation98_spill] sm:$0xff]  ;;  %v1661_v53 = vrot.slane %v19255_v60, 1  ;;  %v15672_v52 = vsel %vm1724_vm4, %v1696_v10, %v1624_v45 }
 0x266   :  { %v11610_v0 = vpop.f32.mrb[26].mxu1  ;;  %19253 = vst [vmem:[#allocation88_spill] sm:$0xff] %v15657_v49  ;;  %19259 = vst [vmem:[#allocation105_spill] sm:$0xff] %v15672_v52  ;;  %v19263_v45 = vld [vmem:[#allocation106_spill] sm:$0xff] }
 0x267   :  { %v15651_v47 = vpop.f32.mrb[27].mxu1  ;;  %11770 = vmatmul.mubr.msk.f32.gmra.mrb[120].mxu1 %vm1106_vm1, %v15645_v43  ;;  %v1625_v0 = vrot.slane %v19254_v50, 1  ;;  %v19260_v50 = vld [vmem:[#allocation99_spill] sm:$0xff] }
 0x268   :  { %19252 = vst [vmem:[#allocation55_spill] sm:$0xff] %v15651_v47  ;;  %11297 = vmatmul.mubr.msk.f32.gmra.mrb[222].mxu0 %vm1106_vm1, %v19256_v35  ;;  %11772 = vmatprep.mubr.msk.f32.mxu1 %vm1106_vm1, %v15657_v49  ;;  %v1725_v47 = vsel %vm1724_vm4, %v1652_v19, %v19258_v63  ;;  %v1697_v39 = vrot.slane %v19260_v50, 1  ;;  %v19262_v19 = vld [vmem:[#allocation109_spill] sm:$0xff]  ;;  %v19266_v63 = vld [vmem:[#allocation10_spill] sm:$0xff] }
 0x269   :  { %11301 = vmatprep.mubr.msk.f32.mxu0 %vm1106_vm1, %v1761_v33  ;;  %v15681_v35 = vsel %vm1724_vm4, %v1625_v0, %v1661_v53  ;;  %v1626_v50 = vrot.slane %v19266_v63, 1 }
 0x26a   :  { %19261 = vst [vmem:[#allocation98_spill] sm:$0xff] %v15681_v35  ;;  %v15694_v2 = vsel %vm1724_vm4, %v1661_v53, %v1697_v39 }
 0x26b   :  { %v15675_v60 = vpop.f32.mrb[150].mxu0  ;;  %11773 = vmatmul.mubr.msk.f32.gmra.mrb[122].mxu1 %vm1106_vm1, %v15672_v52  ;;  %19265 = vst [vmem:[#allocation107_spill] sm:$0xff] %v15694_v2 }
 0x26c   :  { %v2593_v33 = vpop.f32.mrb[151].mxu0  ;;  %11302 = vmatmul.mubr.msk.f32.vlgmr.msra.gmra.mrb[64].mxu0 %vm1106_vm1, %v1725_v47  ;;  %11775 = vmatprep.mubr.msk.f32.mxu1 %vm1106_vm1, %v15681_v35 }
 0x26d   :  { %11304 = vmatprep.mubr.msk.f32.mxu0 %vm1106_vm1, %v19262_v19  ;;  %11446 = vmatpush3.msk.msra.mxu0 %vm2121_vm2, %v19263_v45  ;;  %v19267_v33 = vld [vmem:[#allocation103_spill] sm:$0xff]  ;;  %v15702_v19 = vsel %vm1724_vm4, %v1697_v39, %v1625_v0  ;;  %v1698_v45 = vrot.slane %v12715_v21, 1  ;;  %v12716_v21 = vld [vmem:[#allocation2 + $0x108] sm:$0xff]  ;;  %v12717_v0 = vld [vmem:[#allocation2 + $0x110] sm:$0xff] }
 0x26e   :  { %v15690_v10 = vpop.f32.mrb[30].mxu1  ;;  %v1662_v30 = vrot.slane %v19267_v33, 1  ;;  %19268 = vst [vmem:[#allocation99_spill] sm:$0xff] %v15702_v19 }
 0x26f   :  { %19264 = vst [vmem:[#allocation100_spill] sm:$0xff] %v15690_v10  ;;  %v5061_v47 = vpop.f32.mrb[31].mxu1  ;;  %11776 = vmatmul.mubr.msk.f32.gmra.mrb[40].mxu1 %vm1106_vm1, %v15694_v2  ;;  %v11143_v4 = vpop.f32.mrb[152].mxu0 }
 0x270   :  { %11305 = vmatmul.mubr.msk.f32.gmra.mrb[224].mxu0 %vm1106_vm1, %v15376_v31  ;;  %11778 = vmatprep.mubr.msk.f32.mxu1 %vm1106_vm1, %v15702_v19  ;;  %v15708_v53 = vpop.f32.mrb[153].mxu0  ;;  %v15714_v33 = vsel %vm1724_vm4, %v1626_v50, %v1662_v30  ;;  %v15722_v4 = vsel %vm1724_vm4, %v1662_v30, %v1698_v45  ;;  %v1627_v31 = vrot.slane %v12716_v21, 1  ;;  %v1663_v47 = vrot.slane %v12717_v0, 1  ;;  %v12719_v0 = vld [vmem:[#allocation2 + $0x120] sm:$0xff] }
 0x271   :  { %11307 = vmatprep.mubr.msk.f32.mxu0 %vm1106_vm1, %v15395_v46  ;;  %19269 = vst [vmem:[#allocation109_spill] sm:$0xff] %v15714_v33  ;;  %19271 = vst [vmem:[#allocation10_spill] sm:$0xff] %v15722_v4  ;;  %v15732_v46 = vsel %vm1724_vm4, %v1698_v45, %v1626_v50 }
 0x272   :  { %v11619_v63 = vpop.f32.mrb[32].mxu1  ;;  %19272 = vst [vmem:[#allocation103_spill] sm:$0xff] %v15732_v46 }
 0x273   :  { %v15716_v39 = vpop.f32.mrb[33].mxu1  ;;  %11779 = vmatmul.mubr.msk.f32.gmra.mrb[124].mxu1 %vm1106_vm1, %v15714_v33  ;;  %v12718_v63 = vld [vmem:[#allocation2 + $0x118] sm:$0xff] }
 0x274   :  { %19270 = vst [vmem:[#allocation106_spill] sm:$0xff] %v15716_v39  ;;  %11308 = vmatmul.mubr.msk.f32.gmra.mrb[226].mxu0 %vm1106_vm1, %v15412_v18  ;;  %11781 = vmatprep.mubr.msk.f32.mxu1 %vm1106_vm1, %v15722_v4  ;;  %v1699_v30 = vrot.slane %v12718_v63, 1  ;;  %v15740_v18 = vsel %vm1724_vm4, %v1627_v31, %v1663_v47  ;;  %v1628_v63 = vrot.slane %v12719_v0, 1 }
 0x275   :  { %11310 = vmatprep.mubr.msk.f32.mxu0 %vm1106_vm1, %v15428_v57  ;;  %19273 = vst [vmem:[#allocation150_spill] sm:$0xff] %v15740_v18  ;;  %v12720_v57 = vld [vmem:[#allocation2 + $0x128] sm:$0xff] }
 0x276   :  { %v15752_v45 = vsel %vm1724_vm4, %v1663_v47, %v1699_v30  ;;  %v1664_v10 = vrot.slane %v12720_v57, 1 }
 0x277   :  { %v15734_v39 = vpop.f32.mrb[156].mxu0  ;;  %11782 = vmatmul.mubr.msk.f32.gmra.mrb[126].mxu1 %vm1106_vm1, %v15732_v46  ;;  %19275 = vst [vmem:[#allocation152_spill] sm:$0xff] %v15752_v45 }
 0x278   :  { %v2621_v21 = vpop.f32.mrb[157].mxu0  ;;  %11311 = vmatmul.mubr.msk.f32.gmra.mrb[70].mxu0 %vm1106_vm1, %v15432_v56  ;;  %11784 = vmatprep.mubr.msk.f32.mxu1 %vm1106_vm1, %v15740_v18  ;;  %v15758_v56 = vsel %vm1724_vm4, %v1699_v30, %v1627_v31  ;;  %v15770_v0 = vsel %vm1724_vm4, %v1628_v63, %v1664_v10  ;;  %v12722_v30 = vld [vmem:[#allocation2 + $0x138] sm:$0xff] }
 0x279   :  { %11313 = vmatprep.mubr.msk.f32.mxu0 %vm1106_vm1, %v15457_v37  ;;  %19276 = vst [vmem:[#allocation153_spill] sm:$0xff] %v15758_v56  ;;  %v1700_v37 = vrot.slane %v12721_v1, 1  ;;  %19277 = vst [vmem:[#allocation154_spill] sm:$0xff] %v15770_v0 }
 0x27a   :  { %v15748_v50 = vpop.f32.mrb[36].mxu1 }
 0x27b   :  { %19274 = vst [vmem:[#allocation151_spill] sm:$0xff] %v15748_v50  ;;  %v5089_v21 = vpop.f32.mrb[37].mxu1  ;;  %11785 = vmatmul.mubr.msk.f32.gmra.mrb[46].mxu1 %vm1106_vm1, %v15752_v45  ;;  %v11152_v55 = vpop.f32.mrb[158].mxu0  ;;  %v15783_v31 = vsel %vm1724_vm4, %v1664_v10, %v1700_v37  ;;  %v15795_v10 = vsel %vm1724_vm4, %v1700_v37, %v1628_v63  ;;  %v12725_v50 = vld [vmem:[#allocation2 + $0x150] sm:$0xff] }
 0x27c   :  { %11314 = vmatmul.mubr.msk.f32.gmra.mrb[228].mxu0 %vm1106_vm1, %v15470_v22  ;;  %11787 = vmatprep.mubr.msk.f32.mxu1 %vm1106_vm1, %v15758_v56  ;;  %v15764_v47 = vpop.f32.mrb[159].mxu0  ;;  %v15775_v55 = vld [vmem:[%s18611_s7 + $0x1c] sm:$0xf]  ;;  %19279 = vst [vmem:[#allocation156_spill] sm:$0xff] %v15783_v31  ;;  %v1629_v21 = vrot.slane %v12722_v30, 1  ;;  %19280 = vst [vmem:[#allocation157_spill] sm:$0xff] %v15795_v10 }
 0x27d   :  { %11316 = vmatprep.mubr.msk.f32.mxu0 %vm1106_vm1, %v15487_v14  ;;  %12029 = vmatprep.subr.msk.mxu1 %vm2121_vm2, %v15775_v55  ;;  %v12724_v22 = vld [vmem:[#allocation2 + $0x148] sm:$0xff] }
 0x27e   :  { %v11628_v57 = vpop.f32.mrb[38].mxu1  ;;  %v1701_v30 = vrot.slane %v12724_v22, 1 }
 0x27f   :  { %v15777_v1 = vpop.f32.mrb[39].mxu1  ;;  %11788 = vmatmul.mubr.msk.f32.gmra.mrb[128].mxu1 %vm1106_vm1, %v15770_v0  ;;  %v12723_v57 = vld [vmem:[#allocation2 + $0x140] sm:$0xff] }
 0x280   :  { %19278 = vst [vmem:[#allocation155_spill] sm:$0xff] %v15777_v1  ;;  %v1665_v14 = vrot.slane %v12723_v57, 1  ;;  %11317 = vmatmul.mubr.msk.f32.gmra.mrb[230].mxu0 %vm1106_vm1, %v15501_v41  ;;  %11790 = vmatprep.mubr.msk.f32.mxu1 %vm1106_vm1, %v15783_v31 }
 0x281   :  { %11319 = vmatprep.mubr.msk.f32.mxu0 %vm1106_vm1, %v15520_v16  ;;  %v19282_v16 = vld [vmem:[#allocation67_spill] sm:$0xff] }
 0x282   :  { %v15801_v57 = vsel %vm1724_vm4, %v1629_v21, %v1665_v14  ;;  %v15816_v63 = vsel %vm1724_vm4, %v1665_v14, %v1701_v30 }
 0x283   :  { %v11160_v1 = vpop.f32.mrb[160].mxu0  ;;  %11791 = vmatmul.mubr.msk.f32.gmra.mrb[130].mxu1 %vm1106_vm1, %v15795_v10  ;;  %19281 = vst [vmem:[#allocation158_spill] sm:$0xff] %v15801_v57  ;;  %19285 = vst [vmem:[#allocation160_spill] sm:$0xff] %v15816_v63 }
 0x284   :  { %v3005_v41 = vpop.f32.mrb[161].mxu0  ;;  %11320 = vmatmul.mubr.msk.f32.gmra.mrb[76].mxu0 %vm1106_vm1, %v15528_v38  ;;  %11793 = vmatprep.mubr.msk.f32.mxu1 %vm1106_vm1, %v15801_v57  ;;  %v15808_v37 = vadd.f32 %v11160_v1, %v19282_v16  ;;  %v15822_v16 = vsel %vm1724_vm4, %v1701_v30, %v1629_v21  ;;  %v12727_v1 = vld [vmem:[#allocation2 + $0x160] sm:$0xff]  ;;  %v12728_v30 = vld [vmem:[#allocation2 + $0x168] sm:$0xff] }
 0x285   :  { %11322 = vmatprep.mubr.msk.f32.mxu0 %vm1106_vm1, %v15540_v6  ;;  %v1630_v41 = vrot.slane %v12725_v50, 1  ;;  %19286 = vst [vmem:[#allocation161_spill] sm:$0xff] %v15822_v16  ;;  %v1702_v6 = vrot.slane %v12727_v1, 1  ;;  %v1631_v1 = vrot.slane %v12728_v30, 1 }
 0x286   :  { %19283 = vst [vmem:[#allocation67_spill] sm:$0xff] %v15808_v37  ;;  %v15812_v22 = vpop.f32.mrb[42].mxu1 }
 0x287   :  { %19284 = vst [vmem:[#allocation159_spill] sm:$0xff] %v15812_v22  ;;  %v11163_v38 = vpop.f32.mrb[162].mxu0  ;;  %v5117_v48 = vpop.f32.mrb[43].mxu1  ;;  %11794 = vmatmul.mubr.msk.f32.gmra.mrb[52].mxu1 %vm1106_vm1, %v15816_v63  ;;  %v15843_v21 = vsel %vm1724_vm4, %v1666_v26, %v1702_v6 }
 0x288   :  { %v3014_v22 = vpop.f32.mrb[163].mxu0  ;;  %11323 = vmatmul.mubr.msk.f32.gmra.mrb[232].mxu0 %vm1106_vm1, %v15549_v8  ;;  %11796 = vmatprep.mubr.msk.f32.mxu1 %vm1106_vm1, %v15822_v16  ;;  %v19287_v48 = vld [vmem:[#allocation77_spill] sm:$0xff]  ;;  %v15835_v38 = vsel %vm1724_vm4, %v1630_v41, %v1666_v26  ;;  %19291 = vst [vmem:[#allocation164_spill] sm:$0xff] %v15843_v21 }
 0x289   :  { %11325 = vmatprep.mubr.msk.f32.mxu0 %vm1106_vm1, %v15561_v5  ;;  %v15831_v28 = vadd.f32 %v3014_v22, %v19287_v48  ;;  %19289 = vst [vmem:[#allocation162_spill] sm:$0xff] %v15835_v38  ;;  %v12729_v5 = vld [vmem:[#allocation2 + $0x170] sm:$0xff]  ;;  %v15853_v22 = vsel %vm1724_vm4, %v1702_v6, %v1630_v41  ;;  %v12730_v48 = vld [vmem:[#allocation2 + $0x178] sm:$0xff] }
 0x28a   :  { %v11637_v14 = vpop.f32.mrb[44].mxu1  ;;  %v1667_v8 = vrot.slane %v12729_v5, 1  ;;  %19292 = vst [vmem:[#allocation165_spill] sm:$0xff] %v15853_v22  ;;  %v1703_v26 = vrot.slane %v12730_v48, 1  ;;  %v19295_v41 = vld [vmem:[#allocation90_spill] sm:$0xff] }
 0x28b   :  { %19288 = vst [vmem:[#allocation77_spill] sm:$0xff] %v15831_v28  ;;  %v15837_v50 = vpop.f32.mrb[45].mxu1  ;;  %11797 = vmatmul.mubr.msk.f32.gmra.mrb[132].mxu1 %vm1106_vm1, %v15835_v38  ;;  %v1632_v48 = vrot.slane %v19295_v41, 1 }
 0x28c   :  { %19290 = vst [vmem:[#allocation163_spill] sm:$0xff] %v15837_v50  ;;  %11326 = vmatmul.mubr.msk.f32.gmra.mrb[234].mxu0 %vm1106_vm1, %v15569_v42  ;;  %11799 = vmatprep.mubr.msk.f32.mxu1 %vm1106_vm1, %v15843_v21  ;;  %v15859_v5 = vsel %vm1724_vm4, %v1631_v1, %v1667_v8  ;;  %v19296_v42 = vld [vmem:[#allocation92_spill] sm:$0xff] }
 0x28d   :  { %11328 = vmatprep.mubr.msk.f32.mxu0 %vm1106_vm1, %v15582_v11  ;;  %19293 = vst [vmem:[#allocation166_spill] sm:$0xff] %v15859_v5  ;;  %v19294_v11 = vld [vmem:[#allocation81_spill] sm:$0xff]  ;;  %v1668_v50 = vrot.slane %v19296_v42, 1 }
 0x28e   :  { %v19301_v42 = vld [vmem:[#allocation89_spill] sm:$0xff] }
 0x28f   :  { %v11169_v14 = vpop.f32.mrb[164].mxu0  ;;  %11800 = vmatmul.mubr.msk.f32.gmra.mrb[134].mxu1 %vm1106_vm1, %v15853_v22 }
 0x290   :  { %v3033_v30 = vpop.f32.mrb[165].mxu0  ;;  %11329 = vmatmul.mubr.msk.f32.gmra.mrb[82].mxu0 %vm1106_vm1, %v15590_v13  ;;  %11802 = vmatprep.mubr.msk.f32.mxu1 %vm1106_vm1, %v15859_v5  ;;  %v15866_v6 = vadd.f32 %v11169_v14, %v19294_v11  ;;  %v19299_v13 = vld [vmem:[#allocation95_spill] sm:$0xff]  ;;  %v15883_v11 = vsel %vm1724_vm4, %v1703_v26, %v1631_v1 }
 0x291   :  { %11331 = vmatprep.mubr.msk.f32.mxu0 %vm1106_vm1, %v15602_v59  ;;  %v15876_v30 = vsel %vm1724_vm4, %v1667_v8, %v1703_v26  ;;  %v1704_v54 = vrot.slane %v19299_v13, 1  ;;  %19300 = vst [vmem:[#allocation92_spill] sm:$0xff] %v15883_v11  ;;  %v12732_v26 = vld [vmem:[#allocation2 + $0x1d0] sm:$0xff] }
 0x292   :  { %v15872_v61 = vpop.f32.mrb[48].mxu1  ;;  %19298 = vst [vmem:[#allocation90_spill] sm:$0xff] %v15876_v30  ;;  %v1671_v41 = vrot.slane %v12732_v26, 1 }
 0x293   :  { %19297 = vst [vmem:[#allocation81_spill] sm:$0xff] %v15872_v61  ;;  %v11172_v28 = vpop.f32.mrb[166].mxu0  ;;  %v5145_v37 = vpop.f32.mrb[49].mxu1  ;;  %11803 = vmatmul.mubr.msk.f32.gmra.mrb[58].mxu1 %vm1106_vm1, %v15876_v30 }
 0x294   :  { %v3042_v14 = vpop.f32.mrb[167].mxu0  ;;  %11332 = vmatmul.mubr.msk.f32.gmra.mrb[236].mxu0 %vm1106_vm1, %v15611_v34  ;;  %11805 = vmatprep.mubr.msk.f32.mxu1 %vm1106_vm1, %v15883_v11  ;;  %v15896_v37 = vsel %vm1724_vm4, %v1632_v48, %v1668_v50  ;;  %v12731_v28 = vld [vmem:[#allocation2 + $0x1c8] sm:$0xff] }
 0x295   :  { %11334 = vmatprep.mubr.msk.f32.mxu0 %vm1106_vm1, %v15623_v7  ;;  %v15892_v8 = vadd.f32 %v3042_v14, %v19301_v42  ;;  %19302 = vst [vmem:[#allocation95_spill] sm:$0xff] %v15896_v37  ;;  %v1635_v1 = vrot.slane %v12731_v28, 1  ;;  %v15904_v7 = vsel %vm1724_vm4, %v1668_v50, %v1704_v54  ;;  %v12733_v14 = vld [vmem:[#allocation2 + $0x1d8] sm:$0xff] }
 0x296   :  { %v11646_v13 = vpop.f32.mrb[50].mxu1  ;;  %19304 = vst [vmem:[#allocation167_spill] sm:$0xff] %v15904_v7  ;;  %v1707_v42 = vrot.slane %v12733_v14, 1  ;;  %v19306_v14 = vld [vmem:[#allocation96_spill] sm:$0xff] }
 0x297   :  { %v15898_v59 = vpop.f32.mrb[51].mxu1  ;;  %11806 = vmatmul.mubr.msk.f32.gmra.mrb[136].mxu1 %vm1106_vm1, %v15896_v37  ;;  %v15914_v13 = vsel %vm1724_vm4, %v1704_v54, %v1632_v48  ;;  %v15920_v50 = vsel %vm1724_vm4, %v1635_v1, %v1671_v41  ;;  %v12735_v37 = vld [vmem:[#allocation2 + $0x1e8] sm:$0xff] }
 0x298   :  { %19303 = vst [vmem:[#allocation89_spill] sm:$0xff] %v15898_v59  ;;  %11335 = vmatmul.mubr.msk.f32.gmra.mrb[238].mxu0 %vm1106_vm1, %v15632_v40  ;;  %11808 = vmatprep.mubr.msk.f32.mxu1 %vm1106_vm1, %v15904_v7  ;;  %19305 = vst [vmem:[#allocation168_spill] sm:$0xff] %v15914_v13  ;;  %v15935_v48 = vsel %vm1724_vm4, %v1671_v41, %v1707_v42 }
 0x299   :  { %11337 = vmatprep.mubr.msk.f32.mxu0 %vm1106_vm1, %v15645_v43  ;;  %v1672_v43 = vrot.slane %v12735_v37, 1 }
 0x29b   :  { %v11178_v28 = vpop.f32.mrb[168].mxu0  ;;  %11809 = vmatmul.mubr.msk.f32.gmra.mrb[138].mxu1 %vm1106_vm1, %v15914_v13  ;;  %v12734_v13 = vld [vmem:[#allocation2 + $0x1e0] sm:$0xff] }
 0x29c   :  { %v3061_v26 = vpop.f32.mrb[169].mxu0  ;;  %11338 = vmatmul.mubr.msk.f32.gmra.mrb[88].mxu0 %vm1106_vm1, %v15657_v49  ;;  %11811 = vmatprep.mubr.msk.f32.mxu1 %vm1106_vm1, %v15920_v50  ;;  %v15927_v7 = vadd.f32 %v11178_v28, %v19306_v14  ;;  %v15941_v28 = vsel %vm1724_vm4, %v1707_v42, %v1635_v1  ;;  %v12736_v14 = vld [vmem:[#allocation2 + $0x1f0] sm:$0xff] }
 0x29d   :  { %11340 = vmatprep.mubr.msk.f32.mxu0 %vm1106_vm1, %v15672_v52  ;;  %v1636_v26 = vrot.slane %v12734_v13, 1  ;;  %v1708_v52 = vrot.slane %v12736_v14, 1  ;;  %v12737_v13 = vld [vmem:[#allocation2 + $0x1f8] sm:$0xff] }
 0x29e   :  { %v15931_v54 = vpop.f32.mrb[54].mxu1  ;;  %v1637_v14 = vrot.slane %v12737_v13, 1 }
 0x29f   :  { %19307 = vst [vmem:[#allocation96_spill] sm:$0xff] %v15931_v54  ;;  %v11181_v49 = vpop.f32.mrb[170].mxu0  ;;  %v5173_v40 = vpop.f32.mrb[55].mxu1  ;;  %11812 = vmatmul.mubr.msk.f32.gmra.mrb[64].mxu1 %vm1106_vm1, %v15935_v48  ;;  %v15954_v1 = vsel %vm1724_vm4, %v1636_v26, %v1672_v43  ;;  %v15962_v42 = vsel %vm1724_vm4, %v1672_v43, %v1708_v52 }
 0x2a0   :  { %v3070_v34 = vpop.f32.mrb[171].mxu0  ;;  %11341 = vmatmul.mubr.msk.f32.gmra.mrb[240].mxu0 %vm1106_vm1, %v15681_v35  ;;  %11814 = vmatprep.mubr.msk.f32.mxu1 %vm1106_vm1, %v15941_v28  ;;  %v19308_v40 = vld [vmem:[#allocation102_spill] sm:$0xff]  ;;  %19310 = vst [vmem:[#allocation169_spill] sm:$0xff] %v15954_v1  ;;  %19312 = vst [vmem:[#allocation171_spill] sm:$0xff] %v15962_v42 }
 0x2a1   :  { %11343 = vmatprep.mubr.msk.f32.mxu0 %vm1106_vm1, %v15694_v2  ;;  %v15950_v49 = vadd.f32 %v3070_v34, %v19308_v40  ;;  %v12738_v2 = vld [vmem:[#allocation2 + $0x200] sm:$0xff]  ;;  %v15972_v34 = vsel %vm1724_vm4, %v1708_v52, %v1636_v26  ;;  %v12739_v40 = vld [vmem:[#allocation2 + $0x208] sm:$0xff] }
 0x2a2   :  { %v11655_v37 = vpop.f32.mrb[56].mxu1  ;;  %v1673_v35 = vrot.slane %v12738_v2, 1  ;;  %19313 = vst [vmem:[#allocation172_spill] sm:$0xff] %v15972_v34  ;;  %v1709_v43 = vrot.slane %v12739_v40, 1 }
 0x2a3   :  { %19309 = vst [vmem:[#allocation102_spill] sm:$0xff] %v15950_v49  ;;  %v15956_v41 = vpop.f32.mrb[57].mxu1  ;;  %11815 = vmatmul.mubr.msk.f32.gmra.mrb[140].mxu1 %vm1106_vm1, %v15954_v1 }
 0x2a4   :  { %19311 = vst [vmem:[#allocation170_spill] sm:$0xff] %v15956_v41  ;;  %11344 = vmatmul.mubr.msk.f32.gmra.mrb[242].mxu0 %vm1106_vm1, %v15702_v19  ;;  %11817 = vmatprep.mubr.msk.f32.mxu1 %vm1106_vm1, %v15962_v42  ;;  %v15978_v2 = vsel %vm1724_vm4, %v1637_v14, %v1673_v35  ;;  %v15993_v40 = vsel %vm1724_vm4, %v1673_v35, %v1709_v43  ;;  %v12740_v19 = vld [vmem:[#allocation2 + $0x210] sm:$0xff]  ;;  %v12741_v41 = vld [vmem:[#allocation2 + $0x218] sm:$0xff] }
 0x2a5   :  { %11346 = vmatprep.mubr.msk.f32.mxu0 %vm1106_vm1, %v15714_v33  ;;  %19314 = vst [vmem:[#allocation173_spill] sm:$0xff] %v15978_v2  ;;  %v19315_v33 = vld [vmem:[#allocation104_spill] sm:$0xff]  ;;  %19318 = vst [vmem:[#allocation175_spill] sm:$0xff] %v15993_v40  ;;  %v1674_v54 = vrot.slane %v12741_v41, 1  ;;  %v19320_v35 = vld [vmem:[#allocation18_spill] sm:$0xff] }
 0x2a7   :  { %v11187_v37 = vpop.f32.mrb[172].mxu0  ;;  %11818 = vmatmul.mubr.msk.f32.gmra.mrb[142].mxu1 %vm1106_vm1, %v15972_v34 }
 0x2a8   :  { %v3089_v13 = vpop.f32.mrb[173].mxu0  ;;  %11347 = vmatmul.mubr.msk.f32.gmra.mrb[94].mxu0 %vm1106_vm1, %v15722_v4  ;;  %11820 = vmatprep.mubr.msk.f32.mxu1 %vm1106_vm1, %v15978_v2  ;;  %v15985_v52 = vadd.f32 %v11187_v37, %v19315_v33  ;;  %v15999_v33 = vsel %vm1724_vm4, %v1709_v43, %v1637_v14  ;;  %v12742_v37 = vld [vmem:[#allocation2 + $0x220] sm:$0xff]  ;;  %v12743_v43 = vld [vmem:[#allocation2 + $0x228] sm:$0xff] }
 0x2a9   :  { %11349 = vmatprep.mubr.msk.f32.mxu0 %vm1106_vm1, %v15732_v46  ;;  %v1638_v13 = vrot.slane %v12740_v19, 1  ;;  %19319 = vst [vmem:[#allocation176_spill] sm:$0xff] %v15999_v33  ;;  %v1710_v46 = vrot.slane %v12742_v37, 1  ;;  %v1639_v37 = vrot.slane %v12743_v43, 1 }
 0x2aa   :  { %19316 = vst [vmem:[#allocation104_spill] sm:$0xff] %v15985_v52  ;;  %v15989_v26 = vpop.f32.mrb[60].mxu1 }
 0x2ab   :  { %19317 = vst [vmem:[#allocation174_spill] sm:$0xff] %v15989_v26  ;;  %v11190_v4 = vpop.f32.mrb[174].mxu0  ;;  %v5201_v59 = vpop.f32.mrb[61].mxu1  ;;  %11821 = vmatmul.mubr.msk.f32.gmra.mrb[70].mxu1 %vm1106_vm1, %v15993_v40  ;;  %v16020_v14 = vsel %vm1724_vm4, %v1674_v54, %v1710_v46 }
 0x2ac   :  { %v3098_v26 = vpop.f32.mrb[175].mxu0  ;;  %11350 = vmatmul.mubr.msk.f32.gmra.mrb[244].mxu0 %vm1106_vm1, %v15740_v18  ;;  %11823 = vmatprep.mubr.msk.f32.mxu1 %vm1106_vm1, %v15999_v33  ;;  %v16012_v4 = vsel %vm1724_vm4, %v1638_v13, %v1674_v54  ;;  %19324 = vst [vmem:[#allocation179_spill] sm:$0xff] %v16020_v14 }
 0x2ad   :  { %11352 = vmatprep.mubr.msk.f32.mxu0 %vm1106_vm1, %v15752_v45  ;;  %v16008_v59 = vadd.f32 %v3098_v26, %v19320_v35  ;;  %19322 = vst [vmem:[#allocation177_spill] sm:$0xff] %v16012_v4  ;;  %v12744_v45 = vld [vmem:[#allocation2 + $0x230] sm:$0xff]  ;;  %v16030_v26 = vsel %vm1724_vm4, %v1710_v46, %v1638_v13  ;;  %v12745_v35 = vld [vmem:[#allocation2 + $0x238] sm:$0xff] }
 0x2ae   :  { %v11664_v19 = vpop.f32.mrb[62].mxu1  ;;  %v1675_v18 = vrot.slane %v12744_v45, 1  ;;  %19325 = vst [vmem:[#allocation180_spill] sm:$0xff] %v16030_v26  ;;  %v1711_v54 = vrot.slane %v12745_v35, 1 }
 0x2af   :  { %19321 = vst [vmem:[#allocation18_spill] sm:$0xff] %v16008_v59  ;;  %v16014_v41 = vpop.f32.mrb[63].mxu1  ;;  %11824 = vmatmul.mubr.msk.f32.gmra.mrb[144].mxu1 %vm1106_vm1, %v16012_v4 }
 0x2b0   :  { %19323 = vst [vmem:[#allocation178_spill] sm:$0xff] %v16014_v41  ;;  %11353 = vmatmul.mubr.msk.f32.gmra.mrb[246].mxu0 %vm1106_vm1, %v15758_v56  ;;  %11826 = vmatprep.mubr.msk.f32.mxu1 %vm1106_vm1, %v16020_v14  ;;  %v16036_v45 = vsel %vm1724_vm4, %v1639_v37, %v1675_v18  ;;  %v16051_v35 = vsel %vm1724_vm4, %v1675_v18, %v1711_v54  ;;  %v12746_v56 = vld [vmem:[#allocation2 + $0x240] sm:$0xff]  ;;  %v12747_v41 = vld [vmem:[#allocation2 + $0x248] sm:$0xff] }
 0x2b1   :  { %11355 = vmatprep.mubr.msk.f32.mxu0 %vm1106_vm1, %v15770_v0  ;;  %19326 = vst [vmem:[#allocation181_spill] sm:$0xff] %v16036_v45  ;;  %v19327_v0 = vld [vmem:[#allocation110_spill] sm:$0xff]  ;;  %19330 = vst [vmem:[#allocation183_spill] sm:$0xff] %v16051_v35  ;;  %v1676_v61 = vrot.slane %v12747_v41, 1 }
 0x2b3   :  { %v11196_v19 = vpop.f32.mrb[176].mxu0  ;;  %11827 = vmatmul.mubr.msk.f32.gmra.mrb[146].mxu1 %vm1106_vm1, %v16030_v26 }
 0x2b4   :  { %v3117_v43 = vpop.f32.mrb[177].mxu0  ;;  %11356 = vmatmul.mubr.msk.f32.gmra.mrb[100].mxu0 %vm1106_vm1, %v15783_v31  ;;  %11829 = vmatprep.mubr.msk.f32.mxu1 %vm1106_vm1, %v16036_v45  ;;  %v16043_v46 = vadd.f32 %v11196_v19, %v19327_v0  ;;  %v16057_v0 = vsel %vm1724_vm4, %v1711_v54, %v1639_v37  ;;  %v12748_v19 = vld [vmem:[#allocation2 + $0x250] sm:$0xff]  ;;  %v12749_v54 = vld [vmem:[#allocation2 + $0x258] sm:$0xff] }
 0x2b5   :  { %11358 = vmatprep.mubr.msk.f32.mxu0 %vm1106_vm1, %v15795_v10  ;;  %v1640_v43 = vrot.slane %v12746_v56, 1  ;;  %19331 = vst [vmem:[#allocation184_spill] sm:$0xff] %v16057_v0  ;;  %v1712_v10 = vrot.slane %v12748_v19, 1  ;;  %v19332_v56 = vld [vmem:[#allocation30_spill] sm:$0xff]  ;;  %v1641_v19 = vrot.slane %v12749_v54, 1  ;;  %v19339_v54 = vld [vmem:[#allocation112_spill] sm:$0xff] }
 0x2b6   :  { %19328 = vst [vmem:[#allocation110_spill] sm:$0xff] %v16043_v46  ;;  %v16047_v13 = vpop.f32.mrb[66].mxu1 }
 0x2b7   :  { %19329 = vst [vmem:[#allocation182_spill] sm:$0xff] %v16047_v13  ;;  %v11199_v31 = vpop.f32.mrb[178].mxu0  ;;  %v5229_v59 = vpop.f32.mrb[67].mxu1  ;;  %11830 = vmatmul.mubr.msk.f32.gmra.mrb[76].mxu1 %vm1106_vm1, %v16051_v35  ;;  %v16078_v37 = vsel %vm1724_vm4, %v1676_v61, %v1712_v10 }
 0x2b8   :  { %v3126_v13 = vpop.f32.mrb[179].mxu0  ;;  %11359 = vmatmul.mubr.msk.f32.gmra.mrb[248].mxu0 %vm1106_vm1, %v15801_v57  ;;  %11832 = vmatprep.mubr.msk.f32.mxu1 %vm1106_vm1, %v16057_v0  ;;  %v16070_v59 = vsel %vm1724_vm4, %v1640_v43, %v1676_v61  ;;  %19336 = vst [vmem:[#allocation187_spill] sm:$0xff] %v16078_v37 }
 0x2b9   :  { %11361 = vmatprep.mubr.msk.f32.mxu0 %vm1106_vm1, %v15816_v63  ;;  %v16066_v18 = vadd.f32 %v3126_v13, %v19332_v56  ;;  %19334 = vst [vmem:[#allocation185_spill] sm:$0xff] %v16070_v59  ;;  %v12750_v63 = vld [vmem:[#allocation2 + $0x260] sm:$0xff]  ;;  %v16088_v13 = vsel %vm1724_vm4, %v1712_v10, %v1640_v43  ;;  %v12751_v56 = vld [vmem:[#allocation2 + $0x268] sm:$0xff]  ;;  %v12752_v10 = vld [vmem:[#allocation2 + $0x1b0] sm:$0xff] }
 0x2ba   :  { %v11673_v31 = vpop.f32.mrb[68].mxu1  ;;  %v1677_v57 = vrot.slane %v12750_v63, 1  ;;  %19337 = vst [vmem:[#allocation188_spill] sm:$0xff] %v16088_v13  ;;  %v1713_v61 = vrot.slane %v12751_v56, 1  ;;  %v1634_v43 = vrot.slane %v12752_v10, 1  ;;  %v12753_v56 = vld [vmem:[#allocation2 + $0x1b8] sm:$0xff] }
 0x2bb   :  { %19333 = vst [vmem:[#allocation30_spill] sm:$0xff] %v16066_v18  ;;  %v16072_v41 = vpop.f32.mrb[69].mxu1  ;;  %11833 = vmatmul.mubr.msk.f32.gmra.mrb[148].mxu1 %vm1106_vm1, %v16070_v59 }
 0x2bc   :  { %19335 = vst [vmem:[#allocation186_spill] sm:$0xff] %v16072_v41  ;;  %11362 = vmatmul.mubr.msk.f32.gmra.mrb[250].mxu0 %vm1106_vm1, %v15822_v16  ;;  %11835 = vmatprep.mubr.msk.f32.mxu1 %vm1106_vm1, %v16078_v37  ;;  %v16094_v63 = vsel %vm1724_vm4, %v1641_v19, %v1677_v57  ;;  %v16115_v10 = vsel %vm1724_vm4, %v1713_v61, %v1641_v19 }
 0x2bd   :  { %11364 = vmatprep.mubr.msk.f32.mxu0 %vm1106_vm1, %v15835_v38  ;;  %19338 = vst [vmem:[#allocation189_spill] sm:$0xff] %v16094_v63  ;;  %v1670_v38 = vrot.slane %v12753_v56, 1  ;;  %19343 = vst [vmem:[#allocation192_spill] sm:$0xff] %v16115_v10  ;;  %v12756_v56 = vld [vmem:[#allocation2 + $0x280] sm:$0xff] }
 0x2bf   :  { %v11205_v31 = vpop.f32.mrb[180].mxu0  ;;  %11836 = vmatmul.mubr.msk.f32.gmra.mrb[150].mxu1 %vm1106_vm1, %v16088_v13 }
 0x2c0   :  { %v16097_v16 = vadd.f32 %v11205_v31, %v19339_v54  ;;  %v3145_v41 = vpop.f32.mrb[181].mxu0  ;;  %11365 = vmatmul.mubr.msk.f32.gmra.mrb[106].mxu0 %vm1106_vm1, %v15843_v21  ;;  %11838 = vmatprep.mubr.msk.f32.mxu1 %vm1106_vm1, %v16094_v63  ;;  %v16109_v31 = vsel %vm1724_vm4, %v1677_v57, %v1713_v61  ;;  %v12757_v57 = vld [vmem:[#allocation2 + $0x1c0] sm:$0xff]  ;;  %v1779_v61 = vsel %vm1724_vm4, %v1634_v43, %v1670_v38 }
 0x2c1   :  { %11367 = vmatprep.mubr.msk.f32.mxu0 %vm1106_vm1, %v15853_v22  ;;  %19342 = vst [vmem:[#allocation191_spill] sm:$0xff] %v16109_v31  ;;  %v12754_v41 = vld [vmem:[#allocation2 + $0x270] sm:$0xff]  ;;  %v1714_v22 = vrot.slane %v12756_v56, 1 }
 0x2c2   :  { %19340 = vst [vmem:[#allocation112_spill] sm:$0xff] %v16097_v16  ;;  %v16105_v18 = vpop.f32.mrb[72].mxu1  ;;  %v1642_v54 = vrot.slane %v12754_v41, 1  ;;  %v12755_v16 = vld [vmem:[#allocation2 + $0x278] sm:$0xff] }
 0x2c3   :  { %19341 = vst [vmem:[#allocation190_spill] sm:$0xff] %v16105_v18  ;;  %v1678_v21 = vrot.slane %v12755_v16, 1  ;;  %v11208_v46 = vpop.f32.mrb[182].mxu0  ;;  %v5257_v52 = vpop.f32.mrb[73].mxu1  ;;  %11839 = vmatmul.mubr.msk.f32.gmra.mrb[82].mxu1 %vm1106_vm1, %v16109_v31  ;;  %v1706_v16 = vrot.slane %v12757_v57, 1  ;;  %v12758_v57 = vld [vmem:[#allocation2 + $0x288] sm:$0xff] }
 0x2c4   :  { %v3154_v18 = vpop.f32.mrb[183].mxu0  ;;  %11368 = vmatmul.mubr.msk.f32.gmra.mrb[252].mxu0 %vm1106_vm1, %v15859_v5  ;;  %11841 = vmatprep.mubr.msk.f32.mxu1 %vm1106_vm1, %v16115_v10  ;;  %v19344_v46 = vld [vmem:[#allocation42_spill] sm:$0xff] }
 0x2c5   :  { %v16122_v52 = vadd.f32 %v3154_v18, %v19344_v46  ;;  %11370 = vmatprep.mubr.msk.f32.mxu0 %vm1106_vm1, %v15876_v30  ;;  %v16128_v19 = vsel %vm1724_vm4, %v1642_v54, %v1678_v21  ;;  %v16138_v18 = vsel %vm1724_vm4, %v1678_v21, %v1714_v22  ;;  %v1643_v46 = vrot.slane %v12758_v57, 1  ;;  %v12759_v30 = vld [vmem:[#allocation2 + $0x290] sm:$0xff]  ;;  %v12760_v57 = vld [vmem:[#allocation2 + $0x298] sm:$0xff] }
 0x2c6   :  { %v11682_v41 = vpop.f32.mrb[74].mxu1  ;;  %19346 = vst [vmem:[#allocation193_spill] sm:$0xff] %v16128_v19  ;;  %19348 = vst [vmem:[#allocation195_spill] sm:$0xff] %v16138_v18  ;;  %v1743_v5 = vsel %vm1724_vm4, %v1670_v38, %v1706_v16  ;;  %v1815_v21 = vsel %vm1724_vm4, %v1706_v16, %v1634_v43 }
 0x2c7   :  { %19345 = vst [vmem:[#allocation42_spill] sm:$0xff] %v16122_v52  ;;  %v16132_v56 = vpop.f32.mrb[75].mxu1  ;;  %11842 = vmatmul.mubr.msk.f32.gmra.mrb[152].mxu1 %vm1106_vm1, %v16128_v19  ;;  %v1679_v41 = vrot.slane %v12759_v30, 1  ;;  %v1715_v30 = vrot.slane %v12760_v57, 1  ;;  %v12762_v57 = vld [vmem:[#allocation2 + $0x2a8] sm:$0xff] }
 0x2c8   :  { %19347 = vst [vmem:[#allocation194_spill] sm:$0xff] %v16132_v56  ;;  %11371 = vmatmul.mubr.msk.f32.gmra.mrb[254].mxu0 %vm1106_vm1, %v15883_v11  ;;  %11844 = vmatprep.mubr.msk.f32.mxu1 %vm1106_vm1, %v16138_v18  ;;  %v16149_v56 = vsel %vm1724_vm4, %v1714_v22, %v1642_v54  ;;  %v12761_v54 = vld [vmem:[#allocation2 + $0x2a0] sm:$0xff]  ;;  %v1680_v49 = vrot.slane %v12762_v57, 1  ;;  %v12764_v57 = vld [vmem:[#allocation2 + $0x2b8] sm:$0xff] }
 0x2c9   :  { %11373 = vmatprep.mubr.msk.f32.mxu0 %vm1106_vm1, %v1779_v61  ;;  %19349 = vst [vmem:[#allocation196_spill] sm:$0xff] %v16149_v56  ;;  %v16157_v11 = vsel %vm1724_vm4, %v1643_v46, %v1679_v41  ;;  %v16170_v43 = vsel %vm1724_vm4, %v1679_v41, %v1715_v30  ;;  %v1644_v16 = vrot.slane %v12761_v54, 1 }
 0x2ca   :  { %19350 = vst [vmem:[#allocation197_spill] sm:$0xff] %v16157_v11  ;;  %19352 = vst [vmem:[#allocation199_spill] sm:$0xff] %v16170_v43 }
 0x2cb   :  { %v11214_v52 = vpop.f32.mrb[184].mxu0  ;;  %11845 = vmatmul.mubr.msk.f32.gmra.mrb[154].mxu1 %vm1106_vm1, %v16149_v56 }
 0x2cc   :  { %v16160_v61 = vadd.f32 %v11214_v52, %v15139_v15  ;;  %v3173_v38 = vpop.f32.mrb[185].mxu0  ;;  %11374 = vmatmul.mubr.msk.f32.gmra.mrb[112].mxu0 %vm1106_vm1, %v1743_v5  ;;  %11847 = vmatprep.mubr.msk.f32.mxu1 %vm1106_vm1, %v16157_v11  ;;  %v16176_v5 = vsel %vm1724_vm4, %v1715_v30, %v1643_v46  ;;  %v16189_v46 = vsel %vm1724_vm4, %v1644_v16, %v1680_v49 }
 0x2cd   :  { %11376 = vmatprep.mubr.msk.f32.mxu0 %vm1106_vm1, %v1815_v21  ;;  %19353 = vst [vmem:[#allocation200_spill] sm:$0xff] %v16176_v5  ;;  %v12763_v21 = vld [vmem:[#allocation2 + $0x2b0] sm:$0xff]  ;;  %19354 = vst [vmem:[#allocation201_spill] sm:$0xff] %v16189_v46 }
 0x2ce   :  { %v16166_v22 = vpop.f32.mrb[78].mxu1  ;;  %v1716_v38 = vrot.slane %v12763_v21, 1 }
 0x2cf   :  { %19351 = vst [vmem:[#allocation198_spill] sm:$0xff] %v16166_v22  ;;  %v11217_v15 = vpop.f32.mrb[186].mxu0  ;;  %v5285_v52 = vpop.f32.mrb[79].mxu1  ;;  %11848 = vmatmul.mubr.msk.f32.gmra.mrb[88].mxu1 %vm1106_vm1, %v16170_v43 }
 0x2d0   :  { %v3182_v22 = vpop.f32.mrb[187].mxu0  ;;  %11377 = vmatmul.mubr.msk.f32.gmra.mrb[0].mxu0 %vm1106_vm1, %v15920_v50  ;;  %11850 = vmatprep.mubr.msk.f32.mxu1 %vm1106_vm1, %v16176_v5  ;;  %v16197_v50 = vsel %vm1724_vm4, %v1680_v49, %v1716_v38  ;;  %v12766_v52 = vld [vmem:[#allocation2 + $0x2c8] sm:$0xff] }
 0x2d1   :  { %v16183_v41 = vadd.f32 %v3182_v22, %v15164_v12  ;;  %11379 = vmatprep.mubr.msk.f32.mxu0 %vm1106_vm1, %v15935_v48  ;;  %19356 = vst [vmem:[#allocation203_spill] sm:$0xff] %v16197_v50  ;;  %v1645_v12 = vrot.slane %v12764_v57, 1  ;;  %v12765_v22 = vld [vmem:[#allocation2 + $0x2c0] sm:$0xff]  ;;  %v16207_v48 = vsel %vm1724_vm4, %v1716_v38, %v1644_v16  ;;  %v1717_v49 = vrot.slane %v12766_v52, 1 }
 0x2d2   :  { %v11691_v54 = vpop.f32.mrb[80].mxu1  ;;  %v1681_v15 = vrot.slane %v12765_v22, 1  ;;  %19357 = vst [vmem:[#allocation204_spill] sm:$0xff] %v16207_v48  ;;  %v12767_v22 = vld [vmem:[#allocation2 + $0x2d0] sm:$0xff] }
 0x2d3   :  { %v16191_v30 = vpop.f32.mrb[81].mxu1  ;;  %11851 = vmatmul.mubr.msk.f32.gmra.mrb[156].mxu1 %vm1106_vm1, %v16189_v46  ;;  %v1646_v52 = vrot.slane %v12767_v22, 1  ;;  %v12770_v22 = vld [vmem:[#allocation2 + $0x2e8] sm:$0xff] }
 0x2d4   :  { %19355 = vst [vmem:[#allocation202_spill] sm:$0xff] %v16191_v30  ;;  %11380 = vmatmul.mubr.msk.f32.gmra.mrb[2].mxu0 %vm1106_vm1, %v15941_v28  ;;  %11853 = vmatprep.mubr.msk.f32.mxu1 %vm1106_vm1, %v16197_v50  ;;  %v16213_v54 = vsel %vm1724_vm4, %v1645_v12, %v1681_v15  ;;  %v16228_v38 = vsel %vm1724_vm4, %v1681_v15, %v1717_v49 }
 0x2d5   :  { %11382 = vmatprep.mubr.msk.f32.mxu0 %vm1106_vm1, %v15954_v1  ;;  %19358 = vst [vmem:[#allocation205_spill] sm:$0xff] %v16213_v54  ;;  %19360 = vst [vmem:[#allocation207_spill] sm:$0xff] %v16228_v38 }
 0x2d7   :  { %v11223_v21 = vpop.f32.mrb[188].mxu0  ;;  %11854 = vmatmul.mubr.msk.f32.gmra.mrb[158].mxu1 %vm1106_vm1, %v16207_v48 }
 0x2d8   :  { %v16216_v28 = vadd.f32 %v11223_v21, %v15185_v25  ;;  %v3201_v57 = vpop.f32.mrb[189].mxu0  ;;  %11383 = vmatmul.mubr.msk.f32.gmra.mrb[118].mxu0 %vm1106_vm1, %v15962_v42  ;;  %11856 = vmatprep.mubr.msk.f32.mxu1 %vm1106_vm1, %v16213_v54  ;;  %v12768_v25 = vld [vmem:[#allocation2 + $0x2d8] sm:$0xff]  ;;  %v16234_v42 = vsel %vm1724_vm4, %v1717_v49, %v1645_v12 }
 0x2d9   :  { %11385 = vmatprep.mubr.msk.f32.mxu0 %vm1106_vm1, %v15972_v34  ;;  %v1682_v21 = vrot.slane %v12768_v25, 1  ;;  %19361 = vst [vmem:[#allocation208_spill] sm:$0xff] %v16234_v42  ;;  %v12769_v34 = vld [vmem:[#allocation2 + $0x2e0] sm:$0xff] }
 0x2da   :  { %v16224_v16 = vpop.f32.mrb[84].mxu1  ;;  %v1718_v30 = vrot.slane %v12769_v34, 1 }
 0x2db   :  { %19359 = vst [vmem:[#allocation206_spill] sm:$0xff] %v16224_v16  ;;  %v11226_v57 = vpop.f32.mrb[190].mxu0  ;;  %v5313_v1 = vpop.f32.mrb[85].mxu1  ;;  %11857 = vmatmul.mubr.msk.f32.gmra.mrb[94].mxu1 %vm1106_vm1, %v16228_v38  ;;  %v16247_v12 = vsel %vm1724_vm4, %v1646_v52, %v1682_v21 }
 0x2dc   :  { %v3210_v16 = vpop.f32.mrb[191].mxu0  ;;  %11386 = vmatmul.mubr.msk.f32.gmra.mrb[4].mxu0 %vm1106_vm1, %v15978_v2  ;;  %11859 = vmatprep.mubr.msk.f32.mxu1 %vm1106_vm1, %v16234_v42  ;;  %19362 = vst [vmem:[#allocation209_spill] sm:$0xff] %v16247_v12  ;;  %v16255_v34 = vsel %vm1724_vm4, %v1682_v21, %v1718_v30  ;;  %v16265_v57 = vsel %vm1724_vm4, %v1718_v30, %v1646_v52 }
 0x2dd   :  { %v16241_v15 = vadd.f32 %v3210_v16, %v15222_v32  ;;  %11388 = vmatprep.mubr.msk.f32.mxu0 %vm1106_vm1, %v15993_v40  ;;  %19364 = vst [vmem:[#allocation211_spill] sm:$0xff] %v16255_v34  ;;  %v1647_v32 = vrot.slane %v12770_v22, 1  ;;  %v12771_v16 = vld [vmem:[#allocation2 + $0x2f0] sm:$0xff]  ;;  %19365 = vst [vmem:[#allocation212_spill] sm:$0xff] %v16265_v57 }
 0x2de   :  { %v11700_v1 = vpop.f32.mrb[86].mxu1  ;;  %v1683_v25 = vrot.slane %v12771_v16, 1 }
 0x2df   :  { %v16249_v49 = vpop.f32.mrb[87].mxu1  ;;  %11860 = vmatmul.mubr.msk.f32.gmra.mrb[160].mxu1 %vm1106_vm1, %v16247_v12  ;;  %v12772_v1 = vld [vmem:[#allocation2 + $0x2f8] sm:$0xff] }
 0x2e0   :  { %19363 = vst [vmem:[#allocation210_spill] sm:$0xff] %v16249_v49  ;;  %11389 = vmatmul.mubr.msk.f32.gmra.mrb[6].mxu0 %vm1106_vm1, %v15999_v33  ;;  %11862 = vmatprep.mubr.msk.f32.mxu1 %vm1106_vm1, %v16255_v34  ;;  %v1719_v21 = vrot.slane %v12772_v1, 1  ;;  %v16271_v22 = vsel %vm1724_vm4, %v1647_v32, %v1683_v25  ;;  %v12773_v1 = vld [vmem:[#allocation2 + $0x300] sm:$0xff] }
 0x2e1   :  { %11391 = vmatprep.mubr.msk.f32.mxu0 %vm1106_vm1, %v16012_v4  ;;  %19366 = vst [vmem:[#allocation213_spill] sm:$0xff] %v16271_v22  ;;  %v1648_v4 = vrot.slane %v12773_v1, 1  ;;  %v12776_v1 = vld [vmem:[#allocation2 + $0x318] sm:$0xff] }
 0x2e2   :  { %v16286_v52 = vsel %vm1724_vm4, %v1683_v25, %v1719_v21 }
 0x2e3   :  { %v11232_v40 = vpop.f32.mrb[192].mxu0  ;;  %11863 = vmatmul.mubr.msk.f32.gmra.mrb[162].mxu1 %vm1106_vm1, %v16265_v57  ;;  %19368 = vst [vmem:[#allocation215_spill] sm:$0xff] %v16286_v52 }
 0x2e4   :  { %v16274_v16 = vadd.f32 %v11232_v40, %v15243_v44  ;;  %v3229_v33 = vpop.f32.mrb[193].mxu0  ;;  %11392 = vmatmul.mubr.msk.f32.gmra.mrb[124].mxu0 %vm1106_vm1, %v16020_v14  ;;  %11865 = vmatprep.mubr.msk.f32.mxu1 %vm1106_vm1, %v16271_v22  ;;  %v12774_v44 = vld [vmem:[#allocation2 + $0x308] sm:$0xff]  ;;  %v16292_v14 = vsel %vm1724_vm4, %v1719_v21, %v1647_v32 }
 0x2e5   :  { %11394 = vmatprep.mubr.msk.f32.mxu0 %vm1106_vm1, %v16030_v26  ;;  %v1684_v40 = vrot.slane %v12774_v44, 1  ;;  %19369 = vst [vmem:[#allocation216_spill] sm:$0xff] %v16292_v14  ;;  %v12775_v26 = vld [vmem:[#allocation2 + $0x310] sm:$0xff] }
 0x2e6   :  { %v16282_v30 = vpop.f32.mrb[90].mxu1  ;;  %v1720_v49 = vrot.slane %v12775_v26, 1 }
 0x2e7   :  { %19367 = vst [vmem:[#allocation214_spill] sm:$0xff] %v16282_v30  ;;  %v11235_v33 = vpop.f32.mrb[194].mxu0  ;;  %v5341_v2 = vpop.f32.mrb[91].mxu1  ;;  %11866 = vmatmul.mubr.msk.f32.gmra.mrb[4].mxu1 %vm1106_vm1, %v16286_v52  ;;  %v16305_v32 = vsel %vm1724_vm4, %v1648_v4, %v1684_v40 }
 0x2e8   :  { %v3238_v30 = vpop.f32.mrb[195].mxu0  ;;  %11395 = vmatmul.mubr.msk.f32.gmra.mrb[8].mxu0 %vm1106_vm1, %v16036_v45  ;;  %11868 = vmatprep.mubr.msk.f32.mxu1 %vm1106_vm1, %v16292_v14  ;;  %19370 = vst [vmem:[#allocation217_spill] sm:$0xff] %v16305_v32  ;;  %v16313_v26 = vsel %vm1724_vm4, %v1684_v40, %v1720_v49  ;;  %v16323_v33 = vsel %vm1724_vm4, %v1720_v49, %v1648_v4 }
 0x2e9   :  { %v16299_v25 = vadd.f32 %v3238_v30, %v15280_v62  ;;  %11397 = vmatprep.mubr.msk.f32.mxu0 %vm1106_vm1, %v16051_v35  ;;  %19372 = vst [vmem:[#allocation219_spill] sm:$0xff] %v16313_v26  ;;  %v1649_v62 = vrot.slane %v12776_v1, 1  ;;  %v12777_v30 = vld [vmem:[#allocation2 + $0x320] sm:$0xff]  ;;  %19373 = vst [vmem:[#allocation220_spill] sm:$0xff] %v16323_v33 }
 0x2ea   :  { %v11709_v2 = vpop.f32.mrb[92].mxu1  ;;  %v1685_v44 = vrot.slane %v12777_v30, 1 }
 0x2eb   :  { %v16307_v21 = vpop.f32.mrb[93].mxu1  ;;  %11869 = vmatmul.mubr.msk.f32.gmra.mrb[164].mxu1 %vm1106_vm1, %v16305_v32  ;;  %v12778_v2 = vld [vmem:[#allocation2 + $0x328] sm:$0xff] }
 0x2ec   :  { %19371 = vst [vmem:[#allocation218_spill] sm:$0xff] %v16307_v21  ;;  %11398 = vmatmul.mubr.msk.f32.gmra.mrb[10].mxu0 %vm1106_vm1, %v16057_v0  ;;  %11871 = vmatprep.mubr.msk.f32.mxu1 %vm1106_vm1, %v16313_v26  ;;  %v1721_v40 = vrot.slane %v12778_v2, 1  ;;  %v16329_v1 = vsel %vm1724_vm4, %v1649_v62, %v1685_v44  ;;  %v12779_v2 = vld [vmem:[#allocation2 + $0x330] sm:$0xff] }
 0x2ed   :  { %11400 = vmatprep.mubr.msk.f32.mxu0 %vm1106_vm1, %v16070_v59  ;;  %19374 = vst [vmem:[#allocation221_spill] sm:$0xff] %v16329_v1  ;;  %v1650_v59 = vrot.slane %v12779_v2, 1 }
 0x2ee   :  { %v16344_v49 = vsel %vm1724_vm4, %v1685_v44, %v1721_v40 }
 0x2ef   :  { %v11241_v35 = vpop.f32.mrb[196].mxu0  ;;  %11872 = vmatmul.mubr.msk.f32.gmra.mrb[166].mxu1 %vm1106_vm1, %v16323_v33  ;;  %19376 = vst [vmem:[#allocation223_spill] sm:$0xff] %v16344_v49 }
 0x2f0   :  { %v16332_v30 = vadd.f32 %v11241_v35, %v15301_v9  ;;  %v3257_v0 = vpop.f32.mrb[197].mxu0  ;;  %11401 = vmatmul.mubr.msk.f32.gmra.mrb[130].mxu0 %vm1106_vm1, %v16078_v37  ;;  %11874 = vmatprep.mubr.msk.f32.mxu1 %vm1106_vm1, %v16329_v1  ;;  %v12780_v9 = vld [vmem:[#allocation2 + $0x338] sm:$0xff]  ;;  %v16350_v37 = vsel %vm1724_vm4, %v1721_v40, %v1649_v62 }
 0x2f1   :  { %11403 = vmatprep.mubr.msk.f32.mxu0 %vm1106_vm1, %v16088_v13  ;;  %v1686_v35 = vrot.slane %v12780_v9, 1  ;;  %19377 = vst [vmem:[#allocation224_spill] sm:$0xff] %v16350_v37  ;;  %v12781_v13 = vld [vmem:[#allocation2 + $0x340] sm:$0xff] }
 0x2f2   :  { %v16340_v4 = vpop.f32.mrb[96].mxu1  ;;  %v1722_v21 = vrot.slane %v12781_v13, 1 }
 0x2f3   :  { %19375 = vst [vmem:[#allocation222_spill] sm:$0xff] %v16340_v4  ;;  %v11244_v0 = vpop.f32.mrb[198].mxu0  ;;  %v5369_v45 = vpop.f32.mrb[97].mxu1  ;;  %11875 = vmatmul.mubr.msk.f32.gmra.mrb[10].mxu1 %vm1106_vm1, %v16344_v49  ;;  %v16363_v62 = vsel %vm1724_vm4, %v1650_v59, %v1686_v35 }
 0x2f4   :  { %v3266_v4 = vpop.f32.mrb[199].mxu0  ;;  %11404 = vmatmul.mubr.msk.f32.gmra.mrb[12].mxu0 %vm1106_vm1, %v16094_v63  ;;  %11877 = vmatprep.mubr.msk.f32.mxu1 %vm1106_vm1, %v16350_v37  ;;  %19378 = vst [vmem:[#allocation225_spill] sm:$0xff] %v16363_v62  ;;  %v16371_v13 = vsel %vm1724_vm4, %v1686_v35, %v1722_v21  ;;  %v19381_v35 = vld [vmem:[#allocation59_spill] sm:$0xff]  ;;  %v19414_v63 = vld [vmem:[#allocation12_spill] sm:$0xff] }
 0x2f5   :  { %v16357_v44 = vadd.f32 %v3266_v4, %v15340_v36  ;;  %11406 = vmatprep.mubr.msk.f32.mxu0 %vm1106_vm1, %v16109_v31  ;;  %19379 = vst [vmem:[#allocation226_spill] sm:$0xff] %v16371_v13  ;;  %v16381_v36 = vsel %vm1724_vm4, %v1722_v21, %v1650_v59 }
 0x2f6   :  { %v11718_v45 = vpop.f32.mrb[98].mxu1  ;;  %19380 = vst [vmem:[#allocation227_spill] sm:$0xff] %v16381_v36 }
 0x2f7   :  { %v16365_v40 = vpop.f32.mrb[99].mxu1  ;;  %11878 = vmatmul.mubr.msk.f32.gmra.mrb[168].mxu1 %vm1106_vm1, %v16363_v62  ;;  %v19382_v45 = vld [vmem:[#allocation60_spill] sm:$0xff]  ;;  %v19388_v62 = vld [vmem:[#allocation66_spill] sm:$0xff] }
 0x2f8   :  { %11407 = vmatmul.mubr.msk.f32.gmra.mrb[14].mxu0 %vm1106_vm1, %v16115_v10  ;;  %11880 = vmatprep.mubr.msk.f32.mxu1 %vm1106_vm1, %v16371_v13  ;;  %v19406_v10 = vld [vmem:[#allocation97_spill] sm:$0xff] }
 0x2f9   :  { %11409 = vmatprep.mubr.msk.f32.mxu0 %vm1106_vm1, %v16128_v19 }
 0x2fb   :  { %v11250_v4 = vpop.f32.mrb[200].mxu0  ;;  %11881 = vmatmul.mubr.msk.f32.gmra.mrb[170].mxu1 %vm1106_vm1, %v16381_v36  ;;  %v19385_v36 = vld [vmem:[#allocation62_spill] sm:$0xff] }
 0x2fc   :  { %v16386_v2 = vadd.f32 %v11250_v4, %v15366_v24  ;;  %v3285_v9 = vpop.f32.mrb[201].mxu0  ;;  %11410 = vmatmul.mubr.msk.f32.gmra.mrb[136].mxu0 %vm1106_vm1, %v16138_v18  ;;  %11885 = vmatprep.mubr.msk.f32.mxu1 %vm1106_vm1, %v19381_v35  ;;  %v19398_v18 = vld [vmem:[#allocation82_spill] sm:$0xff] }
 0x2fd   :  { %11412 = vmatprep.mubr.msk.f32.mxu0 %vm1106_vm1, %v16149_v56  ;;  %v19383_v9 = vld [vmem:[#allocation61_spill] sm:$0xff] }
 0x2fe   :  { %v16394_v0 = vpop.f32.mrb[100].mxu1 }
 0x2ff   :  { %v11253_v59 = vpop.f32.mrb[202].mxu0  ;;  %v5397_v21 = vpop.f32.mrb[101].mxu1  ;;  %11886 = vmatmul.mubr.msk.f32.vlgmr.msra.gmra.mrb[16].mxu1 %vm1106_vm1, %v19382_v45 }
 0x300   :  { %12030 = vmatpush3.msk.msra.mxu1 %vm2121_vm2, %v15775_v55  ;;  %v3294_v24 = vpop.f32.mrb[203].mxu0  ;;  %11413 = vmatmul.mubr.msk.f32.gmra.mrb[16].mxu0 %vm1106_vm1, %v16157_v11  ;;  %v19386_v55 = vld [vmem:[#allocation63_spill] sm:$0xff]  ;;  %v19390_v11 = vld [vmem:[#allocation68_spill] sm:$0xff] }
 0x301   :  { %v16403_v4 = vadd.f32 %v3294_v24, %v15420_v58  ;;  %11888 = vmatprep.mubr.msk.f32.mxu1 %vm1106_vm1, %v19383_v9  ;;  %11415 = vmatprep.mubr.msk.f32.mxu0 %vm1106_vm1, %v16170_v43  ;;  %v19387_v24 = vld [vmem:[#allocation65_spill] sm:$0xff] }
 0x302   :  { %v11727_v59 = vpop.f32.mrb[102].mxu1 }
 0x303   :  { %v16409_v21 = vpop.f32.mrb[103].mxu1  ;;  %11889 = vmatmul.mubr.msk.f32.gmra.mrb[172].mxu1 %vm1106_vm1, %v19385_v36 }
 0x304   :  { %19384 = vst [vmem:[#allocation59_spill] sm:$0xff] %v16409_v21  ;;  %11416 = vmatmul.mubr.msk.f32.gmra.mrb[18].mxu0 %vm1106_vm1, %v16176_v5  ;;  %11891 = vmatprep.mubr.msk.f32.mxu1 %vm1106_vm1, %v19386_v55 }
 0x305   :  { %11418 = vmatprep.mubr.msk.f32.mxu0 %vm1106_vm1, %v16189_v46 }
 0x307   :  { %v11259_v58 = vpop.f32.mrb[204].mxu0  ;;  %11892 = vmatmul.mubr.msk.f32.gmra.mrb[174].mxu1 %vm1106_vm1, %v19387_v24 }
 0x308   :  { %v16422_v59 = vadd.f32 %v11259_v58, %v15460_v20  ;;  %v3313_v13 = vpop.f32.mrb[205].mxu0  ;;  %11419 = vmatmul.mubr.msk.f32.gmra.mrb[142].mxu0 %vm1106_vm1, %v16197_v50  ;;  %11894 = vmatprep.mubr.msk.f32.mxu1 %vm1106_vm1, %v19388_v62  ;;  %v19391_v20 = vld [vmem:[#allocation71_spill] sm:$0xff] }
 0x309   :  { %11421 = vmatprep.mubr.msk.f32.mxu0 %vm1106_vm1, %v16207_v48 }
 0x30a   :  { %v16430_v5 = vpop.f32.mrb[104].mxu1 }
 0x30b   :  { %19389 = vst [vmem:[#allocation60_spill] sm:$0xff] %v16430_v5  ;;  %v11262_v46 = vpop.f32.mrb[206].mxu0  ;;  %v5425_v43 = vpop.f32.mrb[105].mxu1  ;;  %11895 = vmatmul.mubr.msk.f32.gmra.mrb[22].mxu1 %vm1106_vm1, %v19390_v11 }
 0x30c   :  { %v3322_v56 = vpop.f32.mrb[207].mxu0  ;;  %11422 = vmatmul.mubr.msk.f32.gmra.mrb[20].mxu0 %vm1106_vm1, %v16213_v54  ;;  %11897 = vmatprep.mubr.msk.f32.mxu1 %vm1106_vm1, %v19391_v20  ;;  %v19393_v43 = vld [vmem:[#allocation73_spill] sm:$0xff]  ;;  %v19394_v46 = vld [vmem:[#allocation74_spill] sm:$0xff]  ;;  %v19396_v54 = vld [vmem:[#allocation80_spill] sm:$0xff] }
 0x30d   :  { %v16439_v13 = vadd.f32 %v3322_v56, %v15514_v17  ;;  %11424 = vmatprep.mubr.msk.f32.mxu0 %vm1106_vm1, %v16228_v38  ;;  %v19395_v56 = vld [vmem:[#allocation78_spill] sm:$0xff] }
 0x30e   :  { %v11736_v58 = vpop.f32.mrb[106].mxu1 }
 0x30f   :  { %v16443_v48 = vpop.f32.mrb[107].mxu1  ;;  %11898 = vmatmul.mubr.msk.f32.gmra.mrb[176].mxu1 %vm1106_vm1, %v19393_v43 }
 0x310   :  { %19392 = vst [vmem:[#allocation61_spill] sm:$0xff] %v16443_v48  ;;  %11425 = vmatmul.mubr.msk.f32.gmra.mrb[22].mxu0 %vm1106_vm1, %v16234_v42  ;;  %11900 = vmatprep.mubr.msk.f32.mxu1 %vm1106_vm1, %v19394_v46  ;;  %v19438_v48 = vld [vmem:[#allocation113_spill] sm:$0xff] }
 0x311   :  { %11427 = vmatprep.mubr.msk.f32.mxu0 %vm1106_vm1, %v16247_v12 }
 0x313   :  { %v11268_v17 = vpop.f32.mrb[208].mxu0  ;;  %11901 = vmatmul.mubr.msk.f32.gmra.mrb[178].mxu1 %vm1106_vm1, %v19395_v56 }
 0x314   :  { %v16456_v58 = vadd.f32 %v11268_v17, %v15543_v3  ;;  %v3341_v38 = vpop.f32.mrb[209].mxu0  ;;  %11428 = vmatmul.mubr.msk.f32.gmra.mrb[148].mxu0 %vm1106_vm1, %v16255_v34  ;;  %11903 = vmatprep.mubr.msk.f32.mxu1 %vm1106_vm1, %v19396_v54  ;;  %v19399_v3 = vld [vmem:[#allocation85_spill] sm:$0xff] }
 0x315   :  { %11430 = vmatprep.mubr.msk.f32.mxu0 %vm1106_vm1, %v16265_v57 }
 0x316   :  { %v16464_v42 = vpop.f32.mrb[108].mxu1 }
 0x317   :  { %19397 = vst [vmem:[#allocation62_spill] sm:$0xff] %v16464_v42  ;;  %v11271_v12 = vpop.f32.mrb[210].mxu0  ;;  %v5603_v50 = vpop.f32.mrb[109].mxu1  ;;  %11904 = vmatmul.mubr.msk.f32.gmra.mrb[28].mxu1 %vm1106_vm1, %v19398_v18 }
 0x318   :  { %v3350_v19 = vpop.f32.mrb[211].mxu0  ;;  %11431 = vmatmul.mubr.msk.f32.gmra.mrb[24].mxu0 %vm1106_vm1, %v16271_v22  ;;  %11906 = vmatprep.mubr.msk.f32.mxu1 %vm1106_vm1, %v19399_v3  ;;  %v19401_v50 = vld [vmem:[#allocation3_spill] sm:$0xff]  ;;  %v19404_v22 = vld [vmem:[#allocation94_spill] sm:$0xff] }
 0x319   :  { %v16473_v38 = vadd.f32 %v3350_v19, %v15576_v27  ;;  %11433 = vmatprep.mubr.msk.f32.mxu0 %vm1106_vm1, %v16286_v52  ;;  %v19402_v12 = vld [vmem:[#allocation87_spill] sm:$0xff] }
 0x31a   :  { %v11747_v17 = vpop.f32.mrb[110].mxu1  ;;  %v19403_v19 = vld [vmem:[#allocation91_spill] sm:$0xff] }
 0x31b   :  { %v16477_v57 = vpop.f32.mrb[111].mxu1  ;;  %11907 = vmatmul.mubr.msk.f32.gmra.mrb[180].mxu1 %vm1106_vm1, %v19401_v50 }
 0x31c   :  { %19400 = vst [vmem:[#allocation63_spill] sm:$0xff] %v16477_v57  ;;  %11434 = vmatmul.mubr.msk.f32.gmra.mrb[26].mxu0 %vm1106_vm1, %v16292_v14  ;;  %11909 = vmatprep.mubr.msk.f32.mxu1 %vm1106_vm1, %v19402_v12  ;;  %v19417_v57 = vld [vmem:[#allocation13_spill] sm:$0xff] }
 0x31d   :  { %11436 = vmatprep.mubr.msk.f32.mxu0 %vm1106_vm1, %v16305_v32 }
 0x31f   :  { %v11277_v27 = vpop.f32.mrb[212].mxu0  ;;  %11910 = vmatmul.mubr.msk.f32.gmra.mrb[182].mxu1 %vm1106_vm1, %v19403_v19 }
 0x320   :  { %v16490_v17 = vadd.f32 %v11277_v27, %v15605_v23  ;;  %v3369_v52 = vpop.f32.mrb[213].mxu0  ;;  %11437 = vmatmul.mubr.msk.f32.gmra.mrb[154].mxu0 %vm1106_vm1, %v16313_v26  ;;  %11912 = vmatprep.mubr.msk.f32.mxu1 %vm1106_vm1, %v19404_v22  ;;  %v19407_v23 = vld [vmem:[#allocation8_spill] sm:$0xff]  ;;  %v19413_v26 = vld [vmem:[#allocation57_spill] sm:$0xff] }
 0x321   :  { %11439 = vmatprep.mubr.msk.f32.mxu0 %vm1106_vm1, %v16323_v33 }
 0x322   :  { %v16498_v14 = vpop.f32.mrb[112].mxu1 }
 0x323   :  { %19405 = vst [vmem:[#allocation65_spill] sm:$0xff] %v16498_v14  ;;  %v11280_v32 = vpop.f32.mrb[214].mxu0  ;;  %v5631_v34 = vpop.f32.mrb[113].mxu1  ;;  %11913 = vmatmul.mubr.msk.f32.gmra.mrb[34].mxu1 %vm1106_vm1, %v19406_v10 }
 0x324   :  { %v3378_v31 = vpop.f32.mrb[215].mxu0  ;;  %11440 = vmatmul.mubr.msk.f32.gmra.mrb[28].mxu0 %vm1106_vm1, %v16329_v1  ;;  %11915 = vmatprep.mubr.msk.f32.mxu1 %vm1106_vm1, %v19407_v23  ;;  %v19409_v34 = vld [vmem:[#allocation9_spill] sm:$0xff]  ;;  %v19411_v1 = vld [vmem:[#allocation56_spill] sm:$0xff] }
 0x325   :  { %v16507_v52 = vadd.f32 %v3378_v31, %v15639_v51  ;;  %11442 = vmatprep.mubr.msk.f32.mxu0 %vm1106_vm1, %v16344_v49  ;;  %v19410_v32 = vld [vmem:[#allocation101_spill] sm:$0xff]  ;;  %v19412_v31 = vld [vmem:[#allocation11_spill] sm:$0xff] }
 0x326   :  { %v11756_v27 = vpop.f32.mrb[114].mxu1 }
 0x327   :  { %v16511_v33 = vpop.f32.mrb[115].mxu1  ;;  %11916 = vmatmul.mubr.msk.f32.gmra.mrb[184].mxu1 %vm1106_vm1, %v19409_v34 }
 0x328   :  { %19408 = vst [vmem:[#allocation66_spill] sm:$0xff] %v16511_v33  ;;  %11443 = vmatmul.mubr.msk.f32.gmra.mrb[30].mxu0 %vm1106_vm1, %v16350_v37  ;;  %11918 = vmatprep.mubr.msk.f32.mxu1 %vm1106_vm1, %v19410_v32  ;;  %v19415_v37 = vld [vmem:[#allocation58_spill] sm:$0xff] }
 0x329   :  { %11447 = vmatprep.mubr.msk.f32.mxu0 %vm1106_vm1, %v19411_v1 }
 0x32b   :  { %v11286_v51 = vpop.f32.mrb[216].mxu0  ;;  %11919 = vmatmul.mubr.msk.f32.gmra.mrb[186].mxu1 %vm1106_vm1, %v19412_v31 }
 0x32c   :  { %v16524_v27 = vadd.f32 %v11286_v51, %v15675_v60  ;;  %v3397_v49 = vpop.f32.mrb[217].mxu0  ;;  %11448 = vmatmul.mubr.msk.f32.vlgmr.msra.gmra.mrb[64].mxu0 %vm1106_vm1, %v19413_v26  ;;  %11921 = vmatprep.mubr.msk.f32.mxu1 %vm1106_vm1, %v19414_v63  ;;  %v19418_v60 = vld [vmem:[#allocation15_spill] sm:$0xff]  ;;  %v19422_v51 = vld [vmem:[#allocation108_spill] sm:$0xff] }
 0x32d   :  { %11450 = vmatprep.mubr.msk.f32.mxu0 %vm1106_vm1, %v19415_v37 }
 0x32e   :  { %v16532_v33 = vpop.f32.mrb[116].mxu1 }
 0x32f   :  { %19416 = vst [vmem:[#allocation68_spill] sm:$0xff] %v16532_v33  ;;  %v11289_v1 = vpop.f32.mrb[218].mxu0  ;;  %v5659_v14 = vpop.f32.mrb[117].mxu1  ;;  %11922 = vmatmul.mubr.msk.f32.gmra.mrb[40].mxu1 %vm1106_vm1, %v19417_v57 }
 0x330   :  { %v3406_v42 = vpop.f32.mrb[219].mxu0  ;;  %11451 = vmatmul.mubr.msk.f32.gmra.mrb[32].mxu0 %vm1106_vm1, %v19381_v35  ;;  %11924 = vmatprep.mubr.msk.f32.mxu1 %vm1106_vm1, %v19418_v60  ;;  %v19421_v14 = vld [vmem:[#allocation16_spill] sm:$0xff]  ;;  %v19425_v1 = vld [vmem:[#allocation23_spill] sm:$0xff] }
 0x331   :  { %v16541_v26 = vadd.f32 %v3406_v42, %v15708_v53  ;;  %11453 = vmatprep.mubr.msk.f32.mxu0 %vm1106_vm1, %v19382_v45  ;;  %v19423_v42 = vld [vmem:[#allocation20_spill] sm:$0xff] }
 0x332   :  { %v11765_v37 = vpop.f32.mrb[118].mxu1 }
 0x333   :  { %19419 = vst [vmem:[#allocation71_spill] sm:$0xff] %v16541_v26  ;;  %v16545_v49 = vpop.f32.mrb[119].mxu1  ;;  %11925 = vmatmul.mubr.msk.f32.gmra.mrb[188].mxu1 %vm1106_vm1, %v19421_v14 }
 0x334   :  { %19420 = vst [vmem:[#allocation73_spill] sm:$0xff] %v16545_v49  ;;  %11454 = vmatmul.mubr.msk.f32.gmra.mrb[34].mxu0 %vm1106_vm1, %v19383_v9  ;;  %11927 = vmatprep.mubr.msk.f32.mxu1 %vm1106_vm1, %v19422_v51  ;;  %v19427_v49 = vld [vmem:[#allocation24_spill] sm:$0xff] }
 0x335   :  { %11456 = vmatprep.mubr.msk.f32.mxu0 %vm1106_vm1, %v19385_v36 }
 0x337   :  { %v11295_v53 = vpop.f32.mrb[220].mxu0  ;;  %11928 = vmatmul.mubr.msk.f32.gmra.mrb[190].mxu1 %vm1106_vm1, %v19423_v42 }
 0x338   :  { %v16558_v35 = vadd.f32 %v11295_v53, %v15734_v39  ;;  %v3425_v45 = vpop.f32.mrb[221].mxu0  ;;  %11457 = vmatmul.mubr.msk.f32.gmra.mrb[70].mxu0 %vm1106_vm1, %v19386_v55  ;;  %11930 = vmatprep.mubr.msk.f32.mxu1 %vm1106_vm1, %v19425_v1  ;;  %v19428_v39 = vld [vmem:[#allocation26_spill] sm:$0xff]  ;;  %v16582_v53 = vld [vmem:[%s18611_s7 + $0x20] sm:$0xf] }
 0x339   :  { %11459 = vmatprep.mubr.msk.f32.mxu0 %vm1106_vm1, %v19387_v24  ;;  %12175 = vmatprep.subr.msk.mxu1 %vm2121_vm2, %v16582_v53 }
 0x33a   :  { %19424 = vst [vmem:[#allocation74_spill] sm:$0xff] %v16558_v35  ;;  %v16566_v9 = vpop.f32.mrb[120].mxu1 }
 0x33b   :  { %19426 = vst [vmem:[#allocation78_spill] sm:$0xff] %v16566_v9  ;;  %v11298_v36 = vpop.f32.mrb[222].mxu0  ;;  %v5687_v37 = vpop.f32.mrb[121].mxu1  ;;  %11931 = vmatmul.mubr.msk.f32.gmra.mrb[46].mxu1 %vm1106_vm1, %v19427_v49 }
 0x33c   :  { %v3434_v33 = vpop.f32.mrb[223].mxu0  ;;  %11460 = vmatmul.mubr.msk.f32.gmra.mrb[36].mxu0 %vm1106_vm1, %v19388_v62  ;;  %11933 = vmatprep.mubr.msk.f32.mxu1 %vm1106_vm1, %v19428_v39  ;;  %v19431_v36 = vld [vmem:[#allocation28_spill] sm:$0xff]  ;;  %v19434_v62 = vld [vmem:[#allocation67_spill] sm:$0xff] }
 0x33d   :  { %v16575_v55 = vadd.f32 %v3434_v33, %v15764_v47  ;;  %11462 = vmatprep.mubr.msk.f32.mxu0 %vm1106_vm1, %v19390_v11  ;;  %v19432_v47 = vld [vmem:[#allocation111_spill] sm:$0xff]  ;;  %v19433_v33 = vld [vmem:[#allocation32_spill] sm:$0xff] }
 0x33e   :  { %v11774_v24 = vpop.f32.mrb[122].mxu1 }
 0x33f   :  { %19429 = vst [vmem:[#allocation80_spill] sm:$0xff] %v16575_v55  ;;  %v16584_v45 = vpop.f32.mrb[123].mxu1  ;;  %11934 = vmatmul.mubr.msk.f32.gmra.mrb[192].mxu1 %vm1106_vm1, %v19431_v36 }
 0x340   :  { %19430 = vst [vmem:[#allocation82_spill] sm:$0xff] %v16584_v45  ;;  %11463 = vmatmul.mubr.msk.f32.gmra.mrb[38].mxu0 %vm1106_vm1, %v19391_v20  ;;  %11936 = vmatprep.mubr.msk.f32.mxu1 %vm1106_vm1, %v19432_v47  ;;  %v19436_v45 = vld [vmem:[#allocation37_spill] sm:$0xff] }
 0x341   :  { %11465 = vmatprep.mubr.msk.f32.mxu0 %vm1106_vm1, %v19393_v43 }
 0x343   :  { %v11306_v11 = vpop.f32.mrb[224].mxu0  ;;  %11937 = vmatmul.mubr.msk.f32.gmra.mrb[194].mxu1 %vm1106_vm1, %v19433_v33 }
 0x344   :  { %v16599_v37 = vadd.f32 %v11306_v11, %v19434_v62  ;;  %v3809_v24 = vpop.f32.mrb[225].mxu0  ;;  %11466 = vmatmul.mubr.msk.f32.gmra.mrb[76].mxu0 %vm1106_vm1, %v19394_v46  ;;  %11939 = vmatprep.mubr.msk.f32.mxu1 %vm1106_vm1, %v19436_v45  ;;  %v19439_v11 = vld [vmem:[#allocation40_spill] sm:$0xff]  ;;  %v19440_v46 = vld [vmem:[#allocation77_spill] sm:$0xff] }
 0x345   :  { %11468 = vmatprep.mubr.msk.f32.mxu0 %vm1106_vm1, %v19395_v56  ;;  %v16620_v24 = vld [vmem:[#allocation2 + $0x180] sm:$0xff] }
 0x346   :  { %19435 = vst [vmem:[#allocation85_spill] sm:$0xff] %v16599_v37  ;;  %v16607_v20 = vpop.f32.mrb[124].mxu1  ;;  %19442 = vst [vmem:[#allocation91_spill] sm:$0xff] %v16620_v24 }
 0x347   :  { %19437 = vst [vmem:[#allocation3_spill] sm:$0xff] %v16607_v20  ;;  %v11309_v43 = vpop.f32.mrb[226].mxu0  ;;  %v5715_v9 = vpop.f32.mrb[125].mxu1  ;;  %11940 = vmatmul.mubr.msk.f32.gmra.mrb[52].mxu1 %vm1106_vm1, %v19438_v48 }
 0x348   :  { %v3818_v55 = vpop.f32.mrb[227].mxu0  ;;  %11469 = vmatmul.mubr.msk.f32.gmra.mrb[40].mxu0 %vm1106_vm1, %v19396_v54  ;;  %11942 = vmatprep.mubr.msk.f32.mxu1 %vm1106_vm1, %v19439_v11  ;;  %v1413_v9 = vrot.slane %v16620_v24, 7  ;;  %v16623_v43 = vld [vmem:[#allocation2 + $0x190] sm:$0xff]  ;;  %v19445_v54 = vld [vmem:[#allocation4_spill] sm:$0xff] }
 0x349   :  { %v16616_v62 = vadd.f32 %v3818_v55, %v19440_v46  ;;  %11471 = vmatprep.mubr.msk.f32.mxu0 %vm1106_vm1, %v19398_v18  ;;  %19443 = vst [vmem:[#allocation94_spill] sm:$0xff] %v16623_v43  ;;  %v1485_v20 = vrot.slane %v16623_v43, 7  ;;  %v19446_v55 = vld [vmem:[#allocation7_spill] sm:$0xff]  ;;  %v16636_v18 = vld [vmem:[#allocation2 + $0x198] sm:$0xff]  ;;  %v16638_v46 = vld [vmem:[#allocation2 + $0x1a8] sm:$0xff] }
 0x34a   :  { %v11783_v56 = vpop.f32.mrb[126].mxu1  ;;  %19447 = vst [vmem:[#allocation8_spill] sm:$0xff] %v16638_v46  ;;  %v16643_v43 = vld [vmem:[#allocation2 + $0x1a0] sm:$0xff]  ;;  %v1486_v35 = vrot.slane %v16638_v46, 7 }
 0x34b   :  { %19441 = vst [vmem:[#allocation87_spill] sm:$0xff] %v16616_v62  ;;  %v16626_v37 = vpop.f32.mrb[127].mxu1  ;;  %11943 = vmatmul.mubr.msk.f32.gmra.mrb[196].mxu1 %vm1106_vm1, %v19445_v54  ;;  %v16640_v56 = vld [vmem:[#allocation2 + $0x188] sm:$0xff]  ;;  %v1450_v21 = vrot.slane %v16643_v43, 7 }
 0x34c   :  { %19444 = vst [vmem:[#allocation97_spill] sm:$0xff] %v16626_v37  ;;  %11472 = vmatmul.mubr.msk.f32.gmra.mrb[42].mxu0 %vm1106_vm1, %v19399_v3  ;;  %11945 = vmatprep.mubr.msk.f32.mxu1 %vm1106_vm1, %v19446_v55  ;;  %19448 = vst [vmem:[#allocation9_spill] sm:$0xff] %v16640_v56  ;;  %v1449_v37 = vrot.slane %v16640_v56, 7  ;;  %v19449_v62 = vld [vmem:[#allocation44_spill] sm:$0xff]  ;;  %v16649_v3 = vsel %vm1507_vm3, %v1485_v20, %v1413_v9  ;;  %v1414_v56 = vrot.slane %v16636_v18, 7 }
 0x34d   :  { %11474 = vmatprep.mubr.msk.f32.mxu0 %vm1106_vm1, %v19401_v50 }
 0x34f   :  { %v11315_v24 = vpop.f32.mrb[228].mxu0  ;;  %11946 = vmatmul.mubr.msk.f32.gmra.mrb[198].mxu1 %vm1106_vm1, %v19449_v62 }
 0x350   :  { %v16652_v50 = vadd.f32 %v11315_v24, %v15866_v6  ;;  %v3837_v5 = vpop.f32.mrb[229].mxu0  ;;  %11475 = vmatmul.mubr.msk.f32.gmra.mrb[82].mxu0 %vm1106_vm1, %v19402_v12  ;;  %11948 = vmatprep.mubr.msk.f32.mxu1 %vm1106_vm1, %v16649_v3  ;;  %v16667_v6 = vsel %vm1507_vm3, %v1413_v9, %v1449_v37  ;;  %v16673_v24 = vsel %vm1507_vm3, %v1449_v37, %v1485_v20 }
 0x351   :  { %11477 = vmatprep.mubr.msk.f32.mxu0 %vm1106_vm1, %v19403_v19  ;;  %v1597_v19 = vsel %vm1507_vm3, %v1486_v35, %v1414_v56  ;;  %v1561_v37 = vsel %vm1507_vm3, %v1414_v56, %v1450_v21  ;;  %v19452_v56 = vld [vmem:[#allocation49_spill] sm:$0xff] }
 0x352   :  { %v16663_v26 = vpop.f32.mrb[128].mxu1 }
 0x353   :  { %19450 = vst [vmem:[#allocation101_spill] sm:$0xff] %v16663_v26  ;;  %v11318_v5 = vpop.f32.mrb[230].mxu0  ;;  %v5743_v12 = vpop.f32.mrb[129].mxu1  ;;  %11949 = vmatmul.mubr.msk.f32.gmra.mrb[58].mxu1 %vm1106_vm1, %v16667_v6 }
 0x354   :  { %v3846_v46 = vpop.f32.mrb[231].mxu0  ;;  %11478 = vmatmul.mubr.msk.f32.gmra.mrb[44].mxu0 %vm1106_vm1, %v19404_v22  ;;  %11951 = vmatprep.mubr.msk.f32.mxu1 %vm1106_vm1, %v16673_v24 }
 0x355   :  { %v16682_v9 = vadd.f32 %v3846_v46, %v15892_v8  ;;  %11480 = vmatprep.mubr.msk.f32.mxu0 %vm1106_vm1, %v19406_v10  ;;  %v1525_v8 = vsel %vm1507_vm3, %v1450_v21, %v1486_v35  ;;  %v19454_v35 = vld [vmem:[#allocation50_spill] sm:$0xff] }
 0x356   :  { %v11792_v20 = vpop.f32.mrb[130].mxu1 }
 0x357   :  { %v16688_v5 = vpop.f32.mrb[131].mxu1  ;;  %11952 = vmatmul.mubr.msk.f32.gmra.mrb[200].mxu1 %vm1106_vm1, %v1597_v19  ;;  %v19458_v20 = vld [vmem:[#allocation52_spill] sm:$0xff] }
 0x358   :  { %19451 = vst [vmem:[#allocation56_spill] sm:$0xff] %v16688_v5  ;;  %11481 = vmatmul.mubr.msk.f32.gmra.mrb[46].mxu0 %vm1106_vm1, %v19407_v23  ;;  %11954 = vmatprep.mubr.msk.f32.mxu1 %vm1106_vm1, %v1561_v37  ;;  %v19487_v5 = vld [vmem:[#allocation35_spill] sm:$0xff] }
 0x359   :  { %11483 = vmatprep.mubr.msk.f32.mxu0 %vm1106_vm1, %v19409_v34 }
 0x35b   :  { %v11324_v10 = vpop.f32.mrb[232].mxu0  ;;  %11955 = vmatmul.mubr.msk.f32.gmra.mrb[202].mxu1 %vm1106_vm1, %v1525_v8  ;;  %v19459_v8 = vld [vmem:[#allocation53_spill] sm:$0xff] }
 0x35c   :  { %v16700_v22 = vadd.f32 %v11324_v10, %v15927_v7  ;;  %v3865_v46 = vpop.f32.mrb[233].mxu0  ;;  %11484 = vmatmul.mubr.msk.f32.gmra.mrb[88].mxu0 %vm1106_vm1, %v19410_v32  ;;  %11957 = vmatprep.mubr.msk.f32.mxu1 %vm1106_vm1, %v19452_v56  ;;  %v19455_v7 = vld [vmem:[#allocation51_spill] sm:$0xff]  ;;  %v19456_v32 = vld [vmem:[#allocation102_spill] sm:$0xff] }
 0x35d   :  { %11486 = vmatprep.mubr.msk.f32.mxu0 %vm1106_vm1, %v19412_v31  ;;  %v19460_v10 = vld [vmem:[#allocation54_spill] sm:$0xff] }
 0x35e   :  { %v16708_v21 = vpop.f32.mrb[132].mxu1 }
 0x35f   :  { %19453 = vst [vmem:[#allocation11_spill] sm:$0xff] %v16708_v21  ;;  %v11327_v23 = vpop.f32.mrb[234].mxu0  ;;  %v5771_v34 = vpop.f32.mrb[133].mxu1  ;;  %11958 = vmatmul.mubr.msk.f32.gmra.mrb[64].mxu1 %vm1106_vm1, %v19454_v35 }
 0x360   :  { %v3874_v12 = vpop.f32.mrb[235].mxu0  ;;  %11487 = vmatmul.mubr.msk.f32.gmra.mrb[48].mxu0 %vm1106_vm1, %v19414_v63  ;;  %11960 = vmatprep.mubr.msk.f32.mxu1 %vm1106_vm1, %v19455_v7  ;;  %v19462_v34 = vld [vmem:[#allocation114_spill] sm:$0xff] }
 0x361   :  { %v16717_v19 = vadd.f32 %v3874_v12, %v19456_v32  ;;  %11489 = vmatprep.mubr.msk.f32.mxu0 %vm1106_vm1, %v19417_v57  ;;  %v19461_v57 = vld [vmem:[#allocation104_spill] sm:$0xff]  ;;  %v19464_v32 = vld [vmem:[#allocation115_spill] sm:$0xff] }
 0x362   :  { %v11801_v31 = vpop.f32.mrb[134].mxu1 }
 0x363   :  { %v16721_v37 = vpop.f32.mrb[135].mxu1  ;;  %11961 = vmatmul.mubr.msk.f32.gmra.mrb[204].mxu1 %vm1106_vm1, %v19458_v20 }
 0x364   :  { %19457 = vst [vmem:[#allocation57_spill] sm:$0xff] %v16721_v37  ;;  %11490 = vmatmul.mubr.msk.f32.gmra.mrb[50].mxu0 %vm1106_vm1, %v19418_v60  ;;  %11963 = vmatprep.mubr.msk.f32.mxu1 %vm1106_vm1, %v19459_v8  ;;  %v19475_v37 = vld [vmem:[#allocation121_spill] sm:$0xff] }
 0x365   :  { %11492 = vmatprep.mubr.msk.f32.mxu0 %vm1106_vm1, %v19421_v14 }
 0x367   :  { %v11333_v63 = vpop.f32.mrb[236].mxu0  ;;  %11964 = vmatmul.mubr.msk.f32.gmra.mrb[206].mxu1 %vm1106_vm1, %v19460_v10 }
 0x368   :  { %v16734_v46 = vadd.f32 %v11333_v63, %v19461_v57  ;;  %v3893_v23 = vpop.f32.mrb[237].mxu0  ;;  %11493 = vmatmul.mubr.msk.f32.gmra.mrb[94].mxu0 %vm1106_vm1, %v19422_v51  ;;  %11966 = vmatprep.mubr.msk.f32.mxu1 %vm1106_vm1, %v19462_v34  ;;  %v19465_v63 = vld [vmem:[#allocation116_spill] sm:$0xff]  ;;  %v19466_v51 = vld [vmem:[#allocation18_spill] sm:$0xff] }
 0x369   :  { %11495 = vmatprep.mubr.msk.f32.mxu0 %vm1106_vm1, %v19423_v42 }
 0x36a   :  { %v16742_v60 = vpop.f32.mrb[136].mxu1 }
 0x36b   :  { %19463 = vst [vmem:[#allocation12_spill] sm:$0xff] %v16742_v60  ;;  %v11336_v14 = vpop.f32.mrb[238].mxu0  ;;  %v5799_v12 = vpop.f32.mrb[137].mxu1  ;;  %11967 = vmatmul.mubr.msk.f32.gmra.mrb[70].mxu1 %vm1106_vm1, %v19464_v32 }
 0x36c   :  { %v3902_v31 = vpop.f32.mrb[239].mxu0  ;;  %11496 = vmatmul.mubr.msk.f32.gmra.mrb[52].mxu0 %vm1106_vm1, %v19425_v1  ;;  %11969 = vmatprep.mubr.msk.f32.mxu1 %vm1106_vm1, %v19465_v63  ;;  %v19468_v14 = vld [vmem:[#allocation117_spill] sm:$0xff]  ;;  %v19469_v12 = vld [vmem:[#allocation118_spill] sm:$0xff] }
 0x36d   :  { %v16751_v57 = vadd.f32 %v3902_v31, %v19466_v51  ;;  %11498 = vmatprep.mubr.msk.f32.mxu0 %vm1106_vm1, %v19427_v49  ;;  %v19470_v31 = vld [vmem:[#allocation119_spill] sm:$0xff]  ;;  %v19471_v49 = vld [vmem:[#allocation110_spill] sm:$0xff] }
 0x36e   :  { %v11810_v42 = vpop.f32.mrb[138].mxu1 }
 0x36f   :  { %v16755_v23 = vpop.f32.mrb[139].mxu1  ;;  %11970 = vmatmul.mubr.msk.f32.gmra.mrb[208].mxu1 %vm1106_vm1, %v19468_v14 }
 0x370   :  { %19467 = vst [vmem:[#allocation58_spill] sm:$0xff] %v16755_v23  ;;  %11499 = vmatmul.mubr.msk.f32.gmra.mrb[54].mxu0 %vm1106_vm1, %v19428_v39  ;;  %11972 = vmatprep.mubr.msk.f32.mxu1 %vm1106_vm1, %v19469_v12  ;;  %v19473_v23 = vld [vmem:[#allocation120_spill] sm:$0xff] }
 0x371   :  { %11501 = vmatprep.mubr.msk.f32.mxu0 %vm1106_vm1, %v19431_v36 }
 0x373   :  { %v11342_v1 = vpop.f32.mrb[240].mxu0  ;;  %11973 = vmatmul.mubr.msk.f32.gmra.mrb[210].mxu1 %vm1106_vm1, %v19470_v31 }
 0x374   :  { %v16768_v51 = vadd.f32 %v11342_v1, %v19471_v49  ;;  %v3921_v42 = vpop.f32.mrb[241].mxu0  ;;  %11502 = vmatmul.mubr.msk.f32.gmra.mrb[100].mxu0 %vm1106_vm1, %v19432_v47  ;;  %11975 = vmatprep.mubr.msk.f32.mxu1 %vm1106_vm1, %v19473_v23  ;;  %v19476_v1 = vld [vmem:[#allocation122_spill] sm:$0xff] }
 0x375   :  { %11504 = vmatprep.mubr.msk.f32.mxu0 %vm1106_vm1, %v19433_v33  ;;  %v19477_v47 = vld [vmem:[#allocation30_spill] sm:$0xff] }
 0x376   :  { %19472 = vst [vmem:[#allocation13_spill] sm:$0xff] %v16768_v51  ;;  %v16776_v39 = vpop.f32.mrb[140].mxu1 }
 0x377   :  { %19474 = vst [vmem:[#allocation15_spill] sm:$0xff] %v16776_v39  ;;  %v11345_v36 = vpop.f32.mrb[242].mxu0  ;;  %v5827_v60 = vpop.f32.mrb[141].mxu1  ;;  %11976 = vmatmul.mubr.msk.f32.gmra.mrb[76].mxu1 %vm1106_vm1, %v19475_v37 }
 0x378   :  { %v3930_v21 = vpop.f32.mrb[243].mxu0  ;;  %11505 = vmatmul.mubr.msk.f32.gmra.mrb[56].mxu0 %vm1106_vm1, %v19436_v45  ;;  %11978 = vmatprep.mubr.msk.f32.mxu1 %vm1106_vm1, %v19476_v1  ;;  %v19480_v60 = vld [vmem:[#allocation124_spill] sm:$0xff]  ;;  %v19481_v36 = vld [vmem:[#allocation125_spill] sm:$0xff] }
 0x379   :  { %v16785_v49 = vadd.f32 %v3930_v21, %v19477_v47  ;;  %11507 = vmatprep.mubr.msk.f32.mxu0 %vm1106_vm1, %v19438_v48  ;;  %v19482_v21 = vld [vmem:[#allocation34_spill] sm:$0xff]  ;;  %v19483_v48 = vld [vmem:[#allocation112_spill] sm:$0xff] }
 0x37a   :  { %v11819_v33 = vpop.f32.mrb[142].mxu1 }
 0x37b   :  { %19478 = vst [vmem:[#allocation16_spill] sm:$0xff] %v16785_v49  ;;  %v16789_v42 = vpop.f32.mrb[143].mxu1  ;;  %11979 = vmatmul.mubr.msk.f32.gmra.mrb[212].mxu1 %vm1106_vm1, %v19480_v60  ;;  %v19499_v49 = vld [vmem:[#allocation137_spill] sm:$0xff] }
 0x37c   :  { %19479 = vst [vmem:[#allocation108_spill] sm:$0xff] %v16789_v42  ;;  %11508 = vmatmul.mubr.msk.f32.gmra.mrb[58].mxu0 %vm1106_vm1, %v19439_v11  ;;  %11981 = vmatprep.mubr.msk.f32.mxu1 %vm1106_vm1, %v19481_v36  ;;  %v19485_v42 = vld [vmem:[#allocation38_spill] sm:$0xff] }
 0x37d   :  { %11510 = vmatprep.mubr.msk.f32.mxu0 %vm1106_vm1, %v19445_v54 }
 0x37f   :  { %v11351_v45 = vpop.f32.mrb[244].mxu0  ;;  %11982 = vmatmul.mubr.msk.f32.gmra.mrb[214].mxu1 %vm1106_vm1, %v19482_v21 }
 0x380   :  { %v16802_v47 = vadd.f32 %v11351_v45, %v19483_v48  ;;  %v3949_v33 = vpop.f32.mrb[245].mxu0  ;;  %11511 = vmatmul.mubr.msk.f32.gmra.mrb[106].mxu0 %vm1106_vm1, %v19446_v55  ;;  %11984 = vmatprep.mubr.msk.f32.mxu1 %vm1106_vm1, %v19485_v42  ;;  %v19488_v45 = vld [vmem:[#allocation127_spill] sm:$0xff]  ;;  %v19489_v55 = vld [vmem:[#allocation42_spill] sm:$0xff] }
 0x381   :  { %11513 = vmatprep.mubr.msk.f32.mxu0 %vm1106_vm1, %v19449_v62 }
 0x382   :  { %19484 = vst [vmem:[#allocation20_spill] sm:$0xff] %v16802_v47  ;;  %v16810_v11 = vpop.f32.mrb[144].mxu1 }
 0x383   :  { %19486 = vst [vmem:[#allocation23_spill] sm:$0xff] %v16810_v11  ;;  %v11354_v54 = vpop.f32.mrb[246].mxu0  ;;  %v5855_v39 = vpop.f32.mrb[145].mxu1  ;;  %11985 = vmatmul.mubr.msk.f32.gmra.mrb[82].mxu1 %vm1106_vm1, %v19487_v5  ;;  %v19497_v11 = vld [vmem:[#allocation135_spill] sm:$0xff] }
 0x384   :  { %v3958_v26 = vpop.f32.mrb[247].mxu0  ;;  %11514 = vmatmul.mubr.msk.f32.gmra.mrb[60].mxu0 %vm1106_vm1, %v16649_v3  ;;  %11987 = vmatprep.mubr.msk.f32.mxu1 %vm1106_vm1, %v19488_v45  ;;  %v19492_v39 = vld [vmem:[#allocation129_spill] sm:$0xff]  ;;  %v19493_v54 = vld [vmem:[#allocation130_spill] sm:$0xff] }
 0x385   :  { %v16819_v48 = vadd.f32 %v3958_v26, %v19489_v55  ;;  %11516 = vmatprep.mubr.msk.f32.mxu0 %vm1106_vm1, %v16667_v6  ;;  %v19494_v3 = vld [vmem:[#allocation6_spill] sm:$0xff] }
 0x386   :  { %v11828_v62 = vpop.f32.mrb[146].mxu1  ;;  %v19495_v55 = vld [vmem:[#allocation134_spill] sm:$0xff] }
 0x387   :  { %19490 = vst [vmem:[#allocation24_spill] sm:$0xff] %v16819_v48  ;;  %v16823_v33 = vpop.f32.mrb[147].mxu1  ;;  %11988 = vmatmul.mubr.msk.f32.gmra.mrb[216].mxu1 %vm1106_vm1, %v19492_v39 }
 0x388   :  { %19491 = vst [vmem:[#allocation26_spill] sm:$0xff] %v16823_v33  ;;  %11517 = vmatmul.mubr.msk.f32.gmra.mrb[62].mxu0 %vm1106_vm1, %v16673_v24  ;;  %11990 = vmatprep.mubr.msk.f32.mxu1 %vm1106_vm1, %v19493_v54  ;;  %v19496_v33 = vld [vmem:[#allocation46_spill] sm:$0xff]  ;;  %v19498_v24 = vld [vmem:[#allocation48_spill] sm:$0xff] }
 0x389   :  { %11519 = vmatprep.mubr.msk.f32.mxu0 %vm1106_vm1, %v19494_v3 }
 0x38b   :  { %v11360_v26 = vpop.f32.mrb[248].mxu0  ;;  %11991 = vmatmul.mubr.msk.f32.gmra.mrb[218].mxu1 %vm1106_vm1, %v19495_v55 }
 0x38c   :  { %v16836_v6 = vadd.f32 %v11360_v26, %v16160_v61  ;;  %v3977_v62 = vpop.f32.mrb[249].mxu0  ;;  %11520 = vmatmul.mubr.msk.f32.gmra.mrb[112].mxu0 %vm1106_vm1, %v19496_v33  ;;  %11993 = vmatprep.mubr.msk.f32.mxu1 %vm1106_vm1, %v19497_v11  ;;  %v19500_v61 = vld [vmem:[#allocation139_spill] sm:$0xff] }
 0x38d   :  { %11522 = vmatprep.mubr.msk.f32.mxu0 %vm1106_vm1, %v19498_v24  ;;  %v19503_v24 = vld [vmem:[#allocation64_spill] sm:$0xff] }
 0x38e   :  { %v16844_v48 = vpop.f32.mrb[148].mxu1 }
 0x38f   :  { %v11363_v3 = vpop.f32.mrb[250].mxu0  ;;  %v5883_v47 = vpop.f32.mrb[149].mxu1  ;;  %11994 = vmatmul.mubr.msk.f32.gmra.mrb[88].mxu1 %vm1106_vm1, %v19499_v49 }
 0x390   :  { %v3986_v51 = vpop.f32.mrb[251].mxu0  ;;  %11523 = vmatmul.mubr.msk.f32.gmra.mrb[66].mxu0 %vm1106_vm1, %v19452_v56  ;;  %11996 = vmatprep.mubr.msk.f32.mxu1 %vm1106_vm1, %v19500_v61  ;;  %v19502_v47 = vld [vmem:[#allocation142_spill] sm:$0xff]  ;;  %v19505_v3 = vld [vmem:[#allocation17_spill] sm:$0xff] }
 0x391   :  { %v16853_v33 = vadd.f32 %v3986_v51, %v16183_v41  ;;  %11525 = vmatprep.mubr.msk.f32.mxu0 %vm1106_vm1, %v19454_v35  ;;  %v19504_v56 = vld [vmem:[#allocation14_spill] sm:$0xff] }
 0x392   :  { %v11837_v26 = vpop.f32.mrb[150].mxu1 }
 0x393   :  { %v16857_v62 = vpop.f32.mrb[151].mxu1  ;;  %11997 = vmatmul.mubr.msk.f32.gmra.mrb[220].mxu1 %vm1106_vm1, %v19502_v47 }
 0x394   :  { %19501 = vst [vmem:[#allocation28_spill] sm:$0xff] %v16857_v62  ;;  %11526 = vmatmul.mubr.msk.f32.gmra.mrb[68].mxu0 %vm1106_vm1, %v19455_v7  ;;  %11999 = vmatprep.mubr.msk.f32.mxu1 %vm1106_vm1, %v19503_v24  ;;  %v19506_v62 = vld [vmem:[#allocation19_spill] sm:$0xff] }
 0x395   :  { %11528 = vmatprep.mubr.msk.f32.mxu0 %vm1106_vm1, %v19458_v20 }
 0x397   :  { %v11369_v41 = vpop.f32.mrb[252].mxu0  ;;  %12000 = vmatmul.mubr.msk.f32.gmra.mrb[222].mxu1 %vm1106_vm1, %v19504_v56 }
 0x398   :  { %v16870_v35 = vadd.f32 %v11369_v41, %v16216_v28  ;;  %v4005_v51 = vpop.f32.mrb[253].mxu0  ;;  %11529 = vmatmul.mubr.msk.f32.gmra.mrb[118].mxu0 %vm1106_vm1, %v19459_v8  ;;  %12002 = vmatprep.mubr.msk.f32.mxu1 %vm1106_vm1, %v19505_v3  ;;  %v19507_v28 = vld [vmem:[#allocation21_spill] sm:$0xff] }
 0x399   :  { %11531 = vmatprep.mubr.msk.f32.mxu0 %vm1106_vm1, %v19460_v10  ;;  %v19508_v51 = vld [vmem:[#allocation22_spill] sm:$0xff] }
 0x39a   :  { %v16878_v7 = vpop.f32.mrb[152].mxu1 }
 0x39b   :  { %v11372_v20 = vpop.f32.mrb[254].mxu0  ;;  %v5911_v26 = vpop.f32.mrb[153].mxu1  ;;  %12003 = vmatmul.mubr.msk.f32.gmra.mrb[94].mxu1 %vm1106_vm1, %v19506_v62  ;;  %v19509_v62 = vld [vmem:[#allocation25_spill] sm:$0xff] }
 0x39c   :  { %v4014_v56 = vpop.f32.mrb[255].mxu0  ;;  %11532 = vmatmul.mubr.msk.f32.gmra.mrb[72].mxu0 %vm1106_vm1, %v19462_v34  ;;  %12005 = vmatprep.mubr.msk.f32.mxu1 %vm1106_vm1, %v19507_v28  ;;  %v19510_v34 = vld [vmem:[#allocation27_spill] sm:$0xff]  ;;  %v19511_v20 = vld [vmem:[#allocation29_spill] sm:$0xff] }
 0x39d   :  { %v16887_v8 = vadd.f32 %v4014_v56, %v16241_v15  ;;  %11534 = vmatprep.mubr.msk.f32.mxu0 %vm1106_vm1, %v19464_v32  ;;  %v19512_v56 = vld [vmem:[#allocation31_spill] sm:$0xff] }
 0x39e   :  { %v11846_v10 = vpop.f32.mrb[154].mxu1 }
 0x39f   :  { %v16891_v41 = vpop.f32.mrb[155].mxu1  ;;  %12006 = vmatmul.mubr.msk.f32.gmra.mrb[224].mxu1 %vm1106_vm1, %v19508_v51  ;;  %v19514_v51 = vld [vmem:[#allocation33_spill] sm:$0xff] }
 0x3a0   :  { %11535 = vmatmul.mubr.msk.f32.gmra.mrb[74].mxu0 %vm1106_vm1, %v19465_v63  ;;  %12008 = vmatprep.mubr.msk.f32.mxu1 %vm1106_vm1, %v19509_v62  ;;  %v19515_v62 = vld [vmem:[#allocation39_spill] sm:$0xff] }
 0x3a1   :  { %11537 = vmatprep.mubr.msk.f32.mxu0 %vm1106_vm1, %v19468_v14 }
 0x3a3   :  { %v11378_v15 = vpop.f32.mrb[0].mxu0  ;;  %12009 = vmatmul.mubr.msk.f32.gmra.mrb[226].mxu1 %vm1106_vm1, %v19510_v34  ;;  %v19516_v34 = vld [vmem:[#allocation41_spill] sm:$0xff] }
 0x3a4   :  { %v16904_v32 = vadd.f32 %v11378_v15, %v16274_v16  ;;  %v4033_v3 = vpop.f32.mrb[1].mxu0  ;;  %11538 = vmatmul.mubr.msk.f32.gmra.mrb[124].mxu0 %vm1106_vm1, %v19469_v12  ;;  %12011 = vmatprep.mubr.msk.f32.mxu1 %vm1106_vm1, %v19511_v20  ;;  %v19513_v16 = vld [vmem:[#allocation36_spill] sm:$0xff]  ;;  %v19517_v20 = vld [vmem:[#allocation43_spill] sm:$0xff] }
 0x3a5   :  { %11540 = vmatprep.mubr.msk.f32.mxu0 %vm1106_vm1, %v19470_v31 }
 0x3a6   :  { %v16912_v63 = vpop.f32.mrb[156].mxu1 }
 0x3a7   :  { %v11381_v14 = vpop.f32.mrb[2].mxu0  ;;  %v5939_v26 = vpop.f32.mrb[157].mxu1  ;;  %12012 = vmatmul.mubr.msk.f32.gmra.mrb[4].mxu1 %vm1106_vm1, %v19512_v56 }
 0x3a8   :  { %v4042_v28 = vpop.f32.mrb[3].mxu0  ;;  %11541 = vmatmul.mubr.msk.f32.gmra.mrb[78].mxu0 %vm1106_vm1, %v19473_v23  ;;  %12014 = vmatprep.mubr.msk.f32.mxu1 %vm1106_vm1, %v19513_v16  ;;  %v16937_v23 = vld [vmem:[#allocation2 + $0x358] sm:$0xff]  ;;  %v19518_v16 = vld [vmem:[#allocation45_spill] sm:$0xff] }
 0x3a9   :  { %v16921_v12 = vadd.f32 %v4042_v28, %v16299_v25  ;;  %11543 = vmatprep.mubr.msk.f32.mxu0 %vm1106_vm1, %v19475_v37  ;;  %v16935_v25 = vld [vmem:[#allocation2 + $0x348] sm:$0xff]  ;;  %v16939_v37 = vld [vmem:[#allocation2 + $0x350] sm:$0xff]  ;;  %v1504_v14 = vrot.slane %v16937_v23, 7 }
 0x3aa   :  { %v11855_v31 = vpop.f32.mrb[158].mxu1  ;;  %v1468_v26 = vrot.slane %v16939_v37, 7 }
 0x3ab   :  { %v16925_v10 = vpop.f32.mrb[159].mxu1  ;;  %12015 = vmatmul.mubr.msk.f32.gmra.mrb[228].mxu1 %vm1106_vm1, %v19514_v51  ;;  %v19519_v31 = vld [vmem:[#allocation47_spill] sm:$0xff] }
 0x3ac   :  { %11544 = vmatmul.mubr.msk.f32.gmra.mrb[80].mxu0 %vm1106_vm1, %v19476_v1  ;;  %12017 = vmatprep.mubr.msk.f32.mxu1 %vm1106_vm1, %v19515_v62 }
 0x3ad   :  { %11546 = vmatprep.mubr.msk.f32.mxu0 %vm1106_vm1, %v19480_v60  ;;  %v1432_v60 = vrot.slane %v16935_v25, 7 }
 0x3af   :  { %v11387_v15 = vpop.f32.mrb[4].mxu0  ;;  %12018 = vmatmul.mubr.msk.f32.gmra.mrb[230].mxu1 %vm1106_vm1, %v19516_v34  ;;  %v1615_v51 = vsel %vm1507_vm3, %v1504_v14, %v1432_v60  ;;  %v1579_v62 = vsel %vm1507_vm3, %v1432_v60, %v1468_v26 }
 0x3b0   :  { %v16944_v3 = vadd.f32 %v11387_v15, %v16332_v30  ;;  %v4061_v1 = vpop.f32.mrb[5].mxu0  ;;  %11547 = vmatmul.mubr.msk.f32.gmra.mrb[130].mxu0 %vm1106_vm1, %v19481_v36  ;;  %12020 = vmatprep.mubr.msk.f32.mxu1 %vm1106_vm1, %v19517_v20  ;;  %v12785_v20 = vld [vmem:[#allocation2 + $0x30] sm:$0xff] }
 0x3b1   :  { %11549 = vmatprep.mubr.msk.f32.mxu0 %vm1106_vm1, %v19482_v21 }
 0x3b2   :  { %v16955_v56 = vpop.f32.mrb[160].mxu1 }
 0x3b3   :  { %v11390_v30 = vpop.f32.mrb[6].mxu0  ;;  %v5967_v28 = vpop.f32.mrb[161].mxu1  ;;  %12021 = vmatmul.mubr.msk.f32.gmra.mrb[10].mxu1 %vm1106_vm1, %v19518_v16 }
 0x3b4   :  { %v4070_v36 = vpop.f32.mrb[7].mxu0  ;;  %11550 = vmatmul.mubr.msk.f32.gmra.mrb[84].mxu0 %vm1106_vm1, %v19485_v42  ;;  %12023 = vmatprep.mubr.msk.f32.mxu1 %vm1106_vm1, %v19519_v31  ;;  %v12788_v28 = vld [vmem:[#allocation2 + $0x48] sm:$0xff] }
 0x3b5   :  { %v16966_v21 = vadd.f32 %v4070_v36, %v16357_v44  ;;  %11552 = vmatprep.mubr.msk.f32.mxu0 %vm1106_vm1, %v19487_v5  ;;  %v1543_v44 = vsel %vm1507_vm3, %v1468_v26, %v1504_v14  ;;  %v12786_v14 = vld [vmem:[#allocation2 + $0x38] sm:$0xff]  ;;  %v12791_v36 = vld [vmem:[#allocation2 + $0x60] sm:$0xff] }
 0x3b6   :  { %v11864_v15 = vpop.f32.mrb[162].mxu1 }
 0x3b7   :  { %v16972_v34 = vpop.f32.mrb[163].mxu1  ;;  %12024 = vmatmul.mubr.msk.f32.gmra.mrb[232].mxu1 %vm1106_vm1, %v1615_v51  ;;  %v12793_v15 = vld [vmem:[#allocation2 + $0x70] sm:$0xff] }
 0x3b8   :  { %11553 = vmatmul.mubr.msk.f32.gmra.mrb[86].mxu0 %vm1106_vm1, %v19488_v45  ;;  %12026 = vmatprep.mubr.msk.f32.mxu1 %vm1106_vm1, %v1579_v62  ;;  %v12792_v62 = vld [vmem:[#allocation2 + $0x68] sm:$0xff] }
 0x3b9   :  { %11555 = vmatprep.mubr.msk.f32.mxu0 %vm1106_vm1, %v19492_v39 }
 0x3bb   :  { %v11396_v5 = vpop.f32.mrb[8].mxu0  ;;  %12027 = vmatmul.mubr.msk.f32.gmra.mrb[234].mxu1 %vm1106_vm1, %v1543_v44 }
 0x3bc   :  { %v16984_v42 = vadd.f32 %v11396_v5, %v16386_v2  ;;  %v4089_v1 = vpop.f32.mrb[9].mxu0  ;;  %11556 = vmatmul.mubr.msk.f32.gmra.mrb[136].mxu0 %vm1106_vm1, %v19493_v54  ;;  %12031 = vmatprep.mubr.msk.f32.mxu1 %vm1106_vm1, %v12785_v20 }
 0x3bd   :  { %11558 = vmatprep.mubr.msk.f32.mxu0 %vm1106_vm1, %v19495_v55  ;;  %v12787_v55 = vld [vmem:[#allocation2 + $0x40] sm:$0xff] }
 0x3be   :  { %v16991_v45 = vpop.f32.mrb[164].mxu1  ;;  %v12795_v1 = vld [vmem:[#allocation2 + $0x80] sm:$0xff] }
 0x3bf   :  { %v11399_v60 = vpop.f32.mrb[10].mxu0  ;;  %v5995_v39 = vpop.f32.mrb[165].mxu1  ;;  %12032 = vmatmul.mubr.msk.f32.vlgmr.msra.gmra.mrb[16].mxu1 %vm1106_vm1, %v12786_v14 }
 0x3c0   :  { %12176 = vmatpush3.msk.msra.mxu1 %vm2121_vm2, %v16582_v53  ;;  %v4098_v2 = vpop.f32.mrb[11].mxu0  ;;  %11559 = vmatmul.mubr.msk.f32.gmra.mrb[90].mxu0 %vm1106_vm1, %v19497_v11  ;;  %v12789_v53 = vld [vmem:[#allocation2 + $0x50] sm:$0xff]  ;;  %v12796_v60 = vld [vmem:[#allocation2 + $0x88] sm:$0xff] }
 0x3c1   :  { %v16999_v54 = vadd.f32 %v4098_v2, %v16403_v4  ;;  %11561 = vmatprep.mubr.msk.f32.mxu0 %vm1106_vm1, %v19499_v49  ;;  %12034 = vmatprep.mubr.msk.f32.mxu1 %vm1106_vm1, %v12787_v55  ;;  %v12790_v49 = vld [vmem:[#allocation2 + $0x58] sm:$0xff]  ;;  %v12797_v2 = vld [vmem:[#allocation2 + $0x90] sm:$0xff] }
 0x3c2   :  { %v11873_v26 = vpop.f32.mrb[166].mxu1 }
 0x3c3   :  { %v17004_v30 = vpop.f32.mrb[167].mxu1  ;;  %12035 = vmatmul.mubr.msk.f32.gmra.mrb[236].mxu1 %vm1106_vm1, %v12788_v28  ;;  %v12798_v28 = vld [vmem:[#allocation2 + $0x98] sm:$0xff] }
 0x3c4   :  { %11562 = vmatmul.mubr.msk.f32.gmra.mrb[92].mxu0 %vm1106_vm1, %v19500_v61  ;;  %12037 = vmatprep.mubr.msk.f32.mxu1 %vm1106_vm1, %v12789_v53 }
 0x3c5   :  { %11564 = vmatprep.mubr.msk.f32.mxu0 %vm1106_vm1, %v19502_v47 }
 0x3c7   :  { %v11405_v4 = vpop.f32.mrb[12].mxu0  ;;  %12038 = vmatmul.mubr.msk.f32.gmra.mrb[238].mxu1 %vm1106_vm1, %v12790_v49 }
 0x3c8   :  { %v17014_v11 = vadd.f32 %v11405_v4, %v16422_v59  ;;  %v4117_v16 = vpop.f32.mrb[13].mxu0  ;;  %11565 = vmatmul.mubr.msk.f32.gmra.mrb[142].mxu0 %vm1106_vm1, %v19503_v24  ;;  %12040 = vmatprep.mubr.msk.f32.mxu1 %vm1106_vm1, %v12791_v36  ;;  %v12794_v24 = vld [vmem:[#allocation2 + $0x78] sm:$0xff]  ;;  %v12799_v4 = vld [vmem:[#allocation2 + $0xa0] sm:$0xff]  ;;  %v12800_v36 = vld [vmem:[#allocation2 + $0xa8] sm:$0xff] }
 0x3ca   :  { %v17019_v61 = vpop.f32.mrb[168].mxu1 }
 0x3cb   :  { %v11408_v31 = vpop.f32.mrb[14].mxu0  ;;  %v6023_v51 = vpop.f32.mrb[169].mxu1  ;;  %12041 = vmatmul.mubr.msk.f32.gmra.mrb[22].mxu1 %vm1106_vm1, %v12792_v62  ;;  %v12802_v62 = vld [vmem:[#allocation2 + $0xb8] sm:$0xff] }
 0x3cc   :  { %v4126_v47 = vpop.f32.mrb[15].mxu0  ;;  %12043 = vmatprep.mubr.msk.f32.mxu1 %vm1106_vm1, %v12793_v15  ;;  %v12801_v31 = vld [vmem:[#allocation2 + $0xb0] sm:$0xff] }
 0x3cd   :  { %v17024_v59 = vadd.f32 %v4126_v47, %v16439_v13 }
 0x3ce   :  { %v11882_v44 = vpop.f32.mrb[170].mxu1 }
 0x3cf   :  { %v17026_v5 = vpop.f32.mrb[171].mxu1  ;;  %12044 = vmatmul.mubr.msk.f32.gmra.mrb[240].mxu1 %vm1106_vm1, %v12794_v24  ;;  %v12803_v44 = vld [vmem:[#allocation2 + $0xc0] sm:$0xff] }
 0x3d0   :  { %12046 = vmatprep.mubr.msk.f32.mxu1 %vm1106_vm1, %v12795_v1 }
 0x3d3   :  { %v11414_v20 = vpop.f32.mrb[16].mxu0  ;;  %12047 = vmatmul.mubr.msk.f32.gmra.mrb[242].mxu1 %vm1106_vm1, %v12796_v60 }
 0x3d4   :  { %v17032_v39 = vadd.f32 %v11414_v20, %v16456_v58  ;;  %v4145_v14 = vpop.f32.mrb[17].mxu0  ;;  %12049 = vmatprep.mubr.msk.f32.mxu1 %vm1106_vm1, %v12797_v2 }
 0x3d5   :  { %v12804_v14 = vld [vmem:[#allocation2 + $0xc8] sm:$0xff] }
 0x3d6   :  { %v17035_v13 = vpop.f32.mrb[172].mxu1 }
 0x3d7   :  { %v11417_v55 = vpop.f32.mrb[18].mxu0  ;;  %v6201_v26 = vpop.f32.mrb[173].mxu1  ;;  %12050 = vmatmul.mubr.msk.f32.gmra.mrb[28].mxu1 %vm1106_vm1, %v12798_v28 }
 0x3d8   :  { %v4154_v53 = vpop.f32.mrb[19].mxu0  ;;  %12052 = vmatprep.mubr.msk.f32.mxu1 %vm1106_vm1, %v12799_v4  ;;  %v12805_v55 = vld [vmem:[#allocation2 + $0xd0] sm:$0xff]  ;;  %v19521_v26 = vld [vmem:[#allocation222_spill] sm:$0xff] }
 0x3d9   :  { %v17040_v49 = vadd.f32 %v4154_v53, %v16473_v38  ;;  %v19520_v38 = vld [vmem:[#allocation123_spill] sm:$0xff] }
 0x3da   :  { %v11893_v58 = vpop.f32.mrb[174].mxu1 }
 0x3db   :  { %v17042_v16 = vpop.f32.mrb[175].mxu1  ;;  %12053 = vmatmul.mubr.msk.f32.gmra.mrb[244].mxu1 %vm1106_vm1, %v12800_v36  ;;  %v19522_v58 = vld [vmem:[#allocation126_spill] sm:$0xff] }
 0x3dc   :  { %12055 = vmatprep.mubr.msk.f32.mxu1 %vm1106_vm1, %v12801_v31 }
 0x3df   :  { %v11423_v51 = vpop.f32.mrb[20].mxu0  ;;  %12056 = vmatmul.mubr.msk.f32.gmra.mrb[246].mxu1 %vm1106_vm1, %v12802_v62  ;;  %v12806_v62 = vld [vmem:[#allocation2 + $0xd8] sm:$0xff] }
 0x3e0   :  { %v4300_v47 = vadd.f32 %v11423_v51, %v16490_v17  ;;  %v4173_v15 = vpop.f32.mrb[21].mxu0  ;;  %12058 = vmatprep.mubr.msk.f32.mxu1 %vm1106_vm1, %v12803_v44 }
 0x3e1   :  { %v12807_v15 = vld [vmem:[#allocation2 + $0xe0] sm:$0xff] }
 0x3e2   :  { %v4898_v24 = vadd.f32 %v19520_v38, %v4300_v47  ;;  %v17050_v1 = vpop.f32.mrb[176].mxu1  ;;  %v12808_v38 = vld [vmem:[#allocation2 + $0xe8] sm:$0xff] }
 0x3e3   :  { %v11426_v20 = vpop.f32.mrb[22].mxu0  ;;  %v6229_v60 = vpop.f32.mrb[177].mxu1  ;;  %12059 = vmatmul.mubr.msk.f32.gmra.mrb[34].mxu1 %vm1106_vm1, %v12804_v14  ;;  %v19525_v14 = vld [vmem:[#allocation128_spill] sm:$0xff] }
 0x3e4   :  { %v4182_v2 = vpop.f32.mrb[23].mxu0  ;;  %12061 = vmatprep.mubr.msk.f32.mxu1 %vm1106_vm1, %v12805_v55  ;;  %v5496_v28 = vadd.f32 %v19521_v26, %v4898_v24  ;;  %v12809_v60 = vld [vmem:[#allocation2 + $0xf0] sm:$0xff] }
 0x3e5   :  { %v4301_v17 = vadd.f32 %v4182_v2, %v16507_v52 }
 0x3e6   :  { %v11902_v53 = vpop.f32.mrb[178].mxu1  ;;  %v17057_v4 = vadd.f32 %v16955_v56, %v5496_v28 }
 0x3e7   :  { %v4899_v36 = vadd.f32 %v19522_v58, %v4301_v17  ;;  %v17060_v31 = vpop.f32.mrb[148].mxu0  ;;  %v17062_v51 = vpop.f32.mrb[179].mxu1  ;;  %12062 = vmatmul.mubr.msk.f32.gmra.mrb[248].mxu1 %vm1106_vm1, %v12806_v62  ;;  %v12811_v53 = vld [vmem:[#allocation2 + $0x100] sm:$0xff] }
 0x3e8   :  { %19523 = vst [vmem:[#allocation111_spill] sm:$0xff] %v17060_v31  ;;  %v17065_v47 = vpop.f32.mrb[149].mxu0  ;;  %12064 = vmatprep.mubr.msk.f32.mxu1 %vm1106_vm1, %v12807_v15  ;;  %v19527_v15 = vld [vmem:[#allocation133_spill] sm:$0xff] }
 0x3e9   :  { %19524 = vst [vmem:[#allocation32_spill] sm:$0xff] %v17065_v47  ;;  %v5497_v52 = vadd.f32 %v16365_v40, %v4899_v36  ;;  %v12810_v40 = vld [vmem:[#allocation2 + $0xf8] sm:$0xff] }
 0x3eb   :  { %v11432_v44 = vpop.f32.mrb[24].mxu0  ;;  %12065 = vmatmul.mubr.msk.f32.gmra.mrb[250].mxu1 %vm1106_vm1, %v12808_v38  ;;  %v17071_v56 = vadd.f32 %v16972_v34, %v5497_v52 }
 0x3ec   :  { %v4304_v24 = vadd.f32 %v11432_v44, %v16524_v27  ;;  %v4201_v20 = vpop.f32.mrb[25].mxu0  ;;  %12067 = vmatprep.mubr.msk.f32.mxu1 %vm1106_vm1, %v12809_v60  ;;  %v19526_v27 = vld [vmem:[#allocation71_spill] sm:$0xff]  ;;  %v12813_v60 = vld [vmem:[#allocation2 + $0x110] sm:$0xff] }
 0x3ee   :  { %v4902_v2 = vadd.f32 %v19525_v14, %v4304_v24  ;;  %v17076_v55 = vpop.f32.mrb[180].mxu1  ;;  %v12812_v24 = vld [vmem:[#allocation2 + $0x108] sm:$0xff] }
 0x3ef   :  { %v11435_v26 = vpop.f32.mrb[26].mxu0  ;;  %v6257_v28 = vpop.f32.mrb[181].mxu1  ;;  %12068 = vmatmul.mubr.msk.f32.gmra.mrb[40].mxu1 %vm1106_vm1, %v12810_v40 }
 0x3f0   :  { %v4210_v17 = vpop.f32.mrb[27].mxu0  ;;  %12070 = vmatprep.mubr.msk.f32.mxu1 %vm1106_vm1, %v12811_v53  ;;  %v5500_v34 = vadd.f32 %v16394_v0, %v4902_v2  ;;  %v19530_v0 = vld [vmem:[#allocation59_spill] sm:$0xff]  ;;  %v12814_v26 = vld [vmem:[#allocation2 + $0x118] sm:$0xff] }
 0x3f1   :  { %v4305_v58 = vadd.f32 %v4210_v17, %v19526_v27  ;;  %v19531_v28 = vld [vmem:[#allocation74_spill] sm:$0xff]  ;;  %v12815_v53 = vld [vmem:[#allocation2 + $0x120] sm:$0xff] }
 0x3f2   :  { %v11911_v36 = vpop.f32.mrb[182].mxu1  ;;  %v17083_v62 = vadd.f32 %v16991_v45, %v5500_v34  ;;  %v19532_v34 = vld [vmem:[#allocation140_spill] sm:$0xff] }
 0x3f3   :  { %v4903_v52 = vadd.f32 %v19527_v15, %v4305_v58  ;;  %v17086_v44 = vpop.f32.mrb[154].mxu0  ;;  %v17088_v38 = vpop.f32.mrb[183].mxu1  ;;  %12071 = vmatmul.mubr.msk.f32.gmra.mrb[252].mxu1 %vm1106_vm1, %v12812_v24 }
 0x3f4   :  { %19528 = vst [vmem:[#allocation67_spill] sm:$0xff] %v17086_v44  ;;  %v17091_v20 = vpop.f32.mrb[155].mxu0  ;;  %12073 = vmatprep.mubr.msk.f32.mxu1 %vm1106_vm1, %v12813_v60  ;;  %v12817_v60 = vld [vmem:[#allocation2 + $0x130] sm:$0xff] }
 0x3f5   :  { %19529 = vst [vmem:[#allocation37_spill] sm:$0xff] %v17091_v20  ;;  %v5501_v14 = vadd.f32 %v19530_v0, %v4903_v52  ;;  %v12816_v52 = vld [vmem:[#allocation2 + $0x128] sm:$0xff] }
 0x3f7   :  { %v11441_v2 = vpop.f32.mrb[28].mxu0  ;;  %12074 = vmatmul.mubr.msk.f32.gmra.mrb[254].mxu1 %vm1106_vm1, %v12814_v26  ;;  %v17097_v45 = vadd.f32 %v17004_v30, %v5501_v14  ;;  %v19533_v30 = vld [vmem:[#allocation60_spill] sm:$0xff] }
 0x3f8   :  { %v4308_v40 = vadd.f32 %v11441_v2, %v19531_v28  ;;  %v4229_v17 = vpop.f32.mrb[29].mxu0  ;;  %12076 = vmatprep.mubr.msk.f32.mxu1 %vm1106_vm1, %v12815_v53  ;;  %v19534_v14 = vld [vmem:[#allocation80_spill] sm:$0xff] }
 0x3fa   :  { %v4906_v27 = vadd.f32 %v19532_v34, %v4308_v40  ;;  %v17102_v58 = vpop.f32.mrb[184].mxu1  ;;  %v19535_v40 = vld [vmem:[#allocation145_spill] sm:$0xff] }
 0x3fb   :  { %v11444_v36 = vpop.f32.mrb[30].mxu0  ;;  %v6285_v15 = vpop.f32.mrb[185].mxu1  ;;  %12077 = vmatmul.mubr.msk.f32.gmra.mrb[46].mxu1 %vm1106_vm1, %v12816_v52  ;;  %v12819_v52 = vld [vmem:[#allocation2 + $0x140] sm:$0xff] }
 0x3fc   :  { %v4238_v24 = vpop.f32.mrb[31].mxu0  ;;  %12079 = vmatprep.mubr.msk.f32.mxu1 %vm1106_vm1, %v12817_v60  ;;  %v5504_v0 = vadd.f32 %v19533_v30, %v4906_v27  ;;  %v12818_v36 = vld [vmem:[#allocation2 + $0x138] sm:$0xff]  ;;  %v19537_v27 = vld [vmem:[#allocation61_spill] sm:$0xff]  ;;  %v12820_v30 = vld [vmem:[#allocation2 + $0x148] sm:$0xff] }
 0x3fd   :  { %v4309_v2 = vadd.f32 %v4238_v24, %v19534_v14 }
 0x3fe   :  { %v11920_v26 = vpop.f32.mrb[186].mxu1  ;;  %v17109_v28 = vadd.f32 %v17019_v61, %v5504_v0  ;;  %v19538_v0 = vld [vmem:[#allocation85_spill] sm:$0xff] }
 0x3ff   :  { %v4907_v17 = vadd.f32 %v19535_v40, %v4309_v2  ;;  %v17112_v53 = vpop.f32.mrb[64].mxu0  ;;  %v17114_v34 = vpop.f32.mrb[187].mxu1  ;;  %12080 = vmatmul.mubr.msk.f32.gmra.mrb[0].mxu1 %vm1106_vm1, %v12818_v36  ;;  %v12821_v26 = vld [vmem:[#allocation2 + $0x150] sm:$0xff]  ;;  %v19539_v40 = vld [vmem:[#allocation70_spill] sm:$0xff] }
 0x400   :  { %v17117_v15 = vpop.f32.mrb[65].mxu0  ;;  %12082 = vmatprep.mubr.msk.f32.mxu1 %vm1106_vm1, %v12819_v52 }
 0x401   :  { %19536 = vst [vmem:[#allocation113_spill] sm:$0xff] %v17117_v15  ;;  %v5505_v24 = vadd.f32 %v19537_v27, %v4907_v17  ;;  %v12822_v17 = vld [vmem:[#allocation2 + $0x158] sm:$0xff] }
 0x403   :  { %v11452_v60 = vpop.f32.mrb[32].mxu0  ;;  %12083 = vmatmul.mubr.msk.f32.gmra.mrb[2].mxu1 %vm1106_vm1, %v12820_v30  ;;  %v17123_v61 = vadd.f32 %v17026_v5, %v5505_v24  ;;  %v12823_v30 = vld [vmem:[#allocation2 + $0x160] sm:$0xff]  ;;  %v19540_v5 = vld [vmem:[#allocation62_spill] sm:$0xff] }
 0x404   :  { %v4846_v14 = vadd.f32 %v11452_v60, %v19538_v0  ;;  %v4407_v2 = vpop.f32.mrb[33].mxu0  ;;  %12085 = vmatprep.mubr.msk.f32.mxu1 %vm1106_vm1, %v12821_v26  ;;  %v19541_v60 = vld [vmem:[#allocation87_spill] sm:$0xff] }
 0x406   :  { %v5444_v36 = vadd.f32 %v19539_v40, %v4846_v14  ;;  %v17128_v20 = vpop.f32.mrb[188].mxu1  ;;  %v19542_v14 = vld [vmem:[#allocation76_spill] sm:$0xff] }
 0x407   :  { %v11455_v52 = vpop.f32.mrb[34].mxu0  ;;  %v6313_v44 = vpop.f32.mrb[189].mxu1  ;;  %12086 = vmatmul.mubr.msk.f32.gmra.mrb[52].mxu1 %vm1106_vm1, %v12822_v17 }
 0x408   :  { %v4416_v27 = vpop.f32.mrb[35].mxu0  ;;  %12088 = vmatprep.mubr.msk.f32.mxu1 %vm1106_vm1, %v12823_v30  ;;  %v6042_v24 = vadd.f32 %v19540_v5, %v5444_v36  ;;  %v12824_v52 = vld [vmem:[#allocation2 + $0x168] sm:$0xff]  ;;  %v12825_v30 = vld [vmem:[#allocation2 + $0x170] sm:$0xff]  ;;  %v19545_v36 = vld [vmem:[#allocation63_spill] sm:$0xff] }
 0x409   :  { %v4847_v0 = vadd.f32 %v4416_v27, %v19541_v60  ;;  %v12826_v60 = vld [vmem:[#allocation2 + $0x178] sm:$0xff] }
 0x40a   :  { %v11929_v2 = vpop.f32.mrb[190].mxu1  ;;  %v17135_v26 = vadd.f32 %v17035_v13, %v6042_v24 }
 0x40b   :  { %v5445_v40 = vadd.f32 %v19542_v14, %v4847_v0  ;;  %v17138_v47 = vpop.f32.mrb[70].mxu0  ;;  %v17140_v44 = vpop.f32.mrb[191].mxu1  ;;  %12089 = vmatmul.mubr.msk.f32.gmra.mrb[6].mxu1 %vm1106_vm1, %v12824_v52  ;;  %v19546_v2 = vld [vmem:[#allocation91_spill] sm:$0xff]  ;;  %v19547_v14 = vld [vmem:[#allocation84_spill] sm:$0xff] }
 0x40c   :  { %19543 = vst [vmem:[#allocation40_spill] sm:$0xff] %v17138_v47  ;;  %v17143_v17 = vpop.f32.mrb[71].mxu0  ;;  %12091 = vmatprep.mubr.msk.f32.mxu1 %vm1106_vm1, %v12825_v30 }
 0x40d   :  { %19544 = vst [vmem:[#allocation77_spill] sm:$0xff] %v17143_v17  ;;  %v6043_v27 = vadd.f32 %v19545_v36, %v5445_v40  ;;  %v19548_v40 = vld [vmem:[#allocation9_spill] sm:$0xff] }
 0x40f   :  { %v11461_v5 = vpop.f32.mrb[36].mxu0  ;;  %12092 = vmatmul.mubr.msk.f32.gmra.mrb[8].mxu1 %vm1106_vm1, %v12826_v60  ;;  %v17149_v13 = vadd.f32 %v17042_v16, %v6043_v27  ;;  %v19549_v60 = vld [vmem:[#allocation94_spill] sm:$0xff]  ;;  %v19550_v16 = vld [vmem:[#allocation65_spill] sm:$0xff] }
 0x410   :  { %v4850_v24 = vadd.f32 %v11461_v5, %v16652_v50  ;;  %v4435_v0 = vpop.f32.mrb[37].mxu0  ;;  %12094 = vmatprep.mubr.msk.f32.mxu1 %vm1106_vm1, %v19546_v2 }
 0x412   :  { %v5448_v52 = vadd.f32 %v19547_v14, %v4850_v24  ;;  %v17155_v31 = vpop.f32.mrb[192].mxu1  ;;  %v19551_v24 = vld [vmem:[#allocation55_spill] sm:$0xff] }
 0x413   :  { %v11464_v30 = vpop.f32.mrb[38].mxu0  ;;  %v6341_v17 = vpop.f32.mrb[193].mxu1  ;;  %12095 = vmatmul.mubr.msk.f32.gmra.mrb[58].mxu1 %vm1106_vm1, %v19548_v40 }
 0x414   :  { %v4444_v36 = vpop.f32.mrb[39].mxu0  ;;  %12097 = vmatprep.mubr.msk.f32.mxu1 %vm1106_vm1, %v19549_v60  ;;  %v6046_v27 = vadd.f32 %v19550_v16, %v5448_v52  ;;  %v19554_v52 = vld [vmem:[#allocation66_spill] sm:$0xff] }
 0x415   :  { %v4851_v50 = vadd.f32 %v4444_v36, %v16682_v9  ;;  %v19555_v36 = vld [vmem:[#allocation8_spill] sm:$0xff] }
 0x416   :  { %v11938_v5 = vpop.f32.mrb[194].mxu1  ;;  %v17164_v0 = vadd.f32 %v17050_v1, %v6046_v27  ;;  %v12827_v27 = vld [vmem:[#allocation2 + $0x1e0] sm:$0xff] }
 0x417   :  { %v5449_v2 = vadd.f32 %v19551_v24, %v4851_v50  ;;  %v17167_v14 = vpop.f32.mrb[76].mxu0  ;;  %v17169_v17 = vpop.f32.mrb[195].mxu1  ;;  %12098 = vmatmul.mubr.msk.f32.gmra.mrb[12].mxu1 %vm1106_vm1, %v16636_v18  ;;  %v19556_v18 = vld [vmem:[#allocation100_spill] sm:$0xff] }
 0x418   :  { %19552 = vst [vmem:[#allocation4_spill] sm:$0xff] %v17167_v14  ;;  %v17173_v30 = vpop.f32.mrb[77].mxu0  ;;  %12100 = vmatprep.mubr.msk.f32.mxu1 %vm1106_vm1, %v16643_v43 }
 0x419   :  { %19553 = vst [vmem:[#allocation7_spill] sm:$0xff] %v17173_v30  ;;  %v6047_v9 = vadd.f32 %v19554_v52, %v5449_v2  ;;  %v12828_v2 = vld [vmem:[#allocation2 + $0x1e8] sm:$0xff] }
 0x41b   :  { %v11470_v40 = vpop.f32.mrb[40].mxu0  ;;  %12101 = vmatmul.mubr.msk.f32.gmra.mrb[14].mxu1 %vm1106_vm1, %v19555_v36  ;;  %v17181_v1 = vadd.f32 %v17062_v51, %v6047_v9  ;;  %v12829_v36 = vld [vmem:[#allocation2 + $0x1f0] sm:$0xff]  ;;  %v19557_v51 = vld [vmem:[#allocation68_spill] sm:$0xff] }
 0x41c   :  { %v4854_v60 = vadd.f32 %v11470_v40, %v16700_v22  ;;  %v4463_v16 = vpop.f32.mrb[41].mxu0  ;;  %12103 = vmatprep.mubr.msk.f32.mxu1 %vm1106_vm1, %v12827_v27 }
 0x41e   :  { %v5452_v50 = vadd.f32 %v19556_v18, %v4854_v60  ;;  %v17186_v5 = vpop.f32.mrb[196].mxu1  ;;  %v19558_v60 = vld [vmem:[#allocation106_spill] sm:$0xff] }
 0x41f   :  { %v11473_v43 = vpop.f32.mrb[42].mxu0  ;;  %v6369_v24 = vpop.f32.mrb[197].mxu1  ;;  %12104 = vmatmul.mubr.msk.f32.gmra.mrb[64].mxu1 %vm1106_vm1, %v12828_v2 }
 0x420   :  { %v4472_v52 = vpop.f32.mrb[43].mxu0  ;;  %12106 = vmatprep.mubr.msk.f32.mxu1 %vm1106_vm1, %v12829_v36  ;;  %v6050_v9 = vadd.f32 %v19557_v51, %v5452_v50  ;;  %v12830_v24 = vld [vmem:[#allocation2 + $0x1f8] sm:$0xff]  ;;  %v12831_v36 = vld [vmem:[#allocation2 + $0x200] sm:$0xff]  ;;  %v19561_v50 = vld [vmem:[#allocation73_spill] sm:$0xff] }
 0x421   :  { %v4855_v22 = vadd.f32 %v4472_v52, %v16717_v19  ;;  %v12832_v51 = vld [vmem:[#allocation2 + $0x208] sm:$0xff] }
 0x422   :  { %v11947_v40 = vpop.f32.mrb[198].mxu1  ;;  %v17193_v16 = vadd.f32 %v17076_v55, %v6050_v9 }
 0x423   :  { %v5453_v27 = vadd.f32 %v19558_v60, %v4855_v22  ;;  %v17196_v18 = vpop.f32.mrb[82].mxu0  ;;  %v17198_v43 = vpop.f32.mrb[199].mxu1  ;;  %12107 = vmatmul.mubr.msk.f32.gmra.mrb[18].mxu1 %vm1106_vm1, %v12830_v24  ;;  %v12833_v40 = vld [vmem:[#allocation2 + $0x210] sm:$0xff]  ;;  %v19562_v60 = vld [vmem:[#allocation151_spill] sm:$0xff] }
 0x424   :  { %19559 = vst [vmem:[#allocation44_spill] sm:$0xff] %v17196_v18  ;;  %v17201_v2 = vpop.f32.mrb[83].mxu0  ;;  %12109 = vmatprep.mubr.msk.f32.mxu1 %vm1106_vm1, %v12831_v36 }
 0x425   :  { %19560 = vst [vmem:[#allocation49_spill] sm:$0xff] %v17201_v2  ;;  %v6051_v19 = vadd.f32 %v19561_v50, %v5453_v27  ;;  %v12834_v27 = vld [vmem:[#allocation2 + $0x218] sm:$0xff] }
 0x427   :  { %v11479_v52 = vpop.f32.mrb[44].mxu0  ;;  %12110 = vmatmul.mubr.msk.f32.gmra.mrb[20].mxu1 %vm1106_vm1, %v12832_v51  ;;  %v17207_v55 = vadd.f32 %v17088_v38, %v6051_v19  ;;  %v12835_v51 = vld [vmem:[#allocation2 + $0x220] sm:$0xff]  ;;  %v19563_v38 = vld [vmem:[#allocation78_spill] sm:$0xff] }
 0x428   :  { %v4858_v9 = vadd.f32 %v11479_v52, %v16734_v46  ;;  %v4491_v22 = vpop.f32.mrb[45].mxu0  ;;  %12112 = vmatprep.mubr.msk.f32.mxu1 %vm1106_vm1, %v12833_v40 }
 0x42a   :  { %v5456_v24 = vadd.f32 %v19562_v60, %v4858_v9  ;;  %v17212_v2 = vpop.f32.mrb[200].mxu1  ;;  %v19564_v9 = vld [vmem:[#allocation155_spill] sm:$0xff] }
 0x42b   :  { %v11482_v36 = vpop.f32.mrb[46].mxu0  ;;  %v6397_v18 = vpop.f32.mrb[201].mxu1  ;;  %12113 = vmatmul.mubr.msk.f32.gmra.mrb[70].mxu1 %vm1106_vm1, %v12834_v27 }
 0x42c   :  { %v4500_v50 = vpop.f32.mrb[47].mxu0  ;;  %12115 = vmatprep.mubr.msk.f32.mxu1 %vm1106_vm1, %v12835_v51  ;;  %v6054_v19 = vadd.f32 %v19563_v38, %v5456_v24  ;;  %v12836_v36 = vld [vmem:[#allocation2 + $0x228] sm:$0xff]  ;;  %v12837_v51 = vld [vmem:[#allocation2 + $0x230] sm:$0xff]  ;;  %v19567_v24 = vld [vmem:[#allocation82_spill] sm:$0xff] }
 0x42d   :  { %v4859_v46 = vadd.f32 %v4500_v50, %v16751_v57  ;;  %v12838_v38 = vld [vmem:[#allocation2 + $0x238] sm:$0xff] }
 0x42e   :  { %v11956_v52 = vpop.f32.mrb[202].mxu1  ;;  %v17219_v22 = vadd.f32 %v17102_v58, %v6054_v19  ;;  %v19568_v19 = vld [vmem:[#allocation13_spill] sm:$0xff] }
 0x42f   :  { %v5457_v40 = vadd.f32 %v19564_v9, %v4859_v46  ;;  %v17222_v60 = vpop.f32.mrb[88].mxu0  ;;  %v17224_v18 = vpop.f32.mrb[203].mxu1  ;;  %12116 = vmatmul.mubr.msk.f32.gmra.mrb[24].mxu1 %vm1106_vm1, %v12836_v36  ;;  %v12839_v9 = vld [vmem:[#allocation2 + $0x240] sm:$0xff] }
 0x430   :  { %19565 = vst [vmem:[#allocation50_spill] sm:$0xff] %v17222_v60  ;;  %v17227_v27 = vpop.f32.mrb[89].mxu0  ;;  %12118 = vmatprep.mubr.msk.f32.mxu1 %vm1106_vm1, %v12837_v51  ;;  %v19569_v36 = vld [vmem:[#allocation159_spill] sm:$0xff] }
 0x431   :  { %19566 = vst [vmem:[#allocation51_spill] sm:$0xff] %v17227_v27  ;;  %v6055_v57 = vadd.f32 %v19567_v24, %v5457_v40  ;;  %v12840_v40 = vld [vmem:[#allocation2 + $0x248] sm:$0xff] }
 0x433   :  { %v11488_v50 = vpop.f32.mrb[48].mxu0  ;;  %12119 = vmatmul.mubr.msk.f32.gmra.mrb[26].mxu1 %vm1106_vm1, %v12838_v38  ;;  %v17233_v58 = vadd.f32 %v17114_v34, %v6055_v57  ;;  %v12841_v38 = vld [vmem:[#allocation2 + $0x250] sm:$0xff]  ;;  %v19570_v34 = vld [vmem:[#allocation3_spill] sm:$0xff] }
 0x434   :  { %v4862_v46 = vadd.f32 %v11488_v50, %v19568_v19  ;;  %v4519_v52 = vpop.f32.mrb[49].mxu0  ;;  %12121 = vmatprep.mubr.msk.f32.mxu1 %vm1106_vm1, %v12839_v9  ;;  %v19571_v50 = vld [vmem:[#allocation16_spill] sm:$0xff] }
 0x436   :  { %v5460_v27 = vadd.f32 %v19569_v36, %v4862_v46  ;;  %v17238_v60 = vpop.f32.mrb[204].mxu1  ;;  %v19572_v46 = vld [vmem:[#allocation163_spill] sm:$0xff] }
 0x437   :  { %v11491_v51 = vpop.f32.mrb[50].mxu0  ;;  %v6425_v30 = vpop.f32.mrb[205].mxu1  ;;  %12122 = vmatmul.mubr.msk.f32.gmra.mrb[76].mxu1 %vm1106_vm1, %v12840_v40 }
 0x438   :  { %v4528_v24 = vpop.f32.mrb[51].mxu0  ;;  %12124 = vmatprep.mubr.msk.f32.mxu1 %vm1106_vm1, %v12841_v38  ;;  %v6058_v57 = vadd.f32 %v19570_v34, %v5460_v27  ;;  %v12842_v51 = vld [vmem:[#allocation2 + $0x258] sm:$0xff]  ;;  %v12843_v38 = vld [vmem:[#allocation2 + $0x260] sm:$0xff]  ;;  %v19575_v27 = vld [vmem:[#allocation97_spill] sm:$0xff] }
 0x439   :  { %v4863_v19 = vadd.f32 %v4528_v24, %v19571_v50  ;;  %v12844_v50 = vld [vmem:[#allocation2 + $0x268] sm:$0xff] }
 0x43a   :  { %v11965_v52 = vpop.f32.mrb[206].mxu1  ;;  %v17245_v9 = vadd.f32 %v17128_v20, %v6058_v57  ;;  %v19576_v57 = vld [vmem:[#allocation20_spill] sm:$0xff] }
 0x43b   :  { %v5461_v36 = vadd.f32 %v19572_v46, %v4863_v19  ;;  %v17248_v14 = vpop.f32.mrb[94].mxu0  ;;  %v17250_v30 = vpop.f32.mrb[207].mxu1  ;;  %12125 = vmatmul.mubr.msk.f32.gmra.mrb[30].mxu1 %vm1106_vm1, %v12842_v51  ;;  %v12845_v46 = vld [vmem:[#allocation2 + $0x270] sm:$0xff] }
 0x43c   :  { %19573 = vst [vmem:[#allocation102_spill] sm:$0xff] %v17248_v14  ;;  %v17253_v40 = vpop.f32.mrb[95].mxu0  ;;  %12127 = vmatprep.mubr.msk.f32.mxu1 %vm1106_vm1, %v12843_v38  ;;  %v19577_v51 = vld [vmem:[#allocation81_spill] sm:$0xff] }
 0x43d   :  { %19574 = vst [vmem:[#allocation52_spill] sm:$0xff] %v17253_v40  ;;  %v6059_v24 = vadd.f32 %v19575_v27, %v5461_v36  ;;  %v12846_v36 = vld [vmem:[#allocation2 + $0x278] sm:$0xff] }
 0x43f   :  { %v11497_v34 = vpop.f32.mrb[52].mxu0  ;;  %12128 = vmatmul.mubr.msk.f32.gmra.mrb[32].mxu1 %vm1106_vm1, %v12844_v50  ;;  %v17259_v20 = vadd.f32 %v17140_v44, %v6059_v24  ;;  %v12847_v50 = vld [vmem:[#allocation2 + $0x280] sm:$0xff]  ;;  %v19578_v44 = vld [vmem:[#allocation101_spill] sm:$0xff] }
 0x440   :  { %v4866_v19 = vadd.f32 %v11497_v34, %v19576_v57  ;;  %v4547_v52 = vpop.f32.mrb[53].mxu0  ;;  %12130 = vmatprep.mubr.msk.f32.mxu1 %vm1106_vm1, %v12845_v46  ;;  %v19579_v34 = vld [vmem:[#allocation24_spill] sm:$0xff] }
 0x442   :  { %v5464_v40 = vadd.f32 %v19577_v51, %v4866_v19  ;;  %v17264_v14 = vpop.f32.mrb[208].mxu1  ;;  %v19580_v19 = vld [vmem:[#allocation89_spill] sm:$0xff] }
 0x443   :  { %v11500_v38 = vpop.f32.mrb[54].mxu0  ;;  %v6453_v47 = vpop.f32.mrb[209].mxu1  ;;  %12131 = vmatmul.mubr.msk.f32.gmra.mrb[82].mxu1 %vm1106_vm1, %v12846_v36 }
 0x444   :  { %v4556_v27 = vpop.f32.mrb[55].mxu0  ;;  %12133 = vmatprep.mubr.msk.f32.mxu1 %vm1106_vm1, %v12847_v50  ;;  %v6062_v24 = vadd.f32 %v19578_v44, %v5464_v40  ;;  %v12848_v38 = vld [vmem:[#allocation2 + $0x288] sm:$0xff]  ;;  %v12849_v50 = vld [vmem:[#allocation2 + $0x290] sm:$0xff] }
 0x445   :  { %v4867_v57 = vadd.f32 %v4556_v27, %v19579_v34  ;;  %v19583_v40 = vld [vmem:[#allocation56_spill] sm:$0xff]  ;;  %v12850_v34 = vld [vmem:[#allocation2 + $0x298] sm:$0xff] }
 0x446   :  { %v11974_v52 = vpop.f32.mrb[210].mxu1  ;;  %v17271_v46 = vadd.f32 %v17155_v31, %v6062_v24 }
 0x447   :  { %v5465_v51 = vadd.f32 %v19580_v19, %v4867_v57  ;;  %v17274_v15 = vpop.f32.mrb[100].mxu0  ;;  %v17276_v47 = vpop.f32.mrb[211].mxu1  ;;  %12134 = vmatmul.mubr.msk.f32.gmra.mrb[36].mxu1 %vm1106_vm1, %v12848_v38  ;;  %v12851_v52 = vld [vmem:[#allocation2 + $0x2a0] sm:$0xff]  ;;  %v19584_v19 = vld [vmem:[#allocation96_spill] sm:$0xff] }
 0x448   :  { %19581 = vst [vmem:[#allocation53_spill] sm:$0xff] %v17274_v15  ;;  %v17279_v36 = vpop.f32.mrb[101].mxu0  ;;  %12136 = vmatprep.mubr.msk.f32.mxu1 %vm1106_vm1, %v12849_v50 }
 0x449   :  { %19582 = vst [vmem:[#allocation54_spill] sm:$0xff] %v17279_v36  ;;  %v6063_v27 = vadd.f32 %v19583_v40, %v5465_v51  ;;  %v12852_v51 = vld [vmem:[#allocation2 + $0x2a8] sm:$0xff] }
 0x44b   :  { %v11506_v44 = vpop.f32.mrb[56].mxu0  ;;  %12137 = vmatmul.mubr.msk.f32.gmra.mrb[38].mxu1 %vm1106_vm1, %v12850_v34  ;;  %v17285_v31 = vadd.f32 %v17169_v17, %v6063_v27  ;;  %v12853_v34 = vld [vmem:[#allocation2 + $0x2b0] sm:$0xff]  ;;  %v19585_v17 = vld [vmem:[#allocation11_spill] sm:$0xff] }
 0x44c   :  { %v4870_v24 = vadd.f32 %v11506_v44, %v16836_v6  ;;  %v4575_v57 = vpop.f32.mrb[57].mxu0  ;;  %12139 = vmatprep.mubr.msk.f32.mxu1 %vm1106_vm1, %v12851_v52 }
 0x44e   :  { %v5468_v38 = vadd.f32 %v19584_v19, %v4870_v24  ;;  %v17290_v36 = vpop.f32.mrb[212].mxu1  ;;  %v19586_v24 = vld [vmem:[#allocation170_spill] sm:$0xff] }
 0x44f   :  { %v11509_v50 = vpop.f32.mrb[58].mxu0  ;;  %v6481_v15 = vpop.f32.mrb[213].mxu1  ;;  %12140 = vmatmul.mubr.msk.f32.gmra.mrb[88].mxu1 %vm1106_vm1, %v12852_v51 }
 0x450   :  { %v4584_v40 = vpop.f32.mrb[59].mxu0  ;;  %12142 = vmatprep.mubr.msk.f32.mxu1 %vm1106_vm1, %v12853_v34  ;;  %v6066_v27 = vadd.f32 %v19585_v17, %v5468_v38  ;;  %v12854_v50 = vld [vmem:[#allocation2 + $0x2b8] sm:$0xff]  ;;  %v12855_v34 = vld [vmem:[#allocation2 + $0x2c0] sm:$0xff]  ;;  %v19589_v38 = vld [vmem:[#allocation57_spill] sm:$0xff] }
 0x451   :  { %v4871_v6 = vadd.f32 %v4584_v40, %v16853_v33  ;;  %v12856_v17 = vld [vmem:[#allocation2 + $0x2c8] sm:$0xff] }
 0x452   :  { %v11983_v44 = vpop.f32.mrb[214].mxu1  ;;  %v17297_v57 = vadd.f32 %v17186_v5, %v6066_v27 }
 0x453   :  { %v5469_v52 = vadd.f32 %v19586_v24, %v4871_v6  ;;  %v17300_v19 = vpop.f32.mrb[106].mxu0  ;;  %v17302_v15 = vpop.f32.mrb[215].mxu1  ;;  %12143 = vmatmul.mubr.msk.f32.gmra.mrb[42].mxu1 %vm1106_vm1, %v12854_v50  ;;  %v12857_v44 = vld [vmem:[#allocation2 + $0x2d0] sm:$0xff]  ;;  %v19590_v24 = vld [vmem:[#allocation174_spill] sm:$0xff] }
 0x454   :  { %19587 = vst [vmem:[#allocation104_spill] sm:$0xff] %v17300_v19  ;;  %v17305_v51 = vpop.f32.mrb[107].mxu0  ;;  %12145 = vmatprep.mubr.msk.f32.mxu1 %vm1106_vm1, %v12855_v34 }
 0x455   :  { %19588 = vst [vmem:[#allocation114_spill] sm:$0xff] %v17305_v51  ;;  %v6067_v33 = vadd.f32 %v19589_v38, %v5469_v52  ;;  %v12858_v52 = vld [vmem:[#allocation2 + $0x2d8] sm:$0xff] }
 0x457   :  { %v11515_v40 = vpop.f32.mrb[60].mxu0  ;;  %12146 = vmatmul.mubr.msk.f32.gmra.mrb[44].mxu1 %vm1106_vm1, %v12856_v17  ;;  %v17311_v5 = vadd.f32 %v17198_v43, %v6067_v33  ;;  %v12859_v17 = vld [vmem:[#allocation2 + $0x2e0] sm:$0xff]  ;;  %v19591_v43 = vld [vmem:[#allocation12_spill] sm:$0xff] }
 0x458   :  { %v4874_v27 = vadd.f32 %v11515_v40, %v16870_v35  ;;  %v4603_v6 = vpop.f32.mrb[61].mxu0  ;;  %12148 = vmatprep.mubr.msk.f32.mxu1 %vm1106_vm1, %v12857_v44 }
 0x45a   :  { %v5472_v50 = vadd.f32 %v19590_v24, %v4874_v27  ;;  %v17316_v51 = vpop.f32.mrb[216].mxu1  ;;  %v19592_v27 = vld [vmem:[#allocation178_spill] sm:$0xff] }
 0x45b   :  { %v11518_v34 = vpop.f32.mrb[62].mxu0  ;;  %v6509_v19 = vpop.f32.mrb[217].mxu1  ;;  %12149 = vmatmul.mubr.msk.f32.gmra.mrb[94].mxu1 %vm1106_vm1, %v12858_v52 }
 0x45c   :  { %v4612_v38 = vpop.f32.mrb[63].mxu0  ;;  %12151 = vmatprep.mubr.msk.f32.mxu1 %vm1106_vm1, %v12859_v17  ;;  %v6070_v33 = vadd.f32 %v19591_v43, %v5472_v50  ;;  %v12860_v34 = vld [vmem:[#allocation2 + $0x2e8] sm:$0xff]  ;;  %v12861_v17 = vld [vmem:[#allocation2 + $0x2f0] sm:$0xff]  ;;  %v19595_v50 = vld [vmem:[#allocation58_spill] sm:$0xff] }
 0x45d   :  { %v4875_v35 = vadd.f32 %v4612_v38, %v16887_v8  ;;  %v12862_v43 = vld [vmem:[#allocation2 + $0x2f8] sm:$0xff] }
 0x45e   :  { %v11992_v40 = vpop.f32.mrb[218].mxu1  ;;  %v17323_v6 = vadd.f32 %v17212_v2, %v6070_v33 }
 0x45f   :  { %v5473_v44 = vadd.f32 %v19592_v27, %v4875_v35  ;;  %v17326_v24 = vpop.f32.mrb[112].mxu0  ;;  %v17328_v19 = vpop.f32.mrb[219].mxu1  ;;  %12152 = vmatmul.mubr.msk.f32.gmra.mrb[48].mxu1 %vm1106_vm1, %v12860_v34  ;;  %v12863_v40 = vld [vmem:[#allocation2 + $0x300] sm:$0xff]  ;;  %v19596_v27 = vld [vmem:[#allocation182_spill] sm:$0xff] }
 0x460   :  { %19593 = vst [vmem:[#allocation115_spill] sm:$0xff] %v17326_v24  ;;  %v17331_v52 = vpop.f32.mrb[113].mxu0  ;;  %12154 = vmatprep.mubr.msk.f32.mxu1 %vm1106_vm1, %v12861_v17 }
 0x461   :  { %19594 = vst [vmem:[#allocation116_spill] sm:$0xff] %v17331_v52  ;;  %v6071_v8 = vadd.f32 %v19595_v50, %v5473_v44  ;;  %v12864_v44 = vld [vmem:[#allocation2 + $0x308] sm:$0xff] }
 0x463   :  { %v11524_v38 = vpop.f32.mrb[66].mxu0  ;;  %12155 = vmatmul.mubr.msk.f32.gmra.mrb[50].mxu1 %vm1106_vm1, %v12862_v43  ;;  %v17337_v2 = vadd.f32 %v17224_v18, %v6071_v8  ;;  %v12865_v43 = vld [vmem:[#allocation2 + $0x310] sm:$0xff]  ;;  %v19597_v18 = vld [vmem:[#allocation15_spill] sm:$0xff] }
 0x464   :  { %v4878_v33 = vadd.f32 %v11524_v38, %v16904_v32  ;;  %v4631_v35 = vpop.f32.mrb[67].mxu0  ;;  %12157 = vmatprep.mubr.msk.f32.mxu1 %vm1106_vm1, %v12863_v40 }
 0x466   :  { %v5476_v34 = vadd.f32 %v19596_v27, %v4878_v33  ;;  %v17342_v52 = vpop.f32.mrb[220].mxu1  ;;  %v19598_v33 = vld [vmem:[#allocation186_spill] sm:$0xff] }
 0x467   :  { %v11527_v17 = vpop.f32.mrb[68].mxu0  ;;  %v6537_v24 = vpop.f32.mrb[221].mxu1  ;;  %12158 = vmatmul.mubr.msk.f32.gmra.mrb[4].mxu1 %vm1106_vm1, %v12864_v44 }
 0x468   :  { %v4640_v50 = vpop.f32.mrb[69].mxu0  ;;  %12160 = vmatprep.mubr.msk.f32.mxu1 %vm1106_vm1, %v12865_v43  ;;  %v6074_v8 = vadd.f32 %v19597_v18, %v5476_v34  ;;  %v12866_v17 = vld [vmem:[#allocation2 + $0x318] sm:$0xff]  ;;  %v12867_v43 = vld [vmem:[#allocation2 + $0x320] sm:$0xff]  ;;  %v19601_v34 = vld [vmem:[#allocation108_spill] sm:$0xff] }
 0x469   :  { %v4879_v32 = vadd.f32 %v4640_v50, %v16921_v12  ;;  %v12868_v18 = vld [vmem:[#allocation2 + $0x328] sm:$0xff] }
 0x46a   :  { %v12001_v38 = vpop.f32.mrb[222].mxu1  ;;  %v17349_v35 = vadd.f32 %v17238_v60, %v6074_v8 }
 0x46b   :  { %v5477_v40 = vadd.f32 %v19598_v33, %v4879_v32  ;;  %v17352_v27 = vpop.f32.mrb[118].mxu0  ;;  %v17354_v24 = vpop.f32.mrb[223].mxu1  ;;  %12161 = vmatmul.mubr.msk.f32.gmra.mrb[54].mxu1 %vm1106_vm1, %v12866_v17  ;;  %v12869_v38 = vld [vmem:[#allocation2 + $0x330] sm:$0xff]  ;;  %v19602_v33 = vld [vmem:[#allocation190_spill] sm:$0xff] }
 0x46c   :  { %19599 = vst [vmem:[#allocation18_spill] sm:$0xff] %v17352_v27  ;;  %v17357_v44 = vpop.f32.mrb[119].mxu0  ;;  %12163 = vmatprep.mubr.msk.f32.mxu1 %vm1106_vm1, %v12867_v43  ;;  %v12870_v27 = vld [vmem:[#allocation2 + $0x338] sm:$0xff] }
 0x46d   :  { %19600 = vst [vmem:[#allocation117_spill] sm:$0xff] %v17357_v44  ;;  %v6075_v12 = vadd.f32 %v19601_v34, %v5477_v40 }
 0x46f   :  { %v11533_v50 = vpop.f32.mrb[72].mxu0  ;;  %12164 = vmatmul.mubr.msk.f32.gmra.mrb[56].mxu1 %vm1106_vm1, %v12868_v18  ;;  %v17363_v60 = vadd.f32 %v17250_v30, %v6075_v12  ;;  %v12871_v30 = vld [vmem:[#allocation2 + $0x340] sm:$0xff] }
 0x470   :  { %v4882_v8 = vadd.f32 %v11533_v50, %v16944_v3  ;;  %v4659_v32 = vpop.f32.mrb[73].mxu0  ;;  %12166 = vmatprep.mubr.msk.f32.mxu1 %vm1106_vm1, %v12869_v38  ;;  %v19603_v3 = vld [vmem:[#allocation23_spill] sm:$0xff]  ;;  %v19604_v38 = vld [vmem:[#allocation194_spill] sm:$0xff] }
 0x472   :  { %v5480_v17 = vadd.f32 %v19602_v33, %v4882_v8  ;;  %v12007_v44 = vpop.f32.mrb[224].mxu1 }
 0x473   :  { %v17369_v43 = vadd.f32 %v12007_v44, %v17057_v4  ;;  %v11536_v40 = vpop.f32.mrb[74].mxu0  ;;  %v6565_v34 = vpop.f32.mrb[225].mxu1  ;;  %12167 = vmatmul.mubr.msk.f32.gmra.mrb[10].mxu1 %vm1106_vm1, %v12870_v27 }
 0x474   :  { %v4668_v18 = vpop.f32.mrb[75].mxu0  ;;  %12169 = vmatprep.mubr.msk.f32.mxu1 %vm1106_vm1, %v12871_v30  ;;  %v6078_v12 = vadd.f32 %v19603_v3, %v5480_v17  ;;  %v19606_v30 = vld [vmem:[#allocation131_spill] sm:$0xff] }
 0x475   :  { %v4883_v50 = vadd.f32 %v4668_v18, %v16966_v21  ;;  %v19605_v21 = vld [vmem:[#allocation26_spill] sm:$0xff] }
 0x476   :  { %v12010_v32 = vpop.f32.mrb[226].mxu1  ;;  %v17376_v8 = vadd.f32 %v17264_v14, %v6078_v12 }
 0x477   :  { %v5481_v4 = vadd.f32 %v19604_v38, %v4883_v50  ;;  %v17379_v44 = vpop.f32.mrb[124].mxu0  ;;  %v6574_v33 = vpop.f32.mrb[227].mxu1  ;;  %12170 = vmatmul.mubr.msk.f32.gmra.mrb[60].mxu1 %vm1106_vm1, %v16935_v25  ;;  %v19608_v32 = vld [vmem:[#allocation132_spill] sm:$0xff] }
 0x478   :  { %v17384_v27 = vadd.f32 %v6574_v33, %v17071_v56  ;;  %v17386_v40 = vpop.f32.mrb[125].mxu0  ;;  %12172 = vmatprep.mubr.msk.f32.mxu1 %vm1106_vm1, %v16939_v37  ;;  %v8175_v56 = vld [vmem:[%s18615_s11] sm:$0xf]  ;;  %v19607_v37 = vld [vmem:[#allocation198_spill] sm:$0xff]  ;;  %v19609_v38 = vld [vmem:[#allocation136_spill] sm:$0xff] }
 0x479   :  { %v6079_v17 = vadd.f32 %v19605_v21, %v5481_v4  ;;  %12321 = vmatprep.subr.msk.mxu0 %vm2121_vm2, %v8175_v56 }
 0x47a   :  { %12322 = vmatpush3.msk.msra.mxu0 %vm2121_vm2, %v8175_v56 }
 0x47b   :  { %v11542_v14 = vpop.f32.mrb[78].mxu0  ;;  %12173 = vmatmul.mubr.msk.f32.gmra.mrb[62].mxu1 %vm1106_vm1, %v16937_v23  ;;  %v17394_v34 = vadd.f32 %v17276_v47, %v6079_v17 }
 0x47c   :  { %v4886_v18 = vadd.f32 %v11542_v14, %v16984_v42  ;;  %v4687_v25 = vpop.f32.mrb[79].mxu0  ;;  %12177 = vmatprep.mubr.msk.f32.mxu1 %vm1106_vm1, %v19606_v30  ;;  %v19611_v30 = vld [vmem:[#allocation138_spill] sm:$0xff] }
 0x47e   :  { %v5484_v3 = vadd.f32 %v19607_v37, %v4886_v18  ;;  %v12016_v12 = vpop.f32.mrb[228].mxu1 }
 0x47f   :  { %v17405_v23 = vadd.f32 %v12016_v12, %v17083_v62  ;;  %v11545_v47 = vpop.f32.mrb[80].mxu0  ;;  %v6593_v50 = vpop.f32.mrb[229].mxu1  ;;  %12178 = vmatmul.mubr.msk.f32.vlgmr.msra.gmra.mrb[16].mxu1 %vm1106_vm1, %v19608_v32  ;;  %v19610_v62 = vld [vmem:[#allocation202_spill] sm:$0xff]  ;;  %v19614_v12 = vld [vmem:[#allocation143_spill] sm:$0xff] }
 0x480   :  { %v4696_v42 = vpop.f32.mrb[81].mxu0  ;;  %12180 = vmatprep.mubr.msk.f32.mxu1 %vm1106_vm1, %v19609_v38  ;;  %v6082_v4 = vadd.f32 %v16844_v48, %v5484_v3  ;;  %v19612_v48 = vld [vmem:[#allocation141_spill] sm:$0xff] }
 0x481   :  { %v4887_v33 = vadd.f32 %v4696_v42, %v16999_v54  ;;  %v19613_v54 = vld [vmem:[#allocation28_spill] sm:$0xff] }
 0x482   :  { %v12019_v21 = vpop.f32.mrb[230].mxu1  ;;  %v17415_v17 = vadd.f32 %v17290_v36, %v6082_v4  ;;  %v19615_v42 = vld [vmem:[#allocation144_spill] sm:$0xff] }
 0x483   :  { %v5485_v14 = vadd.f32 %v19610_v62, %v4887_v33  ;;  %v17418_v18 = vpop.f32.mrb[130].mxu0  ;;  %v6602_v25 = vpop.f32.mrb[231].mxu1  ;;  %12181 = vmatmul.mubr.msk.f32.gmra.mrb[66].mxu1 %vm1106_vm1, %v19611_v30 }
 0x484   :  { %v17423_v56 = vadd.f32 %v6602_v25, %v17097_v45  ;;  %v17425_v37 = vpop.f32.mrb[131].mxu0  ;;  %12183 = vmatprep.mubr.msk.f32.mxu1 %vm1106_vm1, %v19612_v48  ;;  %v19616_v45 = vld [vmem:[#allocation206_spill] sm:$0xff] }
 0x485   :  { %v6083_v3 = vadd.f32 %v19613_v54, %v5485_v14  ;;  %v19617_v14 = vld [vmem:[#allocation146_spill] sm:$0xff] }
 0x487   :  { %v11551_v36 = vpop.f32.mrb[84].mxu0  ;;  %12184 = vmatmul.mubr.msk.f32.gmra.mrb[68].mxu1 %vm1106_vm1, %v19614_v12  ;;  %v17433_v47 = vadd.f32 %v17302_v15, %v6083_v3  ;;  %v19618_v15 = vld [vmem:[#allocation69_spill] sm:$0xff]  ;;  %v19619_v3 = vld [vmem:[#allocation210_spill] sm:$0xff] }
 0x488   :  { %v4890_v50 = vadd.f32 %v11551_v36, %v17014_v11  ;;  %v4715_v32 = vpop.f32.mrb[85].mxu0  ;;  %12186 = vmatprep.mubr.msk.f32.mxu1 %vm1106_vm1, %v19615_v42 }
 0x48a   :  { %v5488_v38 = vadd.f32 %v19616_v45, %v4890_v50  ;;  %v12025_v4 = vpop.f32.mrb[232].mxu1  ;;  %v19620_v50 = vld [vmem:[#allocation72_spill] sm:$0xff]  ;;  %v19622_v45 = vld [vmem:[#allocation75_spill] sm:$0xff] }
 0x48b   :  { %v17440_v33 = vadd.f32 %v12025_v4, %v17109_v28  ;;  %v11554_v21 = vpop.f32.mrb[86].mxu0  ;;  %v6621_v62 = vpop.f32.mrb[233].mxu1  ;;  %12187 = vmatmul.mubr.msk.f32.gmra.mrb[22].mxu1 %vm1106_vm1, %v19617_v14 }
 0x48c   :  { %v4724_v25 = vpop.f32.mrb[87].mxu0  ;;  %12189 = vmatprep.mubr.msk.f32.mxu1 %vm1106_vm1, %v19618_v15  ;;  %v6086_v11 = vadd.f32 %v16878_v7, %v5488_v38  ;;  %v19621_v7 = vld [vmem:[#allocation147_spill] sm:$0xff] }
 0x48d   :  { %v4891_v30 = vadd.f32 %v4724_v25, %v17024_v59  ;;  %v19623_v62 = vld [vmem:[#allocation79_spill] sm:$0xff] }
 0x48e   :  { %v12028_v48 = vpop.f32.mrb[234].mxu1  ;;  %v17449_v54 = vadd.f32 %v17316_v51, %v6086_v11 }
 0x48f   :  { %v5489_v28 = vadd.f32 %v19619_v3, %v4891_v30  ;;  %v17452_v36 = vpop.f32.mrb[136].mxu0  ;;  %v6630_v12 = vpop.f32.mrb[235].mxu1  ;;  %12190 = vmatmul.mubr.msk.f32.gmra.mrb[72].mxu1 %vm1106_vm1, %v19620_v50  ;;  %v19625_v30 = vld [vmem:[#allocation148_spill] sm:$0xff]  ;;  %v19627_v50 = vld [vmem:[#allocation218_spill] sm:$0xff] }
 0x490   :  { %v17457_v32 = vadd.f32 %v6630_v12, %v17123_v61  ;;  %v17459_v42 = vpop.f32.mrb[137].mxu0  ;;  %12192 = vmatprep.mubr.msk.f32.mxu1 %vm1106_vm1, %v19621_v7  ;;  %v19624_v61 = vld [vmem:[#allocation214_spill] sm:$0xff] }
 0x491   :  { %v6087_v59 = vadd.f32 %v16891_v41, %v5489_v28 }
 0x493   :  { %v11560_v51 = vpop.f32.mrb[90].mxu0  ;;  %12193 = vmatmul.mubr.msk.f32.gmra.mrb[74].mxu1 %vm1106_vm1, %v19622_v45  ;;  %v17467_v38 = vadd.f32 %v17328_v19, %v6087_v59  ;;  %v19626_v19 = vld [vmem:[#allocation83_spill] sm:$0xff] }
 0x494   :  { %v4894_v4 = vadd.f32 %v11560_v51, %v17032_v39  ;;  %v4743_v21 = vpop.f32.mrb[91].mxu0  ;;  %12195 = vmatprep.mubr.msk.f32.mxu1 %vm1106_vm1, %v19623_v62  ;;  %v19628_v51 = vld [vmem:[#allocation86_spill] sm:$0xff]  ;;  %v19631_v62 = vld [vmem:[#allocation93_spill] sm:$0xff] }
 0x496   :  { %v5492_v14 = vadd.f32 %v19624_v61, %v4894_v4  ;;  %v12036_v25 = vpop.f32.mrb[236].mxu1 }
 0x497   :  { %v17474_v15 = vadd.f32 %v12036_v25, %v17135_v26  ;;  %v11563_v41 = vpop.f32.mrb[92].mxu0  ;;  %v6799_v11 = vpop.f32.mrb[237].mxu1  ;;  %12196 = vmatmul.mubr.msk.f32.gmra.mrb[28].mxu1 %vm1106_vm1, %v19625_v30  ;;  %v19632_v25 = vld [vmem:[#allocation88_spill] sm:$0xff]  ;;  %v19634_v30 = vld [vmem:[#allocation98_spill] sm:$0xff] }
 0x498   :  { %v4752_v48 = vpop.f32.mrb[93].mxu0  ;;  %12198 = vmatprep.mubr.msk.f32.mxu1 %vm1106_vm1, %v19626_v19  ;;  %v6090_v39 = vadd.f32 %v16912_v63, %v5492_v14  ;;  %v19629_v63 = vld [vmem:[#allocation149_spill] sm:$0xff] }
 0x499   :  { %v4895_v3 = vadd.f32 %v4752_v48, %v17040_v49  ;;  %v19633_v41 = vld [vmem:[#allocation105_spill] sm:$0xff]  ;;  %v19635_v48 = vld [vmem:[#allocation107_spill] sm:$0xff] }
 0x49a   :  { %v12039_v28 = vpop.f32.mrb[238].mxu1  ;;  %v17483_v12 = vadd.f32 %v17342_v52, %v6090_v39  ;;  %v19630_v52 = vld [vmem:[#allocation5_spill] sm:$0xff] }
 0x49b   :  { %v5493_v26 = vadd.f32 %v19627_v50, %v4895_v3  ;;  %v17486_v7 = vpop.f32.mrb[142].mxu0  ;;  %v6808_v59 = vpop.f32.mrb[239].mxu1  ;;  %12199 = vmatmul.mubr.msk.f32.gmra.mrb[78].mxu1 %vm1106_vm1, %v19628_v51  ;;  %v19637_v19 = vld [vmem:[#allocation109_spill] sm:$0xff]  ;;  %v19638_v50 = vld [vmem:[#allocation10_spill] sm:$0xff] }
 0x49c   :  { %v17491_v45 = vadd.f32 %v6808_v59, %v17149_v13  ;;  %v17493_v4 = vpop.f32.mrb[143].mxu0  ;;  %12201 = vmatprep.mubr.msk.f32.mxu1 %vm1106_vm1, %v19629_v63  ;;  %v19640_v51 = vld [vmem:[#allocation150_spill] sm:$0xff] }
 0x49d   :  { %v6091_v49 = vadd.f32 %v16925_v10, %v5493_v26  ;;  %v19639_v26 = vld [vmem:[#allocation103_spill] sm:$0xff] }
 0x49f   :  { %12202 = vmatmul.mubr.msk.f32.gmra.mrb[80].mxu1 %vm1106_vm1, %v19630_v52  ;;  %v17501_v21 = vadd.f32 %v17354_v24, %v6091_v49  ;;  %v19641_v49 = vld [vmem:[#allocation152_spill] sm:$0xff]  ;;  %v19643_v52 = vld [vmem:[#allocation154_spill] sm:$0xff] }
 0x4a0   :  { %12204 = vmatprep.mubr.msk.f32.mxu1 %vm1106_vm1, %v19631_v62 }
 0x4a2   :  { %v12045_v61 = vpop.f32.mrb[240].mxu1 }
 0x4a3   :  { %v17506_v13 = vadd.f32 %v12045_v61, %v17164_v0  ;;  %v6827_v14 = vpop.f32.mrb[241].mxu1  ;;  %12205 = vmatmul.mubr.msk.f32.gmra.mrb[34].mxu1 %vm1106_vm1, %v19632_v25  ;;  %v19636_v0 = vld [vmem:[#allocation99_spill] sm:$0xff]  ;;  %v19644_v25 = vld [vmem:[#allocation156_spill] sm:$0xff] }
 0x4a4   :  { %12207 = vmatprep.mubr.msk.f32.mxu1 %vm1106_vm1, %v19633_v41  ;;  %v19645_v41 = vld [vmem:[#allocation157_spill] sm:$0xff] }
 0x4a6   :  { %v12048_v10 = vpop.f32.mrb[242].mxu1 }
 0x4a7   :  { %v6836_v11 = vpop.f32.mrb[243].mxu1  ;;  %12208 = vmatmul.mubr.msk.f32.gmra.mrb[84].mxu1 %vm1106_vm1, %v19634_v30 }
 0x4a8   :  { %v17515_v24 = vadd.f32 %v6836_v11, %v17181_v1  ;;  %12210 = vmatprep.mubr.msk.f32.mxu1 %vm1106_vm1, %v19635_v48  ;;  %v19646_v11 = vld [vmem:[#allocation158_spill] sm:$0xff]  ;;  %v19647_v48 = vld [vmem:[#allocation160_spill] sm:$0xff] }
 0x4ab   :  { %12211 = vmatmul.mubr.msk.f32.gmra.mrb[86].mxu1 %vm1106_vm1, %v19636_v0  ;;  %v19649_v0 = vld [vmem:[#allocation162_spill] sm:$0xff] }
 0x4ac   :  { %12213 = vmatprep.mubr.msk.f32.mxu1 %vm1106_vm1, %v19637_v19 }
 0x4ae   :  { %v12054_v39 = vpop.f32.mrb[244].mxu1 }
 0x4af   :  { %v17524_v3 = vadd.f32 %v12054_v39, %v17193_v16  ;;  %v6855_v28 = vpop.f32.mrb[245].mxu1  ;;  %12214 = vmatmul.mubr.msk.f32.gmra.mrb[40].mxu1 %vm1106_vm1, %v19638_v50  ;;  %v19642_v16 = vld [vmem:[#allocation153_spill] sm:$0xff]  ;;  %v19650_v50 = vld [vmem:[#allocation164_spill] sm:$0xff] }
 0x4b0   :  { %12216 = vmatprep.mubr.msk.f32.mxu1 %vm1106_vm1, %v19639_v26  ;;  %v19651_v26 = vld [vmem:[#allocation165_spill] sm:$0xff] }
 0x4b2   :  { %v12057_v1 = vpop.f32.mrb[246].mxu1 }
 0x4b3   :  { %v6864_v59 = vpop.f32.mrb[247].mxu1  ;;  %12217 = vmatmul.mubr.msk.f32.gmra.mrb[90].mxu1 %vm1106_vm1, %v19640_v51 }
 0x4b4   :  { %v17533_v63 = vadd.f32 %v6864_v59, %v17207_v55  ;;  %12219 = vmatprep.mubr.msk.f32.mxu1 %vm1106_vm1, %v19641_v49  ;;  %v19652_v59 = vld [vmem:[#allocation166_spill] sm:$0xff] }
 0x4b5   :  { %v19653_v49 = vld [vmem:[#allocation90_spill] sm:$0xff] }
 0x4b7   :  { %12220 = vmatmul.mubr.msk.f32.gmra.mrb[92].mxu1 %vm1106_vm1, %v19642_v16  ;;  %v12872_v16 = vld [vmem:[#allocation2 + $0x198] sm:$0xff] }
 0x4b8   :  { %12222 = vmatprep.mubr.msk.f32.mxu1 %vm1106_vm1, %v19643_v52  ;;  %v1633_v52 = vrot.slane %v12872_v16, 1 }
 0x4ba   :  { %v12063_v62 = vpop.f32.mrb[248].mxu1 }
 0x4bb   :  { %v17542_v61 = vadd.f32 %v12063_v62, %v17219_v22  ;;  %v6883_v14 = vpop.f32.mrb[249].mxu1  ;;  %12223 = vmatmul.mubr.msk.f32.gmra.mrb[46].mxu1 %vm1106_vm1, %v19644_v25  ;;  %v19648_v22 = vld [vmem:[#allocation161_spill] sm:$0xff]  ;;  %v12873_v62 = vld [vmem:[#allocation2 + $0x1a0] sm:$0xff] }
 0x4bc   :  { %12225 = vmatprep.mubr.msk.f32.mxu1 %vm1106_vm1, %v19645_v41  ;;  %v1669_v14 = vrot.slane %v12873_v62, 1  ;;  %v19655_v25 = vld [vmem:[#allocation95_spill] sm:$0xff]  ;;  %v12874_v41 = vld [vmem:[#allocation2 + $0x1a8] sm:$0xff] }
 0x4be   :  { %v12066_v55 = vpop.f32.mrb[250].mxu1 }
 0x4bf   :  { %v6892_v10 = vpop.f32.mrb[251].mxu1  ;;  %12226 = vmatmul.mubr.msk.f32.gmra.mrb[96].mxu1 %vm1106_vm1, %v19646_v11  ;;  %v1705_v55 = vrot.slane %v12874_v41, 1  ;;  %v19664_v41 = vld [vmem:[#allocation177_spill] sm:$0xff] }
 0x4c0   :  { %v17551_v30 = vadd.f32 %v6892_v10, %v17233_v58  ;;  %12228 = vmatprep.mubr.msk.f32.mxu1 %vm1106_vm1, %v19647_v48  ;;  %v19656_v48 = vld [vmem:[#allocation167_spill] sm:$0xff] }
 0x4c3   :  { %12229 = vmatmul.mubr.msk.f32.gmra.mrb[98].mxu1 %vm1106_vm1, %v19648_v22  ;;  %v19657_v22 = vld [vmem:[#allocation168_spill] sm:$0xff] }
 0x4c4   :  { %12231 = vmatprep.mubr.msk.f32.mxu1 %vm1106_vm1, %v19649_v0  ;;  %v1778_v0 = vsel %vm1724_vm4, %v1633_v52, %v1669_v14 }
 0x4c6   :  { %v12072_v19 = vpop.f32.mrb[252].mxu1 }
 0x4c7   :  { %v17560_v39 = vadd.f32 %v12072_v19, %v17245_v9  ;;  %v6911_v28 = vpop.f32.mrb[253].mxu1  ;;  %12232 = vmatmul.mubr.msk.f32.gmra.mrb[52].mxu1 %vm1106_vm1, %v19650_v50  ;;  %v19654_v9 = vld [vmem:[#allocation92_spill] sm:$0xff]  ;;  %v1742_v19 = vsel %vm1724_vm4, %v1669_v14, %v1705_v55  ;;  %v19661_v14 = vld [vmem:[#allocation173_spill] sm:$0xff] }
 0x4c8   :  { %12234 = vmatprep.mubr.msk.f32.mxu1 %vm1106_vm1, %v19651_v26  ;;  %v1814_v26 = vsel %vm1724_vm4, %v1705_v55, %v1633_v52 }
 0x4ca   :  { %v12075_v58 = vpop.f32.mrb[254].mxu1 }
 0x4cb   :  { %v6920_v1 = vpop.f32.mrb[255].mxu1  ;;  %12235 = vmatmul.mubr.msk.f32.gmra.mrb[100].mxu1 %vm1106_vm1, %v19652_v59  ;;  %v19658_v58 = vld [vmem:[#allocation169_spill] sm:$0xff] }
 0x4cc   :  { %v17569_v51 = vadd.f32 %v6920_v1, %v17259_v20  ;;  %12237 = vmatprep.mubr.msk.f32.mxu1 %vm1106_vm1, %v19653_v49 }
 0x4cf   :  { %12238 = vmatmul.mubr.msk.f32.gmra.mrb[102].mxu1 %vm1106_vm1, %v19654_v9  ;;  %v19659_v9 = vld [vmem:[#allocation171_spill] sm:$0xff] }
 0x4d0   :  { %12240 = vmatprep.mubr.msk.f32.mxu1 %vm1106_vm1, %v19655_v25  ;;  %v19662_v25 = vld [vmem:[#allocation175_spill] sm:$0xff] }
 0x4d2   :  { %v12081_v10 = vpop.f32.mrb[0].mxu1 }
 0x4d3   :  { %v17578_v11 = vadd.f32 %v12081_v10, %v17271_v46  ;;  %v6939_v20 = vpop.f32.mrb[1].mxu1  ;;  %12241 = vmatmul.mubr.msk.f32.gmra.mrb[58].mxu1 %vm1106_vm1, %v19656_v48  ;;  %v19665_v48 = vld [vmem:[#allocation179_spill] sm:$0xff] }
 0x4d4   :  { %12243 = vmatprep.mubr.msk.f32.mxu1 %vm1106_vm1, %v19657_v22  ;;  %v19666_v22 = vld [vmem:[#allocation180_spill] sm:$0xff] }
 0x4d6   :  { %v12084_v28 = vpop.f32.mrb[2].mxu1 }
 0x4d7   :  { %v6948_v50 = vpop.f32.mrb[3].mxu1  ;;  %12244 = vmatmul.mubr.msk.f32.gmra.mrb[104].mxu1 %vm1106_vm1, %v1778_v0 }
 0x4d8   :  { %v17590_v46 = vadd.f32 %v6948_v50, %v17285_v31  ;;  %12246 = vmatprep.mubr.msk.f32.mxu1 %vm1106_vm1, %v1742_v19  ;;  %v19660_v31 = vld [vmem:[#allocation172_spill] sm:$0xff]  ;;  %v19667_v19 = vld [vmem:[#allocation181_spill] sm:$0xff]  ;;  %v19668_v50 = vld [vmem:[#allocation183_spill] sm:$0xff] }
 0x4db   :  { %12247 = vmatmul.mubr.msk.f32.gmra.mrb[106].mxu1 %vm1106_vm1, %v1814_v26  ;;  %v19670_v26 = vld [vmem:[#allocation185_spill] sm:$0xff] }
 0x4dc   :  { %12249 = vmatprep.mubr.msk.f32.mxu1 %vm1106_vm1, %v19658_v58 }
 0x4de   :  { %v12090_v1 = vpop.f32.mrb[6].mxu1 }
 0x4df   :  { %v17599_v59 = vadd.f32 %v12090_v1, %v17297_v57  ;;  %v6967_v49 = vpop.f32.mrb[7].mxu1  ;;  %12250 = vmatmul.mubr.msk.f32.gmra.mrb[64].mxu1 %vm1106_vm1, %v19659_v9  ;;  %v19663_v57 = vld [vmem:[#allocation176_spill] sm:$0xff]  ;;  %v19671_v9 = vld [vmem:[#allocation187_spill] sm:$0xff] }
 0x4e0   :  { %12252 = vmatprep.mubr.msk.f32.mxu1 %vm1106_vm1, %v19660_v31  ;;  %v19672_v31 = vld [vmem:[#allocation188_spill] sm:$0xff] }
 0x4e2   :  { %v12093_v16 = vpop.f32.mrb[8].mxu1 }
 0x4e3   :  { %v6976_v62 = vpop.f32.mrb[9].mxu1  ;;  %12253 = vmatmul.mubr.msk.f32.gmra.mrb[108].mxu1 %vm1106_vm1, %v19661_v14 }
 0x4e4   :  { %v17608_v52 = vadd.f32 %v6976_v62, %v17311_v5  ;;  %12255 = vmatprep.mubr.msk.f32.mxu1 %vm1106_vm1, %v19662_v25  ;;  %v19673_v62 = vld [vmem:[#allocation189_spill] sm:$0xff]  ;;  %v19674_v25 = vld [vmem:[#allocation191_spill] sm:$0xff] }
 0x4e7   :  { %12256 = vmatmul.mubr.msk.f32.gmra.mrb[110].mxu1 %vm1106_vm1, %v19663_v57  ;;  %v19676_v57 = vld [vmem:[#allocation193_spill] sm:$0xff] }
 0x4e8   :  { %12258 = vmatprep.mubr.msk.f32.mxu1 %vm1106_vm1, %v19664_v41 }
 0x4ea   :  { %v12099_v55 = vpop.f32.mrb[12].mxu1 }
 0x4eb   :  { %v17617_v10 = vadd.f32 %v12099_v55, %v17323_v6  ;;  %v6995_v20 = vpop.f32.mrb[13].mxu1  ;;  %12259 = vmatmul.mubr.msk.f32.gmra.mrb[70].mxu1 %vm1106_vm1, %v19665_v48  ;;  %v19669_v6 = vld [vmem:[#allocation184_spill] sm:$0xff]  ;;  %v19677_v48 = vld [vmem:[#allocation195_spill] sm:$0xff] }
 0x4ec   :  { %12261 = vmatprep.mubr.msk.f32.mxu1 %vm1106_vm1, %v19666_v22  ;;  %v19678_v22 = vld [vmem:[#allocation196_spill] sm:$0xff] }
 0x4ee   :  { %v12102_v5 = vpop.f32.mrb[14].mxu1 }
 0x4ef   :  { %v7004_v0 = vpop.f32.mrb[15].mxu1  ;;  %12262 = vmatmul.mubr.msk.f32.gmra.mrb[112].mxu1 %vm1106_vm1, %v19667_v19 }
 0x4f0   :  { %v17626_v28 = vadd.f32 %v7004_v0, %v17337_v2  ;;  %12264 = vmatprep.mubr.msk.f32.mxu1 %vm1106_vm1, %v19668_v50  ;;  %v19679_v0 = vld [vmem:[#allocation197_spill] sm:$0xff]  ;;  %v19680_v50 = vld [vmem:[#allocation199_spill] sm:$0xff] }
 0x4f3   :  { %12265 = vmatmul.mubr.msk.f32.gmra.mrb[114].mxu1 %vm1106_vm1, %v19669_v6  ;;  %v19682_v6 = vld [vmem:[#allocation201_spill] sm:$0xff] }
 0x4f4   :  { %12267 = vmatprep.mubr.msk.f32.mxu1 %vm1106_vm1, %v19670_v26 }
 0x4f6   :  { %v12108_v58 = vpop.f32.mrb[18].mxu1 }
 0x4f7   :  { %v17635_v1 = vadd.f32 %v12108_v58, %v17349_v35  ;;  %v7023_v49 = vpop.f32.mrb[19].mxu1  ;;  %12268 = vmatmul.mubr.msk.f32.gmra.mrb[76].mxu1 %vm1106_vm1, %v19671_v9  ;;  %v19675_v35 = vld [vmem:[#allocation192_spill] sm:$0xff]  ;;  %v19683_v9 = vld [vmem:[#allocation203_spill] sm:$0xff] }
 0x4f8   :  { %12270 = vmatprep.mubr.msk.f32.mxu1 %vm1106_vm1, %v19672_v31  ;;  %v19684_v31 = vld [vmem:[#allocation204_spill] sm:$0xff] }
 0x4fa   :  { %v12111_v2 = vpop.f32.mrb[20].mxu1 }
 0x4fb   :  { %v7032_v16 = vpop.f32.mrb[21].mxu1  ;;  %12271 = vmatmul.mubr.msk.f32.gmra.mrb[116].mxu1 %vm1106_vm1, %v19673_v62 }
 0x4fc   :  { %v17644_v14 = vadd.f32 %v7032_v16, %v17363_v60  ;;  %12273 = vmatprep.mubr.msk.f32.mxu1 %vm1106_vm1, %v19674_v25  ;;  %v19685_v16 = vld [vmem:[#allocation205_spill] sm:$0xff]  ;;  %v19686_v25 = vld [vmem:[#allocation207_spill] sm:$0xff] }
 0x4ff   :  { %12274 = vmatmul.mubr.msk.f32.gmra.mrb[118].mxu1 %vm1106_vm1, %v19675_v35  ;;  %v19688_v35 = vld [vmem:[#allocation209_spill] sm:$0xff] }
 0x500   :  { %12276 = vmatprep.mubr.msk.f32.mxu1 %vm1106_vm1, %v19676_v57 }
 0x502   :  { %v12117_v41 = vpop.f32.mrb[24].mxu1 }
 0x503   :  { %v17653_v55 = vadd.f32 %v12117_v41, %v17376_v8  ;;  %v7051_v20 = vpop.f32.mrb[25].mxu1  ;;  %12277 = vmatmul.mubr.msk.f32.gmra.mrb[82].mxu1 %vm1106_vm1, %v19677_v48  ;;  %v19681_v8 = vld [vmem:[#allocation200_spill] sm:$0xff]  ;;  %v19689_v48 = vld [vmem:[#allocation211_spill] sm:$0xff] }
 0x504   :  { %12279 = vmatprep.mubr.msk.f32.mxu1 %vm1106_vm1, %v19678_v22  ;;  %v19690_v22 = vld [vmem:[#allocation212_spill] sm:$0xff] }
 0x506   :  { %v12120_v60 = vpop.f32.mrb[26].mxu1 }
 0x507   :  { %v7060_v5 = vpop.f32.mrb[27].mxu1  ;;  %12280 = vmatmul.mubr.msk.f32.gmra.mrb[120].mxu1 %vm1106_vm1, %v19679_v0 }
 0x508   :  { %v17662_v19 = vadd.f32 %v7060_v5, %v17394_v34  ;;  %12282 = vmatprep.mubr.msk.f32.mxu1 %vm1106_vm1, %v19680_v50  ;;  %v19691_v5 = vld [vmem:[#allocation213_spill] sm:$0xff]  ;;  %v19692_v50 = vld [vmem:[#allocation215_spill] sm:$0xff] }
 0x50b   :  { %12283 = vmatmul.mubr.msk.f32.gmra.mrb[122].mxu1 %vm1106_vm1, %v19681_v8  ;;  %v19694_v8 = vld [vmem:[#allocation217_spill] sm:$0xff] }
 0x50c   :  { %12285 = vmatprep.mubr.msk.f32.mxu1 %vm1106_vm1, %v19682_v6 }
 0x50e   :  { %v12126_v26 = vpop.f32.mrb[30].mxu1 }
 0x50f   :  { %v17671_v58 = vadd.f32 %v12126_v26, %v17415_v17  ;;  %v7079_v49 = vpop.f32.mrb[31].mxu1  ;;  %12286 = vmatmul.mubr.msk.f32.gmra.mrb[88].mxu1 %vm1106_vm1, %v19683_v9  ;;  %v19687_v17 = vld [vmem:[#allocation208_spill] sm:$0xff]  ;;  %v19695_v9 = vld [vmem:[#allocation219_spill] sm:$0xff] }
 0x510   :  { %12288 = vmatprep.mubr.msk.f32.mxu1 %vm1106_vm1, %v19684_v31  ;;  %v19696_v31 = vld [vmem:[#allocation220_spill] sm:$0xff] }
 0x512   :  { %v12129_v34 = vpop.f32.mrb[32].mxu1 }
 0x513   :  { %v7088_v2 = vpop.f32.mrb[33].mxu1  ;;  %12289 = vmatmul.mubr.msk.f32.gmra.mrb[124].mxu1 %vm1106_vm1, %v19685_v16 }
 0x514   :  { %v17680_v62 = vadd.f32 %v7088_v2, %v17433_v47  ;;  %12291 = vmatprep.mubr.msk.f32.mxu1 %vm1106_vm1, %v19686_v25  ;;  %v19697_v2 = vld [vmem:[#allocation221_spill] sm:$0xff]  ;;  %v19698_v25 = vld [vmem:[#allocation223_spill] sm:$0xff] }
 0x517   :  { %12292 = vmatmul.mubr.msk.f32.gmra.mrb[126].mxu1 %vm1106_vm1, %v19687_v17  ;;  %v12875_v17 = vld [vmem:[#allocation2 + $0x348] sm:$0xff] }
 0x518   :  { %12294 = vmatprep.mubr.msk.f32.mxu1 %vm1106_vm1, %v19688_v35  ;;  %v1651_v35 = vrot.slane %v12875_v17, 1 }
 0x51a   :  { %v12135_v57 = vpop.f32.mrb[36].mxu1 }
 0x51b   :  { %v17689_v41 = vadd.f32 %v12135_v57, %v17449_v54  ;;  %v7107_v20 = vpop.f32.mrb[37].mxu1  ;;  %12295 = vmatmul.mubr.msk.f32.gmra.mrb[94].mxu1 %vm1106_vm1, %v19689_v48  ;;  %v19693_v54 = vld [vmem:[#allocation216_spill] sm:$0xff]  ;;  %v12876_v57 = vld [vmem:[#allocation2 + $0x350] sm:$0xff] }
 0x51c   :  { %12297 = vmatprep.mubr.msk.f32.mxu1 %vm1106_vm1, %v19690_v22  ;;  %v1687_v20 = vrot.slane %v12876_v57, 1  ;;  %v19700_v48 = vld [vmem:[#allocation225_spill] sm:$0xff]  ;;  %v12877_v22 = vld [vmem:[#allocation2 + $0x358] sm:$0xff] }
 0x51e   :  { %v12138_v47 = vpop.f32.mrb[38].mxu1 }
 0x51f   :  { %v7116_v60 = vpop.f32.mrb[39].mxu1  ;;  %12298 = vmatmul.mubr.msk.f32.gmra.mrb[128].mxu1 %vm1106_vm1, %v19691_v5  ;;  %v1723_v47 = vrot.slane %v12877_v22, 1 }
 0x520   :  { %v17698_v0 = vadd.f32 %v7116_v60, %v17467_v38  ;;  %12300 = vmatprep.mubr.msk.f32.mxu1 %vm1106_vm1, %v19692_v50  ;;  %v19701_v50 = vld [vmem:[#allocation226_spill] sm:$0xff] }
 0x523   :  { %12301 = vmatmul.mubr.msk.f32.gmra.mrb[130].mxu1 %vm1106_vm1, %v19693_v54  ;;  %v19702_v54 = vld [vmem:[#allocation227_spill] sm:$0xff] }
 0x524   :  { %12303 = vmatprep.mubr.msk.f32.mxu1 %vm1106_vm1, %v19694_v8  ;;  %v1796_v8 = vsel %vm1724_vm4, %v1651_v35, %v1687_v20 }
 0x526   :  { %v12144_v6 = vpop.f32.mrb[42].mxu1 }
 0x527   :  { %v17707_v26 = vadd.f32 %v12144_v6, %v17483_v12  ;;  %v7135_v49 = vpop.f32.mrb[43].mxu1  ;;  %12304 = vmatmul.mubr.msk.f32.gmra.mrb[4].mxu1 %vm1106_vm1, %v19695_v9  ;;  %v19699_v12 = vld [vmem:[#allocation224_spill] sm:$0xff]  ;;  %v1760_v6 = vsel %vm1724_vm4, %v1687_v20, %v1723_v47 }
 0x528   :  { %12306 = vmatprep.mubr.msk.f32.mxu1 %vm1106_vm1, %v19696_v31  ;;  %v1832_v31 = vsel %vm1724_vm4, %v1723_v47, %v1651_v35 }
 0x52a   :  { %v12147_v38 = vpop.f32.mrb[44].mxu1 }
 0x52b   :  { %v7144_v34 = vpop.f32.mrb[45].mxu1  ;;  %12307 = vmatmul.mubr.msk.f32.gmra.mrb[132].mxu1 %vm1106_vm1, %v19697_v2 }
 0x52c   :  { %v17716_v16 = vadd.f32 %v7144_v34, %v17501_v21  ;;  %12309 = vmatprep.mubr.msk.f32.mxu1 %vm1106_vm1, %v19698_v25 }
 0x52f   :  { %12310 = vmatmul.mubr.msk.f32.gmra.mrb[134].mxu1 %vm1106_vm1, %v19699_v12 }
 0x530   :  { %12312 = vmatprep.mubr.msk.f32.mxu1 %vm1106_vm1, %v19700_v48 }
 0x532   :  { %v12153_v60 = vpop.f32.mrb[48].mxu1 }
 0x533   :  { %v17725_v5 = vadd.f32 %v12153_v60, %v17369_v43  ;;  %v7163_v21 = vpop.f32.mrb[49].mxu1  ;;  %12313 = vmatmul.mubr.msk.f32.gmra.mrb[10].mxu1 %vm1106_vm1, %v19701_v50  ;;  %v19703_v60 = vld [vmem:[#allocation113_spill] sm:$0xff] }
 0x534   :  { %12315 = vmatprep.mubr.msk.f32.mxu1 %vm1106_vm1, %v19702_v54 }
 0x536   :  { %v12156_v49 = vpop.f32.mrb[50].mxu1 }
 0x537   :  { %v7172_v9 = vpop.f32.mrb[51].mxu1  ;;  %12316 = vmatmul.mubr.msk.f32.gmra.mrb[136].mxu1 %vm1106_vm1, %v1796_v8 }
 0x538   :  { %v17737_v43 = vadd.f32 %v7172_v9, %v17384_v27  ;;  %12318 = vmatprep.mubr.msk.f32.mxu1 %vm1106_vm1, %v1760_v6 }
 0x53b   :  { %12319 = vmatmul.mubr.msk.f32.gmra.mrb[138].mxu1 %vm1106_vm1, %v1832_v31 }
 0x53e   :  { %v12162_v38 = vpop.f32.mrb[54].mxu1 }
 0x53f   :  { %v17744_v34 = vadd.f32 %v12162_v38, %v17405_v23  ;;  %v7191_v2 = vpop.f32.mrb[55].mxu1  ;;  %v17758_v23 = vld [vmem:[%s18616_s8] ss:$0 sm:$0xff] }
 0x542   :  { %v12165_v25 = vpop.f32.mrb[56].mxu1 }
 0x543   :  { %v7200_v12 = vpop.f32.mrb[57].mxu1 }
 0x544   :  { %v17747_v17 = vadd.f32 %v7200_v12, %v17423_v56 }
 0x54a   :  { %v12171_v57 = vpop.f32.mrb[60].mxu1 }
 0x54b   :  { %v17750_v27 = vadd.f32 %v12171_v57, %v17440_v33  ;;  %v7219_v20 = vpop.f32.mrb[61].mxu1  ;;  %v17764_v33 = vld [vmem:[%s18617_s9] ss:$0 sm:$0xff] }
 0x54e   :  { %v12174_v48 = vpop.f32.mrb[62].mxu1 }
 0x54f   :  { %v7228_v29 = vpop.f32.mrb[63].mxu1 }
 0x550   :  { %v17753_v35 = vadd.f32 %v7228_v29, %v17457_v32  ;;  %v17771_v32 = vld [vmem:[%s18618_s10] ss:$0 sm:$0xff] }
 0x552   :  { %v12179_v22 = vpop.f32.mrb[16].mxu1 }
 0x553   :  { %v12421_v47 = vadd.f32 %v12179_v22, %v17112_v53  ;;  %v7387_v56 = vpop.f32.mrb[17].mxu1 }
 0x554   :  { %v12422_v21 = vadd.f32 %v7387_v56, %v19703_v60  ;;  %v19704_v60 = vld [vmem:[#allocation40_spill] sm:$0xff] }
 0x555   :  { %v7906_v50 = vadd.f32 %v12421_v47, %v17758_v23 }
 0x556   :  { %v7905_v54 = vadd.f32 %v12422_v21, %v17758_v23  ;;  %v12182_v8 = vpop.f32.mrb[66].mxu1 }
 0x557   :  { %v7977_v53 = vmul.f32 %v17764_v33, %v7906_v50  ;;  %v7836_v6 = vadd.f32 %v12182_v8, %v17474_v15  ;;  %v7397_v49 = vpop.f32.mrb[67].mxu1  ;;  %v19705_v8 = vld [vmem:[#allocation77_spill] sm:$0xff] }
 0x558   :  { %v7976_v9 = vmul.f32 %v17764_v33, %v7905_v54 }
 0x559   :  { %v8048_v31 = vadd.f32 %v17771_v32, %v7977_v53  ;;  %v7907_v38 = vadd.f32 %v17758_v23, %v7836_v6 }
 0x55a   :  { %v8047_v2 = vadd.f32 %v17771_v32, %v7976_v9  ;;  %v12185_v25 = vpop.f32.mrb[68].mxu1 }
 0x55b   :  { %v7978_v12 = vmul.f32 %v17764_v33, %v7907_v38  ;;  %v7406_v57 = vpop.f32.mrb[69].mxu1  ;;  %v8112_v29 = vmax.f32 %v8048_v31, 0.0 }
 0x55c   :  { %v8111_v20 = vmax.f32 %v8047_v2, 0.0  ;;  %v7837_v48 = vadd.f32 %v7406_v57, %v17491_v45 }
 0x55d   :  { %v8049_v22 = vadd.f32 %v17771_v32, %v7978_v12 }
 0x55e   :  { %v7908_v15 = vadd.f32 %v17758_v23, %v7837_v48  ;;  %v12188_v47 = vpop.f32.mrb[22].mxu1  ;;  %12323 = vmatprep.mubr.msk.f32.mxu0 %vm1106_vm1, %v8111_v20 }
 0x55f   :  { %v8113_v56 = vmax.f32 %v8049_v22, 0.0  ;;  %v12423_v21 = vadd.f32 %v12188_v47, %v19704_v60  ;;  %v7415_v50 = vpop.f32.mrb[23].mxu1  ;;  %12324 = vmatmul.mubr.msk.f32.vlgmr.msra.gmra.mrb[96].mxu0 %vm1106_vm1, %v8112_v29 }
 0x560   :  { %v7979_v54 = vmul.f32 %v17764_v33, %v7908_v15  ;;  %v12424_v53 = vadd.f32 %v7415_v50, %v19705_v8  ;;  %v19706_v8 = vld [vmem:[#allocation4_spill] sm:$0xff] }
 0x561   :  { %v7910_v45 = vadd.f32 %v12423_v21, %v17758_v23  ;;  %12326 = vmatprep.mubr.msk.f32.mxu0 %vm1106_vm1, %v8113_v56 }
 0x562   :  { %v8050_v6 = vadd.f32 %v17771_v32, %v7979_v54  ;;  %v7909_v49 = vadd.f32 %v12424_v53, %v17758_v23  ;;  %v12191_v9 = vpop.f32.mrb[72].mxu1 }
 0x563   :  { %v7981_v31 = vmul.f32 %v17764_v33, %v7910_v45  ;;  %v7840_v38 = vadd.f32 %v12191_v9, %v17506_v13  ;;  %v7425_v2 = vpop.f32.mrb[73].mxu1 }
 0x564   :  { %v8114_v25 = vmax.f32 %v8050_v6, 0.0  ;;  %v7980_v12 = vmul.f32 %v17764_v33, %v7909_v49  ;;  %v19707_v49 = vld [vmem:[#allocation7_spill] sm:$0xff] }
 0x565   :  { %v8052_v57 = vadd.f32 %v17771_v32, %v7981_v31  ;;  %v7911_v20 = vadd.f32 %v17758_v23, %v7840_v38 }
 0x566   :  { %v8051_v48 = vadd.f32 %v17771_v32, %v7980_v12  ;;  %v12194_v29 = vpop.f32.mrb[74].mxu1  ;;  %12327 = vmatmul.mubr.msk.f32.gmra.mrb[98].mxu0 %vm1106_vm1, %v8114_v25 }
 0x567   :  { %v7982_v22 = vmul.f32 %v17764_v33, %v7911_v20  ;;  %v7434_v15 = vpop.f32.mrb[75].mxu1  ;;  %v8116_v13 = vmax.f32 %v8052_v57, 0.0 }
 0x568   :  { %v8115_v47 = vmax.f32 %v8051_v48, 0.0  ;;  %v7841_v56 = vadd.f32 %v7434_v15, %v17515_v24 }
 0x569   :  { %v8053_v60 = vadd.f32 %v17771_v32, %v7982_v22 }
 0x56a   :  { %v7912_v21 = vadd.f32 %v17758_v23, %v7841_v56  ;;  %v12197_v50 = vpop.f32.mrb[28].mxu1  ;;  %12329 = vmatprep.mubr.msk.f32.mxu0 %vm1106_vm1, %v8115_v47 }
 0x56b   :  { %v8117_v54 = vmax.f32 %v8053_v60, 0.0  ;;  %v12425_v53 = vadd.f32 %v12197_v50, %v19706_v8  ;;  %v7443_v45 = vpop.f32.mrb[29].mxu1  ;;  %12330 = vmatmul.mubr.msk.f32.gmra.mrb[102].mxu0 %vm1106_vm1, %v8116_v13 }
 0x56c   :  { %v7983_v6 = vmul.f32 %v17764_v33, %v7912_v21  ;;  %v12426_v9 = vadd.f32 %v7443_v45, %v19707_v49  ;;  %v19708_v45 = vld [vmem:[#allocation44_spill] sm:$0xff] }
 0x56d   :  { %v7914_v24 = vadd.f32 %v12425_v53, %v17758_v23  ;;  %12332 = vmatprep.mubr.msk.f32.mxu0 %vm1106_vm1, %v8117_v54 }
 0x56e   :  { %v8054_v31 = vadd.f32 %v17771_v32, %v7983_v6  ;;  %v7913_v38 = vadd.f32 %v12426_v9, %v17758_v23  ;;  %v12200_v2 = vpop.f32.mrb[78].mxu1 }
 0x56f   :  { %v7985_v25 = vmul.f32 %v17764_v33, %v7914_v24  ;;  %v7844_v12 = vadd.f32 %v12200_v2, %v17524_v3  ;;  %v7453_v57 = vpop.f32.mrb[79].mxu1  ;;  %v19709_v24 = vld [vmem:[#allocation49_spill] sm:$0xff] }
 0x570   :  { %v8118_v20 = vmax.f32 %v8054_v31, 0.0  ;;  %v7984_v48 = vmul.f32 %v17764_v33, %v7913_v38 }
 0x571   :  { %v8056_v29 = vadd.f32 %v17771_v32, %v7985_v25  ;;  %v7915_v22 = vadd.f32 %v17758_v23, %v7844_v12 }
 0x572   :  { %v8055_v15 = vadd.f32 %v17771_v32, %v7984_v48  ;;  %v12203_v47 = vpop.f32.mrb[80].mxu1  ;;  %12333 = vmatmul.mubr.msk.f32.gmra.mrb[104].mxu0 %vm1106_vm1, %v8118_v20 }
 0x573   :  { %v7986_v56 = vmul.f32 %v17764_v33, %v7915_v22  ;;  %v7462_v13 = vpop.f32.mrb[81].mxu1  ;;  %v8120_v3 = vmax.f32 %v8056_v29, 0.0 }
 0x574   :  { %v8119_v60 = vmax.f32 %v8055_v15, 0.0  ;;  %v7845_v21 = vadd.f32 %v7462_v13, %v17533_v63 }
 0x575   :  { %v8057_v50 = vadd.f32 %v17771_v32, %v7986_v56 }
 0x576   :  { %v7916_v54 = vadd.f32 %v17758_v23, %v7845_v21  ;;  %v12206_v8 = vpop.f32.mrb[34].mxu1  ;;  %12335 = vmatprep.mubr.msk.f32.mxu0 %vm1106_vm1, %v8119_v60 }
 0x577   :  { %v8121_v53 = vmax.f32 %v8057_v50, 0.0  ;;  %v12427_v6 = vadd.f32 %v12206_v8, %v19708_v45  ;;  %v7471_v49 = vpop.f32.mrb[35].mxu1  ;;  %12336 = vmatmul.mubr.msk.f32.gmra.mrb[108].mxu0 %vm1106_vm1, %v8120_v3  ;;  %v19710_v45 = vld [vmem:[#allocation50_spill] sm:$0xff] }
 0x578   :  { %v7987_v9 = vmul.f32 %v17764_v33, %v7916_v54  ;;  %v12428_v31 = vadd.f32 %v7471_v49, %v19709_v24  ;;  %v19711_v24 = vld [vmem:[#allocation51_spill] sm:$0xff] }
 0x579   :  { %v7918_v63 = vadd.f32 %v12427_v6, %v17758_v23  ;;  %12338 = vmatprep.mubr.msk.f32.mxu0 %vm1106_vm1, %v8121_v53 }
 0x57a   :  { %v8058_v38 = vadd.f32 %v17771_v32, %v7987_v9  ;;  %v7917_v2 = vadd.f32 %v12428_v31, %v17758_v23  ;;  %v12209_v25 = vpop.f32.mrb[84].mxu1 }
 0x57b   :  { %v7989_v12 = vmul.f32 %v17764_v33, %v7918_v63  ;;  %v7848_v57 = vadd.f32 %v12209_v25, %v17542_v61  ;;  %v7481_v20 = vpop.f32.mrb[85].mxu1 }
 0x57c   :  { %v8122_v48 = vmax.f32 %v8058_v38, 0.0  ;;  %v7988_v29 = vmul.f32 %v17764_v33, %v7917_v2 }
 0x57d   :  { %v8060_v22 = vadd.f32 %v17771_v32, %v7989_v12  ;;  %v7919_v15 = vadd.f32 %v17758_v23, %v7848_v57 }
 0x57e   :  { %v8059_v47 = vadd.f32 %v17771_v32, %v7988_v29  ;;  %v12212_v56 = vpop.f32.mrb[86].mxu1  ;;  %12339 = vmatmul.mubr.msk.f32.gmra.mrb[110].mxu0 %vm1106_vm1, %v8122_v48 }
 0x57f   :  { %v7990_v13 = vmul.f32 %v17764_v33, %v7919_v15  ;;  %v7490_v60 = vpop.f32.mrb[87].mxu1  ;;  %v8124_v61 = vmax.f32 %v8060_v22, 0.0 }
 0x580   :  { %v8123_v21 = vmax.f32 %v8059_v47, 0.0  ;;  %v7849_v3 = vadd.f32 %v7490_v60, %v17551_v30 }
 0x581   :  { %v8061_v50 = vadd.f32 %v17771_v32, %v7990_v13 }
 0x582   :  { %v7920_v54 = vadd.f32 %v17758_v23, %v7849_v3  ;;  %v12215_v8 = vpop.f32.mrb[40].mxu1  ;;  %12341 = vmatprep.mubr.msk.f32.mxu0 %vm1106_vm1, %v8123_v21 }
 0x583   :  { %v8125_v53 = vmax.f32 %v8061_v50, 0.0  ;;  %v12429_v6 = vadd.f32 %v12215_v8, %v19710_v45  ;;  %v7499_v49 = vpop.f32.mrb[41].mxu1  ;;  %12342 = vmatmul.mubr.msk.f32.gmra.mrb[114].mxu0 %vm1106_vm1, %v8124_v61  ;;  %v19712_v8 = vld [vmem:[#allocation102_spill] sm:$0xff] }
 0x584   :  { %v7991_v9 = vmul.f32 %v17764_v33, %v7920_v54  ;;  %v12430_v31 = vadd.f32 %v7499_v49, %v19711_v24  ;;  %v19713_v49 = vld [vmem:[#allocation52_spill] sm:$0xff] }
 0x585   :  { %v7922_v30 = vadd.f32 %v12429_v6, %v17758_v23  ;;  %12344 = vmatprep.mubr.msk.f32.mxu0 %vm1106_vm1, %v8125_v53 }
 0x586   :  { %v8062_v63 = vadd.f32 %v17771_v32, %v7991_v9  ;;  %v7921_v38 = vadd.f32 %v12430_v31, %v17758_v23  ;;  %v12218_v2 = vpop.f32.mrb[90].mxu1 }
 0x587   :  { %v7993_v25 = vmul.f32 %v17764_v33, %v7922_v30  ;;  %v7852_v12 = vadd.f32 %v12218_v2, %v17560_v39  ;;  %v7509_v57 = vpop.f32.mrb[91].mxu1 }
 0x588   :  { %v8126_v20 = vmax.f32 %v8062_v63, 0.0  ;;  %v7992_v48 = vmul.f32 %v17764_v33, %v7921_v38 }
 0x589   :  { %v8064_v29 = vadd.f32 %v17771_v32, %v7993_v25  ;;  %v7923_v22 = vadd.f32 %v17758_v23, %v7852_v12 }
 0x58a   :  { %v8063_v15 = vadd.f32 %v17771_v32, %v7992_v48  ;;  %v12221_v47 = vpop.f32.mrb[92].mxu1  ;;  %12345 = vmatmul.mubr.msk.f32.gmra.mrb[116].mxu0 %vm1106_vm1, %v8126_v20 }
 0x58b   :  { %v7994_v56 = vmul.f32 %v17764_v33, %v7923_v22  ;;  %v7518_v13 = vpop.f32.mrb[93].mxu1  ;;  %v8128_v39 = vmax.f32 %v8064_v29, 0.0 }
 0x58c   :  { %v8127_v60 = vmax.f32 %v8063_v15, 0.0  ;;  %v7853_v21 = vadd.f32 %v7518_v13, %v17569_v51 }
 0x58d   :  { %v8065_v3 = vadd.f32 %v17771_v32, %v7994_v56 }
 0x58e   :  { %v7924_v61 = vadd.f32 %v17758_v23, %v7853_v21  ;;  %v12224_v50 = vpop.f32.mrb[46].mxu1  ;;  %12347 = vmatprep.mubr.msk.f32.mxu0 %vm1106_vm1, %v8127_v60 }
 0x58f   :  { %v8129_v54 = vmax.f32 %v8065_v3, 0.0  ;;  %v12431_v53 = vadd.f32 %v12224_v50, %v19712_v8  ;;  %v7527_v45 = vpop.f32.mrb[47].mxu1  ;;  %12348 = vmatmul.mubr.msk.f32.gmra.mrb[120].mxu0 %vm1106_vm1, %v8128_v39  ;;  %v19714_v3 = vld [vmem:[#allocation53_spill] sm:$0xff]  ;;  %v19715_v8 = vld [vmem:[#allocation54_spill] sm:$0xff] }
 0x590   :  { %v7995_v6 = vmul.f32 %v17764_v33, %v7924_v61  ;;  %v12432_v9 = vadd.f32 %v7527_v45, %v19713_v49 }
 0x591   :  { %v7926_v51 = vadd.f32 %v12431_v53, %v17758_v23  ;;  %12350 = vmatprep.mubr.msk.f32.mxu0 %vm1106_vm1, %v8129_v54 }
 0x592   :  { %v8066_v24 = vadd.f32 %v17771_v32, %v7995_v6  ;;  %v7925_v31 = vadd.f32 %v12432_v9, %v17758_v23  ;;  %v12227_v30 = vpop.f32.mrb[96].mxu1 }
 0x593   :  { %v7997_v63 = vmul.f32 %v17764_v33, %v7926_v51  ;;  %v7856_v38 = vadd.f32 %v12227_v30, %v17578_v11  ;;  %v7537_v2 = vpop.f32.mrb[97].mxu1 }
 0x594   :  { %v8130_v25 = vmax.f32 %v8066_v24, 0.0  ;;  %v7996_v12 = vmul.f32 %v17764_v33, %v7925_v31 }
 0x595   :  { %v8068_v57 = vadd.f32 %v17771_v32, %v7997_v63  ;;  %v7927_v20 = vadd.f32 %v17758_v23, %v7856_v38 }
 0x596   :  { %v8067_v48 = vadd.f32 %v17771_v32, %v7996_v12  ;;  %v12230_v29 = vpop.f32.mrb[98].mxu1  ;;  %12351 = vmatmul.mubr.msk.f32.gmra.mrb[122].mxu0 %vm1106_vm1, %v8130_v25 }
 0x597   :  { %v7998_v22 = vmul.f32 %v17764_v33, %v7927_v20  ;;  %v7546_v15 = vpop.f32.mrb[99].mxu1  ;;  %v8132_v11 = vmax.f32 %v8068_v57, 0.0 }
 0x598   :  { %v8131_v47 = vmax.f32 %v8067_v48, 0.0  ;;  %v7857_v56 = vadd.f32 %v7546_v15, %v17590_v46 }
 0x599   :  { %v8069_v13 = vadd.f32 %v17771_v32, %v7998_v22 }
 0x59a   :  { %v7928_v60 = vadd.f32 %v17758_v23, %v7857_v56  ;;  %v12233_v21 = vpop.f32.mrb[52].mxu1  ;;  %12353 = vmatprep.mubr.msk.f32.mxu0 %vm1106_vm1, %v8131_v47  ;;  %v19716_v56 = vld [vmem:[#allocation104_spill] sm:$0xff] }
 0x59b   :  { %v8133_v39 = vmax.f32 %v8069_v13, 0.0  ;;  %v12433_v61 = vadd.f32 %v12233_v21, %v19714_v3  ;;  %v7555_v50 = vpop.f32.mrb[53].mxu1  ;;  %12354 = vmatmul.mubr.msk.f32.gmra.mrb[126].mxu0 %vm1106_vm1, %v8132_v11  ;;  %v19717_v21 = vld [vmem:[#allocation114_spill] sm:$0xff] }
 0x59c   :  { %v7999_v54 = vmul.f32 %v17764_v33, %v7928_v60  ;;  %v12434_v53 = vadd.f32 %v7555_v50, %v19715_v8 }
 0x59d   :  { %v7930_v46 = vadd.f32 %v12433_v61, %v17758_v23  ;;  %12356 = vmatprep.mubr.msk.f32.mxu0 %vm1106_vm1, %v8133_v39 }
 0x59e   :  { %v8070_v45 = vadd.f32 %v17771_v32, %v7999_v54  ;;  %v7929_v6 = vadd.f32 %v12434_v53, %v17758_v23  ;;  %v12236_v49 = vpop.f32.mrb[100].mxu1 }
 0x59f   :  { %v8001_v9 = vmul.f32 %v17764_v33, %v7930_v46  ;;  %v7860_v51 = vadd.f32 %v12236_v49, %v17599_v59  ;;  %v7565_v24 = vpop.f32.mrb[101].mxu1 }
 0x5a0   :  { %v8134_v31 = vmax.f32 %v8070_v45, 0.0  ;;  %v8000_v30 = vmul.f32 %v17764_v33, %v7929_v6 }
 0x5a1   :  { %v8072_v63 = vadd.f32 %v17771_v32, %v8001_v9  ;;  %v7931_v38 = vadd.f32 %v17758_v23, %v7860_v51 }
 0x5a2   :  { %v8071_v2 = vadd.f32 %v17771_v32, %v8000_v30  ;;  %v12239_v25 = vpop.f32.mrb[102].mxu1  ;;  %12357 = vmatmul.mubr.msk.f32.gmra.mrb[128].mxu0 %vm1106_vm1, %v8134_v31 }
 0x5a3   :  { %v8002_v12 = vmul.f32 %v17764_v33, %v7931_v38  ;;  %v7574_v57 = vpop.f32.mrb[103].mxu1  ;;  %v8136_v59 = vmax.f32 %v8072_v63, 0.0 }
 0x5a4   :  { %v8135_v20 = vmax.f32 %v8071_v2, 0.0  ;;  %v7861_v48 = vadd.f32 %v7574_v57, %v17608_v52  ;;  %v19718_v57 = vld [vmem:[#allocation115_spill] sm:$0xff] }
 0x5a5   :  { %v8073_v29 = vadd.f32 %v17771_v32, %v8002_v12 }
 0x5a6   :  { %v7932_v22 = vadd.f32 %v17758_v23, %v7861_v48  ;;  %v12242_v15 = vpop.f32.mrb[58].mxu1  ;;  %12359 = vmatprep.mubr.msk.f32.mxu0 %vm1106_vm1, %v8135_v20 }
 0x5a7   :  { %v8137_v47 = vmax.f32 %v8073_v29, 0.0  ;;  %v12435_v11 = vadd.f32 %v12242_v15, %v19716_v56  ;;  %v7583_v13 = vpop.f32.mrb[59].mxu1  ;;  %12360 = vmatmul.mubr.msk.f32.gmra.mrb[132].mxu0 %vm1106_vm1, %v8136_v59  ;;  %v19719_v29 = vld [vmem:[#allocation116_spill] sm:$0xff] }
 0x5a8   :  { %v8003_v60 = vmul.f32 %v17764_v33, %v7932_v22  ;;  %v12436_v39 = vadd.f32 %v7583_v13, %v19717_v21 }
 0x5a9   :  { %v7934_v52 = vadd.f32 %v12435_v11, %v17758_v23  ;;  %12362 = vmatprep.mubr.msk.f32.mxu0 %vm1106_vm1, %v8137_v47 }
 0x5aa   :  { %v8074_v3 = vadd.f32 %v17771_v32, %v8003_v60  ;;  %v7933_v61 = vadd.f32 %v12436_v39, %v17758_v23  ;;  %v12245_v50 = vpop.f32.mrb[104].mxu1 }
 0x5ab   :  { %v8005_v54 = vmul.f32 %v17764_v33, %v7934_v52  ;;  %v7864_v8 = vadd.f32 %v12245_v50, %v17617_v10  ;;  %v7593_v53 = vpop.f32.mrb[105].mxu1 }
 0x5ac   :  { %v8138_v46 = vmax.f32 %v8074_v3, 0.0  ;;  %v8004_v45 = vmul.f32 %v17764_v33, %v7933_v61 }
 0x5ad   :  { %v8076_v6 = vadd.f32 %v17771_v32, %v8005_v54  ;;  %v7935_v49 = vadd.f32 %v17758_v23, %v7864_v8 }
 0x5ae   :  { %v8075_v9 = vadd.f32 %v17771_v32, %v8004_v45  ;;  %v12248_v51 = vpop.f32.mrb[106].mxu1  ;;  %12363 = vmatmul.mubr.msk.f32.gmra.mrb[134].mxu0 %vm1106_vm1, %v8138_v46 }
 0x5af   :  { %v8006_v24 = vmul.f32 %v17764_v33, %v7935_v49  ;;  %v7602_v31 = vpop.f32.mrb[107].mxu1  ;;  %v8140_v10 = vmax.f32 %v8076_v6, 0.0  ;;  %v19720_v51 = vld [vmem:[#allocation18_spill] sm:$0xff] }
 0x5b0   :  { %v8139_v30 = vmax.f32 %v8075_v9, 0.0  ;;  %v7865_v63 = vadd.f32 %v7602_v31, %v17626_v28 }
 0x5b1   :  { %v8077_v38 = vadd.f32 %v17771_v32, %v8006_v24 }
 0x5b2   :  { %v7936_v2 = vadd.f32 %v17758_v23, %v7865_v63  ;;  %v12251_v25 = vpop.f32.mrb[64].mxu1  ;;  %12365 = vmatprep.mubr.msk.f32.mxu0 %vm1106_vm1, %v8139_v30  ;;  %v19721_v63 = vld [vmem:[#allocation117_spill] sm:$0xff] }
 0x5b3   :  { %v8141_v12 = vmax.f32 %v8077_v38, 0.0  ;;  %v12437_v20 = vadd.f32 %v12251_v25, %v19718_v57  ;;  %v7611_v48 = vpop.f32.mrb[65].mxu1  ;;  %12366 = vmatmul.mubr.msk.f32.gmra.mrb[138].mxu0 %vm1106_vm1, %v8140_v10 }
 0x5b4   :  { %v8007_v59 = vmul.f32 %v17764_v33, %v7936_v2  ;;  %v12438_v22 = vadd.f32 %v7611_v48, %v19719_v29 }
 0x5b5   :  { %v7938_v28 = vadd.f32 %v12437_v20, %v17758_v23  ;;  %12368 = vmatprep.mubr.msk.f32.mxu0 %vm1106_vm1, %v8141_v12 }
 0x5b6   :  { %v8078_v15 = vadd.f32 %v17771_v32, %v8007_v59  ;;  %v7937_v47 = vadd.f32 %v12438_v22, %v17758_v23  ;;  %v12254_v56 = vpop.f32.mrb[108].mxu1 }
 0x5b7   :  { %v8009_v11 = vmul.f32 %v17764_v33, %v7938_v28  ;;  %v7868_v13 = vadd.f32 %v12254_v56, %v17635_v1  ;;  %v7621_v60 = vpop.f32.mrb[109].mxu1 }
 0x5b8   :  { %v8142_v21 = vmax.f32 %v8078_v15, 0.0  ;;  %v8008_v39 = vmul.f32 %v17764_v33, %v7937_v47 }
 0x5b9   :  { %v8080_v52 = vadd.f32 %v17771_v32, %v8009_v11  ;;  %v7939_v3 = vadd.f32 %v17758_v23, %v7868_v13 }
 0x5ba   :  { %v8079_v61 = vadd.f32 %v17771_v32, %v8008_v39  ;;  %v12257_v50 = vpop.f32.mrb[110].mxu1  ;;  %12369 = vmatmul.mubr.msk.f32.gmra.mrb[140].mxu0 %vm1106_vm1, %v8142_v21 }
 0x5bb   :  { %v8010_v54 = vmul.f32 %v17764_v33, %v7939_v3  ;;  %v7630_v8 = vpop.f32.mrb[111].mxu1  ;;  %v8144_v1 = vmax.f32 %v8080_v52, 0.0 }
 0x5bc   :  { %v8143_v53 = vmax.f32 %v8079_v61, 0.0  ;;  %v7869_v46 = vadd.f32 %v7630_v8, %v17644_v14 }
 0x5bd   :  { %v8081_v45 = vadd.f32 %v17771_v32, %v8010_v54 }
 0x5be   :  { %v7940_v6 = vadd.f32 %v17758_v23, %v7869_v46  ;;  %v12260_v49 = vpop.f32.mrb[70].mxu1  ;;  %12371 = vmatprep.mubr.msk.f32.mxu0 %vm1106_vm1, %v8143_v53 }
 0x5bf   :  { %v8145_v9 = vmax.f32 %v8081_v45, 0.0  ;;  %v12439_v24 = vadd.f32 %v12260_v49, %v19720_v51  ;;  %v7639_v31 = vpop.f32.mrb[71].mxu1  ;;  %12372 = vmatmul.mubr.msk.f32.gmra.mrb[144].mxu0 %vm1106_vm1, %v8144_v1 }
 0x5c0   :  { %v8011_v30 = vmul.f32 %v17764_v33, %v7940_v6  ;;  %v12440_v10 = vadd.f32 %v7639_v31, %v19721_v63 }
 0x5c1   :  { %v7942_v14 = vadd.f32 %v12439_v24, %v17758_v23  ;;  %12374 = vmatprep.mubr.msk.f32.mxu0 %vm1106_vm1, %v8145_v9 }
 0x5c2   :  { %v8082_v38 = vadd.f32 %v17771_v32, %v8011_v30  ;;  %v7941_v2 = vadd.f32 %v12440_v10, %v17758_v23  ;;  %v12263_v25 = vpop.f32.mrb[112].mxu1 }
 0x5c3   :  { %v8013_v12 = vmul.f32 %v17764_v33, %v7942_v14  ;;  %v7872_v57 = vadd.f32 %v12263_v25, %v17653_v55  ;;  %v7649_v20 = vpop.f32.mrb[113].mxu1 }
 0x5c4   :  { %v8146_v48 = vmax.f32 %v8082_v38, 0.0  ;;  %v8012_v59 = vmul.f32 %v17764_v33, %v7941_v2 }
 0x5c5   :  { %v8084_v29 = vadd.f32 %v17771_v32, %v8013_v12  ;;  %v7943_v22 = vadd.f32 %v17758_v23, %v7872_v57 }
 0x5c6   :  { %v8083_v28 = vadd.f32 %v17771_v32, %v8012_v59  ;;  %v12266_v15 = vpop.f32.mrb[114].mxu1  ;;  %12375 = vmatmul.mubr.msk.f32.gmra.mrb[146].mxu0 %vm1106_vm1, %v8146_v48 }
 0x5c7   :  { %v8014_v47 = vmul.f32 %v17764_v33, %v7943_v22  ;;  %v7658_v56 = vpop.f32.mrb[115].mxu1  ;;  %v8148_v55 = vmax.f32 %v8084_v29, 0.0 }
 0x5c8   :  { %v8147_v11 = vmax.f32 %v8083_v28, 0.0  ;;  %v7873_v13 = vadd.f32 %v7658_v56, %v17662_v19 }
 0x5c9   :  { %v8085_v60 = vadd.f32 %v17771_v32, %v8014_v47 }
 0x5ca   :  { %v7944_v21 = vadd.f32 %v17758_v23, %v7873_v13  ;;  %v12269_v39 = vpop.f32.mrb[76].mxu1  ;;  %12377 = vmatprep.mubr.msk.f32.mxu0 %vm1106_vm1, %v8147_v11 }
 0x5cb   :  { %v8149_v52 = vmax.f32 %v8085_v60, 0.0  ;;  %v12441_v3 = vadd.f32 %v12269_v39, %v17379_v44  ;;  %v7667_v61 = vpop.f32.mrb[77].mxu1  ;;  %12378 = vmatmul.mubr.msk.f32.gmra.mrb[150].mxu0 %vm1106_vm1, %v8148_v55 }
 0x5cc   :  { %v8015_v50 = vmul.f32 %v17764_v33, %v7944_v21  ;;  %v12442_v54 = vadd.f32 %v7667_v61, %v17386_v40 }
 0x5cd   :  { %v7946_v19 = vadd.f32 %v12441_v3, %v17758_v23  ;;  %12380 = vmatprep.mubr.msk.f32.mxu0 %vm1106_vm1, %v8149_v52 }
 0x5ce   :  { %v8086_v8 = vadd.f32 %v17771_v32, %v8015_v50  ;;  %v7945_v53 = vadd.f32 %v12442_v54, %v17758_v23  ;;  %v12272_v46 = vpop.f32.mrb[116].mxu1 }
 0x5cf   :  { %v8017_v1 = vmul.f32 %v17764_v33, %v7946_v19  ;;  %v7876_v44 = vadd.f32 %v12272_v46, %v17671_v58  ;;  %v7677_v45 = vpop.f32.mrb[117].mxu1 }
 0x5d0   :  { %v8150_v6 = vmax.f32 %v8086_v8, 0.0  ;;  %v8016_v49 = vmul.f32 %v17764_v33, %v7945_v53 }
 0x5d1   :  { %v8088_v9 = vadd.f32 %v17771_v32, %v8017_v1  ;;  %v7947_v40 = vadd.f32 %v17758_v23, %v7876_v44 }
 0x5d2   :  { %v8087_v51 = vadd.f32 %v17771_v32, %v8016_v49  ;;  %v12275_v24 = vpop.f32.mrb[118].mxu1  ;;  %12381 = vmatmul.mubr.msk.f32.gmra.mrb[152].mxu0 %vm1106_vm1, %v8150_v6 }
 0x5d3   :  { %v8018_v31 = vmul.f32 %v17764_v33, %v7947_v40  ;;  %v7686_v30 = vpop.f32.mrb[119].mxu1  ;;  %v8152_v58 = vmax.f32 %v8088_v9, 0.0 }
 0x5d4   :  { %v8151_v63 = vmax.f32 %v8087_v51, 0.0  ;;  %v7877_v10 = vadd.f32 %v7686_v30, %v17680_v62 }
 0x5d5   :  { %v8089_v14 = vadd.f32 %v17771_v32, %v8018_v31 }
 0x5d6   :  { %v7948_v38 = vadd.f32 %v17758_v23, %v7877_v10  ;;  %v12278_v2 = vpop.f32.mrb[82].mxu1  ;;  %12383 = vmatprep.mubr.msk.f32.mxu0 %vm1106_vm1, %v8151_v63 }
 0x5d7   :  { %v8153_v25 = vmax.f32 %v8089_v14, 0.0  ;;  %v12443_v12 = vadd.f32 %v12278_v2, %v17418_v18  ;;  %v7695_v57 = vpop.f32.mrb[83].mxu1  ;;  %12384 = vmatmul.mubr.msk.f32.gmra.mrb[156].mxu0 %vm1106_vm1, %v8152_v58 }
 0x5d8   :  { %v8019_v20 = vmul.f32 %v17764_v33, %v7948_v38  ;;  %v12444_v48 = vadd.f32 %v7695_v57, %v17425_v37 }
 0x5d9   :  { %v7950_v62 = vadd.f32 %v12443_v12, %v17758_v23  ;;  %12386 = vmatprep.mubr.msk.f32.mxu0 %vm1106_vm1, %v8153_v25 }
 0x5da   :  { %v8090_v59 = vadd.f32 %v17771_v32, %v8019_v20  ;;  %v7949_v29 = vadd.f32 %v12444_v48, %v17758_v23  ;;  %v12281_v22 = vpop.f32.mrb[120].mxu1 }
 0x5db   :  { %v8021_v28 = vmul.f32 %v17764_v33, %v7950_v62  ;;  %v7880_v18 = vadd.f32 %v12281_v22, %v17689_v41  ;;  %v7705_v15 = vpop.f32.mrb[121].mxu1 }
 0x5dc   :  { %v8154_v47 = vmax.f32 %v8090_v59, 0.0  ;;  %v8020_v56 = vmul.f32 %v17764_v33, %v7949_v29 }
 0x5dd   :  { %v8092_v11 = vadd.f32 %v17771_v32, %v8021_v28  ;;  %v7951_v37 = vadd.f32 %v17758_v23, %v7880_v18 }
 0x5de   :  { %v8091_v13 = vadd.f32 %v17771_v32, %v8020_v56  ;;  %v12284_v55 = vpop.f32.mrb[122].mxu1  ;;  %12387 = vmatmul.mubr.msk.f32.gmra.mrb[158].mxu0 %vm1106_vm1, %v8154_v47 }
 0x5df   :  { %v8022_v60 = vmul.f32 %v17764_v33, %v7951_v37  ;;  %v7714_v21 = vpop.f32.mrb[123].mxu1  ;;  %v8156_v41 = vmax.f32 %v8092_v11, 0.0 }
 0x5e0   :  { %v8155_v39 = vmax.f32 %v8091_v13, 0.0  ;;  %v7881_v52 = vadd.f32 %v7714_v21, %v17698_v0 }
 0x5e1   :  { %v8093_v3 = vadd.f32 %v17771_v32, %v8022_v60 }
 0x5e2   :  { %v7952_v61 = vadd.f32 %v17758_v23, %v7881_v52  ;;  %v12287_v50 = vpop.f32.mrb[88].mxu1  ;;  %12389 = vmatprep.mubr.msk.f32.mxu0 %vm1106_vm1, %v8155_v39 }
 0x5e3   :  { %v8157_v54 = vmax.f32 %v8093_v3, 0.0  ;;  %v12445_v19 = vadd.f32 %v12287_v50, %v17452_v36  ;;  %v7723_v8 = vpop.f32.mrb[89].mxu1  ;;  %12390 = vmatmul.mubr.msk.f32.gmra.mrb[160].mxu0 %vm1106_vm1, %v8156_v41  ;;  %v19722_v3 = vld [vmem:[#allocation111_spill] sm:$0xff] }
 0x5e4   :  { %v8023_v53 = vmul.f32 %v17764_v33, %v7952_v61  ;;  %v12446_v46 = vadd.f32 %v7723_v8, %v17459_v42 }
 0x5e5   :  { %v7954_v0 = vadd.f32 %v12445_v19, %v17758_v23  ;;  %12392 = vmatprep.mubr.msk.f32.mxu0 %vm1106_vm1, %v8157_v54  ;;  %v19723_v19 = vld [vmem:[#allocation32_spill] sm:$0xff] }
 0x5e6   :  { %v8094_v1 = vadd.f32 %v17771_v32, %v8023_v53  ;;  %v7953_v44 = vadd.f32 %v12446_v46, %v17758_v23  ;;  %v12290_v45 = vpop.f32.mrb[124].mxu1 }
 0x5e7   :  { %v8025_v6 = vmul.f32 %v17764_v33, %v7954_v0  ;;  %v7884_v36 = vadd.f32 %v12290_v45, %v17707_v26  ;;  %v7733_v49 = vpop.f32.mrb[125].mxu1 }
 0x5e8   :  { %v8158_v9 = vmax.f32 %v8094_v1, 0.0  ;;  %v8024_v40 = vmul.f32 %v17764_v33, %v7953_v44 }
 0x5e9   :  { %v8096_v51 = vadd.f32 %v17771_v32, %v8025_v6  ;;  %v7955_v42 = vadd.f32 %v17758_v23, %v7884_v36 }
 0x5ea   :  { %v8095_v24 = vadd.f32 %v17771_v32, %v8024_v40  ;;  %v12293_v31 = vpop.f32.mrb[126].mxu1  ;;  %12393 = vmatmul.mubr.msk.f32.gmra.mrb[162].mxu0 %vm1106_vm1, %v8158_v9 }
 0x5eb   :  { %v8026_v30 = vmul.f32 %v17764_v33, %v7955_v42  ;;  %v7742_v63 = vpop.f32.mrb[127].mxu1  ;;  %v8160_v26 = vmax.f32 %v8096_v51, 0.0 }
 0x5ec   :  { %v8159_v10 = vmax.f32 %v8095_v24, 0.0  ;;  %v7885_v58 = vadd.f32 %v7742_v63, %v17716_v16 }
 0x5ed   :  { %v8097_v14 = vadd.f32 %v17771_v32, %v8026_v30 }
 0x5ee   :  { %v7956_v38 = vadd.f32 %v17758_v23, %v7885_v58  ;;  %v12296_v2 = vpop.f32.mrb[94].mxu1  ;;  %12395 = vmatprep.mubr.msk.f32.mxu0 %vm1106_vm1, %v8159_v10 }
 0x5ef   :  { %v8161_v25 = vmax.f32 %v8097_v14, 0.0  ;;  %v12447_v12 = vadd.f32 %v12296_v2, %v17486_v7  ;;  %v7751_v57 = vpop.f32.mrb[95].mxu1  ;;  %12396 = vmatmul.mubr.msk.f32.gmra.mrb[164].mxu0 %vm1106_vm1, %v8160_v26  ;;  %v19724_v14 = vld [vmem:[#allocation67_spill] sm:$0xff] }
 0x5f0   :  { %v8027_v20 = vmul.f32 %v17764_v33, %v7956_v38  ;;  %v12448_v48 = vadd.f32 %v7751_v57, %v17493_v4 }
 0x5f1   :  { %v7958_v16 = vadd.f32 %v12447_v12, %v17758_v23  ;;  %12398 = vmatprep.mubr.msk.f32.mxu0 %vm1106_vm1, %v8161_v25  ;;  %v19725_v12 = vld [vmem:[#allocation37_spill] sm:$0xff] }
 0x5f2   :  { %v8098_v62 = vadd.f32 %v17771_v32, %v8027_v20  ;;  %v7957_v59 = vadd.f32 %v12448_v48, %v17758_v23  ;;  %v12299_v29 = vpop.f32.mrb[128].mxu1 }
 0x5f3   :  { %v8029_v22 = vmul.f32 %v17764_v33, %v7958_v16  ;;  %v7888_v7 = vadd.f32 %v12299_v29, %v17725_v5  ;;  %v7761_v28 = vpop.f32.mrb[129].mxu1 }
 0x5f4   :  { %v8162_v18 = vmax.f32 %v8098_v62, 0.0  ;;  %v8028_v15 = vmul.f32 %v17764_v33, %v7957_v59 }
 0x5f5   :  { %v8100_v47 = vadd.f32 %v17771_v32, %v8029_v22  ;;  %v7959_v4 = vadd.f32 %v17758_v23, %v7888_v7 }
 0x5f6   :  { %v8099_v56 = vadd.f32 %v17771_v32, %v8028_v15  ;;  %v12302_v11 = vpop.f32.mrb[130].mxu1  ;;  %12399 = vmatmul.mubr.msk.f32.gmra.mrb[166].mxu0 %vm1106_vm1, %v8162_v18 }
 0x5f7   :  { %v8030_v37 = vmul.f32 %v17764_v33, %v7959_v4  ;;  %v7770_v13 = vpop.f32.mrb[131].mxu1  ;;  %v8164_v5 = vmax.f32 %v8100_v47, 0.0 }
 0x5f8   :  { %v8163_v55 = vmax.f32 %v8099_v56, 0.0  ;;  %v7889_v60 = vadd.f32 %v7770_v13, %v17737_v43 }
 0x5f9   :  { %v8101_v21 = vadd.f32 %v17771_v32, %v8030_v37 }
 0x5fa   :  { %v7960_v39 = vadd.f32 %v17758_v23, %v7889_v60  ;;  %v12305_v52 = vpop.f32.mrb[4].mxu1  ;;  %12401 = vmatprep.mubr.msk.f32.mxu0 %vm1106_vm1, %v8163_v55 }
 0x5fb   :  { %v8165_v41 = vmax.f32 %v8101_v21, 0.0  ;;  %v12449_v61 = vadd.f32 %v12305_v52, %v19722_v3  ;;  %v7779_v50 = vpop.f32.mrb[5].mxu1  ;;  %12402 = vmatmul.mubr.msk.f32.gmra.mrb[168].mxu0 %vm1106_vm1, %v8164_v5 }
 0x5fc   :  { %v8031_v54 = vmul.f32 %v17764_v33, %v7960_v39  ;;  %v12450_v8 = vadd.f32 %v7779_v50, %v19723_v19 }
 0x5fd   :  { %v7962_v43 = vadd.f32 %v12449_v61, %v17758_v23  ;;  %12404 = vmatprep.mubr.msk.f32.mxu0 %vm1106_vm1, %v8165_v41 }
 0x5fe   :  { %v8102_v53 = vadd.f32 %v17771_v32, %v8031_v54  ;;  %v7961_v46 = vadd.f32 %v12450_v8, %v17758_v23  ;;  %v12308_v0 = vpop.f32.mrb[132].mxu1 }
 0x5ff   :  { %v8033_v1 = vmul.f32 %v17764_v33, %v7962_v43  ;;  %v7892_v44 = vadd.f32 %v12308_v0, %v17744_v34  ;;  %v7789_v45 = vpop.f32.mrb[133].mxu1  ;;  %v12881_v0 = vld [vmem:[%s18608_s0 + $0x10] sm:$0xff] }
 0x600   :  { %v8166_v6 = vmax.f32 %v8102_v53, 0.0  ;;  %v8032_v36 = vmul.f32 %v17764_v33, %v7961_v46  ;;  %v12880_v53 = vld [vmem:[%s18608_s0 + $0x18] sm:$0xff] }
 0x601   :  { %v8104_v49 = vadd.f32 %v17771_v32, %v8033_v1  ;;  %v7963_v9 = vadd.f32 %v17758_v23, %v7892_v44 }
 0x602   :  { %v8103_v40 = vadd.f32 %v17771_v32, %v8032_v36  ;;  %v12311_v51 = vpop.f32.mrb[134].mxu1  ;;  %12405 = vmatmul.mubr.msk.f32.gmra.mrb[170].mxu0 %vm1106_vm1, %v8166_v6 }
 0x603   :  { %v8034_v42 = vmul.f32 %v17764_v33, %v7963_v9  ;;  %v7798_v24 = vpop.f32.mrb[135].mxu1  ;;  %v8168_v34 = vmax.f32 %v8104_v49, 0.0  ;;  %v12882_v49 = vld [vmem:[%s18608_s0 + $0x28] sm:$0xff] }
 0x604   :  { %v8167_v31 = vmax.f32 %v8103_v40, 0.0  ;;  %v7893_v30 = vadd.f32 %v7798_v24, %v17747_v17  ;;  %v12883_v40 = vld [vmem:[%s18608_s0 + $0x20] sm:$0xff] }
 0x605   :  { %v8105_v63 = vadd.f32 %v17771_v32, %v8034_v42 }
 0x606   :  { %v7964_v10 = vadd.f32 %v17758_v23, %v7893_v30  ;;  %v12314_v58 = vpop.f32.mrb[10].mxu1  ;;  %12407 = vmatprep.mubr.msk.f32.mxu0 %vm1106_vm1, %v8167_v31 }
 0x607   :  { %v8169_v26 = vmax.f32 %v8105_v63, 0.0  ;;  %v12451_v38 = vadd.f32 %v12314_v58, %v19724_v14  ;;  %v7807_v2 = vpop.f32.mrb[11].mxu1  ;;  %12408 = vmatmul.mubr.msk.f32.gmra.mrb[172].mxu0 %vm1106_vm1, %v8168_v34  ;;  %v12884_v34 = vld [vmem:[%s18608_s0 + $0x38] sm:$0xff] }
 0x608   :  { %v8035_v25 = vmul.f32 %v17764_v33, %v7964_v10  ;;  %v12452_v57 = vadd.f32 %v7807_v2, %v19725_v12  ;;  %v12885_v10 = vld [vmem:[%s18608_s0 + $0x30] sm:$0xff] }
 0x609   :  { %v7966_v17 = vadd.f32 %v12451_v38, %v17758_v23  ;;  %12410 = vmatprep.mubr.msk.f32.mxu0 %vm1106_vm1, %v8169_v26 }
 0x60a   :  { %v8106_v20 = vadd.f32 %v17771_v32, %v8035_v25  ;;  %v7965_v48 = vadd.f32 %v12452_v57, %v17758_v23  ;;  %v12317_v16 = vpop.f32.mrb[136].mxu1  ;;  %v12886_v25 = vld [vmem:[%s18608_s0 + $0x48] sm:$0xff]  ;;  %v12887_v57 = vld [vmem:[%s18608_s0 + $0x40] sm:$0xff] }
 0x60b   :  { %v8037_v62 = vmul.f32 %v17764_v33, %v7966_v17  ;;  %v7896_v59 = vadd.f32 %v12317_v16, %v17750_v27  ;;  %v7817_v29 = vpop.f32.mrb[137].mxu1 }
 0x60c   :  { %v8170_v22 = vmax.f32 %v8106_v20, 0.0  ;;  %v8036_v7 = vmul.f32 %v17764_v33, %v7965_v48 }
 0x60d   :  { %v8108_v28 = vadd.f32 %v17771_v32, %v8037_v62  ;;  %v7967_v18 = vadd.f32 %v17758_v23, %v7896_v59  ;;  %v12888_v59 = vld [vmem:[%s18608_s0 + $0x58] sm:$0xff] }
 0x60e   :  { %v8107_v15 = vadd.f32 %v17771_v32, %v8036_v7  ;;  %v12320_v47 = vpop.f32.mrb[138].mxu1  ;;  %12411 = vmatmul.mubr.msk.f32.gmra.mrb[174].mxu0 %vm1106_vm1, %v8170_v22  ;;  %v12889_v22 = vld [vmem:[%s18608_s0 + $0x50] sm:$0xff] }
 0x60f   :  { %v8038_v4 = vmul.f32 %v17764_v33, %v7967_v18  ;;  %v7826_v56 = vpop.f32.mrb[139].mxu1  ;;  %v8172_v27 = vmax.f32 %v8108_v28, 0.0 }
 0x610   :  { %v8171_v11 = vmax.f32 %v8107_v15, 0.0  ;;  %v7897_v37 = vadd.f32 %v7826_v56, %v17753_v35  ;;  %v18093_v35 = vld [vmem:[%s18619_s12] ss:$0 sm:$0xff] }
 0x611   :  { %v8109_v13 = vadd.f32 %v17771_v32, %v8038_v4  ;;  %v12890_v4 = vld [vmem:[%s18608_s0 + $0x68] sm:$0xff] }
 0x612   :  { %v7968_v55 = vadd.f32 %v17758_v23, %v7897_v37  ;;  %12413 = vmatprep.mubr.msk.f32.mxu0 %vm1106_vm1, %v8171_v11  ;;  %v12891_v11 = vld [vmem:[%s18608_s0 + $0x60] sm:$0xff] }
 0x613   :  { %v8173_v60 = vmax.f32 %v8109_v13, 0.0  ;;  %12414 = vmatmul.mubr.msk.f32.gmra.mrb[176].mxu0 %vm1106_vm1, %v8172_v27 }
 0x614   :  { %v8039_v5 = vmul.f32 %v17764_v33, %v7968_v55  ;;  %v12878_v33 = vld [vmem:[%s18608_s0 + $0x8] sm:$0xff] }
 0x615   :  { %12416 = vmatprep.mubr.msk.f32.mxu0 %vm1106_vm1, %v8173_v60 }
 0x616   :  { %v8110_v21 = vadd.f32 %v17771_v32, %v8039_v5  ;;  %v12879_v32 = vld [vmem:[%s18608_s0] sm:$0xff]  ;;  %v12892_v5 = vld [vmem:[%s18608_s0 + $0x78] sm:$0xff] }
 0x618   :  { %v8174_v39 = vmax.f32 %v8110_v21, 0.0 }
 0x61a   :  { %12417 = vmatmul.mubr.msk.f32.gmra.mrb[178].mxu0 %vm1106_vm1, %v8174_v39  ;;  %v12893_v39 = vld [vmem:[%s18608_s0 + $0x70] sm:$0xff] }
 0x632   :  { %v12325_v23 = vpop.f32.mrb[96].mxu0 }
 0x633   :  { %v8450_v52 = vadd.f32 %v12325_v23, %v18093_v35  ;;  %v8444_v41 = vpop.f32.mrb[97].mxu0 }
 0x634   :  { %v8445_v3 = vadd.f32 %v18093_v35, %v8444_v41 }
 0x635   :  { %v8764_v61 = vadd.f32 %v12878_v33, %v8450_v52 }
 0x636   :  { %v8763_v50 = vadd.f32 %v12879_v32, %v8445_v3 }
 0x637   :  { %8828 = vst.msk [vmem:[%s18620_s13 + $0x8] sm:$0xff] %vm322_vm0, %v8764_v61  ;;  %v12894_v61 = vld [vmem:[%s18608_s0 + $0x88] sm:$0xff] }
 0x638   :  { %8827 = vst.msk [vmem:[%s18620_s13] sm:$0xff] %vm322_vm0, %v8763_v50  ;;  %v12895_v50 = vld [vmem:[%s18608_s0 + $0x80] sm:$0xff] }
 0x639   :  { %v12328_v54 = vpop.f32.mrb[98].mxu0 }
 0x63a   :  { %v8460_v19 = vadd.f32 %v12328_v54, %v18093_v35  ;;  %v8454_v8 = vpop.f32.mrb[99].mxu0 }
 0x63b   :  { %v8455_v43 = vadd.f32 %v18093_v35, %v8454_v8 }
 0x63c   :  { %v8766_v46 = vadd.f32 %v12880_v53, %v8460_v19 }
 0x63d   :  { %v8765_v1 = vadd.f32 %v12881_v0, %v8455_v43 }
 0x63e   :  { %8830 = vst.msk [vmem:[%s18620_s13 + $0x18] sm:$0xff] %vm322_vm0, %v8766_v46  ;;  %v12331_v44 = vpop.f32.mrb[102].mxu0  ;;  %v12896_v46 = vld [vmem:[%s18608_s0 + $0x98] sm:$0xff] }
 0x63f   :  { %8829 = vst.msk [vmem:[%s18620_s13 + $0x10] sm:$0xff] %vm322_vm0, %v8765_v1  ;;  %v8470_v45 = vadd.f32 %v12331_v44, %v18093_v35  ;;  %v8464_v6 = vpop.f32.mrb[103].mxu0  ;;  %v12897_v1 = vld [vmem:[%s18608_s0 + $0x90] sm:$0xff] }
 0x640   :  { %v8465_v36 = vadd.f32 %v18093_v35, %v8464_v6 }
 0x641   :  { %v8768_v9 = vadd.f32 %v12882_v49, %v8470_v45 }
 0x642   :  { %v8767_v51 = vadd.f32 %v12883_v40, %v8465_v36 }
 0x643   :  { %8832 = vst.msk [vmem:[%s18620_s13 + $0x28] sm:$0xff] %vm322_vm0, %v8768_v9  ;;  %v12898_v9 = vld [vmem:[%s18608_s0 + $0xa8] sm:$0xff] }
 0x644   :  { %8831 = vst.msk [vmem:[%s18620_s13 + $0x20] sm:$0xff] %vm322_vm0, %v8767_v51  ;;  %v12899_v51 = vld [vmem:[%s18608_s0 + $0xa0] sm:$0xff] }
 0x645   :  { %v12334_v42 = vpop.f32.mrb[104].mxu0 }
 0x646   :  { %v8480_v24 = vadd.f32 %v12334_v42, %v18093_v35  ;;  %v8474_v31 = vpop.f32.mrb[105].mxu0 }
 0x647   :  { %v8475_v30 = vadd.f32 %v18093_v35, %v8474_v31 }
 0x648   :  { %v8770_v63 = vadd.f32 %v12884_v34, %v8480_v24 }
 0x649   :  { %v8769_v58 = vadd.f32 %v12885_v10, %v8475_v30 }
 0x64a   :  { %8834 = vst.msk [vmem:[%s18620_s13 + $0x38] sm:$0xff] %vm322_vm0, %v8770_v63  ;;  %v12337_v26 = vpop.f32.mrb[108].mxu0  ;;  %v12900_v63 = vld [vmem:[%s18608_s0 + $0xb8] sm:$0xff] }
 0x64b   :  { %8833 = vst.msk [vmem:[%s18620_s13 + $0x30] sm:$0xff] %vm322_vm0, %v8769_v58  ;;  %v8490_v14 = vadd.f32 %v12337_v26, %v18093_v35  ;;  %v8484_v38 = vpop.f32.mrb[109].mxu0  ;;  %v12901_v58 = vld [vmem:[%s18608_s0 + $0xb0] sm:$0xff] }
 0x64c   :  { %v8485_v2 = vadd.f32 %v18093_v35, %v8484_v38 }
 0x64d   :  { %v8772_v12 = vadd.f32 %v12886_v25, %v8490_v14 }
 0x64e   :  { %v8771_v17 = vadd.f32 %v12887_v57, %v8485_v2 }
 0x64f   :  { %8836 = vst.msk [vmem:[%s18620_s13 + $0x48] sm:$0xff] %vm322_vm0, %v8772_v12  ;;  %v12902_v12 = vld [vmem:[%s18608_s0 + $0xc8] sm:$0xff] }
 0x650   :  { %8835 = vst.msk [vmem:[%s18620_s13 + $0x40] sm:$0xff] %vm322_vm0, %v8771_v17  ;;  %v12903_v17 = vld [vmem:[%s18608_s0 + $0xc0] sm:$0xff] }
 0x651   :  { %v12340_v20 = vpop.f32.mrb[110].mxu0 }
 0x652   :  { %v8500_v48 = vadd.f32 %v12340_v20, %v18093_v35  ;;  %v8494_v16 = vpop.f32.mrb[111].mxu0 }
 0x653   :  { %v8495_v62 = vadd.f32 %v18093_v35, %v8494_v16 }
 0x654   :  { %v8774_v29 = vadd.f32 %v12888_v59, %v8500_v48 }
 0x655   :  { %v8773_v7 = vadd.f32 %v12889_v22, %v8495_v62 }
 0x656   :  { %8838 = vst.msk [vmem:[%s18620_s13 + $0x58] sm:$0xff] %vm322_vm0, %v8774_v29  ;;  %v12343_v28 = vpop.f32.mrb[114].mxu0  ;;  %v12904_v29 = vld [vmem:[%s18608_s0 + $0xd8] sm:$0xff] }
 0x657   :  { %8837 = vst.msk [vmem:[%s18620_s13 + $0x50] sm:$0xff] %vm322_vm0, %v8773_v7  ;;  %v8510_v18 = vadd.f32 %v12343_v28, %v18093_v35  ;;  %v8504_v15 = vpop.f32.mrb[115].mxu0  ;;  %v12905_v7 = vld [vmem:[%s18608_s0 + $0xd0] sm:$0xff] }
 0x658   :  { %v8505_v47 = vadd.f32 %v18093_v35, %v8504_v15 }
 0x659   :  { %v8776_v56 = vadd.f32 %v12890_v4, %v8510_v18 }
 0x65a   :  { %v8775_v37 = vadd.f32 %v12891_v11, %v8505_v47 }
 0x65b   :  { %8840 = vst.msk [vmem:[%s18620_s13 + $0x68] sm:$0xff] %vm322_vm0, %v8776_v56  ;;  %v12906_v56 = vld [vmem:[%s18608_s0 + $0xe8] sm:$0xff] }
 0x65c   :  { %8839 = vst.msk [vmem:[%s18620_s13 + $0x60] sm:$0xff] %vm322_vm0, %v8775_v37  ;;  %v12907_v37 = vld [vmem:[%s18608_s0 + $0xe0] sm:$0xff] }
 0x65d   :  { %v12346_v27 = vpop.f32.mrb[116].mxu0 }
 0x65e   :  { %v8520_v13 = vadd.f32 %v12346_v27, %v18093_v35  ;;  %v8514_v55 = vpop.f32.mrb[117].mxu0 }
 0x65f   :  { %v8515_v60 = vadd.f32 %v18093_v35, %v8514_v55 }
 0x660   :  { %v8778_v21 = vadd.f32 %v12892_v5, %v8520_v13 }
 0x661   :  { %v8777_v23 = vadd.f32 %v12893_v39, %v8515_v60 }
 0x662   :  { %8842 = vst.msk [vmem:[%s18620_s13 + $0x78] sm:$0xff] %vm322_vm0, %v8778_v21  ;;  %v12349_v52 = vpop.f32.mrb[120].mxu0  ;;  %v12908_v21 = vld [vmem:[%s18608_s0 + $0xf8] sm:$0xff] }
 0x663   :  { %8841 = vst.msk [vmem:[%s18620_s13 + $0x70] sm:$0xff] %vm322_vm0, %v8777_v23  ;;  %v8530_v41 = vadd.f32 %v12349_v52, %v18093_v35  ;;  %v8524_v3 = vpop.f32.mrb[121].mxu0  ;;  %v12909_v23 = vld [vmem:[%s18608_s0 + $0xf0] sm:$0xff] }
 0x664   :  { %v8525_v33 = vadd.f32 %v18093_v35, %v8524_v3 }
 0x665   :  { %v8780_v32 = vadd.f32 %v12894_v61, %v8530_v41 }
 0x666   :  { %v8779_v54 = vadd.f32 %v12895_v50, %v8525_v33 }
 0x667   :  { %8844 = vst.msk [vmem:[%s18620_s13 + $0x88] sm:$0xff] %vm322_vm0, %v8780_v32  ;;  %v12910_v32 = vld [vmem:[%s18608_s0 + $0x108] sm:$0xff] }
 0x668   :  { %8843 = vst.msk [vmem:[%s18620_s13 + $0x80] sm:$0xff] %vm322_vm0, %v8779_v54  ;;  %v12911_v54 = vld [vmem:[%s18608_s0 + $0x100] sm:$0xff] }
 0x669   :  { %v12352_v19 = vpop.f32.mrb[122].mxu0 }
 0x66a   :  { %v8540_v8 = vadd.f32 %v12352_v19, %v18093_v35  ;;  %v8534_v43 = vpop.f32.mrb[123].mxu0 }
 0x66b   :  { %v8535_v53 = vadd.f32 %v18093_v35, %v8534_v43 }
 0x66c   :  { %v8782_v0 = vadd.f32 %v12896_v46, %v8540_v8 }
 0x66d   :  { %v8781_v44 = vadd.f32 %v12897_v1, %v8535_v53 }
 0x66e   :  { %8846 = vst.msk [vmem:[%s18620_s13 + $0x98] sm:$0xff] %vm322_vm0, %v8782_v0  ;;  %v12355_v45 = vpop.f32.mrb[126].mxu0  ;;  %v12912_v0 = vld [vmem:[%s18608_s0 + $0x118] sm:$0xff] }
 0x66f   :  { %8845 = vst.msk [vmem:[%s18620_s13 + $0x90] sm:$0xff] %vm322_vm0, %v8781_v44  ;;  %v8550_v6 = vadd.f32 %v12355_v45, %v18093_v35  ;;  %v8544_v36 = vpop.f32.mrb[127].mxu0  ;;  %v12913_v44 = vld [vmem:[%s18608_s0 + $0x110] sm:$0xff] }
 0x670   :  { %v8545_v49 = vadd.f32 %v18093_v35, %v8544_v36 }
 0x671   :  { %v8784_v40 = vadd.f32 %v12898_v9, %v8550_v6 }
 0x672   :  { %v8783_v42 = vadd.f32 %v12899_v51, %v8545_v49 }
 0x673   :  { %8848 = vst.msk [vmem:[%s18620_s13 + $0xa8] sm:$0xff] %vm322_vm0, %v8784_v40  ;;  %v12914_v40 = vld [vmem:[%s18608_s0 + $0x128] sm:$0xff] }
 0x674   :  { %8847 = vst.msk [vmem:[%s18620_s13 + $0xa0] sm:$0xff] %vm322_vm0, %v8783_v42  ;;  %v12915_v42 = vld [vmem:[%s18608_s0 + $0x120] sm:$0xff] }
 0x675   :  { %v12358_v24 = vpop.f32.mrb[128].mxu0 }
 0x676   :  { %v8560_v31 = vadd.f32 %v12358_v24, %v18093_v35  ;;  %v8554_v30 = vpop.f32.mrb[129].mxu0 }
 0x677   :  { %v8555_v34 = vadd.f32 %v18093_v35, %v8554_v30 }
 0x678   :  { %v8786_v10 = vadd.f32 %v12900_v63, %v8560_v31 }
 0x679   :  { %v8785_v26 = vadd.f32 %v12901_v58, %v8555_v34 }
 0x67a   :  { %8850 = vst.msk [vmem:[%s18620_s13 + $0xb8] sm:$0xff] %vm322_vm0, %v8786_v10  ;;  %v12361_v14 = vpop.f32.mrb[132].mxu0  ;;  %v12916_v10 = vld [vmem:[%s18608_s0 + $0x138] sm:$0xff] }
 0x67b   :  { %8849 = vst.msk [vmem:[%s18620_s13 + $0xb0] sm:$0xff] %vm322_vm0, %v8785_v26  ;;  %v8570_v38 = vadd.f32 %v12361_v14, %v18093_v35  ;;  %v8564_v2 = vpop.f32.mrb[133].mxu0  ;;  %v12917_v26 = vld [vmem:[%s18608_s0 + $0x130] sm:$0xff] }
 0x67c   :  { %v8565_v25 = vadd.f32 %v18093_v35, %v8564_v2 }
 0x67d   :  { %v8788_v57 = vadd.f32 %v12902_v12, %v8570_v38 }
 0x67e   :  { %v8787_v20 = vadd.f32 %v12903_v17, %v8565_v25 }
 0x67f   :  { %8852 = vst.msk [vmem:[%s18620_s13 + $0xc8] sm:$0xff] %vm322_vm0, %v8788_v57  ;;  %v12918_v57 = vld [vmem:[%s18608_s0 + $0x148] sm:$0xff] }
 0x680   :  { %8851 = vst.msk [vmem:[%s18620_s13 + $0xc0] sm:$0xff] %vm322_vm0, %v8787_v20  ;;  %v12919_v20 = vld [vmem:[%s18608_s0 + $0x140] sm:$0xff] }
 0x681   :  { %v12364_v48 = vpop.f32.mrb[134].mxu0 }
 0x682   :  { %v8580_v16 = vadd.f32 %v12364_v48, %v18093_v35  ;;  %v8574_v62 = vpop.f32.mrb[135].mxu0 }
 0x683   :  { %v8575_v59 = vadd.f32 %v18093_v35, %v8574_v62 }
 0x684   :  { %v8790_v22 = vadd.f32 %v12904_v29, %v8580_v16 }
 0x685   :  { %v8789_v28 = vadd.f32 %v12905_v7, %v8575_v59 }
 0x686   :  { %8854 = vst.msk [vmem:[%s18620_s13 + $0xd8] sm:$0xff] %vm322_vm0, %v8790_v22  ;;  %v12367_v18 = vpop.f32.mrb[138].mxu0  ;;  %v12920_v22 = vld [vmem:[%s18608_s0 + $0x158] sm:$0xff] }
 0x687   :  { %8853 = vst.msk [vmem:[%s18620_s13 + $0xd0] sm:$0xff] %vm322_vm0, %v8789_v28  ;;  %v8590_v15 = vadd.f32 %v12367_v18, %v18093_v35  ;;  %v8584_v47 = vpop.f32.mrb[139].mxu0  ;;  %v12921_v28 = vld [vmem:[%s18608_s0 + $0x150] sm:$0xff] }
 0x688   :  { %v8585_v4 = vadd.f32 %v18093_v35, %v8584_v47 }
 0x689   :  { %v8792_v11 = vadd.f32 %v12906_v56, %v8590_v15 }
 0x68a   :  { %v8791_v27 = vadd.f32 %v12907_v37, %v8585_v4 }
 0x68b   :  { %8856 = vst.msk [vmem:[%s18620_s13 + $0xe8] sm:$0xff] %vm322_vm0, %v8792_v11  ;;  %v12922_v11 = vld [vmem:[%s18608_s0 + $0x168] sm:$0xff] }
 0x68c   :  { %8855 = vst.msk [vmem:[%s18620_s13 + $0xe0] sm:$0xff] %vm322_vm0, %v8791_v27  ;;  %v12923_v27 = vld [vmem:[%s18608_s0 + $0x160] sm:$0xff] }
 0x68d   :  { %v12370_v13 = vpop.f32.mrb[140].mxu0 }
 0x68e   :  { %v8600_v55 = vadd.f32 %v12370_v13, %v18093_v35  ;;  %v8594_v60 = vpop.f32.mrb[141].mxu0 }
 0x68f   :  { %v8595_v5 = vadd.f32 %v18093_v35, %v8594_v60 }
 0x690   :  { %v8794_v39 = vadd.f32 %v12908_v21, %v8600_v55 }
 0x691   :  { %v8793_v52 = vadd.f32 %v12909_v23, %v8595_v5 }
 0x692   :  { %8858 = vst.msk [vmem:[%s18620_s13 + $0xf8] sm:$0xff] %vm322_vm0, %v8794_v39  ;;  %v12373_v41 = vpop.f32.mrb[144].mxu0  ;;  %v12924_v39 = vld [vmem:[%s18608_s0 + $0x178] sm:$0xff] }
 0x693   :  { %8857 = vst.msk [vmem:[%s18620_s13 + $0xf0] sm:$0xff] %vm322_vm0, %v8793_v52  ;;  %v8610_v3 = vadd.f32 %v12373_v41, %v18093_v35  ;;  %v8604_v33 = vpop.f32.mrb[145].mxu0  ;;  %v12925_v52 = vld [vmem:[%s18608_s0 + $0x170] sm:$0xff] }
 0x694   :  { %v8605_v61 = vadd.f32 %v18093_v35, %v8604_v33 }
 0x695   :  { %v8796_v50 = vadd.f32 %v12910_v32, %v8610_v3 }
 0x696   :  { %v8795_v19 = vadd.f32 %v12911_v54, %v8605_v61 }
 0x697   :  { %8860 = vst.msk [vmem:[%s18620_s13 + $0x108] sm:$0xff] %vm322_vm0, %v8796_v50  ;;  %v12926_v50 = vld [vmem:[%s18608_s0 + $0x188] sm:$0xff] }
 0x698   :  { %8859 = vst.msk [vmem:[%s18620_s13 + $0x100] sm:$0xff] %vm322_vm0, %v8795_v19  ;;  %v12927_v19 = vld [vmem:[%s18608_s0 + $0x180] sm:$0xff] }
 0x699   :  { %v12376_v8 = vpop.f32.mrb[146].mxu0 }
 0x69a   :  { %v8620_v43 = vadd.f32 %v12376_v8, %v18093_v35  ;;  %v8614_v53 = vpop.f32.mrb[147].mxu0 }
 0x69b   :  { %v8615_v46 = vadd.f32 %v18093_v35, %v8614_v53 }
 0x69c   :  { %v8798_v1 = vadd.f32 %v12912_v0, %v8620_v43 }
 0x69d   :  { %v8797_v45 = vadd.f32 %v12913_v44, %v8615_v46 }
 0x69e   :  { %8862 = vst.msk [vmem:[%s18620_s13 + $0x118] sm:$0xff] %vm322_vm0, %v8798_v1  ;;  %v12379_v6 = vpop.f32.mrb[150].mxu0  ;;  %v12928_v1 = vld [vmem:[%s18608_s0 + $0x198] sm:$0xff] }
 0x69f   :  { %8861 = vst.msk [vmem:[%s18620_s13 + $0x110] sm:$0xff] %vm322_vm0, %v8797_v45  ;;  %v8630_v36 = vadd.f32 %v12379_v6, %v18093_v35  ;;  %v8624_v49 = vpop.f32.mrb[151].mxu0  ;;  %v12929_v45 = vld [vmem:[%s18608_s0 + $0x190] sm:$0xff] }
 0x6a0   :  { %v8625_v9 = vadd.f32 %v18093_v35, %v8624_v49 }
 0x6a1   :  { %v8800_v51 = vadd.f32 %v12914_v40, %v8630_v36 }
 0x6a2   :  { %v8799_v24 = vadd.f32 %v12915_v42, %v8625_v9 }
 0x6a3   :  { %8864 = vst.msk [vmem:[%s18620_s13 + $0x128] sm:$0xff] %vm322_vm0, %v8800_v51  ;;  %v12930_v51 = vld [vmem:[%s18608_s0 + $0x1a8] sm:$0xff] }
 0x6a4   :  { %8863 = vst.msk [vmem:[%s18620_s13 + $0x120] sm:$0xff] %vm322_vm0, %v8799_v24  ;;  %v12931_v24 = vld [vmem:[%s18608_s0 + $0x1a0] sm:$0xff] }
 0x6a5   :  { %v12382_v31 = vpop.f32.mrb[152].mxu0 }
 0x6a6   :  { %v8640_v30 = vadd.f32 %v12382_v31, %v18093_v35  ;;  %v8634_v34 = vpop.f32.mrb[153].mxu0 }
 0x6a7   :  { %v8635_v63 = vadd.f32 %v18093_v35, %v8634_v34 }
 0x6a8   :  { %v8802_v58 = vadd.f32 %v12916_v10, %v8640_v30 }
 0x6a9   :  { %v8801_v14 = vadd.f32 %v12917_v26, %v8635_v63 }
 0x6aa   :  { %8866 = vst.msk [vmem:[%s18620_s13 + $0x138] sm:$0xff] %vm322_vm0, %v8802_v58  ;;  %v12385_v38 = vpop.f32.mrb[156].mxu0  ;;  %v12932_v58 = vld [vmem:[%s18608_s0 + $0x1b8] sm:$0xff] }
 0x6ab   :  { %8865 = vst.msk [vmem:[%s18620_s13 + $0x130] sm:$0xff] %vm322_vm0, %v8801_v14  ;;  %v8650_v2 = vadd.f32 %v12385_v38, %v18093_v35  ;;  %v8644_v25 = vpop.f32.mrb[157].mxu0  ;;  %v12933_v14 = vld [vmem:[%s18608_s0 + $0x1b0] sm:$0xff] }
 0x6ac   :  { %v8645_v12 = vadd.f32 %v18093_v35, %v8644_v25 }
 0x6ad   :  { %v8804_v17 = vadd.f32 %v12918_v57, %v8650_v2 }
 0x6ae   :  { %v8803_v48 = vadd.f32 %v12919_v20, %v8645_v12 }
 0x6af   :  { %8868 = vst.msk [vmem:[%s18620_s13 + $0x148] sm:$0xff] %vm322_vm0, %v8804_v17  ;;  %v12934_v17 = vld [vmem:[%s18608_s0 + $0x1c8] sm:$0xff] }
 0x6b0   :  { %8867 = vst.msk [vmem:[%s18620_s13 + $0x140] sm:$0xff] %vm322_vm0, %v8803_v48  ;;  %v12935_v48 = vld [vmem:[%s18608_s0 + $0x1c0] sm:$0xff] }
 0x6b1   :  { %v12388_v16 = vpop.f32.mrb[158].mxu0 }
 0x6b2   :  { %v8660_v62 = vadd.f32 %v12388_v16, %v18093_v35  ;;  %v8654_v59 = vpop.f32.mrb[159].mxu0 }
 0x6b3   :  { %v8655_v29 = vadd.f32 %v18093_v35, %v8654_v59 }
 0x6b4   :  { %v8806_v7 = vadd.f32 %v12920_v22, %v8660_v62 }
 0x6b5   :  { %v8805_v18 = vadd.f32 %v12921_v28, %v8655_v29 }
 0x6b6   :  { %8870 = vst.msk [vmem:[%s18620_s13 + $0x158] sm:$0xff] %vm322_vm0, %v8806_v7  ;;  %v12391_v15 = vpop.f32.mrb[160].mxu0  ;;  %v12936_v7 = vld [vmem:[%s18608_s0 + $0x1d8] sm:$0xff] }
 0x6b7   :  { %8869 = vst.msk [vmem:[%s18620_s13 + $0x150] sm:$0xff] %vm322_vm0, %v8805_v18  ;;  %v8670_v47 = vadd.f32 %v12391_v15, %v18093_v35  ;;  %v8664_v4 = vpop.f32.mrb[161].mxu0  ;;  %v12937_v18 = vld [vmem:[%s18608_s0 + $0x1d0] sm:$0xff] }
 0x6b8   :  { %v8665_v56 = vadd.f32 %v18093_v35, %v8664_v4 }
 0x6b9   :  { %v8808_v37 = vadd.f32 %v12922_v11, %v8670_v47 }
 0x6ba   :  { %v8807_v13 = vadd.f32 %v12923_v27, %v8665_v56 }
 0x6bb   :  { %8872 = vst.msk [vmem:[%s18620_s13 + $0x168] sm:$0xff] %vm322_vm0, %v8808_v37  ;;  %v12938_v37 = vld [vmem:[%s18608_s0 + $0x1e8] sm:$0xff] }
 0x6bc   :  { %8871 = vst.msk [vmem:[%s18620_s13 + $0x160] sm:$0xff] %vm322_vm0, %v8807_v13  ;;  %v12939_v13 = vld [vmem:[%s18608_s0 + $0x1e0] sm:$0xff] }
 0x6bd   :  { %v12394_v55 = vpop.f32.mrb[162].mxu0 }
 0x6be   :  { %v8680_v60 = vadd.f32 %v12394_v55, %v18093_v35  ;;  %v8674_v5 = vpop.f32.mrb[163].mxu0 }
 0x6bf   :  { %v8675_v21 = vadd.f32 %v18093_v35, %v8674_v5 }
 0x6c0   :  { %v8810_v23 = vadd.f32 %v12924_v39, %v8680_v60 }
 0x6c1   :  { %v8809_v41 = vadd.f32 %v12925_v52, %v8675_v21 }
 0x6c2   :  { %8874 = vst.msk [vmem:[%s18620_s13 + $0x178] sm:$0xff] %vm322_vm0, %v8810_v23  ;;  %v12397_v3 = vpop.f32.mrb[164].mxu0  ;;  %v12940_v23 = vld [vmem:[%s18608_s0 + $0x1f8] sm:$0xff] }
 0x6c3   :  { %8873 = vst.msk [vmem:[%s18620_s13 + $0x170] sm:$0xff] %vm322_vm0, %v8809_v41  ;;  %v8690_v33 = vadd.f32 %v12397_v3, %v18093_v35  ;;  %v8684_v61 = vpop.f32.mrb[165].mxu0  ;;  %v12941_v41 = vld [vmem:[%s18608_s0 + $0x1f0] sm:$0xff] }
 0x6c4   :  { %v8685_v32 = vadd.f32 %v18093_v35, %v8684_v61 }
 0x6c5   :  { %v8812_v54 = vadd.f32 %v12926_v50, %v8690_v33 }
 0x6c6   :  { %v8811_v8 = vadd.f32 %v12927_v19, %v8685_v32 }
 0x6c7   :  { %8876 = vst.msk [vmem:[%s18620_s13 + $0x188] sm:$0xff] %vm322_vm0, %v8812_v54 }
 0x6c8   :  { %8875 = vst.msk [vmem:[%s18620_s13 + $0x180] sm:$0xff] %vm322_vm0, %v8811_v8 }
 0x6c9   :  { %v12400_v43 = vpop.f32.mrb[166].mxu0 }
 0x6ca   :  { %v8700_v53 = vadd.f32 %v12400_v43, %v18093_v35  ;;  %v8694_v46 = vpop.f32.mrb[167].mxu0 }
 0x6cb   :  { %v8695_v0 = vadd.f32 %v18093_v35, %v8694_v46 }
 0x6cc   :  { %v8814_v44 = vadd.f32 %v12928_v1, %v8700_v53 }
 0x6cd   :  { %v8813_v6 = vadd.f32 %v12929_v45, %v8695_v0 }
 0x6ce   :  { %8878 = vst.msk [vmem:[%s18620_s13 + $0x198] sm:$0xff] %vm322_vm0, %v8814_v44  ;;  %v12403_v36 = vpop.f32.mrb[168].mxu0 }
 0x6cf   :  { %8877 = vst.msk [vmem:[%s18620_s13 + $0x190] sm:$0xff] %vm322_vm0, %v8813_v6  ;;  %v8710_v49 = vadd.f32 %v12403_v36, %v18093_v35  ;;  %v8704_v9 = vpop.f32.mrb[169].mxu0 }
 0x6d0   :  { %v8705_v40 = vadd.f32 %v18093_v35, %v8704_v9 }
 0x6d1   :  { %v8816_v42 = vadd.f32 %v12930_v51, %v8710_v49 }
 0x6d2   :  { %v8815_v31 = vadd.f32 %v12931_v24, %v8705_v40 }
 0x6d3   :  { %8880 = vst.msk [vmem:[%s18620_s13 + $0x1a8] sm:$0xff] %vm322_vm0, %v8816_v42 }
 0x6d4   :  { %8879 = vst.msk [vmem:[%s18620_s13 + $0x1a0] sm:$0xff] %vm322_vm0, %v8815_v31 }
 0x6d5   :  { %v12406_v30 = vpop.f32.mrb[170].mxu0 }
 0x6d6   :  { %v8720_v34 = vadd.f32 %v12406_v30, %v18093_v35  ;;  %v8714_v63 = vpop.f32.mrb[171].mxu0 }
 0x6d7   :  { %v8715_v10 = vadd.f32 %v18093_v35, %v8714_v63 }
 0x6d8   :  { %v8818_v26 = vadd.f32 %v12932_v58, %v8720_v34 }
 0x6d9   :  { %v8817_v38 = vadd.f32 %v12933_v14, %v8715_v10 }
 0x6da   :  { %8882 = vst.msk [vmem:[%s18620_s13 + $0x1b8] sm:$0xff] %vm322_vm0, %v8818_v26  ;;  %v12409_v2 = vpop.f32.mrb[172].mxu0 }
 0x6db   :  { %8881 = vst.msk [vmem:[%s18620_s13 + $0x1b0] sm:$0xff] %vm322_vm0, %v8817_v38  ;;  %v8730_v25 = vadd.f32 %v12409_v2, %v18093_v35  ;;  %v8724_v12 = vpop.f32.mrb[173].mxu0 }
 0x6dc   :  { %v8725_v57 = vadd.f32 %v18093_v35, %v8724_v12 }
 0x6dd   :  { %v8820_v20 = vadd.f32 %v12934_v17, %v8730_v25 }
 0x6de   :  { %v8819_v16 = vadd.f32 %v12935_v48, %v8725_v57 }
 0x6df   :  { %8884 = vst.msk [vmem:[%s18620_s13 + $0x1c8] sm:$0xff] %vm322_vm0, %v8820_v20 }
 0x6e0   :  { %8883 = vst.msk [vmem:[%s18620_s13 + $0x1c0] sm:$0xff] %vm322_vm0, %v8819_v16 }
 0x6e1   :  { %v12412_v62 = vpop.f32.mrb[174].mxu0 }
 0x6e2   :  { %v8740_v59 = vadd.f32 %v12412_v62, %v18093_v35  ;;  %v8734_v29 = vpop.f32.mrb[175].mxu0 }
 0x6e3   :  { %v8735_v22 = vadd.f32 %v18093_v35, %v8734_v29 }
 0x6e4   :  { %v8822_v28 = vadd.f32 %v12936_v7, %v8740_v59 }
 0x6e5   :  { %v8821_v15 = vadd.f32 %v12937_v18, %v8735_v22 }
 0x6e6   :  { %8886 = vst.msk [vmem:[%s18620_s13 + $0x1d8] sm:$0xff] %vm322_vm0, %v8822_v28  ;;  %v12415_v47 = vpop.f32.mrb[176].mxu0 }
 0x6e7   :  { %8885 = vst.msk [vmem:[%s18620_s13 + $0x1d0] sm:$0xff] %vm322_vm0, %v8821_v15  ;;  %v8750_v4 = vadd.f32 %v12415_v47, %v18093_v35  ;;  %v8744_v56 = vpop.f32.mrb[177].mxu0 }
 0x6e8   :  { %v8745_v11 = vadd.f32 %v18093_v35, %v8744_v56 }
 0x6e9   :  { %v8824_v27 = vadd.f32 %v12938_v37, %v8750_v4 }
 0x6ea   :  { %v8823_v55 = vadd.f32 %v12939_v13, %v8745_v11 }
 0x6eb   :  { %8888 = vst.msk [vmem:[%s18620_s13 + $0x1e8] sm:$0xff] %vm322_vm0, %v8824_v27 }
 0x6ec   :  { %8887 = vst.msk [vmem:[%s18620_s13 + $0x1e0] sm:$0xff] %vm322_vm0, %v8823_v55 }
 0x6ed   :  { %v12418_v60 = vpop.f32.mrb[178].mxu0 }
 0x6ee   :  { %v8760_v5 = vadd.f32 %v12418_v60, %v18093_v35  ;;  %v8754_v21 = vpop.f32.mrb[179].mxu0 }
 0x6ef   :  { %v8755_v39 = vadd.f32 %v18093_v35, %v8754_v21 }
 0x6f0   :  { %v8826_v52 = vadd.f32 %v12940_v23, %v8760_v5 }
 0x6f1   :  { %v8825_v3 = vadd.f32 %v12941_v41, %v8755_v39 }
 0x6f2   :  { %8890 = vst.msk [vmem:[%s18620_s13 + $0x1f8] sm:$0xff] %vm322_vm0, %v8826_v52 }
 0x6f3   :  { %8889 = vst.msk [vmem:[%s18620_s13 + $0x1f0] sm:$0xff] %vm322_vm0, %v8825_v3 }

</bundles_post_ra>
